<compile_context>
chip_gen: v7x
topology: tpu7x:2x2x1
jax: 0.10.0
libtpu: 0.0.40
codegen_flags: <defaults>
</compile_context>

<pallas_src>
import functools

import jax
import jax.numpy as jnp
from jax.experimental import pallas as pl
from jax.experimental.pallas import tpu as pltpu


# ---------------------------------------------------------------------------
# Pallas kernels
# ---------------------------------------------------------------------------
def _gemm_bias_act_kernel(p_ref, w_ref, b_ref, o_ref, *, apply_relu):
    """One M-tile of y = act(p @ w + b). p/w are bf16, accumulate in f32."""
    acc = jnp.dot(p_ref[...], w_ref[...], preferred_element_type=jnp.float32)
    acc = acc + b_ref[...]                       # (tm, N) + (1, N)
    if apply_relu:
        acc = jnp.maximum(acc, 0.0)
    o_ref[...] = acc.astype(o_ref.dtype)


def _head_kernel(p_ref, w6_ref, b6_ref, wl_ref, bl_ref, o_ref):
    """Fused conv6-GEMM + ReLU + Flatten + Linear (two chained MXU matmuls)."""
    h = jnp.dot(p_ref[...], w6_ref[...], preferred_element_type=jnp.float32)
    h = jnp.maximum(h + b6_ref[...], 0.0)
    out = jnp.dot(h.astype(wl_ref.dtype), wl_ref[...],
                  preferred_element_type=jnp.float32)
    o_ref[...] = (out + bl_ref[...]).astype(o_ref.dtype)


def _compiler_params():
    return pltpu.CompilerParams(
        dimension_semantics=("parallel",),       # M tiles are independent
        vmem_limit_bytes=32 * 1024 * 1024,
    )


def _pick_tile_m(M, K, N, cap=512):
    """Largest row tile <= cap (multiple of 8) dividing M, within a VMEM budget."""
    bytes_per_row = K * 2 * 2 + N * 4 * 2        # bf16 in x2 bufs + f32 out x2 bufs
    cap = min(cap, max(8, (8 * 1024 * 1024 // bytes_per_row) // 8 * 8))
    if M <= cap:
        return M                                  # single full block (any M allowed)
    t = cap
    while t >= 8:
        if M % t == 0:
            return t
        t -= 8
    return M                                      # fallback: one full block


def gemm_bias_act(p, w, b, *, apply_relu):
    """p: (M, K) bf16, w: (K, N) bf16, b: (N,) f32  ->  (M, N) f32."""
    M, K = p.shape
    K2, N = w.shape
    assert K == K2
    tm = _pick_tile_m(M, K, N)
    return pl.pallas_call(
        functools.partial(_gemm_bias_act_kernel, apply_relu=apply_relu),
        out_shape=jax.ShapeDtypeStruct((M, N), jnp.float32),
        grid=(M // tm,),
        in_specs=[
            pl.BlockSpec((tm, K), lambda i: (i, 0)),   # streamed row tiles
            pl.BlockSpec((K, N), lambda i: (0, 0)),    # weight VMEM-resident
            pl.BlockSpec((1, N), lambda i: (0, 0)),    # bias VMEM-resident
        ],
        out_specs=pl.BlockSpec((tm, N), lambda i: (i, 0)),
        compiler_params=_compiler_params(),
    )(p, w, b.reshape(1, N).astype(jnp.float32))


def conv6_linear_head(patches, w6, b6, wl_t, bl):
    """Fused conv6 (on 2x2 input -> 1x1) + ReLU + Flatten + Linear."""
    M, K = patches.shape
    N1 = w6.shape[1]
    N2 = wl_t.shape[1]
    tm = _pick_tile_m(M, K, N1)
    return pl.pallas_call(
        _head_kernel,
        out_shape=jax.ShapeDtypeStruct((M, N2), jnp.float32),
        grid=(M // tm,),
        in_specs=[
            pl.BlockSpec((tm, K), lambda i: (i, 0)),
            pl.BlockSpec((K, N1), lambda i: (0, 0)),
            pl.BlockSpec((1, N1), lambda i: (0, 0)),
            pl.BlockSpec((N1, N2), lambda i: (0, 0)),
            pl.BlockSpec((1, N2), lambda i: (0, 0)),
        ],
        out_specs=pl.BlockSpec((tm, N2), lambda i: (i, 0)),
        compiler_params=_compiler_params(),
    )(patches, w6, b6.reshape(1, N1).astype(jnp.float32),
      wl_t, bl.reshape(1, N2).astype(jnp.float32))


# ---------------------------------------------------------------------------
# XLA glue: im2col (pure data movement) for k=4, s=2, p=1 convolutions
# ---------------------------------------------------------------------------
def _im2col(x_nhwc, k=4, s=2, p=1):
    """(B,H,W,C) -> patches (B*Ho*Wo, k*k*C) in (kh, kw, C) column order."""
    B, H, W, C = x_nhwc.shape
    xp = jnp.pad(x_nhwc, ((0, 0), (p, p), (p, p), (0, 0)))
    Ho = (H + 2 * p - k) // s + 1
    Wo = (W + 2 * p - k) // s + 1
    cols = []
    for kh in range(k):
        for kw in range(k):
            patch = jax.lax.slice(
                xp,
                (0, kh, kw, 0),
                (B, kh + s * (Ho - 1) + 1, kw + s * (Wo - 1) + 1, C),
                (1, s, s, 1),
            )
            cols.append(patch)                    # (B, Ho, Wo, C)
    patches = jnp.stack(cols, axis=3)             # (B, Ho, Wo, k*k, C)
    return patches.reshape(B * Ho * Wo, k * k * C), Ho, Wo


def conv2d_relu(x_nhwc, w_packed, b_packed, *, cout, fold):
    """Conv2d(4,2,1)+ReLU; w_packed is the (block-diag folded) bf16 GEMM weight."""
    B = x_nhwc.shape[0]
    patches, Ho, Wo = _im2col(x_nhwc.astype(jnp.bfloat16))
    M, K = patches.shape
    assert M % fold == 0
    p_f = patches.reshape(M // fold, fold * K)    # free reshape: lane-dense folding
    y = gemm_bias_act(p_f, w_packed, b_packed, apply_relu=True)
    return y.reshape(B, Ho, Wo, cout)             # same bytes as (M, cout) row-major


# ---------------------------------------------------------------------------
# Parameters: PyTorch-style init + one-time GEMM-ready repack (bf16, folded)
# ---------------------------------------------------------------------------
_CONV_COUTS = (32, 32, 64, 128, 256, 256)


def _fold_for(cout):
    return 128 // cout if (cout < 128 and 128 % cout == 0) else 1


def init_params(key, latent_dim=10, num_channels=1):
    channels = [num_channels, 32, 32, 64, 128, 256, 256]
    keys = jax.random.split(key, 14)
    convs = []
    for i in range(6):
        cin, cout = channels[i], channels[i + 1]
        bound = (cin * 4 * 4) ** -0.5
        w = jax.random.uniform(keys[2 * i], (cout, cin, 4, 4), jnp.float32,
                               -bound, bound)
        bb = jax.random.uniform(keys[2 * i + 1], (cout,), jnp.float32,
                                -bound, bound)
        convs.append((w, bb))
    bound = 256.0 ** -0.5
    wl = jax.random.uniform(keys[12], (latent_dim, 256), jnp.float32, -bound, bound)
    bl = jax.random.uniform(keys[13], (latent_dim,), jnp.float32, -bound, bound)
    return {"convs": convs, "linear": (wl, bl)}


def pack_params(params):
    """One-time repack: GEMM-ready, bf16, lane-dense (block-diag) weights."""
    convs = []
    for i in range(5):
        w, b = params["convs"][i]
        cout, cin, kh, kw = w.shape
        w2 = jnp.transpose(w, (2, 3, 1, 0)).reshape(kh * kw * cin, cout)
        fold = _fold_for(cout)
        if fold > 1:
            w2 = jnp.kron(jnp.eye(fold, dtype=w2.dtype), w2)   # block-diag replicate
            b2 = jnp.tile(b, fold)
        else:
            b2 = b
        convs.append({"w": w2.astype(jnp.bfloat16), "b": b2.astype(jnp.float32)})
    w6, b6 = params["convs"][5]
    cout, cin, kh, kw = w6.shape
    w6p = jnp.transpose(w6, (2, 3, 1, 0)).reshape(kh * kw * cin, cout)
    wl, bl = params["linear"]
    head = {"w6": w6p.astype(jnp.bfloat16), "b6": b6.astype(jnp.float32),
            "wl": jnp.transpose(wl).astype(jnp.bfloat16),
            "bl": bl.astype(jnp.float32)}
    return {"convs": convs, "head": head}


# ---------------------------------------------------------------------------
# SimpleConv64 forward  (input: NCHW, image_size must be 64)
# ---------------------------------------------------------------------------
def simple_conv64_forward(packed, x_nchw):
    assert x_nchw.shape[2] == 64 and x_nchw.shape[3] == 64, \
        "This model only works with image size 64x64."
    x = jnp.transpose(x_nchw, (0, 2, 3, 1)).astype(jnp.float32)   # NCHW -> NHWC
    for i in range(5):                                            # 64->32->16->8->4->2
        cout = _CONV_COUTS[i]
        x = conv2d_relu(x, packed["convs"][i]["w"], packed["convs"][i]["b"],
                        cout=cout, fold=_fold_for(cout))
    # conv6 + Flatten3D + Linear fused into one Pallas kernel
    patches6, Ho, Wo = _im2col(x.astype(jnp.bfloat16))
    assert Ho == 1 and Wo == 1
    head = packed["head"]
    out = conv6_linear_head(patches6, head["w6"], head["b6"],
                            head["wl"], head["bl"])
    return (out,)                                                 # module returns tuple


# ---------------------------------------------------------------------------
# Pure-JAX reference (mirrors the bf16 rounding points of the kernel path)
# ---------------------------------------------------------------------------
def reference_forward(params, x_nchw):
    x = x_nchw
    for w, b in params["convs"]:
        y = jax.lax.conv_general_dilated(
            x.astype(jnp.bfloat16), w.astype(jnp.bfloat16),
            window_strides=(2, 2), padding=((1, 1), (1, 1)),
            dimension_numbers=("NCHW", "OIHW", "NCHW"),
            preferred_element_type=jnp.float32)
        x = jax.nn.relu(y + b.reshape(1, -1, 1, 1))
    flat = x.reshape(x.shape[0], -1)
    wl, bl = params["linear"]
    out = jax.lax.dot(flat.astype(jnp.bfloat16), wl.T.astype(jnp.bfloat16),
                      preferred_element_type=jnp.float32) + bl
    return out


if __name__ == "__main__":
    key = jax.random.PRNGKey(0)
    pkey, xkey = jax.random.split(key)
    params = init_params(pkey, latent_dim=10, num_channels=1)
    packed = pack_params(params)
    # batch=2, channels=1, 64x64 (the module asserts image_size == 64)
    x = jax.random.normal(xkey, (2, 1, 64, 64), jnp.float32)

    fwd = jax.jit(simple_conv64_forward)
    (out,) = fwd(packed, x)
    out = jax.block_until_ready(out)
    assert out.shape == (2, 10), out.shape

    ref = reference_forward(params, x)
    assert jnp.allclose(out, ref, rtol=2e-2, atol=2e-4), \
        float(jnp.max(jnp.abs(out - ref)))
    print("KERNEL_OK")
</pallas_src>

<mosaic_0001>
module attributes {stable_mosaic.version = 11 : i64} {
  func.func @_gemm_bias_act_kernel(%arg0: i32, %arg1: memref<512x64xbf16, #tpu.memory_space<vmem>>, %arg2: memref<64x128xbf16, #tpu.memory_space<vmem>>, %arg3: memref<1x128xf32, #tpu.memory_space<vmem>>, %arg4: memref<512x128xf32, #tpu.memory_space<vmem>>) attributes {dimension_semantics = [#tpu.dimension_semantics<parallel>], iteration_bounds = array<i64: 1>, scalar_prefetch = 0 : i64, scratch_operands = 0 : i64, tpu.core_type = #tpu.core_type<tc>, window_params = [{transform_indices = @transform_0, window_bounds = array<i64: 512, 64>}, {pipeline_mode = #tpu.pipeline_mode<synchronous>, transform_indices = @transform_1, window_bounds = array<i64: 64, 128>}, {pipeline_mode = #tpu.pipeline_mode<synchronous>, transform_indices = @transform_2, window_bounds = array<i64: 1, 128>}, {transform_indices = @transform_3, window_bounds = array<i64: 512, 128>}]} {
    %c0 = arith.constant 0 : index
    %c0_0 = arith.constant 0 : index
    %0 = vector.load %arg1[%c0, %c0_0] : memref<512x64xbf16, #tpu.memory_space<vmem>>, vector<512x64xbf16>
    %c0_1 = arith.constant 0 : index
    %c0_2 = arith.constant 0 : index
    %1 = vector.load %arg2[%c0_1, %c0_2] : memref<64x128xbf16, #tpu.memory_space<vmem>>, vector<64x128xbf16>
    %cst = arith.constant dense<0.000000e+00> : vector<512x128xf32>
    %2 = tpu.matmul %0, %1, %cst {dimension_numbers = #tpu.dot_dimension_numbers<[1], [0], [0], [1], [0, 0, 1, 1], [], []>} : vector<512x64xbf16>, vector<64x128xbf16>, vector<512x128xf32> -> vector<512x128xf32>
    %c0_3 = arith.constant 0 : index
    %c0_4 = arith.constant 0 : index
    %3 = vector.load %arg3[%c0_3, %c0_4] : memref<1x128xf32, #tpu.memory_space<vmem>>, vector<1x128xf32>
    %4 = vector.broadcast %3 : vector<1x128xf32> to vector<512x128xf32>
    %5 = arith.addf %2, %4 : vector<512x128xf32>
    %cst_5 = arith.constant 0.000000e+00 : f32
    %6 = vector.broadcast %cst_5 : f32 to vector<512x128xf32>
    %7 = arith.maximumf %5, %6 : vector<512x128xf32>
    %c0_6 = arith.constant 0 : index
    %c0_7 = arith.constant 0 : index
    %8 = vector.load %arg4[%c0_6, %c0_7] : memref<512x128xf32, #tpu.memory_space<vmem>>, vector<512x128xf32>
    tpu.vector_store %arg4[%c0_6, %c0_7], %7 {strides = array<i32>} : memref<512x128xf32, #tpu.memory_space<vmem>>, vector<512x128xf32>,
    return
  }
  func.func @transform_0(%arg0: i32) -> (i32, i32) {
    %c0_i32 = arith.constant 0 : i32
    %c0_i32_0 = arith.constant 0 : i32
    return %arg0, %c0_i32 : i32, i32
  }
  func.func @transform_1(%arg0: i32) -> (i32, i32) {
    %c0_i32 = arith.constant 0 : i32
    %c0_i32_0 = arith.constant 0 : i32
    %c0_i32_1 = arith.constant 0 : i32
    return %c0_i32, %c0_i32_0 : i32, i32
  }
  func.func @transform_2(%arg0: i32) -> (i32, i32) {
    %c0_i32 = arith.constant 0 : i32
    %c0_i32_0 = arith.constant 0 : i32
    %c0_i32_1 = arith.constant 0 : i32
    return %c0_i32, %c0_i32_0 : i32, i32
  }
  func.func @transform_3(%arg0: i32) -> (i32, i32) {
    %c0_i32 = arith.constant 0 : i32
    %c0_i32_0 = arith.constant 0 : i32
    return %arg0, %c0_i32 : i32, i32
  }
}

module attributes {stable_mosaic.version = 11 : i64} {
  func.func @_gemm_bias_act_kernel(%arg0: i32, %arg1: memref<128x2048xbf16, #tpu.memory_space<vmem>>, %arg2: memref<2048x128xbf16, #tpu.memory_space<vmem>>, %arg3: memref<1x128xf32, #tpu.memory_space<vmem>>, %arg4: memref<128x128xf32, #tpu.memory_space<vmem>>) attributes {dimension_semantics = [#tpu.dimension_semantics<parallel>], iteration_bounds = array<i64: 1>, scalar_prefetch = 0 : i64, scratch_operands = 0 : i64, tpu.core_type = #tpu.core_type<tc>, window_params = [{transform_indices = @transform_0, window_bounds = array<i64: 128, 2048>}, {pipeline_mode = #tpu.pipeline_mode<synchronous>, transform_indices = @transform_1, window_bounds = array<i64: 2048, 128>}, {pipeline_mode = #tpu.pipeline_mode<synchronous>, transform_indices = @transform_2, window_bounds = array<i64: 1, 128>}, {transform_indices = @transform_3, window_bounds = array<i64: 128, 128>}]} {
    %c0 = arith.constant 0 : index
    %c0_0 = arith.constant 0 : index
    %0 = vector.load %arg1[%c0, %c0_0] : memref<128x2048xbf16, #tpu.memory_space<vmem>>, vector<128x2048xbf16>
    %c0_1 = arith.constant 0 : index
    %c0_2 = arith.constant 0 : index
    %1 = vector.load %arg2[%c0_1, %c0_2] : memref<2048x128xbf16, #tpu.memory_space<vmem>>, vector<2048x128xbf16>
    %cst = arith.constant dense<0.000000e+00> : vector<128x128xf32>
    %2 = tpu.matmul %0, %1, %cst {dimension_numbers = #tpu.dot_dimension_numbers<[1], [0], [0], [1], [0, 0, 1, 1], [], []>} : vector<128x2048xbf16>, vector<2048x128xbf16>, vector<128x128xf32> -> vector<128x128xf32>
    %c0_3 = arith.constant 0 : index
    %c0_4 = arith.constant 0 : index
    %3 = vector.load %arg3[%c0_3, %c0_4] : memref<1x128xf32, #tpu.memory_space<vmem>>, vector<1x128xf32>
    %4 = vector.broadcast %3 : vector<1x128xf32> to vector<128x128xf32>
    %5 = arith.addf %2, %4 : vector<128x128xf32>
    %cst_5 = arith.constant 0.000000e+00 : f32
    %6 = vector.broadcast %cst_5 : f32 to vector<128x128xf32>
    %7 = arith.maximumf %5, %6 : vector<128x128xf32>
    %c0_6 = arith.constant 0 : index
    %c0_7 = arith.constant 0 : index
    %8 = vector.load %arg4[%c0_6, %c0_7] : memref<128x128xf32, #tpu.memory_space<vmem>>, vector<128x128xf32>
    tpu.vector_store %arg4[%c0_6, %c0_7], %7 {strides = array<i32>} : memref<128x128xf32, #tpu.memory_space<vmem>>, vector<128x128xf32>,
    return
  }
  func.func @transform_0(%arg0: i32) -> (i32, i32) {
    %c0_i32 = arith.constant 0 : i32
    %c0_i32_0 = arith.constant 0 : i32
    return %arg0, %c0_i32 : i32, i32
  }
  func.func @transform_1(%arg0: i32) -> (i32, i32) {
    %c0_i32 = arith.constant 0 : i32
    %c0_i32_0 = arith.constant 0 : i32
    %c0_i32_1 = arith.constant 0 : i32
    return %c0_i32, %c0_i32_0 : i32, i32
  }
  func.func @transform_2(%arg0: i32) -> (i32, i32) {
    %c0_i32 = arith.constant 0 : i32
    %c0_i32_0 = arith.constant 0 : i32
    %c0_i32_1 = arith.constant 0 : i32
    return %c0_i32, %c0_i32_0 : i32, i32
  }
  func.func @transform_3(%arg0: i32) -> (i32, i32) {
    %c0_i32 = arith.constant 0 : i32
    %c0_i32_0 = arith.constant 0 : i32
    return %arg0, %c0_i32 : i32, i32
  }
}

module attributes {stable_mosaic.version = 11 : i64} {
  func.func @_gemm_bias_act_kernel(%arg0: i32, %arg1: memref<64x1024xbf16, #tpu.memory_space<vmem>>, %arg2: memref<1024x128xbf16, #tpu.memory_space<vmem>>, %arg3: memref<1x128xf32, #tpu.memory_space<vmem>>, %arg4: memref<64x128xf32, #tpu.memory_space<vmem>>) attributes {dimension_semantics = [#tpu.dimension_semantics<parallel>], iteration_bounds = array<i64: 1>, scalar_prefetch = 0 : i64, scratch_operands = 0 : i64, tpu.core_type = #tpu.core_type<tc>, window_params = [{transform_indices = @transform_0, window_bounds = array<i64: 64, 1024>}, {pipeline_mode = #tpu.pipeline_mode<synchronous>, transform_indices = @transform_1, window_bounds = array<i64: 1024, 128>}, {pipeline_mode = #tpu.pipeline_mode<synchronous>, transform_indices = @transform_2, window_bounds = array<i64: 1, 128>}, {transform_indices = @transform_3, window_bounds = array<i64: 64, 128>}]} {
    %c0 = arith.constant 0 : index
    %c0_0 = arith.constant 0 : index
    %0 = vector.load %arg1[%c0, %c0_0] : memref<64x1024xbf16, #tpu.memory_space<vmem>>, vector<64x1024xbf16>
    %c0_1 = arith.constant 0 : index
    %c0_2 = arith.constant 0 : index
    %1 = vector.load %arg2[%c0_1, %c0_2] : memref<1024x128xbf16, #tpu.memory_space<vmem>>, vector<1024x128xbf16>
    %cst = arith.constant dense<0.000000e+00> : vector<64x128xf32>
    %2 = tpu.matmul %0, %1, %cst {dimension_numbers = #tpu.dot_dimension_numbers<[1], [0], [0], [1], [0, 0, 1, 1], [], []>} : vector<64x1024xbf16>, vector<1024x128xbf16>, vector<64x128xf32> -> vector<64x128xf32>
    %c0_3 = arith.constant 0 : index
    %c0_4 = arith.constant 0 : index
    %3 = vector.load %arg3[%c0_3, %c0_4] : memref<1x128xf32, #tpu.memory_space<vmem>>, vector<1x128xf32>
    %4 = vector.broadcast %3 : vector<1x128xf32> to vector<64x128xf32>
    %5 = arith.addf %2, %4 : vector<64x128xf32>
    %cst_5 = arith.constant 0.000000e+00 : f32
    %6 = vector.broadcast %cst_5 : f32 to vector<64x128xf32>
    %7 = arith.maximumf %5, %6 : vector<64x128xf32>
    %c0_6 = arith.constant 0 : index
    %c0_7 = arith.constant 0 : index
    %8 = vector.load %arg4[%c0_6, %c0_7] : memref<64x128xf32, #tpu.memory_space<vmem>>, vector<64x128xf32>
    tpu.vector_store %arg4[%c0_6, %c0_7], %7 {strides = array<i32>} : memref<64x128xf32, #tpu.memory_space<vmem>>, vector<64x128xf32>,
    return
  }
  func.func @transform_0(%arg0: i32) -> (i32, i32) {
    %c0_i32 = arith.constant 0 : i32
    %c0_i32_0 = arith.constant 0 : i32
    return %arg0, %c0_i32 : i32, i32
  }
  func.func @transform_1(%arg0: i32) -> (i32, i32) {
    %c0_i32 = arith.constant 0 : i32
    %c0_i32_0 = arith.constant 0 : i32
    %c0_i32_1 = arith.constant 0 : i32
    return %c0_i32, %c0_i32_0 : i32, i32
  }
  func.func @transform_2(%arg0: i32) -> (i32, i32) {
    %c0_i32 = arith.constant 0 : i32
    %c0_i32_0 = arith.constant 0 : i32
    %c0_i32_1 = arith.constant 0 : i32
    return %c0_i32, %c0_i32_0 : i32, i32
  }
  func.func @transform_3(%arg0: i32) -> (i32, i32) {
    %c0_i32 = arith.constant 0 : i32
    %c0_i32_0 = arith.constant 0 : i32
    return %arg0, %c0_i32 : i32, i32
  }
}

module attributes {stable_mosaic.version = 11 : i64} {
  func.func @_gemm_bias_act_kernel(%arg0: i32, %arg1: memref<32x1024xbf16, #tpu.memory_space<vmem>>, %arg2: memref<1024x128xbf16, #tpu.memory_space<vmem>>, %arg3: memref<1x128xf32, #tpu.memory_space<vmem>>, %arg4: memref<32x128xf32, #tpu.memory_space<vmem>>) attributes {dimension_semantics = [#tpu.dimension_semantics<parallel>], iteration_bounds = array<i64: 1>, scalar_prefetch = 0 : i64, scratch_operands = 0 : i64, tpu.core_type = #tpu.core_type<tc>, window_params = [{transform_indices = @transform_0, window_bounds = array<i64: 32, 1024>}, {pipeline_mode = #tpu.pipeline_mode<synchronous>, transform_indices = @transform_1, window_bounds = array<i64: 1024, 128>}, {pipeline_mode = #tpu.pipeline_mode<synchronous>, transform_indices = @transform_2, window_bounds = array<i64: 1, 128>}, {transform_indices = @transform_3, window_bounds = array<i64: 32, 128>}]} {
    %c0 = arith.constant 0 : index
    %c0_0 = arith.constant 0 : index
    %0 = vector.load %arg1[%c0, %c0_0] : memref<32x1024xbf16, #tpu.memory_space<vmem>>, vector<32x1024xbf16>
    %c0_1 = arith.constant 0 : index
    %c0_2 = arith.constant 0 : index
    %1 = vector.load %arg2[%c0_1, %c0_2] : memref<1024x128xbf16, #tpu.memory_space<vmem>>, vector<1024x128xbf16>
    %cst = arith.constant dense<0.000000e+00> : vector<32x128xf32>
    %2 = tpu.matmul %0, %1, %cst {dimension_numbers = #tpu.dot_dimension_numbers<[1], [0], [0], [1], [0, 0, 1, 1], [], []>} : vector<32x1024xbf16>, vector<1024x128xbf16>, vector<32x128xf32> -> vector<32x128xf32>
    %c0_3 = arith.constant 0 : index
    %c0_4 = arith.constant 0 : index
    %3 = vector.load %arg3[%c0_3, %c0_4] : memref<1x128xf32, #tpu.memory_space<vmem>>, vector<1x128xf32>
    %4 = vector.broadcast %3 : vector<1x128xf32> to vector<32x128xf32>
    %5 = arith.addf %2, %4 : vector<32x128xf32>
    %cst_5 = arith.constant 0.000000e+00 : f32
    %6 = vector.broadcast %cst_5 : f32 to vector<32x128xf32>
    %7 = arith.maximumf %5, %6 : vector<32x128xf32>
    %c0_6 = arith.constant 0 : index
    %c0_7 = arith.constant 0 : index
    %8 = vector.load %arg4[%c0_6, %c0_7] : memref<32x128xf32, #tpu.memory_space<vmem>>, vector<32x128xf32>
    tpu.vector_store %arg4[%c0_6, %c0_7], %7 {strides = array<i32>} : memref<32x128xf32, #tpu.memory_space<vmem>>, vector<32x128xf32>,
    return
  }
  func.func @transform_0(%arg0: i32) -> (i32, i32) {
    %c0_i32 = arith.constant 0 : i32
    %c0_i32_0 = arith.constant 0 : i32
    return %arg0, %c0_i32 : i32, i32
  }
  func.func @transform_1(%arg0: i32) -> (i32, i32) {
    %c0_i32 = arith.constant 0 : i32
    %c0_i32_0 = arith.constant 0 : i32
    %c0_i32_1 = arith.constant 0 : i32
    return %c0_i32, %c0_i32_0 : i32, i32
  }
  func.func @transform_2(%arg0: i32) -> (i32, i32) {
    %c0_i32 = arith.constant 0 : i32
    %c0_i32_0 = arith.constant 0 : i32
    %c0_i32_1 = arith.constant 0 : i32
    return %c0_i32, %c0_i32_0 : i32, i32
  }
  func.func @transform_3(%arg0: i32) -> (i32, i32) {
    %c0_i32 = arith.constant 0 : i32
    %c0_i32_0 = arith.constant 0 : i32
    return %arg0, %c0_i32 : i32, i32
  }
}

module attributes {stable_mosaic.version = 11 : i64} {
  func.func @_gemm_bias_act_kernel(%arg0: i32, %arg1: memref<8x2048xbf16, #tpu.memory_space<vmem>>, %arg2: memref<2048x256xbf16, #tpu.memory_space<vmem>>, %arg3: memref<1x256xf32, #tpu.memory_space<vmem>>, %arg4: memref<8x256xf32, #tpu.memory_space<vmem>>) attributes {dimension_semantics = [#tpu.dimension_semantics<parallel>], iteration_bounds = array<i64: 1>, scalar_prefetch = 0 : i64, scratch_operands = 0 : i64, tpu.core_type = #tpu.core_type<tc>, window_params = [{transform_indices = @transform_0, window_bounds = array<i64: 8, 2048>}, {pipeline_mode = #tpu.pipeline_mode<synchronous>, transform_indices = @transform_1, window_bounds = array<i64: 2048, 256>}, {pipeline_mode = #tpu.pipeline_mode<synchronous>, transform_indices = @transform_2, window_bounds = array<i64: 1, 256>}, {transform_indices = @transform_3, window_bounds = array<i64: 8, 256>}]} {
    %c0 = arith.constant 0 : index
    %c0_0 = arith.constant 0 : index
    %0 = vector.load %arg1[%c0, %c0_0] : memref<8x2048xbf16, #tpu.memory_space<vmem>>, vector<8x2048xbf16>
    %c0_1 = arith.constant 0 : index
    %c0_2 = arith.constant 0 : index
    %1 = vector.load %arg2[%c0_1, %c0_2] : memref<2048x256xbf16, #tpu.memory_space<vmem>>, vector<2048x256xbf16>
    %cst = arith.constant dense<0.000000e+00> : vector<8x256xf32>
    %2 = tpu.matmul %0, %1, %cst {dimension_numbers = #tpu.dot_dimension_numbers<[1], [0], [0], [1], [0, 0, 1, 1], [], []>} : vector<8x2048xbf16>, vector<2048x256xbf16>, vector<8x256xf32> -> vector<8x256xf32>
    %c0_3 = arith.constant 0 : index
    %c0_4 = arith.constant 0 : index
    %3 = vector.load %arg3[%c0_3, %c0_4] : memref<1x256xf32, #tpu.memory_space<vmem>>, vector<1x256xf32>
    %4 = vector.broadcast %3 : vector<1x256xf32> to vector<8x256xf32>
    %5 = arith.addf %2, %4 : vector<8x256xf32>
    %cst_5 = arith.constant 0.000000e+00 : f32
    %6 = vector.broadcast %cst_5 : f32 to vector<8x256xf32>
    %7 = arith.maximumf %5, %6 : vector<8x256xf32>
    %c0_6 = arith.constant 0 : index
    %c0_7 = arith.constant 0 : index
    %8 = vector.load %arg4[%c0_6, %c0_7] : memref<8x256xf32, #tpu.memory_space<vmem>>, vector<8x256xf32>
    tpu.vector_store %arg4[%c0_6, %c0_7], %7 {strides = array<i32>} : memref<8x256xf32, #tpu.memory_space<vmem>>, vector<8x256xf32>,
    return
  }
  func.func @transform_0(%arg0: i32) -> (i32, i32) {
    %c0_i32 = arith.constant 0 : i32
    %c0_i32_0 = arith.constant 0 : i32
    return %arg0, %c0_i32 : i32, i32
  }
  func.func @transform_1(%arg0: i32) -> (i32, i32) {
    %c0_i32 = arith.constant 0 : i32
    %c0_i32_0 = arith.constant 0 : i32
    %c0_i32_1 = arith.constant 0 : i32
    return %c0_i32, %c0_i32_0 : i32, i32
  }
  func.func @transform_2(%arg0: i32) -> (i32, i32) {
    %c0_i32 = arith.constant 0 : i32
    %c0_i32_0 = arith.constant 0 : i32
    %c0_i32_1 = arith.constant 0 : i32
    return %c0_i32, %c0_i32_0 : i32, i32
  }
  func.func @transform_3(%arg0: i32) -> (i32, i32) {
    %c0_i32 = arith.constant 0 : i32
    %c0_i32_0 = arith.constant 0 : i32
    return %arg0, %c0_i32 : i32, i32
  }
}

module attributes {stable_mosaic.version = 11 : i64} {
  func.func @_head_kernel(%arg0: i32, %arg1: memref<2x4096xbf16, #tpu.memory_space<vmem>>, %arg2: memref<4096x256xbf16, #tpu.memory_space<vmem>>, %arg3: memref<1x256xf32, #tpu.memory_space<vmem>>, %arg4: memref<256x10xbf16, #tpu.memory_space<vmem>>, %arg5: memref<1x10xf32, #tpu.memory_space<vmem>>, %arg6: memref<2x10xf32, #tpu.memory_space<vmem>>) attributes {dimension_semantics = [#tpu.dimension_semantics<parallel>], iteration_bounds = array<i64: 1>, scalar_prefetch = 0 : i64, scratch_operands = 0 : i64, tpu.core_type = #tpu.core_type<tc>, window_params = [{transform_indices = @transform_0, window_bounds = array<i64: 2, 4096>}, {pipeline_mode = #tpu.pipeline_mode<synchronous>, transform_indices = @transform_1, window_bounds = array<i64: 4096, 256>}, {pipeline_mode = #tpu.pipeline_mode<synchronous>, transform_indices = @transform_2, window_bounds = array<i64: 1, 256>}, {pipeline_mode = #tpu.pipeline_mode<synchronous>, transform_indices = @transform_3, window_bounds = array<i64: 256, 10>}, {pipeline_mode = #tpu.pipeline_mode<synchronous>, transform_indices = @transform_4, window_bounds = array<i64: 1, 10>}, {transform_indices = @transform_5, window_bounds = array<i64: 2, 10>}]} {
    %c0 = arith.constant 0 : index
    %c0_0 = arith.constant 0 : index
    %0 = vector.load %arg1[%c0, %c0_0] : memref<2x4096xbf16, #tpu.memory_space<vmem>>, vector<2x4096xbf16>
    %c0_1 = arith.constant 0 : index
    %c0_2 = arith.constant 0 : index
    %1 = vector.load %arg2[%c0_1, %c0_2] : memref<4096x256xbf16, #tpu.memory_space<vmem>>, vector<4096x256xbf16>
    %cst = arith.constant dense<0.000000e+00> : vector<2x256xf32>
    %2 = tpu.matmul %0, %1, %cst {dimension_numbers = #tpu.dot_dimension_numbers<[1], [0], [0], [1], [0, 0, 1, 1], [], []>} : vector<2x4096xbf16>, vector<4096x256xbf16>, vector<2x256xf32> -> vector<2x256xf32>
    %c0_3 = arith.constant 0 : index
    %c0_4 = arith.constant 0 : index
    %3 = vector.load %arg3[%c0_3, %c0_4] : memref<1x256xf32, #tpu.memory_space<vmem>>, vector<1x256xf32>
    %4 = vector.broadcast %3 : vector<1x256xf32> to vector<2x256xf32>
    %5 = arith.addf %2, %4 : vector<2x256xf32>
    %cst_5 = arith.constant 0.000000e+00 : f32
    %6 = vector.broadcast %cst_5 : f32 to vector<2x256xf32>
    %7 = arith.maximumf %5, %6 : vector<2x256xf32>
    %8 = arith.truncf %7 : vector<2x256xf32> to vector<2x256xbf16>
    %c0_6 = arith.constant 0 : index
    %c0_7 = arith.constant 0 : index
    %9 = vector.load %arg4[%c0_6, %c0_7] : memref<256x10xbf16, #tpu.memory_space<vmem>>, vector<256x10xbf16>
    %cst_8 = arith.constant dense<0.000000e+00> : vector<2x10xf32>
    %10 = tpu.matmul %8, %9, %cst_8 {dimension_numbers = #tpu.dot_dimension_numbers<[1], [0], [0], [1], [0, 0, 1, 1], [], []>} : vector<2x256xbf16>, vector<256x10xbf16>, vector<2x10xf32> -> vector<2x10xf32>
    %c0_9 = arith.constant 0 : index
    %c0_10 = arith.constant 0 : index
    %11 = vector.load %arg5[%c0_9, %c0_10] : memref<1x10xf32, #tpu.memory_space<vmem>>, vector<1x10xf32>
    %12 = vector.broadcast %11 : vector<1x10xf32> to vector<2x10xf32>
    %13 = arith.addf %10, %12 : vector<2x10xf32>
    %c0_11 = arith.constant 0 : index
    %c0_12 = arith.constant 0 : index
    %14 = vector.load %arg6[%c0_11, %c0_12] : memref<2x10xf32, #tpu.memory_space<vmem>>, vector<2x10xf32>
    tpu.vector_store %arg6[%c0_11, %c0_12], %13 {strides = array<i32>} : memref<2x10xf32, #tpu.memory_space<vmem>>, vector<2x10xf32>,
    return
  }
  func.func @transform_0(%arg0: i32) -> (i32, i32) {
    %c0_i32 = arith.constant 0 : i32
    %c0_i32_0 = arith.constant 0 : i32
    return %arg0, %c0_i32 : i32, i32
  }
  func.func @transform_1(%arg0: i32) -> (i32, i32) {
    %c0_i32 = arith.constant 0 : i32
    %c0_i32_0 = arith.constant 0 : i32
    %c0_i32_1 = arith.constant 0 : i32
    return %c0_i32, %c0_i32_0 : i32, i32
  }
  func.func @transform_2(%arg0: i32) -> (i32, i32) {
    %c0_i32 = arith.constant 0 : i32
    %c0_i32_0 = arith.constant 0 : i32
    %c0_i32_1 = arith.constant 0 : i32
    return %c0_i32, %c0_i32_0 : i32, i32
  }
  func.func @transform_3(%arg0: i32) -> (i32, i32) {
    %c0_i32 = arith.constant 0 : i32
    %c0_i32_0 = arith.constant 0 : i32
    %c0_i32_1 = arith.constant 0 : i32
    return %c0_i32, %c0_i32_0 : i32, i32
  }
  func.func @transform_4(%arg0: i32) -> (i32, i32) {
    %c0_i32 = arith.constant 0 : i32
    %c0_i32_0 = arith.constant 0 : i32
    %c0_i32_1 = arith.constant 0 : i32
    return %c0_i32, %c0_i32_0 : i32, i32
  }
  func.func @transform_5(%arg0: i32) -> (i32, i32) {
    %c0_i32 = arith.constant 0 : i32
    %c0_i32_0 = arith.constant 0 : i32
    return %arg0, %c0_i32 : i32, i32
  }
}

</mosaic_0001>

<bundles_post_ra>
// kernel: simple_conv64_forward.6
= control target key start
LH: loop header
LB: loop body
LE: loop exit
PB: predicated region body
PF: predicated region fallthrough
CT: control target
= control target key end

     0   :  { %vm278_vm0 = vcmask 523264   ;;  %s1438_s1 = inlined_call_operand.vmem [shape: bf16[64,128], index: 1, kind: input, shape index: {}]   ;;  %s1439_s0 = inlined_call_operand.vmem [shape: bf16[512,64], index: 0, kind: input, shape index: {}]   ;;  %s1440_s2 = inlined_call_operand.vmem [shape: f32[1,128], index: 2, kind: input, shape index: {}]   ;;  %s1441_s3 = inlined_call_operand.vmem [shape: f32[512,128], index: 3, kind: output, shape index: {}]  }
   0x1   :  { %v981_v0 = vld [vmem:[%s1438_s1] sm:$0xff]   ;;  %v982_v1 = vld [vmem:[%s1438_s1 + $0x8] sm:$0xff]   ;;  %v983_v2 = vld [vmem:[%s1438_s1 + $0x10] sm:$0xff]  }
   0x2   :  { %901 = vmatprep.subr.bf16.mxu0 %v981_v0  ;;  %973 = vmatprep.subr.bf16.mxu1 %v981_v0  ;;  %v985_v3 = vld [vmem:[%s1439_s0] sm:$0xff]   ;;  %v984_v5 = vld [vmem:[%s1438_s1 + $0x18] sm:$0xff]   ;;  %v987_v6 = vld [vmem:[%s1439_s0 + $0x8] sm:$0xff]  }
   0x3   :  { %902 = vmatpush3.bf16.msra.mxu0 %v981_v0  ;;  %977 = vmatpush3.bf16.msra.mxu1 %v981_v0  ;;  %v986_v4 = vld [vmem:[%s1439_s0 + $0x80] sm:$0xff]   ;;  %v988_v7 = vld [vmem:[%s1439_s0 + $0x88] sm:$0xff]   ;;  %v989_v8 = vld [vmem:[%s1439_s0 + $0x10] sm:$0xff]  }
   0x4   :  { %903 = vmatprep.subr.bf16.mxu0 %v982_v1  ;;  %974 = vmatprep.subr.bf16.mxu1 %v982_v1  ;;  %v990_v9 = vld [vmem:[%s1439_s0 + $0x90] sm:$0xff]   ;;  %v991_v10 = vld [vmem:[%s1439_s0 + $0x18] sm:$0xff]   ;;  %v993_v12 = vld [vmem:[%s1439_s0 + $0x20] sm:$0xff]  }
   0x5   :  { %909 = vmatprep.mubr.msk.bf16.mxu0 %vm278_vm0, %v985_v3  ;;  %941 = vmatprep.mubr.msk.bf16.mxu1 %vm278_vm0, %v986_v4  ;;  %v992_v11 = vld [vmem:[%s1439_s0 + $0x98] sm:$0xff]   ;;  %v994_v13 = vld [vmem:[%s1439_s0 + $0xa0] sm:$0xff]   ;;  %v995_v14 = vld [vmem:[%s1439_s0 + $0x28] sm:$0xff]  }
   0x6   :  { %v996_v15 = vld [vmem:[%s1439_s0 + $0xa8] sm:$0xff]   ;;  %v997_v16 = vld [vmem:[%s1439_s0 + $0x30] sm:$0xff]   ;;  %v999_v18 = vld [vmem:[%s1439_s0 + $0x38] sm:$0xff]  }
   0x7   :  { %904 = vmatpush3.bf16.msra.mxu0 %v982_v1  ;;  %978 = vmatpush3.bf16.msra.mxu1 %v982_v1  ;;  %v998_v17 = vld [vmem:[%s1439_s0 + $0xb0] sm:$0xff]   ;;  %v1000_v19 = vld [vmem:[%s1439_s0 + $0xb8] sm:$0xff]   ;;  %v1001_v20 = vld [vmem:[%s1439_s0 + $0x40] sm:$0xff]  }
   0x8   :  { %905 = vmatprep.subr.bf16.mxu0 %v983_v2  ;;  %975 = vmatprep.subr.bf16.mxu1 %v983_v2  ;;  %v1002_v21 = vld [vmem:[%s1439_s0 + $0xc0] sm:$0xff]   ;;  %v1003_v22 = vld [vmem:[%s1439_s0 + $0x48] sm:$0xff]   ;;  %v1005_v24 = vld [vmem:[%s1439_s0 + $0x50] sm:$0xff]  }
   0x9   :  { %v1004_v23 = vld [vmem:[%s1439_s0 + $0xc8] sm:$0xff]   ;;  %v1006_v25 = vld [vmem:[%s1439_s0 + $0xd0] sm:$0xff]   ;;  %v1007_v26 = vld [vmem:[%s1439_s0 + $0x58] sm:$0xff]  }
   0xa   :  { %v1008_v27 = vld [vmem:[%s1439_s0 + $0xd8] sm:$0xff]   ;;  %v1009_v28 = vld [vmem:[%s1439_s0 + $0x60] sm:$0xff]   ;;  %v1011_v30 = vld [vmem:[%s1439_s0 + $0x68] sm:$0xff]  }
   0xb   :  { %906 = vmatpush3.bf16.msra.mxu0 %v983_v2  ;;  %979 = vmatpush3.bf16.msra.mxu1 %v983_v2  ;;  %v1010_v29 = vld [vmem:[%s1439_s0 + $0xe0] sm:$0xff]   ;;  %v1012_v31 = vld [vmem:[%s1439_s0 + $0xe8] sm:$0xff]   ;;  %v1013_v32 = vld [vmem:[%s1439_s0 + $0x70] sm:$0xff]  }
   0xc   :  { %907 = vmatprep.subr.bf16.mxu0 %v984_v5  ;;  %976 = vmatprep.subr.bf16.mxu1 %v984_v5  ;;  %v1014_v33 = vld [vmem:[%s1439_s0 + $0xf0] sm:$0xff]   ;;  %v1015_v34 = vld [vmem:[%s1439_s0 + $0x78] sm:$0xff]   ;;  %v1180_v36 = vld [vmem:[%s1440_s2] ss:$0 sm:$0xff] }
   0xd   :  { %v1016_v35 = vld [vmem:[%s1439_s0 + $0xf8] sm:$0xff]  }
   0xf   :  { %908 = vmatpush3.bf16.msra.mxu0 %v984_v5  ;;  %980 = vmatpush3.bf16.msra.mxu1 %v984_v5 }
  0x12   :  { %910 = vmatmul.mubr.msk.bf16.vlgmr.msra.gmra.mrb[0].mxu0 %vm278_vm0, %v987_v6  ;;  %942 = vmatmul.mubr.msk.bf16.vlgmr.msra.gmra.mrb[0].mxu1 %vm278_vm0, %v988_v7 }
  0x13   :  { %913 = vmatprep.mubr.msk.bf16.mxu0 %vm278_vm0, %v989_v8  ;;  %945 = vmatprep.mubr.msk.bf16.mxu1 %vm278_vm0, %v990_v9 }
  0x1a   :  { %914 = vmatmul.mubr.msk.bf16.gmra.mrb[4].mxu0 %vm278_vm0, %v991_v10  ;;  %946 = vmatmul.mubr.msk.bf16.gmra.mrb[4].mxu1 %vm278_vm0, %v992_v11 }
  0x1b   :  { %917 = vmatprep.mubr.msk.bf16.mxu0 %vm278_vm0, %v993_v12  ;;  %949 = vmatprep.mubr.msk.bf16.mxu1 %vm278_vm0, %v994_v13 }
  0x22   :  { %918 = vmatmul.mubr.msk.bf16.gmra.mrb[8].mxu0 %vm278_vm0, %v995_v14  ;;  %950 = vmatmul.mubr.msk.bf16.gmra.mrb[8].mxu1 %vm278_vm0, %v996_v15 }
  0x23   :  { %921 = vmatprep.mubr.msk.bf16.mxu0 %vm278_vm0, %v997_v16  ;;  %953 = vmatprep.mubr.msk.bf16.mxu1 %vm278_vm0, %v998_v17 }
  0x2a   :  { %922 = vmatmul.mubr.msk.bf16.gmra.mrb[12].mxu0 %vm278_vm0, %v999_v18  ;;  %954 = vmatmul.mubr.msk.bf16.gmra.mrb[12].mxu1 %vm278_vm0, %v1000_v19 }
  0x2b   :  { %925 = vmatprep.mubr.msk.bf16.mxu0 %vm278_vm0, %v1001_v20  ;;  %957 = vmatprep.mubr.msk.bf16.mxu1 %vm278_vm0, %v1002_v21 }
  0x32   :  { %926 = vmatmul.mubr.msk.bf16.gmra.mrb[16].mxu0 %vm278_vm0, %v1003_v22  ;;  %958 = vmatmul.mubr.msk.bf16.gmra.mrb[16].mxu1 %vm278_vm0, %v1004_v23 }
  0x33   :  { %929 = vmatprep.mubr.msk.bf16.mxu0 %vm278_vm0, %v1005_v24  ;;  %961 = vmatprep.mubr.msk.bf16.mxu1 %vm278_vm0, %v1006_v25 }
  0x3a   :  { %930 = vmatmul.mubr.msk.bf16.gmra.mrb[20].mxu0 %vm278_vm0, %v1007_v26  ;;  %962 = vmatmul.mubr.msk.bf16.gmra.mrb[20].mxu1 %vm278_vm0, %v1008_v27 }
  0x3b   :  { %933 = vmatprep.mubr.msk.bf16.mxu0 %vm278_vm0, %v1009_v28  ;;  %965 = vmatprep.mubr.msk.bf16.mxu1 %vm278_vm0, %v1010_v29 }
  0x42   :  { %934 = vmatmul.mubr.msk.bf16.gmra.mrb[24].mxu0 %vm278_vm0, %v1011_v30  ;;  %966 = vmatmul.mubr.msk.bf16.gmra.mrb[24].mxu1 %vm278_vm0, %v1012_v31 }
  0x43   :  { %937 = vmatprep.mubr.msk.bf16.mxu0 %vm278_vm0, %v1013_v32  ;;  %969 = vmatprep.mubr.msk.bf16.mxu1 %vm278_vm0, %v1014_v33 }
  0x4a   :  { %938 = vmatmul.mubr.msk.bf16.gmra.mrb[28].mxu0 %vm278_vm0, %v1015_v34  ;;  %970 = vmatmul.mubr.msk.bf16.gmra.mrb[28].mxu1 %vm278_vm0, %v1016_v35 }
  0xe5   :  { %v911_v37 = vpop.f32.mrb[0].mxu0  ;;  %v943_v38 = vpop.f32.mrb[0].mxu1 }
  0xe6   :  { %v418_v39 = vadd.f32 %v911_v37, %v1180_v36  ;;  %v546_v40 = vadd.f32 %v943_v38, %v1180_v36  ;;  %v409_v41 = vpop.f32.mrb[1].mxu0  ;;  %v537_v42 = vpop.f32.mrb[1].mxu1 }
  0xe7   :  { %v410_v43 = vadd.f32 %v1180_v36, %v409_v41  ;;  %v538_v44 = vadd.f32 %v1180_v36, %v537_v42  ;;  %v912_v45 = vpop.f32.mrb[2].mxu0  ;;  %v944_v46 = vpop.f32.mrb[2].mxu1 }
  0xe8   :  { %v666_v47 = vmax.f32 %v418_v39, 0.0  ;;  %v698_v48 = vmax.f32 %v546_v40, 0.0  ;;  %v421_v49 = vadd.f32 %v912_v45, %v1180_v36  ;;  %v549_v50 = vadd.f32 %v944_v46, %v1180_v36  ;;  %v412_v51 = vpop.f32.mrb[3].mxu0  ;;  %v540_v52 = vpop.f32.mrb[3].mxu1 }
  0xe9   :  { %v664_v53 = vmax.f32 %v410_v43, 0.0  ;;  %v696_v54 = vmax.f32 %v538_v44, 0.0  ;;  %v413_v55 = vadd.f32 %v1180_v36, %v412_v51  ;;  %v541_v56 = vadd.f32 %v1180_v36, %v540_v52 }
  0xea   :  { %730 = vst [vmem:[%s1441_s3 + $0x10] sm:$0xff] %v666_v47  ;;  %762 = vst [vmem:[%s1441_s3 + $0x110] sm:$0xff] %v698_v48  ;;  %v667_v57 = vmax.f32 %v421_v49, 0.0  ;;  %v699_v58 = vmax.f32 %v549_v50, 0.0 }
  0xeb   :  { %728 = vst [vmem:[%s1441_s3] sm:$0xff] %v664_v53  ;;  %760 = vst [vmem:[%s1441_s3 + $0x100] sm:$0xff] %v696_v54  ;;  %v665_v59 = vmax.f32 %v413_v55, 0.0  ;;  %v697_v60 = vmax.f32 %v541_v56, 0.0 }
  0xec   :  { %731 = vst [vmem:[%s1441_s3 + $0x18] sm:$0xff] %v667_v57  ;;  %763 = vst [vmem:[%s1441_s3 + $0x118] sm:$0xff] %v699_v58 }
  0xed   :  { %729 = vst [vmem:[%s1441_s3 + $0x8] sm:$0xff] %v665_v59  ;;  %761 = vst [vmem:[%s1441_s3 + $0x108] sm:$0xff] %v697_v60  ;;  %v915_v61 = vpop.f32.mrb[4].mxu0  ;;  %v947_v62 = vpop.f32.mrb[4].mxu1 }
  0xee   :  { %v434_v63 = vadd.f32 %v915_v61, %v1180_v36  ;;  %v562_v0 = vadd.f32 %v947_v62, %v1180_v36  ;;  %v425_v1 = vpop.f32.mrb[5].mxu0  ;;  %v553_v2 = vpop.f32.mrb[5].mxu1 }
  0xef   :  { %v426_v3 = vadd.f32 %v1180_v36, %v425_v1  ;;  %v554_v4 = vadd.f32 %v1180_v36, %v553_v2  ;;  %v916_v5 = vpop.f32.mrb[6].mxu0  ;;  %v948_v6 = vpop.f32.mrb[6].mxu1 }
  0xf0   :  { %v670_v7 = vmax.f32 %v434_v63, 0.0  ;;  %v702_v8 = vmax.f32 %v562_v0, 0.0  ;;  %v437_v9 = vadd.f32 %v916_v5, %v1180_v36  ;;  %v565_v10 = vadd.f32 %v948_v6, %v1180_v36  ;;  %v428_v11 = vpop.f32.mrb[7].mxu0  ;;  %v556_v12 = vpop.f32.mrb[7].mxu1 }
  0xf1   :  { %v668_v13 = vmax.f32 %v426_v3, 0.0  ;;  %v700_v14 = vmax.f32 %v554_v4, 0.0  ;;  %v429_v15 = vadd.f32 %v1180_v36, %v428_v11  ;;  %v557_v16 = vadd.f32 %v1180_v36, %v556_v12 }
  0xf2   :  { %734 = vst [vmem:[%s1441_s3 + $0x30] sm:$0xff] %v670_v7  ;;  %766 = vst [vmem:[%s1441_s3 + $0x130] sm:$0xff] %v702_v8  ;;  %v671_v17 = vmax.f32 %v437_v9, 0.0  ;;  %v703_v18 = vmax.f32 %v565_v10, 0.0 }
  0xf3   :  { %732 = vst [vmem:[%s1441_s3 + $0x20] sm:$0xff] %v668_v13  ;;  %764 = vst [vmem:[%s1441_s3 + $0x120] sm:$0xff] %v700_v14  ;;  %v669_v19 = vmax.f32 %v429_v15, 0.0  ;;  %v701_v20 = vmax.f32 %v557_v16, 0.0 }
  0xf4   :  { %735 = vst [vmem:[%s1441_s3 + $0x38] sm:$0xff] %v671_v17  ;;  %767 = vst [vmem:[%s1441_s3 + $0x138] sm:$0xff] %v703_v18 }
  0xf5   :  { %733 = vst [vmem:[%s1441_s3 + $0x28] sm:$0xff] %v669_v19  ;;  %765 = vst [vmem:[%s1441_s3 + $0x128] sm:$0xff] %v701_v20  ;;  %v919_v21 = vpop.f32.mrb[8].mxu0  ;;  %v951_v22 = vpop.f32.mrb[8].mxu1 }
  0xf6   :  { %v450_v23 = vadd.f32 %v919_v21, %v1180_v36  ;;  %v578_v24 = vadd.f32 %v951_v22, %v1180_v36  ;;  %v441_v25 = vpop.f32.mrb[9].mxu0  ;;  %v569_v26 = vpop.f32.mrb[9].mxu1 }
  0xf7   :  { %v442_v27 = vadd.f32 %v1180_v36, %v441_v25  ;;  %v570_v28 = vadd.f32 %v1180_v36, %v569_v26  ;;  %v920_v29 = vpop.f32.mrb[10].mxu0  ;;  %v952_v30 = vpop.f32.mrb[10].mxu1 }
  0xf8   :  { %v674_v31 = vmax.f32 %v450_v23, 0.0  ;;  %v706_v32 = vmax.f32 %v578_v24, 0.0  ;;  %v453_v33 = vadd.f32 %v920_v29, %v1180_v36  ;;  %v581_v34 = vadd.f32 %v952_v30, %v1180_v36  ;;  %v444_v35 = vpop.f32.mrb[11].mxu0  ;;  %v572_v37 = vpop.f32.mrb[11].mxu1 }
  0xf9   :  { %v672_v38 = vmax.f32 %v442_v27, 0.0  ;;  %v704_v39 = vmax.f32 %v570_v28, 0.0  ;;  %v445_v40 = vadd.f32 %v1180_v36, %v444_v35  ;;  %v573_v41 = vadd.f32 %v1180_v36, %v572_v37 }
  0xfa   :  { %738 = vst [vmem:[%s1441_s3 + $0x50] sm:$0xff] %v674_v31  ;;  %770 = vst [vmem:[%s1441_s3 + $0x150] sm:$0xff] %v706_v32  ;;  %v675_v42 = vmax.f32 %v453_v33, 0.0  ;;  %v707_v43 = vmax.f32 %v581_v34, 0.0 }
  0xfb   :  { %736 = vst [vmem:[%s1441_s3 + $0x40] sm:$0xff] %v672_v38  ;;  %768 = vst [vmem:[%s1441_s3 + $0x140] sm:$0xff] %v704_v39  ;;  %v673_v44 = vmax.f32 %v445_v40, 0.0  ;;  %v705_v45 = vmax.f32 %v573_v41, 0.0 }
  0xfc   :  { %739 = vst [vmem:[%s1441_s3 + $0x58] sm:$0xff] %v675_v42  ;;  %771 = vst [vmem:[%s1441_s3 + $0x158] sm:$0xff] %v707_v43 }
  0xfd   :  { %737 = vst [vmem:[%s1441_s3 + $0x48] sm:$0xff] %v673_v44  ;;  %769 = vst [vmem:[%s1441_s3 + $0x148] sm:$0xff] %v705_v45  ;;  %v923_v46 = vpop.f32.mrb[12].mxu0  ;;  %v955_v47 = vpop.f32.mrb[12].mxu1 }
  0xfe   :  { %v466_v48 = vadd.f32 %v923_v46, %v1180_v36  ;;  %v594_v49 = vadd.f32 %v955_v47, %v1180_v36  ;;  %v457_v50 = vpop.f32.mrb[13].mxu0  ;;  %v585_v51 = vpop.f32.mrb[13].mxu1 }
  0xff   :  { %v458_v52 = vadd.f32 %v1180_v36, %v457_v50  ;;  %v586_v53 = vadd.f32 %v1180_v36, %v585_v51  ;;  %v924_v54 = vpop.f32.mrb[14].mxu0  ;;  %v956_v55 = vpop.f32.mrb[14].mxu1 }
 0x100   :  { %v678_v56 = vmax.f32 %v466_v48, 0.0  ;;  %v710_v57 = vmax.f32 %v594_v49, 0.0  ;;  %v469_v58 = vadd.f32 %v924_v54, %v1180_v36  ;;  %v597_v59 = vadd.f32 %v956_v55, %v1180_v36  ;;  %v460_v60 = vpop.f32.mrb[15].mxu0  ;;  %v588_v61 = vpop.f32.mrb[15].mxu1 }
 0x101   :  { %v676_v62 = vmax.f32 %v458_v52, 0.0  ;;  %v708_v63 = vmax.f32 %v586_v53, 0.0  ;;  %v461_v0 = vadd.f32 %v1180_v36, %v460_v60  ;;  %v589_v1 = vadd.f32 %v1180_v36, %v588_v61 }
 0x102   :  { %742 = vst [vmem:[%s1441_s3 + $0x70] sm:$0xff] %v678_v56  ;;  %774 = vst [vmem:[%s1441_s3 + $0x170] sm:$0xff] %v710_v57  ;;  %v679_v2 = vmax.f32 %v469_v58, 0.0  ;;  %v711_v3 = vmax.f32 %v597_v59, 0.0 }
 0x103   :  { %740 = vst [vmem:[%s1441_s3 + $0x60] sm:$0xff] %v676_v62  ;;  %772 = vst [vmem:[%s1441_s3 + $0x160] sm:$0xff] %v708_v63  ;;  %v677_v4 = vmax.f32 %v461_v0, 0.0  ;;  %v709_v5 = vmax.f32 %v589_v1, 0.0 }
 0x104   :  { %743 = vst [vmem:[%s1441_s3 + $0x78] sm:$0xff] %v679_v2  ;;  %775 = vst [vmem:[%s1441_s3 + $0x178] sm:$0xff] %v711_v3 }
 0x105   :  { %741 = vst [vmem:[%s1441_s3 + $0x68] sm:$0xff] %v677_v4  ;;  %773 = vst [vmem:[%s1441_s3 + $0x168] sm:$0xff] %v709_v5  ;;  %v927_v6 = vpop.f32.mrb[16].mxu0  ;;  %v959_v7 = vpop.f32.mrb[16].mxu1 }
 0x106   :  { %v482_v8 = vadd.f32 %v927_v6, %v1180_v36  ;;  %v610_v9 = vadd.f32 %v959_v7, %v1180_v36  ;;  %v473_v10 = vpop.f32.mrb[17].mxu0  ;;  %v601_v11 = vpop.f32.mrb[17].mxu1 }
 0x107   :  { %v474_v12 = vadd.f32 %v1180_v36, %v473_v10  ;;  %v602_v13 = vadd.f32 %v1180_v36, %v601_v11  ;;  %v928_v14 = vpop.f32.mrb[18].mxu0  ;;  %v960_v15 = vpop.f32.mrb[18].mxu1 }
 0x108   :  { %v682_v16 = vmax.f32 %v482_v8, 0.0  ;;  %v714_v17 = vmax.f32 %v610_v9, 0.0  ;;  %v485_v18 = vadd.f32 %v928_v14, %v1180_v36  ;;  %v613_v19 = vadd.f32 %v960_v15, %v1180_v36  ;;  %v476_v20 = vpop.f32.mrb[19].mxu0  ;;  %v604_v21 = vpop.f32.mrb[19].mxu1 }
 0x109   :  { %v680_v22 = vmax.f32 %v474_v12, 0.0  ;;  %v712_v23 = vmax.f32 %v602_v13, 0.0  ;;  %v477_v24 = vadd.f32 %v1180_v36, %v476_v20  ;;  %v605_v25 = vadd.f32 %v1180_v36, %v604_v21 }
 0x10a   :  { %746 = vst [vmem:[%s1441_s3 + $0x90] sm:$0xff] %v682_v16  ;;  %778 = vst [vmem:[%s1441_s3 + $0x190] sm:$0xff] %v714_v17  ;;  %v683_v26 = vmax.f32 %v485_v18, 0.0  ;;  %v715_v27 = vmax.f32 %v613_v19, 0.0 }
 0x10b   :  { %744 = vst [vmem:[%s1441_s3 + $0x80] sm:$0xff] %v680_v22  ;;  %776 = vst [vmem:[%s1441_s3 + $0x180] sm:$0xff] %v712_v23  ;;  %v681_v28 = vmax.f32 %v477_v24, 0.0  ;;  %v713_v29 = vmax.f32 %v605_v25, 0.0 }
 0x10c   :  { %747 = vst [vmem:[%s1441_s3 + $0x98] sm:$0xff] %v683_v26  ;;  %779 = vst [vmem:[%s1441_s3 + $0x198] sm:$0xff] %v715_v27 }
 0x10d   :  { %745 = vst [vmem:[%s1441_s3 + $0x88] sm:$0xff] %v681_v28  ;;  %777 = vst [vmem:[%s1441_s3 + $0x188] sm:$0xff] %v713_v29  ;;  %v931_v30 = vpop.f32.mrb[20].mxu0  ;;  %v963_v31 = vpop.f32.mrb[20].mxu1 }
 0x10e   :  { %v498_v32 = vadd.f32 %v931_v30, %v1180_v36  ;;  %v626_v33 = vadd.f32 %v963_v31, %v1180_v36  ;;  %v489_v34 = vpop.f32.mrb[21].mxu0  ;;  %v617_v35 = vpop.f32.mrb[21].mxu1 }
 0x10f   :  { %v490_v37 = vadd.f32 %v1180_v36, %v489_v34  ;;  %v618_v38 = vadd.f32 %v1180_v36, %v617_v35  ;;  %v932_v39 = vpop.f32.mrb[22].mxu0  ;;  %v964_v40 = vpop.f32.mrb[22].mxu1 }
 0x110   :  { %v686_v41 = vmax.f32 %v498_v32, 0.0  ;;  %v718_v42 = vmax.f32 %v626_v33, 0.0  ;;  %v501_v43 = vadd.f32 %v932_v39, %v1180_v36  ;;  %v629_v44 = vadd.f32 %v964_v40, %v1180_v36  ;;  %v492_v45 = vpop.f32.mrb[23].mxu0  ;;  %v620_v46 = vpop.f32.mrb[23].mxu1 }
 0x111   :  { %v684_v47 = vmax.f32 %v490_v37, 0.0  ;;  %v716_v48 = vmax.f32 %v618_v38, 0.0  ;;  %v493_v49 = vadd.f32 %v1180_v36, %v492_v45  ;;  %v621_v50 = vadd.f32 %v1180_v36, %v620_v46 }
 0x112   :  { %750 = vst [vmem:[%s1441_s3 + $0xb0] sm:$0xff] %v686_v41  ;;  %782 = vst [vmem:[%s1441_s3 + $0x1b0] sm:$0xff] %v718_v42  ;;  %v687_v51 = vmax.f32 %v501_v43, 0.0  ;;  %v719_v52 = vmax.f32 %v629_v44, 0.0 }
 0x113   :  { %748 = vst [vmem:[%s1441_s3 + $0xa0] sm:$0xff] %v684_v47  ;;  %780 = vst [vmem:[%s1441_s3 + $0x1a0] sm:$0xff] %v716_v48  ;;  %v685_v53 = vmax.f32 %v493_v49, 0.0  ;;  %v717_v54 = vmax.f32 %v621_v50, 0.0 }
 0x114   :  { %751 = vst [vmem:[%s1441_s3 + $0xb8] sm:$0xff] %v687_v51  ;;  %783 = vst [vmem:[%s1441_s3 + $0x1b8] sm:$0xff] %v719_v52 }
 0x115   :  { %749 = vst [vmem:[%s1441_s3 + $0xa8] sm:$0xff] %v685_v53  ;;  %781 = vst [vmem:[%s1441_s3 + $0x1a8] sm:$0xff] %v717_v54  ;;  %v935_v55 = vpop.f32.mrb[24].mxu0  ;;  %v967_v56 = vpop.f32.mrb[24].mxu1 }
 0x116   :  { %v514_v57 = vadd.f32 %v935_v55, %v1180_v36  ;;  %v642_v58 = vadd.f32 %v967_v56, %v1180_v36  ;;  %v505_v59 = vpop.f32.mrb[25].mxu0  ;;  %v633_v60 = vpop.f32.mrb[25].mxu1 }
 0x117   :  { %v506_v61 = vadd.f32 %v1180_v36, %v505_v59  ;;  %v634_v62 = vadd.f32 %v1180_v36, %v633_v60  ;;  %v936_v63 = vpop.f32.mrb[26].mxu0  ;;  %v968_v0 = vpop.f32.mrb[26].mxu1 }
 0x118   :  { %v690_v1 = vmax.f32 %v514_v57, 0.0  ;;  %v722_v2 = vmax.f32 %v642_v58, 0.0  ;;  %v517_v3 = vadd.f32 %v936_v63, %v1180_v36  ;;  %v645_v4 = vadd.f32 %v968_v0, %v1180_v36  ;;  %v508_v5 = vpop.f32.mrb[27].mxu0  ;;  %v636_v6 = vpop.f32.mrb[27].mxu1 }
 0x119   :  { %v688_v7 = vmax.f32 %v506_v61, 0.0  ;;  %v720_v8 = vmax.f32 %v634_v62, 0.0  ;;  %v509_v9 = vadd.f32 %v1180_v36, %v508_v5  ;;  %v637_v10 = vadd.f32 %v1180_v36, %v636_v6 }
 0x11a   :  { %754 = vst [vmem:[%s1441_s3 + $0xd0] sm:$0xff] %v690_v1  ;;  %786 = vst [vmem:[%s1441_s3 + $0x1d0] sm:$0xff] %v722_v2  ;;  %v691_v11 = vmax.f32 %v517_v3, 0.0  ;;  %v723_v12 = vmax.f32 %v645_v4, 0.0 }
 0x11b   :  { %752 = vst [vmem:[%s1441_s3 + $0xc0] sm:$0xff] %v688_v7  ;;  %784 = vst [vmem:[%s1441_s3 + $0x1c0] sm:$0xff] %v720_v8  ;;  %v689_v13 = vmax.f32 %v509_v9, 0.0  ;;  %v721_v14 = vmax.f32 %v637_v10, 0.0 }
 0x11c   :  { %755 = vst [vmem:[%s1441_s3 + $0xd8] sm:$0xff] %v691_v11  ;;  %787 = vst [vmem:[%s1441_s3 + $0x1d8] sm:$0xff] %v723_v12 }
 0x11d   :  { %753 = vst [vmem:[%s1441_s3 + $0xc8] sm:$0xff] %v689_v13  ;;  %785 = vst [vmem:[%s1441_s3 + $0x1c8] sm:$0xff] %v721_v14  ;;  %v939_v15 = vpop.f32.mrb[28].mxu0  ;;  %v971_v16 = vpop.f32.mrb[28].mxu1 }
 0x11e   :  { %v530_v17 = vadd.f32 %v939_v15, %v1180_v36  ;;  %v658_v18 = vadd.f32 %v971_v16, %v1180_v36  ;;  %v521_v19 = vpop.f32.mrb[29].mxu0  ;;  %v649_v20 = vpop.f32.mrb[29].mxu1 }
 0x11f   :  { %v522_v21 = vadd.f32 %v1180_v36, %v521_v19  ;;  %v650_v22 = vadd.f32 %v1180_v36, %v649_v20  ;;  %v940_v23 = vpop.f32.mrb[30].mxu0  ;;  %v972_v24 = vpop.f32.mrb[30].mxu1 }
 0x120   :  { %v694_v25 = vmax.f32 %v530_v17, 0.0  ;;  %v726_v26 = vmax.f32 %v658_v18, 0.0  ;;  %v533_v27 = vadd.f32 %v940_v23, %v1180_v36  ;;  %v661_v28 = vadd.f32 %v972_v24, %v1180_v36  ;;  %v524_v29 = vpop.f32.mrb[31].mxu0  ;;  %v652_v30 = vpop.f32.mrb[31].mxu1 }
 0x121   :  { %v692_v31 = vmax.f32 %v522_v21, 0.0  ;;  %v724_v32 = vmax.f32 %v650_v22, 0.0  ;;  %v525_v33 = vadd.f32 %v1180_v36, %v524_v29  ;;  %v653_v34 = vadd.f32 %v1180_v36, %v652_v30 }
 0x122   :  { %758 = vst [vmem:[%s1441_s3 + $0xf0] sm:$0xff] %v694_v25  ;;  %790 = vst [vmem:[%s1441_s3 + $0x1f0] sm:$0xff] %v726_v26  ;;  %v695_v35 = vmax.f32 %v533_v27, 0.0  ;;  %v727_v37 = vmax.f32 %v661_v28, 0.0 }
 0x123   :  { %756 = vst [vmem:[%s1441_s3 + $0xe0] sm:$0xff] %v692_v31  ;;  %788 = vst [vmem:[%s1441_s3 + $0x1e0] sm:$0xff] %v724_v32  ;;  %v693_v38 = vmax.f32 %v525_v33, 0.0  ;;  %v725_v36 = vmax.f32 %v653_v34, 0.0 }
 0x124   :  { %759 = vst [vmem:[%s1441_s3 + $0xf8] sm:$0xff] %v695_v35  ;;  %791 = vst [vmem:[%s1441_s3 + $0x1f8] sm:$0xff] %v727_v37 }
 0x125   :  { %757 = vst [vmem:[%s1441_s3 + $0xe8] sm:$0xff] %v693_v38  ;;  %789 = vst [vmem:[%s1441_s3 + $0x1e8] sm:$0xff] %v725_v36 }

// kernel: simple_conv64_forward.7
= control target key start
LH: loop header
LB: loop body
LE: loop exit
PB: predicated region body
PF: predicated region fallthrough
CT: control target
= control target key end

     0   :  { %s4524_s1 = inlined_call_operand.vmem [shape: bf16[2048,128], index: 1, kind: input, shape index: {}]   ;;  %s4525_s0 = inlined_call_operand.vmem [shape: bf16[128,2048], index: 0, kind: input, shape index: {}]   ;;  %s4526_s2 = inlined_call_operand.vmem [shape: f32[1,128], index: 2, kind: input, shape index: {}]   ;;  %s4527_s3 = inlined_call_operand.vmem [shape: f32[128,128], index: 3, kind: output, shape index: {}]  }
   0x1   :  { %v3395_v0 = vld [vmem:[%s4524_s1 + $0x40] sm:$0xff]   ;;  %v3399_v4 = vld [vmem:[%s4524_s1 + $0x48] sm:$0xff]   ;;  %v3403_v8 = vld [vmem:[%s4524_s1 + $0x50] sm:$0xff]  }
   0x2   :  { %v3396_v1 = vld [vmem:[%s4524_s1 + $0xc0] sm:$0xff]   ;;  %2883 = vmatprep.subr.bf16.mxu0 %v3395_v0  ;;  %v3400_v5 = vld [vmem:[%s4524_s1 + $0xc8] sm:$0xff]   ;;  %v3404_v9 = vld [vmem:[%s4524_s1 + $0xd0] sm:$0xff]  }
   0x3   :  { %v3397_v2 = vld [vmem:[%s4524_s1] sm:$0xff]   ;;  %2947 = vmatprep.subr.bf16.mxu1 %v3396_v1  ;;  %v3401_v6 = vld [vmem:[%s4524_s1 + $0x8] sm:$0xff]   ;;  %v3405_v10 = vld [vmem:[%s4524_s1 + $0x10] sm:$0xff]  }
   0x4   :  { %v3398_v3 = vld [vmem:[%s4524_s1 + $0x80] sm:$0xff]   ;;  %2884 = vmatpush3.bf16.msra.mxu0 %v3397_v2  ;;  %v3402_v7 = vld [vmem:[%s4524_s1 + $0x88] sm:$0xff]   ;;  %v3406_v11 = vld [vmem:[%s4524_s1 + $0x90] sm:$0xff]  }
   0x5   :  { %2948 = vmatpush3.bf16.msra.mxu1 %v3398_v3  ;;  %2885 = vmatprep.subr.bf16.mxu0 %v3399_v4  ;;  %v3407_v12 = vld [vmem:[%s4524_s1 + $0x58] sm:$0xff]   ;;  %v3411_v16 = vld [vmem:[%s4524_s1 + $0x60] sm:$0xff]   ;;  %v3415_v20 = vld [vmem:[%s4524_s1 + $0x68] sm:$0xff]  }
   0x6   :  { %2949 = vmatprep.subr.bf16.mxu1 %v3400_v5  ;;  %v3408_v13 = vld [vmem:[%s4524_s1 + $0xd8] sm:$0xff]   ;;  %v3412_v17 = vld [vmem:[%s4524_s1 + $0xe0] sm:$0xff]   ;;  %v3416_v21 = vld [vmem:[%s4524_s1 + $0xe8] sm:$0xff]  }
   0x7   :  { %v3409_v14 = vld [vmem:[%s4524_s1 + $0x18] sm:$0xff]   ;;  %v3413_v18 = vld [vmem:[%s4524_s1 + $0x20] sm:$0xff]   ;;  %v3417_v22 = vld [vmem:[%s4524_s1 + $0x28] sm:$0xff]  }
   0x8   :  { %2886 = vmatpush3.bf16.msra.mxu0 %v3401_v6  ;;  %v3410_v15 = vld [vmem:[%s4524_s1 + $0x98] sm:$0xff]   ;;  %v3414_v19 = vld [vmem:[%s4524_s1 + $0xa0] sm:$0xff]   ;;  %v3418_v23 = vld [vmem:[%s4524_s1 + $0xa8] sm:$0xff]  }
   0x9   :  { %2950 = vmatpush3.bf16.msra.mxu1 %v3402_v7  ;;  %2887 = vmatprep.subr.bf16.mxu0 %v3403_v8  ;;  %v3419_v24 = vld [vmem:[%s4524_s1 + $0x70] sm:$0xff]   ;;  %v3423_v28 = vld [vmem:[%s4524_s1 + $0x78] sm:$0xff]   ;;  %v15_v32 = vld [vmem:[%s4525_s0] sm:$0xff] }
   0xa   :  { %2951 = vmatprep.subr.bf16.mxu1 %v3404_v9  ;;  %v3420_v25 = vld [vmem:[%s4524_s1 + $0xf0] sm:$0xff]   ;;  %v3424_v29 = vld [vmem:[%s4524_s1 + $0xf8] sm:$0xff]   ;;  %v23_v33 = vld [vmem:[%s4525_s0 + $0x40] sm:$0xff] }
   0xb   :  { %v3421_v26 = vld [vmem:[%s4524_s1 + $0x30] sm:$0xff]   ;;  %v3425_v30 = vld [vmem:[%s4524_s1 + $0x38] sm:$0xff]   ;;  %v16_v34 = vld [vmem:[%s4525_s0 + $0x8] sm:$0xff]  ;;  %v2627_v35 = vcombine.low %v15_v32, %v23_v33  ;;  %v2628_v36 = vcombine.high %v15_v32, %v23_v33 }
   0xc   :  { %2888 = vmatpush3.bf16.msra.mxu0 %v3405_v10  ;;  %v3422_v27 = vld [vmem:[%s4524_s1 + $0xb0] sm:$0xff]   ;;  %v3426_v31 = vld [vmem:[%s4524_s1 + $0xb8] sm:$0xff]   ;;  %v24_v37 = vld [vmem:[%s4525_s0 + $0x48] sm:$0xff] }
   0xd   :  { %2952 = vmatpush3.bf16.msra.mxu1 %v3406_v11  ;;  %2889 = vmatprep.subr.bf16.mxu0 %v3407_v12  ;;  %v2629_v38 = vcombine.low %v16_v34, %v24_v37  ;;  %v2630_v39 = vcombine.high %v16_v34, %v24_v37  ;;  %v3427_v40 = vld [vmem:[%s4524_s1 + $0x140] sm:$0xff]   ;;  %v32_v47 = vld [vmem:[%s4525_s0 + $0x88] sm:$0xff]  ;;  %v3435_v62 = vld [vmem:[%s4524_s1 + $0x150] sm:$0xff]  }
   0xe   :  { %2953 = vmatprep.subr.bf16.mxu1 %v3408_v13  ;;  %1846 = vmatprep.mubr.bf16.mxu0 %v2628_v36  ;;  %v3428_v41 = vld [vmem:[%s4524_s1 + $0x100] sm:$0xff]   ;;  %v40_v48 = vld [vmem:[%s4525_s0 + $0xc8] sm:$0xff]  ;;  %v3436_v63 = vld [vmem:[%s4524_s1 + $0x110] sm:$0xff]  }
   0xf   :  { %1943 = vmatprep.mubr.bf16.mxu1 %v2630_v39  ;;  %v3429_v42 = vld [vmem:[%s4524_s1 + $0x1c0] sm:$0xff]   ;;  %v2646_v49 = vcombine.high %v32_v47, %v40_v48  ;;  %v3431_v50 = vld [vmem:[%s4524_s1 + $0x148] sm:$0xff]   ;;  %v2645_v53 = vcombine.low %v32_v47, %v40_v48  ;;  %v3437_v0 = vld [vmem:[%s4524_s1 + $0x1d0] sm:$0xff]  }
  0x10   :  { %2890 = vmatpush3.bf16.msra.mxu0 %v3409_v14  ;;  %v3430_v43 = vld [vmem:[%s4524_s1 + $0x180] sm:$0xff]   ;;  %v3432_v52 = vld [vmem:[%s4524_s1 + $0x108] sm:$0xff]   ;;  %v3438_v1 = vld [vmem:[%s4524_s1 + $0x190] sm:$0xff]  }
  0x11   :  { %2954 = vmatpush3.bf16.msra.mxu1 %v3410_v15  ;;  %2891 = vmatprep.subr.bf16.mxu0 %v3411_v16  ;;  %v31_v44 = vld [vmem:[%s4525_s0 + $0x80] sm:$0xff]  ;;  %v3433_v54 = vld [vmem:[%s4524_s1 + $0x1c8] sm:$0xff]   ;;  %v3439_v10 = vld [vmem:[%s4524_s1 + $0x158] sm:$0xff]  }
  0x12   :  { %2955 = vmatprep.subr.bf16.mxu1 %v3412_v17  ;;  %v39_v45 = vld [vmem:[%s4525_s0 + $0xc0] sm:$0xff]  ;;  %v3434_v55 = vld [vmem:[%s4524_s1 + $0x188] sm:$0xff]   ;;  %v3440_v11 = vld [vmem:[%s4524_s1 + $0x118] sm:$0xff]  }
  0x13   :  { %v2644_v46 = vcombine.high %v31_v44, %v39_v45  ;;  %v2643_v51 = vcombine.low %v31_v44, %v39_v45  ;;  %v47_v56 = vld [vmem:[%s4525_s0 + $0x100] sm:$0xff]  ;;  %v48_v58 = vld [vmem:[%s4525_s0 + $0x108] sm:$0xff]  ;;  %v3441_v12 = vld [vmem:[%s4524_s1 + $0x1d8] sm:$0xff]  }
  0x14   :  { %2892 = vmatpush3.bf16.msra.mxu0 %v3413_v18  ;;  %v55_v57 = vld [vmem:[%s4525_s0 + $0x140] sm:$0xff]  ;;  %v56_v59 = vld [vmem:[%s4525_s0 + $0x148] sm:$0xff]  ;;  %v3442_v13 = vld [vmem:[%s4524_s1 + $0x198] sm:$0xff]  }
  0x15   :  { %2956 = vmatpush3.bf16.msra.mxu1 %v3414_v19  ;;  %2893 = vmatprep.subr.bf16.mxu0 %v3415_v20  ;;  %v2660_v60 = vcombine.high %v47_v56, %v55_v57  ;;  %v2662_v61 = vcombine.high %v48_v58, %v56_v59  ;;  %v2659_v2 = vcombine.low %v47_v56, %v55_v57  ;;  %v63_v3 = vld [vmem:[%s4525_s0 + $0x180] sm:$0xff]  ;;  %v64_v5 = vld [vmem:[%s4525_s0 + $0x188] sm:$0xff]  ;;  %v3452_v39 = vld [vmem:[%s4524_s1 + $0x130] sm:$0xff]  }
  0x16   :  { %2957 = vmatprep.subr.bf16.mxu1 %v3416_v21  ;;  %v71_v4 = vld [vmem:[%s4525_s0 + $0x1c0] sm:$0xff]  ;;  %v2661_v6 = vcombine.low %v48_v58, %v56_v59  ;;  %v72_v8 = vld [vmem:[%s4525_s0 + $0x1c8] sm:$0xff]  ;;  %v3456_v48 = vld [vmem:[%s4524_s1 + $0x138] sm:$0xff]  }
  0x17   :  { %v2676_v7 = vcombine.high %v63_v3, %v71_v4  ;;  %v2678_v9 = vcombine.high %v64_v5, %v72_v8  ;;  %v79_v14 = vld [vmem:[%s4525_s0 + $0x200] sm:$0xff]  ;;  %v80_v16 = vld [vmem:[%s4525_s0 + $0x208] sm:$0xff]  ;;  %v2675_v19 = vcombine.low %v63_v3, %v71_v4  ;;  %v2677_v21 = vcombine.low %v64_v5, %v72_v8  ;;  %v26_v3 = vld [vmem:[%s4525_s0 + $0x58] sm:$0xff] }
  0x18   :  { %2894 = vmatpush3.bf16.msra.mxu0 %v3417_v22  ;;  %v87_v15 = vld [vmem:[%s4525_s0 + $0x240] sm:$0xff]  ;;  %v88_v17 = vld [vmem:[%s4525_s0 + $0x248] sm:$0xff]  ;;  %v33_v8 = vld [vmem:[%s4525_s0 + $0x90] sm:$0xff] }
  0x19   :  { %2958 = vmatpush3.bf16.msra.mxu1 %v3418_v23  ;;  %2895 = vmatprep.subr.bf16.mxu0 %v3419_v24  ;;  %v3443_v18 = vld [vmem:[%s4524_s1 + $0x160] sm:$0xff]   ;;  %v2692_v22 = vcombine.high %v79_v14, %v87_v15  ;;  %v2694_v24 = vcombine.high %v80_v16, %v88_v17  ;;  %v3449_v32 = vld [vmem:[%s4524_s1 + $0x1e8] sm:$0xff]   ;;  %v2691_v34 = vcombine.low %v79_v14, %v87_v15 }
  0x1a   :  { %2959 = vmatprep.subr.bf16.mxu1 %v3420_v25  ;;  %v3444_v20 = vld [vmem:[%s4524_s1 + $0x120] sm:$0xff]   ;;  %v3450_v33 = vld [vmem:[%s4524_s1 + $0x1a8] sm:$0xff]  }
  0x1b   :  { %v3445_v23 = vld [vmem:[%s4524_s1 + $0x1e0] sm:$0xff]   ;;  %v112_v44 = vld [vmem:[%s4525_s0 + $0x308] sm:$0xff] }
  0x1c   :  { %2896 = vmatpush3.bf16.msra.mxu0 %v3421_v26  ;;  %v3446_v25 = vld [vmem:[%s4524_s1 + $0x1a0] sm:$0xff]   ;;  %v120_v45 = vld [vmem:[%s4525_s0 + $0x348] sm:$0xff] }
  0x1d   :  { %2960 = vmatpush3.bf16.msra.mxu1 %v3422_v27  ;;  %2897 = vmatprep.subr.bf16.mxu0 %v3423_v28  ;;  %v95_v26 = vld [vmem:[%s4525_s0 + $0x280] sm:$0xff]  ;;  %v3447_v28 = vld [vmem:[%s4524_s1 + $0x168] sm:$0xff]  }
  0x1e   :  { %2961 = vmatprep.subr.bf16.mxu1 %v3424_v29  ;;  %v103_v27 = vld [vmem:[%s4525_s0 + $0x2c0] sm:$0xff]  ;;  %v96_v29 = vld [vmem:[%s4525_s0 + $0x288] sm:$0xff] }
  0x1f   :  { %v2708_v36 = vcombine.high %v95_v26, %v103_v27  ;;  %v2707_v47 = vcombine.low %v95_v26, %v103_v27  ;;  %v3459_v56 = vld [vmem:[%s4524_s1 + $0x240] sm:$0xff]   ;;  %v128_v57 = vld [vmem:[%s4525_s0 + $0x388] sm:$0xff]  ;;  %v3467_v26 = vld [vmem:[%s4524_s1 + $0x250] sm:$0xff]  }
  0x20   :  { %2898 = vmatpush3.bf16.msra.mxu0 %v3425_v30  ;;  %v104_v30 = vld [vmem:[%s4525_s0 + $0x2c8] sm:$0xff]  ;;  %v3461_v58 = vld [vmem:[%s4524_s1 + $0x2c0] sm:$0xff]   ;;  %v3469_v27 = vld [vmem:[%s4524_s1 + $0x2d0] sm:$0xff]  }
  0x21   :  { %2962 = vmatpush3.bf16.msra.mxu1 %v3426_v31  ;;  %3011 = vmatprep.subr.bf16.mxu0 %v3427_v40  ;;  %v3448_v31 = vld [vmem:[%s4524_s1 + $0x128] sm:$0xff]   ;;  %v2710_v37 = vcombine.high %v96_v29, %v104_v30  ;;  %v3453_v40 = vld [vmem:[%s4524_s1 + $0x1f0] sm:$0xff]   ;;  %v3462_v15 = vld [vmem:[%s4524_s1 + $0x280] sm:$0xff]  }
  0x22   :  { %3075 = vmatprep.subr.bf16.mxu1 %v3429_v42  ;;  %v119_v42 = vld [vmem:[%s4525_s0 + $0x340] sm:$0xff]  ;;  %v136_v59 = vld [vmem:[%s4525_s0 + $0x3c8] sm:$0xff] }
  0x23   :  { %1847 = vmatmul.mubr.bf16.vlgmr.msra.gmra.mrb[0].mxu0 %v2627_v35  ;;  %v2693_v35 = vcombine.low %v80_v16, %v88_v17  ;;  %v2741_v5 = vcombine.low %v128_v57, %v136_v59  ;;  %v3463_v17 = vld [vmem:[%s4524_s1 + $0x248] sm:$0xff]  }
  0x24   :  { %1944 = vmatmul.mubr.bf16.vlgmr.msra.gmra.mrb[0].mxu1 %v2629_v38  ;;  %3012 = vmatpush3.bf16.msra.mxu0 %v3428_v41  ;;  %v3451_v38 = vld [vmem:[%s4524_s1 + $0x170] sm:$0xff]   ;;  %v111_v41 = vld [vmem:[%s4525_s0 + $0x300] sm:$0xff] }
  0x25   :  { %3076 = vmatpush3.bf16.msra.mxu1 %v3430_v43  ;;  %1854 = vmatprep.mubr.bf16.mxu0 %v2644_v46  ;;  %v3454_v43 = vld [vmem:[%s4524_s1 + $0x1b0] sm:$0xff]   ;;  %v3455_v46 = vld [vmem:[%s4524_s1 + $0x178] sm:$0xff]  }
  0x26   :  { %1951 = vmatprep.mubr.bf16.mxu1 %v2646_v49  ;;  %3013 = vmatprep.subr.bf16.mxu0 %v3431_v50  ;;  %v2709_v49 = vcombine.low %v96_v29, %v104_v30  ;;  %v2724_v50 = vcombine.high %v111_v41, %v119_v42 }
  0x27   :  { %3077 = vmatprep.subr.bf16.mxu1 %v3433_v54  ;;  %v127_v54 = vld [vmem:[%s4525_s0 + $0x380] sm:$0xff] }
  0x28   :  { %3014 = vmatpush3.bf16.msra.mxu0 %v3432_v52  ;;  %v2726_v52 = vcombine.high %v112_v44, %v120_v45 }
  0x29   :  { %3078 = vmatpush3.bf16.msra.mxu1 %v3434_v55  ;;  %3015 = vmatprep.subr.bf16.mxu0 %v3435_v62  ;;  %v135_v55 = vld [vmem:[%s4525_s0 + $0x3c0] sm:$0xff] }
  0x2a   :  { %3079 = vmatprep.subr.bf16.mxu1 %v3437_v0  ;;  %v2740_v62 = vcombine.high %v127_v54, %v135_v55  ;;  %v17_v0 = vld [vmem:[%s4525_s0 + $0x10] sm:$0xff]  ;;  %v2739_v4 = vcombine.low %v127_v54, %v135_v55  ;;  %v82_v54 = vld [vmem:[%s4525_s0 + $0x218] sm:$0xff] }
  0x2b   :  { %1855 = vmatmul.mubr.bf16.gmra.mrb[4].mxu0 %v2643_v51  ;;  %v3457_v51 = vld [vmem:[%s4524_s1 + $0x1f8] sm:$0xff]  }
  0x2c   :  { %1952 = vmatmul.mubr.bf16.gmra.mrb[4].mxu1 %v2645_v53  ;;  %1862 = vmatprep.mubr.bf16.mxu0 %v2660_v60  ;;  %v3458_v53 = vld [vmem:[%s4524_s1 + $0x1b8] sm:$0xff]   ;;  %v2723_v60 = vcombine.low %v111_v41, %v119_v42  ;;  %v3475_v42 = vld [vmem:[%s4524_s1 + $0x260] sm:$0xff]  }
  0x2d   :  { %1959 = vmatprep.mubr.bf16.mxu1 %v2662_v61  ;;  %3016 = vmatpush3.bf16.msra.mxu0 %v3436_v63  ;;  %v2725_v61 = vcombine.low %v112_v44, %v120_v45  ;;  %v2742_v63 = vcombine.high %v128_v57, %v136_v59  ;;  %v3474_v41 = vld [vmem:[%s4524_s1 + $0x298] sm:$0xff]   ;;  %v3477_v44 = vld [vmem:[%s4524_s1 + $0x2e0] sm:$0xff]   ;;  %v3482_v57 = vld [vmem:[%s4524_s1 + $0x2a8] sm:$0xff]  }
  0x2e   :  { %3080 = vmatpush3.bf16.msra.mxu1 %v3438_v1  ;;  %3017 = vmatprep.subr.bf16.mxu0 %v3439_v10  ;;  %v25_v1 = vld [vmem:[%s4525_s0 + $0x50] sm:$0xff]  ;;  %v90_v55 = vld [vmem:[%s4525_s0 + $0x258] sm:$0xff] }
  0x2f   :  { %3081 = vmatprep.subr.bf16.mxu1 %v3441_v12  ;;  %v2631_v10 = vcombine.low %v17_v0, %v25_v1  ;;  %v34_v12 = vld [vmem:[%s4525_s0 + $0x98] sm:$0xff] }
  0x31   :  { %3018 = vmatpush3.bf16.msra.mxu0 %v3440_v11  ;;  %v3460_v11 = vld [vmem:[%s4524_s1 + $0x200] sm:$0xff]  }
  0x32   :  { %3082 = vmatpush3.bf16.msra.mxu1 %v3442_v13  ;;  %3019 = vmatprep.subr.bf16.mxu0 %v3443_v18  ;;  %v42_v13 = vld [vmem:[%s4525_s0 + $0xd8] sm:$0xff] }
  0x33   :  { %1863 = vmatmul.mubr.bf16.gmra.mrb[8].mxu0 %v2659_v2  ;;  %3083 = vmatprep.subr.bf16.mxu1 %v3445_v23  ;;  %v18_v2 = vld [vmem:[%s4525_s0 + $0x18] sm:$0xff]  ;;  %v2650_v18 = vcombine.high %v34_v12, %v42_v13  ;;  %v57_v23 = vld [vmem:[%s4525_s0 + $0x150] sm:$0xff]  ;;  %v2649_v29 = vcombine.low %v34_v12, %v42_v13  ;;  %v3493_v12 = vld [vmem:[%s4524_s1 + $0x3c0] sm:$0xff]   ;;  %v2697_v13 = vcombine.low %v82_v54, %v90_v55 }
  0x34   :  { %1960 = vmatmul.mubr.bf16.gmra.mrb[8].mxu1 %v2661_v6  ;;  %1870 = vmatprep.mubr.bf16.mxu0 %v2676_v7  ;;  %v2632_v6 = vcombine.high %v17_v0, %v25_v1  ;;  %v2634_v7 = vcombine.high %v18_v2, %v26_v3  ;;  %v2633_v14 = vcombine.low %v18_v2, %v26_v3  ;;  %v3484_v0 = vld [vmem:[%s4524_s1 + $0x230] sm:$0xff]   ;;  %v3487_v2 = vld [vmem:[%s4524_s1 + $0x278] sm:$0xff]  }
  0x35   :  { %1967 = vmatprep.mubr.bf16.mxu1 %v2678_v9  ;;  %3020 = vmatpush3.bf16.msra.mxu0 %v3444_v20  ;;  %v41_v9 = vld [vmem:[%s4525_s0 + $0xd0] sm:$0xff]  ;;  %v3465_v20 = vld [vmem:[%s4524_s1 + $0x2c8] sm:$0xff]  }
  0x36   :  { %3084 = vmatpush3.bf16.msra.mxu1 %v3446_v25  ;;  %3021 = vmatprep.subr.bf16.mxu0 %v3447_v28  ;;  %v2648_v16 = vcombine.high %v33_v8, %v41_v9  ;;  %v58_v25 = vld [vmem:[%s4525_s0 + $0x158] sm:$0xff]  ;;  %v2647_v28 = vcombine.low %v33_v8, %v41_v9  ;;  %v3486_v1 = vld [vmem:[%s4524_s1 + $0x2b0] sm:$0xff]  }
  0x37   :  { %3085 = vmatprep.subr.bf16.mxu1 %v3449_v32  ;;  %v3468_v32 = vld [vmem:[%s4524_s1 + $0x210] sm:$0xff]   ;;  %v3488_v8 = vld [vmem:[%s4524_s1 + $0x238] sm:$0xff]  }
  0x38   :  { %v97_v3 = vld [vmem:[%s4525_s0 + $0x290] sm:$0xff]  ;;  %v3490_v9 = vld [vmem:[%s4524_s1 + $0x2b8] sm:$0xff]  }
  0x39   :  { %3022 = vmatpush3.bf16.msra.mxu0 %v3448_v31 }
  0x3a   :  { %3086 = vmatpush3.bf16.msra.mxu1 %v3450_v33  ;;  %3023 = vmatprep.subr.bf16.mxu0 %v3451_v38  ;;  %v3470_v33 = vld [vmem:[%s4524_s1 + $0x290] sm:$0xff]   ;;  %v66_v38 = vld [vmem:[%s4525_s0 + $0x198] sm:$0xff] }
  0x3b   :  { %1871 = vmatmul.mubr.bf16.gmra.mrb[12].mxu0 %v2675_v19  ;;  %3087 = vmatprep.subr.bf16.mxu1 %v3453_v40  ;;  %v3464_v19 = vld [vmem:[%s4524_s1 + $0x208] sm:$0xff]   ;;  %v3472_v40 = vld [vmem:[%s4524_s1 + $0x218] sm:$0xff]  }
  0x3c   :  { %1968 = vmatmul.mubr.bf16.gmra.mrb[12].mxu1 %v2677_v21  ;;  %1878 = vmatprep.mubr.bf16.mxu0 %v2692_v22  ;;  %v3466_v21 = vld [vmem:[%s4524_s1 + $0x288] sm:$0xff]   ;;  %v49_v22 = vld [vmem:[%s4525_s0 + $0x110] sm:$0xff] }
  0x3d   :  { %1975 = vmatprep.mubr.bf16.mxu1 %v2694_v24  ;;  %3024 = vmatpush3.bf16.msra.mxu0 %v3452_v39  ;;  %v50_v24 = vld [vmem:[%s4525_s0 + $0x118] sm:$0xff]  ;;  %v2664_v30 = vcombine.high %v49_v22, %v57_v23 }
  0x3e   :  { %3088 = vmatpush3.bf16.msra.mxu1 %v3454_v43  ;;  %3025 = vmatprep.subr.bf16.mxu0 %v3455_v46  ;;  %v2666_v31 = vcombine.high %v50_v24, %v58_v25  ;;  %v74_v39 = vld [vmem:[%s4525_s0 + $0x1d8] sm:$0xff]  ;;  %v2663_v43 = vcombine.low %v49_v22, %v57_v23  ;;  %v2665_v45 = vcombine.low %v50_v24, %v58_v25  ;;  %v129_v24 = vld [vmem:[%s4525_s0 + $0x390] sm:$0xff] }
  0x3f   :  { %3089 = vmatprep.subr.bf16.mxu1 %v3457_v51  ;;  %v81_v51 = vld [vmem:[%s4525_s0 + $0x210] sm:$0xff] }
  0x40   :  { %v137_v25 = vld [vmem:[%s4525_s0 + $0x3d0] sm:$0xff] }
  0x41   :  { %3026 = vmatpush3.bf16.msra.mxu0 %v3456_v48  ;;  %v2682_v48 = vcombine.high %v66_v38, %v74_v39 }
  0x42   :  { %3090 = vmatpush3.bf16.msra.mxu1 %v3458_v53  ;;  %3139 = vmatprep.subr.bf16.mxu0 %v3459_v56  ;;  %v89_v53 = vld [vmem:[%s4525_s0 + $0x250] sm:$0xff]  ;;  %v3480_v56 = vld [vmem:[%s4524_s1 + $0x228] sm:$0xff]  }
  0x43   :  { %1879 = vmatmul.mubr.bf16.gmra.mrb[16].mxu0 %v2691_v34  ;;  %3203 = vmatprep.subr.bf16.mxu1 %v3461_v58  ;;  %v3471_v34 = vld [vmem:[%s4524_s1 + $0x258] sm:$0xff]   ;;  %v3483_v58 = vld [vmem:[%s4524_s1 + $0x270] sm:$0xff]  }
  0x44   :  { %1976 = vmatmul.mubr.bf16.gmra.mrb[16].mxu1 %v2693_v35  ;;  %1886 = vmatprep.mubr.bf16.mxu0 %v2708_v36  ;;  %v65_v35 = vld [vmem:[%s4525_s0 + $0x190] sm:$0xff] }
  0x45   :  { %1983 = vmatprep.mubr.bf16.mxu1 %v2710_v37  ;;  %v73_v36 = vld [vmem:[%s4525_s0 + $0x1d0] sm:$0xff]  ;;  %v3473_v37 = vld [vmem:[%s4524_s1 + $0x2d8] sm:$0xff]  }
  0x46   :  { %v2680_v46 = vcombine.high %v65_v35, %v73_v36  ;;  %v2679_v59 = vcombine.low %v65_v35, %v73_v36  ;;  %v28_v35 = vld [vmem:[%s4525_s0 + $0x68] sm:$0xff]  ;;  %v2743_v36 = vcombine.low %v129_v24, %v137_v25 }
  0x4b   :  { %1887 = vmatmul.mubr.bf16.gmra.mrb[20].mxu0 %v2707_v47  ;;  %v3476_v47 = vld [vmem:[%s4524_s1 + $0x220] sm:$0xff]  }
  0x4c   :  { %1984 = vmatmul.mubr.bf16.gmra.mrb[20].mxu1 %v2709_v49  ;;  %1894 = vmatprep.mubr.bf16.mxu0 %v2724_v50  ;;  %v3478_v49 = vld [vmem:[%s4524_s1 + $0x2a0] sm:$0xff]   ;;  %v3479_v50 = vld [vmem:[%s4524_s1 + $0x268] sm:$0xff]  }
  0x4d   :  { %1991 = vmatprep.mubr.bf16.mxu1 %v2726_v52  ;;  %v3481_v52 = vld [vmem:[%s4524_s1 + $0x2e8] sm:$0xff]  }
  0x53   :  { %1895 = vmatmul.mubr.bf16.gmra.mrb[24].mxu0 %v2723_v60  ;;  %v3485_v60 = vld [vmem:[%s4524_s1 + $0x2f0] sm:$0xff]  }
  0x54   :  { %1992 = vmatmul.mubr.bf16.gmra.mrb[24].mxu1 %v2725_v61  ;;  %1902 = vmatprep.mubr.bf16.mxu0 %v2740_v62  ;;  %v2681_v61 = vcombine.low %v66_v38, %v74_v39  ;;  %v2696_v62 = vcombine.high %v81_v51, %v89_v53 }
  0x55   :  { %1999 = vmatprep.mubr.bf16.mxu1 %v2742_v63  ;;  %v2698_v63 = vcombine.high %v82_v54, %v90_v55  ;;  %v51_v54 = vld [vmem:[%s4525_s0 + $0x120] sm:$0xff] }
  0x56   :  { %v59_v55 = vld [vmem:[%s4525_s0 + $0x160] sm:$0xff] }
  0x5b   :  { %1903 = vmatmul.mubr.bf16.gmra.mrb[28].mxu0 %v2739_v4  ;;  %v105_v4 = vld [vmem:[%s4525_s0 + $0x2d0] sm:$0xff] }
  0x5c   :  { %2000 = vmatmul.mubr.bf16.gmra.mrb[28].mxu1 %v2741_v5  ;;  %2040 = vmatprep.mubr.bf16.mxu0 %v2632_v6  ;;  %v3489_v5 = vld [vmem:[%s4524_s1 + $0x2f8] sm:$0xff]  }
  0x5d   :  { %2137 = vmatprep.mubr.bf16.mxu1 %v2634_v7  ;;  %v98_v6 = vld [vmem:[%s4525_s0 + $0x298] sm:$0xff] }
  0x5e   :  { %v106_v7 = vld [vmem:[%s4525_s0 + $0x2d8] sm:$0xff] }
  0x63   :  { %2041 = vmatmul.mubr.bf16.vlgmr.msra.gmra.mrb[32].mxu0 %v2631_v10  ;;  %v3491_v10 = vld [vmem:[%s4524_s1 + $0x340] sm:$0xff]  }
  0x64   :  { %2138 = vmatmul.mubr.bf16.vlgmr.msra.gmra.mrb[32].mxu1 %v2633_v14  ;;  %3140 = vmatpush3.bf16.msra.mxu0 %v3460_v11  ;;  %v2695_v11 = vcombine.low %v81_v51, %v89_v53  ;;  %v2712_v14 = vcombine.high %v97_v3, %v105_v4  ;;  %v3497_v51 = vld [vmem:[%s4524_s1 + $0x3c8] sm:$0xff]  }
  0x65   :  { %3204 = vmatpush3.bf16.msra.mxu1 %v3462_v15  ;;  %2048 = vmatprep.mubr.bf16.mxu0 %v2648_v16  ;;  %v2714_v15 = vcombine.high %v98_v6, %v106_v7  ;;  %v113_v16 = vld [vmem:[%s4525_s0 + $0x310] sm:$0xff]  ;;  %v3498_v53 = vld [vmem:[%s4524_s1 + $0x388] sm:$0xff]  }
  0x66   :  { %2145 = vmatprep.mubr.bf16.mxu1 %v2650_v18  ;;  %3141 = vmatprep.subr.bf16.mxu0 %v3463_v17  ;;  %v121_v17 = vld [vmem:[%s4525_s0 + $0x350] sm:$0xff]  ;;  %v114_v18 = vld [vmem:[%s4525_s0 + $0x318] sm:$0xff] }
  0x67   :  { %3205 = vmatprep.subr.bf16.mxu1 %v3465_v20  ;;  %v2711_v20 = vcombine.low %v97_v3, %v105_v4  ;;  %v2728_v22 = vcombine.high %v113_v16, %v121_v17  ;;  %v3505_v3 = vld [vmem:[%s4524_s1 + $0x3d8] sm:$0xff]   ;;  %v67_v4 = vld [vmem:[%s4525_s0 + $0x1a0] sm:$0xff] }
  0x68   :  { %3142 = vmatpush3.bf16.msra.mxu0 %v3464_v19  ;;  %v122_v19 = vld [vmem:[%s4525_s0 + $0x358] sm:$0xff] }
  0x69   :  { %3206 = vmatpush3.bf16.msra.mxu1 %v3466_v21  ;;  %3143 = vmatprep.subr.bf16.mxu0 %v3467_v26  ;;  %v2713_v21 = vcombine.low %v98_v6, %v106_v7  ;;  %v2730_v23 = vcombine.high %v114_v18, %v122_v19  ;;  %v130_v26 = vld [vmem:[%s4525_s0 + $0x398] sm:$0xff]  ;;  %v68_v6 = vld [vmem:[%s4525_s0 + $0x1a8] sm:$0xff] }
  0x6a   :  { %3207 = vmatprep.subr.bf16.mxu1 %v3469_v27  ;;  %v138_v27 = vld [vmem:[%s4525_s0 + $0x3d8] sm:$0xff] }
  0x6b   :  { %2049 = vmatmul.mubr.bf16.gmra.mrb[36].mxu0 %v2647_v28  ;;  %v2727_v28 = vcombine.low %v113_v16, %v121_v17  ;;  %v3504_v7 = vld [vmem:[%s4524_s1 + $0x318] sm:$0xff]   ;;  %v3508_v16 = vld [vmem:[%s4524_s1 + $0x320] sm:$0xff]  }
  0x6c   :  { %2146 = vmatmul.mubr.bf16.gmra.mrb[36].mxu1 %v2649_v29  ;;  %2056 = vmatprep.mubr.bf16.mxu0 %v2664_v30  ;;  %v2729_v29 = vcombine.low %v114_v18, %v122_v19  ;;  %v2744_v30 = vcombine.high %v129_v24, %v137_v25  ;;  %v3510_v17 = vld [vmem:[%s4524_s1 + $0x3a0] sm:$0xff]   ;;  %v3511_v18 = vld [vmem:[%s4524_s1 + $0x368] sm:$0xff]  }
  0x6d   :  { %2153 = vmatprep.mubr.bf16.mxu1 %v2666_v31  ;;  %3144 = vmatpush3.bf16.msra.mxu0 %v3468_v32  ;;  %v2746_v31 = vcombine.high %v130_v26, %v138_v27  ;;  %v19_v32 = vld [vmem:[%s4525_s0 + $0x20] sm:$0xff]  ;;  %v3513_v19 = vld [vmem:[%s4524_s1 + $0x3e8] sm:$0xff]  }
  0x6e   :  { %3208 = vmatpush3.bf16.msra.mxu1 %v3470_v33  ;;  %3145 = vmatprep.subr.bf16.mxu0 %v3471_v34  ;;  %v27_v33 = vld [vmem:[%s4525_s0 + $0x60] sm:$0xff]  ;;  %v20_v34 = vld [vmem:[%s4525_s0 + $0x28] sm:$0xff] }
  0x6f   :  { %3209 = vmatprep.subr.bf16.mxu1 %v3473_v37  ;;  %v2745_v37 = vcombine.low %v130_v26, %v138_v27  ;;  %v2636_v38 = vcombine.high %v19_v32, %v27_v33  ;;  %v2638_v39 = vcombine.high %v20_v34, %v28_v35  ;;  %v92_v24 = vld [vmem:[%s4525_s0 + $0x268] sm:$0xff]  ;;  %v3515_v26 = vld [vmem:[%s4524_s1 + $0x370] sm:$0xff]  }
  0x70   :  { %v3514_v25 = vld [vmem:[%s4524_s1 + $0x3a8] sm:$0xff]  }
  0x71   :  { %3146 = vmatpush3.bf16.msra.mxu0 %v3472_v40  ;;  %v35_v40 = vld [vmem:[%s4525_s0 + $0xa0] sm:$0xff] }
  0x72   :  { %3210 = vmatpush3.bf16.msra.mxu1 %v3474_v41  ;;  %3147 = vmatprep.subr.bf16.mxu0 %v3475_v42  ;;  %v43_v41 = vld [vmem:[%s4525_s0 + $0xe0] sm:$0xff]  ;;  %v2635_v42 = vcombine.low %v19_v32, %v27_v33  ;;  %v3516_v32 = vld [vmem:[%s4524_s1 + $0x330] sm:$0xff]  }
  0x73   :  { %2057 = vmatmul.mubr.bf16.gmra.mrb[40].mxu0 %v2663_v43  ;;  %3211 = vmatprep.subr.bf16.mxu1 %v3477_v44  ;;  %v36_v43 = vld [vmem:[%s4525_s0 + $0xa8] sm:$0xff]  ;;  %v3518_v33 = vld [vmem:[%s4524_s1 + $0x3b0] sm:$0xff]  }
  0x74   :  { %2154 = vmatmul.mubr.bf16.gmra.mrb[40].mxu1 %v2665_v45  ;;  %2064 = vmatprep.mubr.bf16.mxu0 %v2680_v46  ;;  %v44_v44 = vld [vmem:[%s4525_s0 + $0xe8] sm:$0xff]  ;;  %v2637_v45 = vcombine.low %v20_v34, %v28_v35  ;;  %v3492_v46 = vld [vmem:[%s4524_s1 + $0x300] sm:$0xff]   ;;  %v3519_v34 = vld [vmem:[%s4524_s1 + $0x378] sm:$0xff]  }
  0x75   :  { %2161 = vmatprep.mubr.bf16.mxu1 %v2682_v48  ;;  %3148 = vmatpush3.bf16.msra.mxu0 %v3476_v47  ;;  %v3494_v47 = vld [vmem:[%s4524_s1 + $0x380] sm:$0xff]   ;;  %v2652_v48 = vcombine.high %v35_v40, %v43_v41  ;;  %v3521_v35 = vld [vmem:[%s4524_s1 + $0x3f8] sm:$0xff]  }
  0x76   :  { %3212 = vmatpush3.bf16.msra.mxu1 %v3478_v49  ;;  %3149 = vmatprep.subr.bf16.mxu0 %v3479_v50  ;;  %v2654_v49 = vcombine.high %v36_v43, %v44_v44  ;;  %v3495_v50 = vld [vmem:[%s4524_s1 + $0x348] sm:$0xff]  }
  0x77   :  { %3213 = vmatprep.subr.bf16.mxu1 %v3481_v52  ;;  %v3496_v52 = vld [vmem:[%s4524_s1 + $0x308] sm:$0xff]  }
  0x79   :  { %3150 = vmatpush3.bf16.msra.mxu0 %v3480_v56  ;;  %v3499_v56 = vld [vmem:[%s4524_s1 + $0x350] sm:$0xff]  }
  0x7a   :  { %3214 = vmatpush3.bf16.msra.mxu1 %v3482_v57  ;;  %3151 = vmatprep.subr.bf16.mxu0 %v3483_v58  ;;  %v52_v57 = vld [vmem:[%s4525_s0 + $0x128] sm:$0xff] }
  0x7b   :  { %2065 = vmatmul.mubr.bf16.gmra.mrb[44].mxu0 %v2679_v59  ;;  %3215 = vmatprep.subr.bf16.mxu1 %v3485_v60  ;;  %v60_v58 = vld [vmem:[%s4525_s0 + $0x168] sm:$0xff]  ;;  %v3501_v59 = vld [vmem:[%s4524_s1 + $0x3d0] sm:$0xff]   ;;  %v2651_v60 = vcombine.low %v35_v40, %v43_v41  ;;  %v3522_v41 = vld [vmem:[%s4524_s1 + $0x3b8] sm:$0xff]  }
  0x7c   :  { %2162 = vmatmul.mubr.bf16.gmra.mrb[44].mxu1 %v2681_v61  ;;  %2072 = vmatprep.mubr.bf16.mxu0 %v2696_v62  ;;  %v2653_v61 = vcombine.low %v36_v43, %v44_v44  ;;  %v2668_v62 = vcombine.high %v51_v54, %v59_v55  ;;  %v108_v40 = vld [vmem:[%s4525_s0 + $0x2e8] sm:$0xff] }
  0x7d   :  { %2169 = vmatprep.mubr.bf16.mxu1 %v2698_v63  ;;  %3152 = vmatpush3.bf16.msra.mxu0 %v3484_v0  ;;  %v2670_v63 = vcombine.high %v52_v57, %v60_v58  ;;  %v3500_v0 = vld [vmem:[%s4524_s1 + $0x310] sm:$0xff]  }
  0x7e   :  { %3216 = vmatpush3.bf16.msra.mxu1 %v3486_v1  ;;  %3153 = vmatprep.subr.bf16.mxu0 %v3487_v2  ;;  %v3502_v1 = vld [vmem:[%s4524_s1 + $0x390] sm:$0xff]   ;;  %v3503_v2 = vld [vmem:[%s4524_s1 + $0x358] sm:$0xff]  }
  0x7f   :  { %3217 = vmatprep.subr.bf16.mxu1 %v3489_v5  ;;  %v75_v5 = vld [vmem:[%s4525_s0 + $0x1e0] sm:$0xff] }
  0x80   :  { %v2683_v27 = vcombine.low %v67_v4, %v75_v5 }
  0x81   :  { %3154 = vmatpush3.bf16.msra.mxu0 %v3488_v8  ;;  %v76_v8 = vld [vmem:[%s4525_s0 + $0x1e8] sm:$0xff] }
  0x82   :  { %3218 = vmatpush3.bf16.msra.mxu1 %v3490_v9  ;;  %3267 = vmatprep.subr.bf16.mxu0 %v3491_v10  ;;  %v3506_v9 = vld [vmem:[%s4524_s1 + $0x398] sm:$0xff]   ;;  %v3507_v10 = vld [vmem:[%s4524_s1 + $0x360] sm:$0xff]  }
  0x83   :  { %2073 = vmatmul.mubr.bf16.gmra.mrb[48].mxu0 %v2695_v11  ;;  %3331 = vmatprep.subr.bf16.mxu1 %v3493_v12  ;;  %v2667_v11 = vcombine.low %v51_v54, %v59_v55  ;;  %v3509_v12 = vld [vmem:[%s4524_s1 + $0x3e0] sm:$0xff]  }
  0x84   :  { %2170 = vmatmul.mubr.bf16.gmra.mrb[48].mxu1 %v2697_v13  ;;  %2080 = vmatprep.mubr.bf16.mxu0 %v2712_v14  ;;  %v2669_v13 = vcombine.low %v52_v57, %v60_v58  ;;  %v2684_v14 = vcombine.high %v67_v4, %v75_v5  ;;  %v131_v54 = vld [vmem:[%s4525_s0 + $0x3a0] sm:$0xff]  ;;  %v140_v57 = vld [vmem:[%s4525_s0 + $0x3e8] sm:$0xff] }
  0x85   :  { %2177 = vmatprep.mubr.bf16.mxu1 %v2714_v15  ;;  %v2686_v15 = vcombine.high %v68_v6, %v76_v8  ;;  %v139_v55 = vld [vmem:[%s4525_s0 + $0x3e0] sm:$0xff] }
  0x8b   :  { %2081 = vmatmul.mubr.bf16.gmra.mrb[52].mxu0 %v2711_v20  ;;  %v83_v20 = vld [vmem:[%s4525_s0 + $0x220] sm:$0xff] }
  0x8c   :  { %2178 = vmatmul.mubr.bf16.gmra.mrb[52].mxu1 %v2713_v21  ;;  %2088 = vmatprep.mubr.bf16.mxu0 %v2728_v22  ;;  %v91_v21 = vld [vmem:[%s4525_s0 + $0x260] sm:$0xff]  ;;  %v84_v22 = vld [vmem:[%s4525_s0 + $0x228] sm:$0xff] }
  0x8d   :  { %2185 = vmatprep.mubr.bf16.mxu1 %v2730_v23  ;;  %v3512_v23 = vld [vmem:[%s4524_s1 + $0x328] sm:$0xff]   ;;  %v2701_v43 = vcombine.low %v84_v22, %v92_v24 }
  0x93   :  { %2089 = vmatmul.mubr.bf16.gmra.mrb[56].mxu0 %v2727_v28  ;;  %v3517_v28 = vld [vmem:[%s4524_s1 + $0x3f0] sm:$0xff]  }
  0x94   :  { %2186 = vmatmul.mubr.bf16.gmra.mrb[56].mxu1 %v2729_v29  ;;  %2096 = vmatprep.mubr.bf16.mxu0 %v2744_v30  ;;  %v2685_v29 = vcombine.low %v68_v6, %v76_v8  ;;  %v2700_v30 = vcombine.high %v83_v20, %v91_v21  ;;  %v37_v6 = vld [vmem:[%s4525_s0 + $0xb0] sm:$0xff]  ;;  %v38_v8 = vld [vmem:[%s4525_s0 + $0xb8] sm:$0xff] }
  0x95   :  { %2193 = vmatprep.mubr.bf16.mxu1 %v2746_v31  ;;  %v2702_v31 = vcombine.high %v84_v22, %v92_v24  ;;  %v69_v22 = vld [vmem:[%s4525_s0 + $0x1b0] sm:$0xff]  ;;  %v70_v24 = vld [vmem:[%s4525_s0 + $0x1b8] sm:$0xff] }
  0x9b   :  { %2097 = vmatmul.mubr.bf16.gmra.mrb[60].mxu0 %v2743_v36  ;;  %v99_v36 = vld [vmem:[%s4525_s0 + $0x2a0] sm:$0xff] }
  0x9c   :  { %2194 = vmatmul.mubr.bf16.gmra.mrb[60].mxu1 %v2745_v37  ;;  %2234 = vmatprep.mubr.bf16.mxu0 %v2636_v38  ;;  %v107_v37 = vld [vmem:[%s4525_s0 + $0x2e0] sm:$0xff]  ;;  %v3520_v38 = vld [vmem:[%s4524_s1 + $0x338] sm:$0xff]  }
  0x9d   :  { %2331 = vmatprep.mubr.bf16.mxu1 %v2638_v39  ;;  %v100_v39 = vld [vmem:[%s4525_s0 + $0x2a8] sm:$0xff]  ;;  %v2716_v44 = vcombine.high %v99_v36, %v107_v37 }
  0xa3   :  { %2235 = vmatmul.mubr.bf16.vlgmr.msra.gmra.mrb[64].mxu0 %v2635_v42  ;;  %v2699_v42 = vcombine.low %v83_v20, %v91_v21 }
  0xa4   :  { %2332 = vmatmul.mubr.bf16.vlgmr.msra.gmra.mrb[64].mxu1 %v2637_v45  ;;  %3268 = vmatpush3.bf16.msra.mxu0 %v3492_v46  ;;  %v2718_v45 = vcombine.high %v100_v39, %v108_v40  ;;  %v115_v46 = vld [vmem:[%s4525_s0 + $0x320] sm:$0xff] }
  0xa5   :  { %3332 = vmatpush3.bf16.msra.mxu1 %v3494_v47  ;;  %2242 = vmatprep.mubr.bf16.mxu0 %v2652_v48  ;;  %v123_v47 = vld [vmem:[%s4525_s0 + $0x360] sm:$0xff]  ;;  %v116_v48 = vld [vmem:[%s4525_s0 + $0x328] sm:$0xff] }
  0xa6   :  { %2339 = vmatprep.mubr.bf16.mxu1 %v2654_v49  ;;  %3269 = vmatprep.subr.bf16.mxu0 %v3495_v50  ;;  %v124_v49 = vld [vmem:[%s4525_s0 + $0x368] sm:$0xff]  ;;  %v2715_v50 = vcombine.low %v99_v36, %v107_v37  ;;  %v2731_v58 = vcombine.low %v115_v46, %v123_v47  ;;  %v4278_v36 = vld [vmem:[%s4526_s2] ss:$0 sm:$0xff] }
  0xa7   :  { %3333 = vmatprep.subr.bf16.mxu1 %v3497_v51  ;;  %v2717_v51 = vcombine.low %v100_v39, %v108_v40 }
  0xa8   :  { %3270 = vmatpush3.bf16.msra.mxu0 %v3496_v52  ;;  %v2732_v52 = vcombine.high %v115_v46, %v123_v47 }
  0xa9   :  { %3334 = vmatpush3.bf16.msra.mxu1 %v3498_v53  ;;  %3271 = vmatprep.subr.bf16.mxu0 %v3499_v56  ;;  %v2734_v53 = vcombine.high %v116_v48, %v124_v49  ;;  %v132_v56 = vld [vmem:[%s4525_s0 + $0x3a8] sm:$0xff] }
  0xaa   :  { %3335 = vmatprep.subr.bf16.mxu1 %v3501_v59  ;;  %v2733_v59 = vcombine.low %v116_v48, %v124_v49 }
  0xab   :  { %2243 = vmatmul.mubr.bf16.gmra.mrb[68].mxu0 %v2651_v60  ;;  %v2748_v60 = vcombine.high %v131_v54, %v139_v55 }
  0xac   :  { %2340 = vmatmul.mubr.bf16.gmra.mrb[68].mxu1 %v2653_v61  ;;  %2250 = vmatprep.mubr.bf16.mxu0 %v2668_v62  ;;  %v2750_v61 = vcombine.high %v132_v56, %v140_v57  ;;  %v21_v62 = vld [vmem:[%s4525_s0 + $0x30] sm:$0xff] }
  0xad   :  { %2347 = vmatprep.mubr.bf16.mxu1 %v2670_v63  ;;  %3272 = vmatpush3.bf16.msra.mxu0 %v3500_v0  ;;  %v29_v63 = vld [vmem:[%s4525_s0 + $0x70] sm:$0xff]  ;;  %v22_v0 = vld [vmem:[%s4525_s0 + $0x38] sm:$0xff] }
  0xae   :  { %3336 = vmatpush3.bf16.msra.mxu1 %v3502_v1  ;;  %3273 = vmatprep.subr.bf16.mxu0 %v3503_v2  ;;  %v30_v1 = vld [vmem:[%s4525_s0 + $0x78] sm:$0xff]  ;;  %v2747_v2 = vcombine.low %v131_v54, %v139_v55  ;;  %v2640_v4 = vcombine.high %v21_v62, %v29_v63  ;;  %v101_v54 = vld [vmem:[%s4525_s0 + $0x2b0] sm:$0xff] }
  0xaf   :  { %3337 = vmatprep.subr.bf16.mxu1 %v3505_v3  ;;  %v2749_v3 = vcombine.low %v132_v56, %v140_v57  ;;  %v2642_v5 = vcombine.high %v22_v0, %v30_v1  ;;  %v109_v55 = vld [vmem:[%s4525_s0 + $0x2f0] sm:$0xff] }
  0xb1   :  { %3274 = vmatpush3.bf16.msra.mxu0 %v3504_v7  ;;  %v45_v7 = vld [vmem:[%s4525_s0 + $0xf0] sm:$0xff] }
  0xb2   :  { %3338 = vmatpush3.bf16.msra.mxu1 %v3506_v9  ;;  %3275 = vmatprep.subr.bf16.mxu0 %v3507_v10  ;;  %v46_v9 = vld [vmem:[%s4525_s0 + $0xf8] sm:$0xff]  ;;  %v2639_v10 = vcombine.low %v21_v62, %v29_v63 }
  0xb3   :  { %2251 = vmatmul.mubr.bf16.gmra.mrb[72].mxu0 %v2667_v11  ;;  %3339 = vmatprep.subr.bf16.mxu1 %v3509_v12  ;;  %v2641_v11 = vcombine.low %v22_v0, %v30_v1  ;;  %v2656_v12 = vcombine.high %v37_v6, %v45_v7 }
  0xb4   :  { %2348 = vmatmul.mubr.bf16.gmra.mrb[72].mxu1 %v2669_v13  ;;  %2258 = vmatprep.mubr.bf16.mxu0 %v2684_v14  ;;  %v2658_v13 = vcombine.high %v38_v8, %v46_v9  ;;  %v53_v14 = vld [vmem:[%s4525_s0 + $0x130] sm:$0xff] }
  0xb5   :  { %2355 = vmatprep.mubr.bf16.mxu1 %v2686_v15  ;;  %3276 = vmatpush3.bf16.msra.mxu0 %v3508_v16  ;;  %v61_v15 = vld [vmem:[%s4525_s0 + $0x170] sm:$0xff]  ;;  %v54_v16 = vld [vmem:[%s4525_s0 + $0x138] sm:$0xff] }
  0xb6   :  { %3340 = vmatpush3.bf16.msra.mxu1 %v3510_v17  ;;  %3277 = vmatprep.subr.bf16.mxu0 %v3511_v18  ;;  %v62_v17 = vld [vmem:[%s4525_s0 + $0x178] sm:$0xff]  ;;  %v2655_v18 = vcombine.low %v37_v6, %v45_v7  ;;  %v2672_v20 = vcombine.high %v53_v14, %v61_v15 }
  0xb7   :  { %3341 = vmatprep.subr.bf16.mxu1 %v3513_v19  ;;  %v2657_v19 = vcombine.low %v38_v8, %v46_v9  ;;  %v2674_v21 = vcombine.high %v54_v16, %v62_v17 }
  0xb9   :  { %3278 = vmatpush3.bf16.msra.mxu0 %v3512_v23  ;;  %v77_v23 = vld [vmem:[%s4525_s0 + $0x1f0] sm:$0xff] }
  0xba   :  { %3342 = vmatpush3.bf16.msra.mxu1 %v3514_v25  ;;  %3279 = vmatprep.subr.bf16.mxu0 %v3515_v26  ;;  %v78_v25 = vld [vmem:[%s4525_s0 + $0x1f8] sm:$0xff]  ;;  %v2671_v26 = vcombine.low %v53_v14, %v61_v15  ;;  %v117_v14 = vld [vmem:[%s4525_s0 + $0x330] sm:$0xff] }
  0xbb   :  { %2259 = vmatmul.mubr.bf16.gmra.mrb[76].mxu0 %v2683_v27  ;;  %3343 = vmatprep.subr.bf16.mxu1 %v3517_v28  ;;  %v2673_v27 = vcombine.low %v54_v16, %v62_v17  ;;  %v2688_v28 = vcombine.high %v69_v22, %v77_v23  ;;  %v125_v15 = vld [vmem:[%s4525_s0 + $0x370] sm:$0xff] }
  0xbc   :  { %2356 = vmatmul.mubr.bf16.gmra.mrb[76].mxu1 %v2685_v29  ;;  %2266 = vmatprep.mubr.bf16.mxu0 %v2700_v30  ;;  %v2690_v29 = vcombine.high %v70_v24, %v78_v25  ;;  %v85_v30 = vld [vmem:[%s4525_s0 + $0x230] sm:$0xff] }
  0xbd   :  { %2363 = vmatprep.mubr.bf16.mxu1 %v2702_v31  ;;  %3280 = vmatpush3.bf16.msra.mxu0 %v3516_v32  ;;  %v93_v31 = vld [vmem:[%s4525_s0 + $0x270] sm:$0xff] }
  0xbe   :  { %3344 = vmatpush3.bf16.msra.mxu1 %v3518_v33  ;;  %3281 = vmatprep.subr.bf16.mxu0 %v3519_v34  ;;  %v86_v33 = vld [vmem:[%s4525_s0 + $0x238] sm:$0xff]  ;;  %v2703_v62 = vcombine.low %v85_v30, %v93_v31 }
  0xbf   :  { %3345 = vmatprep.subr.bf16.mxu1 %v3521_v35  ;;  %v94_v34 = vld [vmem:[%s4525_s0 + $0x278] sm:$0xff] }
  0xc0   :  { %v2706_v47 = vcombine.high %v86_v33, %v94_v34 }
  0xc1   :  { %3282 = vmatpush3.bf16.msra.mxu0 %v3520_v38  ;;  %v2687_v38 = vcombine.low %v69_v22, %v77_v23  ;;  %v2719_v22 = vcombine.low %v101_v54, %v109_v55 }
  0xc2   :  { %3346 = vmatpush3.bf16.msra.mxu1 %v3522_v41 }
  0xc3   :  { %2267 = vmatmul.mubr.bf16.gmra.mrb[80].mxu0 %v2699_v42  ;;  %v2689_v42 = vcombine.low %v70_v24, %v78_v25 }
  0xc4   :  { %2364 = vmatmul.mubr.bf16.gmra.mrb[80].mxu1 %v2701_v43  ;;  %2274 = vmatprep.mubr.bf16.mxu0 %v2716_v44  ;;  %v2704_v43 = vcombine.high %v85_v30, %v93_v31 }
  0xc5   :  { %2371 = vmatprep.mubr.bf16.mxu1 %v2718_v45 }
  0xcb   :  { %2275 = vmatmul.mubr.bf16.gmra.mrb[84].mxu0 %v2715_v50 }
  0xcc   :  { %2372 = vmatmul.mubr.bf16.gmra.mrb[84].mxu1 %v2717_v51  ;;  %2282 = vmatprep.mubr.bf16.mxu0 %v2732_v52 }
  0xcd   :  { %2379 = vmatprep.mubr.bf16.mxu1 %v2734_v53 }
  0xd3   :  { %2283 = vmatmul.mubr.bf16.gmra.mrb[88].mxu0 %v2731_v58  ;;  %v102_v58 = vld [vmem:[%s4525_s0 + $0x2b8] sm:$0xff] }
  0xd4   :  { %2380 = vmatmul.mubr.bf16.gmra.mrb[88].mxu1 %v2733_v59  ;;  %2290 = vmatprep.mubr.bf16.mxu0 %v2748_v60  ;;  %v110_v59 = vld [vmem:[%s4525_s0 + $0x2f8] sm:$0xff] }
  0xd5   :  { %2387 = vmatprep.mubr.bf16.mxu1 %v2750_v61  ;;  %v2722_v7 = vcombine.high %v102_v58, %v110_v59 }
  0xdb   :  { %2291 = vmatmul.mubr.bf16.gmra.mrb[92].mxu0 %v2747_v2  ;;  %v2705_v2 = vcombine.low %v86_v33, %v94_v34 }
  0xdc   :  { %2388 = vmatmul.mubr.bf16.gmra.mrb[92].mxu1 %v2749_v3  ;;  %2428 = vmatprep.mubr.bf16.mxu0 %v2640_v4  ;;  %v2720_v3 = vcombine.high %v101_v54, %v109_v55 }
  0xdd   :  { %2525 = vmatprep.mubr.bf16.mxu1 %v2642_v5 }
  0xe3   :  { %2429 = vmatmul.mubr.bf16.vlgmr.msra.gmra.mrb[96].mxu0 %v2639_v10 }
  0xe4   :  { %2526 = vmatmul.mubr.bf16.vlgmr.msra.gmra.mrb[96].mxu1 %v2641_v11  ;;  %2436 = vmatprep.mubr.bf16.mxu0 %v2656_v12 }
  0xe5   :  { %2533 = vmatprep.mubr.bf16.mxu1 %v2658_v13 }
  0xeb   :  { %2437 = vmatmul.mubr.bf16.gmra.mrb[100].mxu0 %v2655_v18  ;;  %v118_v18 = vld [vmem:[%s4525_s0 + $0x338] sm:$0xff] }
  0xec   :  { %2534 = vmatmul.mubr.bf16.gmra.mrb[100].mxu1 %v2657_v19  ;;  %2444 = vmatprep.mubr.bf16.mxu0 %v2672_v20  ;;  %v126_v19 = vld [vmem:[%s4525_s0 + $0x378] sm:$0xff] }
  0xed   :  { %2541 = vmatprep.mubr.bf16.mxu1 %v2674_v21  ;;  %v2738_v31 = vcombine.high %v118_v18, %v126_v19 }
  0xf3   :  { %2445 = vmatmul.mubr.bf16.gmra.mrb[104].mxu0 %v2671_v26  ;;  %v2721_v26 = vcombine.low %v102_v58, %v110_v59 }
  0xf4   :  { %2542 = vmatmul.mubr.bf16.gmra.mrb[104].mxu1 %v2673_v27  ;;  %2452 = vmatprep.mubr.bf16.mxu0 %v2688_v28  ;;  %v2736_v27 = vcombine.high %v117_v14, %v125_v15 }
  0xf5   :  { %2549 = vmatprep.mubr.bf16.mxu1 %v2690_v29 }
  0xf6   :  { %v2899_v32 = vpop.f32.mrb[0].mxu0 }
  0xf7   :  { %v2963_v35 = vpop.f32.mrb[0].mxu1  ;;  %v2900_v37 = vpop.f32.mrb[1].mxu0 }
  0xf8   :  { %v2901_v39 = vadd.f32 %v2900_v37, %v2899_v32  ;;  %v2964_v40 = vpop.f32.mrb[1].mxu1  ;;  %v2902_v41 = vpop.f32.mrb[2].mxu0 }
  0xf9   :  { %v2965_v44 = vadd.f32 %v2964_v40, %v2963_v35  ;;  %v2966_v45 = vpop.f32.mrb[2].mxu1  ;;  %v2903_v46 = vpop.f32.mrb[3].mxu0  ;;  %v141_v40 = vld [vmem:[%s4525_s0 + $0x3f0] sm:$0xff] }
  0xfa   :  { %v1849_v48 = vadd.f32 %v2901_v39, %v4278_v36  ;;  %v2904_v49 = vadd.f32 %v2903_v46, %v2902_v41  ;;  %v2967_v50 = vpop.f32.mrb[3].mxu1  ;;  %v133_v39 = vld [vmem:[%s4525_s0 + $0x3b0] sm:$0xff] }
  0xfb   :  { %v2968_v51 = vadd.f32 %v2967_v50, %v2966_v45  ;;  %2453 = vmatmul.mubr.bf16.gmra.mrb[108].mxu0 %v2687_v38 }
  0xfc   :  { %v4281_v52 = vadd.f32 %v2965_v44, %v1849_v48  ;;  %v1852_v53 = vadd.f32 %v2904_v49, %v4278_v36  ;;  %2550 = vmatmul.mubr.bf16.gmra.mrb[108].mxu1 %v2689_v42  ;;  %2460 = vmatprep.mubr.bf16.mxu0 %v2704_v43  ;;  %v134_v43 = vld [vmem:[%s4525_s0 + $0x3b8] sm:$0xff] }
  0xfd   :  { %2557 = vmatprep.mubr.bf16.mxu1 %v2706_v47  ;;  %v142_v44 = vld [vmem:[%s4525_s0 + $0x3f8] sm:$0xff]  ;;  %v2735_v47 = vcombine.low %v117_v14, %v125_v15 }
  0xfe   :  { %v4290_v56 = vadd.f32 %v2968_v51, %v1852_v53  ;;  %v2905_v57 = vpop.f32.mrb[4].mxu0  ;;  %v2737_v51 = vcombine.low %v118_v18, %v126_v19  ;;  %v2752_v53 = vcombine.high %v133_v39, %v141_v40  ;;  %v2754_v58 = vcombine.high %v134_v43, %v142_v44 }
  0xff   :  { %v2969_v60 = vpop.f32.mrb[4].mxu1  ;;  %v2906_v61 = vpop.f32.mrb[5].mxu0 }
 0x100   :  { %v2907_v63 = vadd.f32 %v2906_v61, %v2905_v57  ;;  %v2970_v0 = vpop.f32.mrb[5].mxu1  ;;  %v2908_v1 = vpop.f32.mrb[6].mxu0 }
 0x101   :  { %v2971_v4 = vadd.f32 %v2970_v0, %v2969_v60  ;;  %v2972_v5 = vpop.f32.mrb[6].mxu1  ;;  %v2909_v6 = vpop.f32.mrb[7].mxu0 }
 0x102   :  { %v1857_v8 = vadd.f32 %v2907_v63, %v4278_v36  ;;  %v2910_v9 = vadd.f32 %v2909_v6, %v2908_v1  ;;  %v2973_v10 = vpop.f32.mrb[7].mxu1 }
 0x103   :  { %v2974_v11 = vadd.f32 %v2973_v10, %v2972_v5  ;;  %2461 = vmatmul.mubr.bf16.gmra.mrb[112].mxu0 %v2703_v62  ;;  %v2751_v5 = vcombine.low %v133_v39, %v141_v40 }
 0x104   :  { %v4299_v12 = vadd.f32 %v2971_v4, %v1857_v8  ;;  %v1860_v13 = vadd.f32 %v2910_v9, %v4278_v36  ;;  %2558 = vmatmul.mubr.bf16.gmra.mrb[112].mxu1 %v2705_v2  ;;  %2468 = vmatprep.mubr.bf16.mxu0 %v2720_v3  ;;  %v2753_v9 = vcombine.low %v134_v43, %v142_v44 }
 0x105   :  { %2565 = vmatprep.mubr.bf16.mxu1 %v2722_v7 }
 0x106   :  { %v4308_v16 = vadd.f32 %v2974_v11, %v1860_v13  ;;  %v2911_v17 = vpop.f32.mrb[8].mxu0 }
 0x107   :  { %v2975_v20 = vpop.f32.mrb[8].mxu1  ;;  %v2912_v21 = vpop.f32.mrb[9].mxu0 }
 0x108   :  { %v2913_v23 = vadd.f32 %v2912_v21, %v2911_v17  ;;  %v2976_v24 = vpop.f32.mrb[9].mxu1  ;;  %v2914_v25 = vpop.f32.mrb[10].mxu0 }
 0x109   :  { %v2977_v28 = vadd.f32 %v2976_v24, %v2975_v20  ;;  %v2978_v29 = vpop.f32.mrb[10].mxu1  ;;  %v2915_v30 = vpop.f32.mrb[11].mxu0 }
 0x10a   :  { %v1865_v32 = vadd.f32 %v2913_v23, %v4278_v36  ;;  %v2916_v33 = vadd.f32 %v2915_v30, %v2914_v25  ;;  %v2979_v34 = vpop.f32.mrb[11].mxu1 }
 0x10b   :  { %v2980_v35 = vadd.f32 %v2979_v34, %v2978_v29  ;;  %2469 = vmatmul.mubr.bf16.gmra.mrb[116].mxu0 %v2719_v22 }
 0x10c   :  { %v4317_v37 = vadd.f32 %v2977_v28, %v1865_v32  ;;  %v1868_v38 = vadd.f32 %v2916_v33, %v4278_v36  ;;  %2566 = vmatmul.mubr.bf16.gmra.mrb[116].mxu1 %v2721_v26  ;;  %2476 = vmatprep.mubr.bf16.mxu0 %v2736_v27 }
 0x10d   :  { %2573 = vmatprep.mubr.bf16.mxu1 %v2738_v31 }
 0x10e   :  { %v4326_v41 = vadd.f32 %v2980_v35, %v1868_v38  ;;  %v2917_v42 = vpop.f32.mrb[12].mxu0 }
 0x10f   :  { %v2981_v45 = vpop.f32.mrb[12].mxu1  ;;  %v2918_v46 = vpop.f32.mrb[13].mxu0 }
 0x110   :  { %v2919_v48 = vadd.f32 %v2918_v46, %v2917_v42  ;;  %v2982_v49 = vpop.f32.mrb[13].mxu1  ;;  %v2920_v50 = vpop.f32.mrb[14].mxu0 }
 0x111   :  { %v2983_v54 = vadd.f32 %v2982_v49, %v2981_v45  ;;  %v2984_v55 = vpop.f32.mrb[14].mxu1  ;;  %v2921_v57 = vpop.f32.mrb[15].mxu0 }
 0x112   :  { %v1873_v59 = vadd.f32 %v2919_v48, %v4278_v36  ;;  %v2922_v60 = vadd.f32 %v2921_v57, %v2920_v50  ;;  %v2985_v61 = vpop.f32.mrb[15].mxu1 }
 0x113   :  { %v2986_v62 = vadd.f32 %v2985_v61, %v2984_v55  ;;  %2477 = vmatmul.mubr.bf16.gmra.mrb[120].mxu0 %v2735_v47 }
 0x114   :  { %v4335_v63 = vadd.f32 %v2983_v54, %v1873_v59  ;;  %v1876_v0 = vadd.f32 %v2922_v60, %v4278_v36  ;;  %2574 = vmatmul.mubr.bf16.gmra.mrb[120].mxu1 %v2737_v51  ;;  %2484 = vmatprep.mubr.bf16.mxu0 %v2752_v53 }
 0x115   :  { %2581 = vmatprep.mubr.bf16.mxu1 %v2754_v58 }
 0x116   :  { %v4338_v1 = vadd.f32 %v2986_v62, %v1876_v0  ;;  %v2923_v2 = vpop.f32.mrb[16].mxu0 }
 0x117   :  { %v2987_v3 = vpop.f32.mrb[16].mxu1  ;;  %v2924_v4 = vpop.f32.mrb[17].mxu0 }
 0x118   :  { %v2925_v6 = vadd.f32 %v2924_v4, %v2923_v2  ;;  %v2988_v7 = vpop.f32.mrb[17].mxu1  ;;  %v2926_v8 = vpop.f32.mrb[18].mxu0 }
 0x119   :  { %v2989_v10 = vadd.f32 %v2988_v7, %v2987_v3  ;;  %v2990_v11 = vpop.f32.mrb[18].mxu1  ;;  %v2927_v13 = vpop.f32.mrb[19].mxu0 }
 0x11a   :  { %v1881_v14 = vadd.f32 %v2925_v6, %v4278_v36  ;;  %v2928_v15 = vadd.f32 %v2927_v13, %v2926_v8  ;;  %v2991_v17 = vpop.f32.mrb[19].mxu1 }
 0x11b   :  { %v2992_v18 = vadd.f32 %v2991_v17, %v2990_v11  ;;  %2485 = vmatmul.mubr.bf16.gmra.mrb[124].mxu0 %v2751_v5 }
 0x11c   :  { %v4341_v19 = vadd.f32 %v2989_v10, %v1881_v14  ;;  %v1884_v20 = vadd.f32 %v2928_v15, %v4278_v36  ;;  %2582 = vmatmul.mubr.bf16.gmra.mrb[124].mxu1 %v2753_v9 }
 0x11e   :  { %v4344_v21 = vadd.f32 %v2992_v18, %v1884_v20  ;;  %v2929_v22 = vpop.f32.mrb[20].mxu0 }
 0x11f   :  { %v2993_v23 = vpop.f32.mrb[20].mxu1  ;;  %v2930_v24 = vpop.f32.mrb[21].mxu0 }
 0x120   :  { %v2931_v25 = vadd.f32 %v2930_v24, %v2929_v22  ;;  %v2994_v26 = vpop.f32.mrb[21].mxu1  ;;  %v2932_v27 = vpop.f32.mrb[22].mxu0 }
 0x121   :  { %v2995_v28 = vadd.f32 %v2994_v26, %v2993_v23  ;;  %v2996_v29 = vpop.f32.mrb[22].mxu1  ;;  %v2933_v30 = vpop.f32.mrb[23].mxu0 }
 0x122   :  { %v1889_v31 = vadd.f32 %v2931_v25, %v4278_v36  ;;  %v2934_v32 = vadd.f32 %v2933_v30, %v2932_v27  ;;  %v2997_v33 = vpop.f32.mrb[23].mxu1 }
 0x123   :  { %v2998_v34 = vadd.f32 %v2997_v33, %v2996_v29 }
 0x124   :  { %v4347_v35 = vadd.f32 %v2995_v28, %v1889_v31  ;;  %v1892_v38 = vadd.f32 %v2934_v32, %v4278_v36 }
 0x126   :  { %v4350_v39 = vadd.f32 %v2998_v34, %v1892_v38  ;;  %v2935_v40 = vpop.f32.mrb[24].mxu0 }
 0x127   :  { %v2999_v42 = vpop.f32.mrb[24].mxu1  ;;  %v2936_v43 = vpop.f32.mrb[25].mxu0 }
 0x128   :  { %v2937_v44 = vadd.f32 %v2936_v43, %v2935_v40  ;;  %v3000_v45 = vpop.f32.mrb[25].mxu1  ;;  %v2938_v46 = vpop.f32.mrb[26].mxu0 }
 0x129   :  { %v3001_v47 = vadd.f32 %v3000_v45, %v2999_v42  ;;  %v3002_v48 = vpop.f32.mrb[26].mxu1  ;;  %v2939_v49 = vpop.f32.mrb[27].mxu0 }
 0x12a   :  { %v1897_v50 = vadd.f32 %v2937_v44, %v4278_v36  ;;  %v2940_v51 = vadd.f32 %v2939_v49, %v2938_v46  ;;  %v3003_v53 = vpop.f32.mrb[27].mxu1 }
 0x12b   :  { %v3004_v54 = vadd.f32 %v3003_v53, %v3002_v48 }
 0x12c   :  { %v4353_v55 = vadd.f32 %v3001_v47, %v1897_v50  ;;  %v1900_v57 = vadd.f32 %v2940_v51, %v4278_v36 }
 0x12e   :  { %v4356_v58 = vadd.f32 %v3004_v54, %v1900_v57  ;;  %v2941_v59 = vpop.f32.mrb[28].mxu0 }
 0x12f   :  { %v3005_v60 = vpop.f32.mrb[28].mxu1  ;;  %v2942_v61 = vpop.f32.mrb[29].mxu0 }
 0x130   :  { %v2943_v62 = vadd.f32 %v2942_v61, %v2941_v59  ;;  %v3006_v0 = vpop.f32.mrb[29].mxu1  ;;  %v2944_v2 = vpop.f32.mrb[30].mxu0 }
 0x131   :  { %v3007_v3 = vadd.f32 %v3006_v0, %v3005_v60  ;;  %v3008_v4 = vpop.f32.mrb[30].mxu1  ;;  %v2945_v5 = vpop.f32.mrb[31].mxu0 }
 0x132   :  { %v1905_v6 = vadd.f32 %v2943_v62, %v4278_v36  ;;  %v2946_v7 = vadd.f32 %v2945_v5, %v2944_v2  ;;  %v3009_v8 = vpop.f32.mrb[31].mxu1 }
 0x133   :  { %v3010_v9 = vadd.f32 %v3009_v8, %v3008_v4 }
 0x134   :  { %v4359_v10 = vadd.f32 %v3007_v3, %v1905_v6  ;;  %v1908_v11 = vadd.f32 %v2946_v7, %v4278_v36 }
 0x136   :  { %v4362_v13 = vadd.f32 %v3010_v9, %v1908_v11  ;;  %v3027_v14 = vpop.f32.mrb[32].mxu0 }
 0x137   :  { %v3091_v15 = vpop.f32.mrb[32].mxu1  ;;  %v3028_v17 = vpop.f32.mrb[33].mxu0 }
 0x138   :  { %v3029_v18 = vadd.f32 %v3028_v17, %v3027_v14  ;;  %v3092_v20 = vpop.f32.mrb[33].mxu1  ;;  %v3030_v22 = vpop.f32.mrb[34].mxu0 }
 0x139   :  { %v3093_v23 = vadd.f32 %v3092_v20, %v3091_v15  ;;  %v3094_v24 = vpop.f32.mrb[34].mxu1  ;;  %v3031_v25 = vpop.f32.mrb[35].mxu0 }
 0x13a   :  { %v2043_v26 = vadd.f32 %v3029_v18, %v4281_v52  ;;  %v3032_v27 = vadd.f32 %v3031_v25, %v3030_v22  ;;  %v3095_v28 = vpop.f32.mrb[35].mxu1 }
 0x13b   :  { %v3096_v29 = vadd.f32 %v3095_v28, %v3094_v24 }
 0x13c   :  { %v4365_v30 = vadd.f32 %v3093_v23, %v2043_v26  ;;  %v2046_v36 = vadd.f32 %v3032_v27, %v4290_v56 }
 0x13e   :  { %v4368_v31 = vadd.f32 %v3096_v29, %v2046_v36  ;;  %v3033_v32 = vpop.f32.mrb[36].mxu0 }
 0x13f   :  { %v3097_v33 = vpop.f32.mrb[36].mxu1  ;;  %v3034_v34 = vpop.f32.mrb[37].mxu0 }
 0x140   :  { %v3035_v38 = vadd.f32 %v3034_v34, %v3033_v32  ;;  %v3098_v40 = vpop.f32.mrb[37].mxu1  ;;  %v3036_v42 = vpop.f32.mrb[38].mxu0 }
 0x141   :  { %v3099_v43 = vadd.f32 %v3098_v40, %v3097_v33  ;;  %v3100_v44 = vpop.f32.mrb[38].mxu1  ;;  %v3037_v45 = vpop.f32.mrb[39].mxu0 }
 0x142   :  { %v2051_v52 = vadd.f32 %v3035_v38, %v4299_v12  ;;  %v3038_v46 = vadd.f32 %v3037_v45, %v3036_v42  ;;  %v3101_v47 = vpop.f32.mrb[39].mxu1 }
 0x143   :  { %v3102_v48 = vadd.f32 %v3101_v47, %v3100_v44 }
 0x144   :  { %v4371_v49 = vadd.f32 %v3099_v43, %v2051_v52  ;;  %v2054_v56 = vadd.f32 %v3038_v46, %v4308_v16 }
 0x146   :  { %v4374_v50 = vadd.f32 %v3102_v48, %v2054_v56  ;;  %v3039_v51 = vpop.f32.mrb[40].mxu0 }
 0x147   :  { %v3103_v53 = vpop.f32.mrb[40].mxu1  ;;  %v3040_v54 = vpop.f32.mrb[41].mxu0 }
 0x148   :  { %v3041_v57 = vadd.f32 %v3040_v54, %v3039_v51  ;;  %v3104_v59 = vpop.f32.mrb[41].mxu1  ;;  %v3042_v60 = vpop.f32.mrb[42].mxu0 }
 0x149   :  { %v3105_v61 = vadd.f32 %v3104_v59, %v3103_v53  ;;  %v3106_v62 = vpop.f32.mrb[42].mxu1  ;;  %v3043_v0 = vpop.f32.mrb[43].mxu0 }
 0x14a   :  { %v2059_v12 = vadd.f32 %v3041_v57, %v4317_v37  ;;  %v3044_v2 = vadd.f32 %v3043_v0, %v3042_v60  ;;  %v3107_v3 = vpop.f32.mrb[43].mxu1 }
 0x14b   :  { %v3108_v4 = vadd.f32 %v3107_v3, %v3106_v62 }
 0x14c   :  { %v4377_v5 = vadd.f32 %v3105_v61, %v2059_v12  ;;  %v2062_v16 = vadd.f32 %v3044_v2, %v4326_v41 }
 0x14e   :  { %v4380_v6 = vadd.f32 %v3108_v4, %v2062_v16  ;;  %v3045_v7 = vpop.f32.mrb[44].mxu0 }
 0x14f   :  { %v3109_v8 = vpop.f32.mrb[44].mxu1  ;;  %v3046_v9 = vpop.f32.mrb[45].mxu0 }
 0x150   :  { %v3047_v11 = vadd.f32 %v3046_v9, %v3045_v7  ;;  %v3110_v14 = vpop.f32.mrb[45].mxu1  ;;  %v3048_v15 = vpop.f32.mrb[46].mxu0 }
 0x151   :  { %v3111_v17 = vadd.f32 %v3110_v14, %v3109_v8  ;;  %v3112_v18 = vpop.f32.mrb[46].mxu1  ;;  %v3049_v20 = vpop.f32.mrb[47].mxu0 }
 0x152   :  { %v2067_v37 = vadd.f32 %v3047_v11, %v4335_v63  ;;  %v3050_v22 = vadd.f32 %v3049_v20, %v3048_v15  ;;  %v3113_v23 = vpop.f32.mrb[47].mxu1 }
 0x153   :  { %v3114_v24 = vadd.f32 %v3113_v23, %v3112_v18 }
 0x154   :  { %v4383_v25 = vadd.f32 %v3111_v17, %v2067_v37  ;;  %v2070_v41 = vadd.f32 %v3050_v22, %v4338_v1 }
 0x156   :  { %v4386_v26 = vadd.f32 %v3114_v24, %v2070_v41  ;;  %v3051_v27 = vpop.f32.mrb[48].mxu0 }
 0x157   :  { %v3115_v28 = vpop.f32.mrb[48].mxu1  ;;  %v3052_v29 = vpop.f32.mrb[49].mxu0 }
 0x158   :  { %v3053_v36 = vadd.f32 %v3052_v29, %v3051_v27  ;;  %v3116_v32 = vpop.f32.mrb[49].mxu1  ;;  %v3054_v33 = vpop.f32.mrb[50].mxu0 }
 0x159   :  { %v3117_v34 = vadd.f32 %v3116_v32, %v3115_v28  ;;  %v3118_v38 = vpop.f32.mrb[50].mxu1  ;;  %v3055_v40 = vpop.f32.mrb[51].mxu0 }
 0x15a   :  { %v2075_v63 = vadd.f32 %v3053_v36, %v4341_v19  ;;  %v3056_v42 = vadd.f32 %v3055_v40, %v3054_v33  ;;  %v3119_v43 = vpop.f32.mrb[51].mxu1 }
 0x15b   :  { %v3120_v44 = vadd.f32 %v3119_v43, %v3118_v38 }
 0x15c   :  { %v4389_v45 = vadd.f32 %v3117_v34, %v2075_v63  ;;  %v2078_v1 = vadd.f32 %v3056_v42, %v4344_v21 }
 0x15e   :  { %v4392_v52 = vadd.f32 %v3120_v44, %v2078_v1  ;;  %v3057_v46 = vpop.f32.mrb[52].mxu0 }
 0x15f   :  { %v3121_v47 = vpop.f32.mrb[52].mxu1  ;;  %v3058_v48 = vpop.f32.mrb[53].mxu0 }
 0x160   :  { %v3059_v56 = vadd.f32 %v3058_v48, %v3057_v46  ;;  %v3122_v51 = vpop.f32.mrb[53].mxu1  ;;  %v3060_v53 = vpop.f32.mrb[54].mxu0 }
 0x161   :  { %v3123_v54 = vadd.f32 %v3122_v51, %v3121_v47  ;;  %v3124_v57 = vpop.f32.mrb[54].mxu1  ;;  %v3061_v59 = vpop.f32.mrb[55].mxu0 }
 0x162   :  { %v2083_v19 = vadd.f32 %v3059_v56, %v4347_v35  ;;  %v3062_v60 = vadd.f32 %v3061_v59, %v3060_v53  ;;  %v3125_v61 = vpop.f32.mrb[55].mxu1 }
 0x163   :  { %v3126_v62 = vadd.f32 %v3125_v61, %v3124_v57 }
 0x164   :  { %v4395_v0 = vadd.f32 %v3123_v54, %v2083_v19  ;;  %v2086_v21 = vadd.f32 %v3062_v60, %v4350_v39 }
 0x166   :  { %v4398_v12 = vadd.f32 %v3126_v62, %v2086_v21  ;;  %v3063_v2 = vpop.f32.mrb[56].mxu0 }
 0x167   :  { %v3127_v3 = vpop.f32.mrb[56].mxu1  ;;  %v3064_v4 = vpop.f32.mrb[57].mxu0 }
 0x168   :  { %v3065_v16 = vadd.f32 %v3064_v4, %v3063_v2  ;;  %v3128_v7 = vpop.f32.mrb[57].mxu1  ;;  %v3066_v8 = vpop.f32.mrb[58].mxu0 }
 0x169   :  { %v3129_v9 = vadd.f32 %v3128_v7, %v3127_v3  ;;  %v3130_v11 = vpop.f32.mrb[58].mxu1  ;;  %v3067_v14 = vpop.f32.mrb[59].mxu0 }
 0x16a   :  { %v2091_v35 = vadd.f32 %v3065_v16, %v4353_v55  ;;  %v3068_v15 = vadd.f32 %v3067_v14, %v3066_v8  ;;  %v3131_v17 = vpop.f32.mrb[59].mxu1 }
 0x16b   :  { %v3132_v18 = vadd.f32 %v3131_v17, %v3130_v11 }
 0x16c   :  { %v4401_v20 = vadd.f32 %v3129_v9, %v2091_v35  ;;  %v2094_v39 = vadd.f32 %v3068_v15, %v4356_v58 }
 0x16e   :  { %v4404_v37 = vadd.f32 %v3132_v18, %v2094_v39  ;;  %v3069_v22 = vpop.f32.mrb[60].mxu0 }
 0x16f   :  { %v3133_v23 = vpop.f32.mrb[60].mxu1  ;;  %v3070_v24 = vpop.f32.mrb[61].mxu0 }
 0x170   :  { %v3071_v41 = vadd.f32 %v3070_v24, %v3069_v22  ;;  %v3134_v27 = vpop.f32.mrb[61].mxu1  ;;  %v3072_v28 = vpop.f32.mrb[62].mxu0 }
 0x171   :  { %v3135_v29 = vadd.f32 %v3134_v27, %v3133_v23  ;;  %v3136_v36 = vpop.f32.mrb[62].mxu1  ;;  %v3073_v32 = vpop.f32.mrb[63].mxu0 }
 0x172   :  { %v2099_v55 = vadd.f32 %v3071_v41, %v4359_v10  ;;  %v3074_v33 = vadd.f32 %v3073_v32, %v3072_v28  ;;  %v3137_v34 = vpop.f32.mrb[63].mxu1 }
 0x173   :  { %v3138_v38 = vadd.f32 %v3137_v34, %v3136_v36 }
 0x174   :  { %v4407_v40 = vadd.f32 %v3135_v29, %v2099_v55  ;;  %v2102_v58 = vadd.f32 %v3074_v33, %v4362_v13 }
 0x176   :  { %v4410_v63 = vadd.f32 %v3138_v38, %v2102_v58  ;;  %v3155_v42 = vpop.f32.mrb[64].mxu0 }
 0x177   :  { %v3219_v43 = vpop.f32.mrb[64].mxu1  ;;  %v3156_v44 = vpop.f32.mrb[65].mxu0 }
 0x178   :  { %v3157_v1 = vadd.f32 %v3156_v44, %v3155_v42  ;;  %v3220_v46 = vpop.f32.mrb[65].mxu1  ;;  %v3158_v47 = vpop.f32.mrb[66].mxu0 }
 0x179   :  { %v3221_v48 = vadd.f32 %v3220_v46, %v3219_v43  ;;  %v3222_v56 = vpop.f32.mrb[66].mxu1  ;;  %v3159_v51 = vpop.f32.mrb[67].mxu0 }
 0x17a   :  { %v2237_v10 = vadd.f32 %v3157_v1, %v4365_v30  ;;  %v3160_v53 = vadd.f32 %v3159_v51, %v3158_v47  ;;  %v3223_v54 = vpop.f32.mrb[67].mxu1 }
 0x17b   :  { %v3224_v57 = vadd.f32 %v3223_v54, %v3222_v56 }
 0x17c   :  { %v4413_v59 = vadd.f32 %v3221_v48, %v2237_v10  ;;  %v2240_v13 = vadd.f32 %v3160_v53, %v4368_v31 }
 0x17e   :  { %v4416_v19 = vadd.f32 %v3224_v57, %v2240_v13  ;;  %v3161_v60 = vpop.f32.mrb[68].mxu0 }
 0x17f   :  { %v3225_v61 = vpop.f32.mrb[68].mxu1  ;;  %v3162_v62 = vpop.f32.mrb[69].mxu0 }
 0x180   :  { %v3163_v21 = vadd.f32 %v3162_v62, %v3161_v60  ;;  %v3226_v2 = vpop.f32.mrb[69].mxu1  ;;  %v3164_v3 = vpop.f32.mrb[70].mxu0 }
 0x181   :  { %v3227_v4 = vadd.f32 %v3226_v2, %v3225_v61  ;;  %v3228_v16 = vpop.f32.mrb[70].mxu1  ;;  %v3165_v7 = vpop.f32.mrb[71].mxu0 }
 0x182   :  { %v2245_v30 = vadd.f32 %v3163_v21, %v4371_v49  ;;  %v3166_v8 = vadd.f32 %v3165_v7, %v3164_v3  ;;  %v3229_v9 = vpop.f32.mrb[71].mxu1 }
 0x183   :  { %v3230_v11 = vadd.f32 %v3229_v9, %v3228_v16 }
 0x184   :  { %v4419_v14 = vadd.f32 %v3227_v4, %v2245_v30  ;;  %v2248_v31 = vadd.f32 %v3166_v8, %v4374_v50 }
 0x186   :  { %v4422_v35 = vadd.f32 %v3230_v11, %v2248_v31  ;;  %v3167_v15 = vpop.f32.mrb[72].mxu0 }
 0x187   :  { %v3231_v17 = vpop.f32.mrb[72].mxu1  ;;  %v3168_v18 = vpop.f32.mrb[73].mxu0 }
 0x188   :  { %v3169_v39 = vadd.f32 %v3168_v18, %v3167_v15  ;;  %v3232_v22 = vpop.f32.mrb[73].mxu1  ;;  %v3170_v23 = vpop.f32.mrb[74].mxu0 }
 0x189   :  { %v3233_v24 = vadd.f32 %v3232_v22, %v3231_v17  ;;  %v3234_v41 = vpop.f32.mrb[74].mxu1  ;;  %v3171_v27 = vpop.f32.mrb[75].mxu0 }
 0x18a   :  { %v2253_v49 = vadd.f32 %v3169_v39, %v4377_v5  ;;  %v3172_v28 = vadd.f32 %v3171_v27, %v3170_v23  ;;  %v3235_v29 = vpop.f32.mrb[75].mxu1 }
 0x18b   :  { %v3236_v36 = vadd.f32 %v3235_v29, %v3234_v41 }
 0x18c   :  { %v4425_v32 = vadd.f32 %v3233_v24, %v2253_v49  ;;  %v2256_v50 = vadd.f32 %v3172_v28, %v4380_v6 }
 0x18e   :  { %v4428_v55 = vadd.f32 %v3236_v36, %v2256_v50  ;;  %v3173_v33 = vpop.f32.mrb[76].mxu0 }
 0x18f   :  { %v3237_v34 = vpop.f32.mrb[76].mxu1  ;;  %v3174_v38 = vpop.f32.mrb[77].mxu0 }
 0x190   :  { %v3175_v58 = vadd.f32 %v3174_v38, %v3173_v33  ;;  %v3238_v42 = vpop.f32.mrb[77].mxu1  ;;  %v3176_v43 = vpop.f32.mrb[78].mxu0 }
 0x191   :  { %v3239_v44 = vadd.f32 %v3238_v42, %v3237_v34  ;;  %v3240_v1 = vpop.f32.mrb[78].mxu1  ;;  %v3177_v46 = vpop.f32.mrb[79].mxu0 }
 0x192   :  { %v2261_v5 = vadd.f32 %v3175_v58, %v4383_v25  ;;  %v3178_v47 = vadd.f32 %v3177_v46, %v3176_v43  ;;  %v3241_v48 = vpop.f32.mrb[79].mxu1 }
 0x193   :  { %v3242_v56 = vadd.f32 %v3241_v48, %v3240_v1 }
 0x194   :  { %v4431_v51 = vadd.f32 %v3239_v44, %v2261_v5  ;;  %v2264_v6 = vadd.f32 %v3178_v47, %v4386_v26 }
 0x196   :  { %v4434_v10 = vadd.f32 %v3242_v56, %v2264_v6  ;;  %v3179_v53 = vpop.f32.mrb[80].mxu0 }
 0x197   :  { %v3243_v54 = vpop.f32.mrb[80].mxu1  ;;  %v3180_v57 = vpop.f32.mrb[81].mxu0 }
 0x198   :  { %v3181_v13 = vadd.f32 %v3180_v57, %v3179_v53  ;;  %v3244_v60 = vpop.f32.mrb[81].mxu1  ;;  %v3182_v61 = vpop.f32.mrb[82].mxu0 }
 0x199   :  { %v3245_v62 = vadd.f32 %v3244_v60, %v3243_v54  ;;  %v3246_v21 = vpop.f32.mrb[82].mxu1  ;;  %v3183_v2 = vpop.f32.mrb[83].mxu0 }
 0x19a   :  { %v2269_v25 = vadd.f32 %v3181_v13, %v4389_v45  ;;  %v3184_v3 = vadd.f32 %v3183_v2, %v3182_v61  ;;  %v3247_v4 = vpop.f32.mrb[83].mxu1 }
 0x19b   :  { %v3248_v16 = vadd.f32 %v3247_v4, %v3246_v21 }
 0x19c   :  { %v4437_v7 = vadd.f32 %v3245_v62, %v2269_v25  ;;  %v2272_v26 = vadd.f32 %v3184_v3, %v4392_v52 }
 0x19e   :  { %v4440_v30 = vadd.f32 %v3248_v16, %v2272_v26  ;;  %v3185_v8 = vpop.f32.mrb[84].mxu0 }
 0x19f   :  { %v3249_v9 = vpop.f32.mrb[84].mxu1  ;;  %v3186_v11 = vpop.f32.mrb[85].mxu0 }
 0x1a0   :  { %v3187_v31 = vadd.f32 %v3186_v11, %v3185_v8  ;;  %v3250_v15 = vpop.f32.mrb[85].mxu1  ;;  %v3188_v17 = vpop.f32.mrb[86].mxu0 }
 0x1a1   :  { %v3251_v18 = vadd.f32 %v3250_v15, %v3249_v9  ;;  %v3252_v39 = vpop.f32.mrb[86].mxu1  ;;  %v3189_v22 = vpop.f32.mrb[87].mxu0 }
 0x1a2   :  { %v2277_v45 = vadd.f32 %v3187_v31, %v4395_v0  ;;  %v3190_v23 = vadd.f32 %v3189_v22, %v3188_v17  ;;  %v3253_v24 = vpop.f32.mrb[87].mxu1 }
 0x1a3   :  { %v3254_v41 = vadd.f32 %v3253_v24, %v3252_v39 }
 0x1a4   :  { %v4443_v27 = vadd.f32 %v3251_v18, %v2277_v45  ;;  %v2280_v52 = vadd.f32 %v3190_v23, %v4398_v12 }
 0x1a6   :  { %v4446_v49 = vadd.f32 %v3254_v41, %v2280_v52  ;;  %v3191_v28 = vpop.f32.mrb[88].mxu0 }
 0x1a7   :  { %v3255_v29 = vpop.f32.mrb[88].mxu1  ;;  %v3192_v36 = vpop.f32.mrb[89].mxu0 }
 0x1a8   :  { %v3193_v50 = vadd.f32 %v3192_v36, %v3191_v28  ;;  %v3256_v33 = vpop.f32.mrb[89].mxu1  ;;  %v3194_v34 = vpop.f32.mrb[90].mxu0 }
 0x1a9   :  { %v3257_v38 = vadd.f32 %v3256_v33, %v3255_v29  ;;  %v3258_v58 = vpop.f32.mrb[90].mxu1  ;;  %v3195_v42 = vpop.f32.mrb[91].mxu0 }
 0x1aa   :  { %v2285_v0 = vadd.f32 %v3193_v50, %v4401_v20  ;;  %v3196_v43 = vadd.f32 %v3195_v42, %v3194_v34  ;;  %v3259_v44 = vpop.f32.mrb[91].mxu1 }
 0x1ab   :  { %v3260_v1 = vadd.f32 %v3259_v44, %v3258_v58 }
 0x1ac   :  { %v4449_v46 = vadd.f32 %v3257_v38, %v2285_v0  ;;  %v2288_v12 = vadd.f32 %v3196_v43, %v4404_v37 }
 0x1ae   :  { %v4452_v5 = vadd.f32 %v3260_v1, %v2288_v12  ;;  %v3197_v47 = vpop.f32.mrb[92].mxu0 }
 0x1af   :  { %v3261_v48 = vpop.f32.mrb[92].mxu1  ;;  %v3198_v56 = vpop.f32.mrb[93].mxu0 }
 0x1b0   :  { %v3199_v6 = vadd.f32 %v3198_v56, %v3197_v47  ;;  %v3262_v53 = vpop.f32.mrb[93].mxu1  ;;  %v3200_v54 = vpop.f32.mrb[94].mxu0 }
 0x1b1   :  { %v3263_v57 = vadd.f32 %v3262_v53, %v3261_v48  ;;  %v3264_v13 = vpop.f32.mrb[94].mxu1  ;;  %v3201_v60 = vpop.f32.mrb[95].mxu0 }
 0x1b2   :  { %v2293_v20 = vadd.f32 %v3199_v6, %v4407_v40  ;;  %v3202_v61 = vadd.f32 %v3201_v60, %v3200_v54  ;;  %v3265_v62 = vpop.f32.mrb[95].mxu1 }
 0x1b3   :  { %v3266_v21 = vadd.f32 %v3265_v62, %v3264_v13 }
 0x1b4   :  { %v4455_v2 = vadd.f32 %v3263_v57, %v2293_v20  ;;  %v2296_v37 = vadd.f32 %v3202_v61, %v4410_v63 }
 0x1b6   :  { %v4458_v25 = vadd.f32 %v3266_v21, %v2296_v37  ;;  %v3283_v3 = vpop.f32.mrb[96].mxu0 }
 0x1b7   :  { %v3347_v4 = vpop.f32.mrb[96].mxu1  ;;  %v3284_v16 = vpop.f32.mrb[97].mxu0 }
 0x1b8   :  { %v3285_v26 = vadd.f32 %v3284_v16, %v3283_v3  ;;  %v3348_v8 = vpop.f32.mrb[97].mxu1  ;;  %v3286_v9 = vpop.f32.mrb[98].mxu0 }
 0x1b9   :  { %v3349_v11 = vadd.f32 %v3348_v8, %v3347_v4  ;;  %v3350_v31 = vpop.f32.mrb[98].mxu1  ;;  %v3287_v15 = vpop.f32.mrb[99].mxu0 }
 0x1ba   :  { %v2431_v40 = vadd.f32 %v3285_v26, %v4413_v59  ;;  %v3288_v17 = vadd.f32 %v3287_v15, %v3286_v9  ;;  %v3351_v18 = vpop.f32.mrb[99].mxu1 }
 0x1bb   :  { %v3352_v39 = vadd.f32 %v3351_v18, %v3350_v31 }
 0x1bc   :  { %v2528_v22 = vadd.f32 %v3349_v11, %v2431_v40  ;;  %v2434_v45 = vadd.f32 %v3288_v17, %v4416_v19 }
 0x1be   :  { %v2590_v63 = vmax.f32 %v2528_v22, 0.0  ;;  %v2531_v23 = vadd.f32 %v3352_v39, %v2434_v45  ;;  %v3289_v24 = vpop.f32.mrb[100].mxu0 }
 0x1bf   :  { %v3353_v41 = vpop.f32.mrb[100].mxu1  ;;  %v3290_v52 = vpop.f32.mrb[101].mxu0 }
 0x1c0   :  { %2606 = vst [vmem:[%s4527_s3] sm:$0xff] %v2590_v63  ;;  %v2591_v28 = vmax.f32 %v2531_v23, 0.0  ;;  %v3291_v29 = vadd.f32 %v3290_v52, %v3289_v24  ;;  %v3354_v36 = vpop.f32.mrb[101].mxu1  ;;  %v3292_v50 = vpop.f32.mrb[102].mxu0 }
 0x1c1   :  { %v3355_v59 = vadd.f32 %v3354_v36, %v3353_v41  ;;  %v3356_v33 = vpop.f32.mrb[102].mxu1  ;;  %v3293_v34 = vpop.f32.mrb[103].mxu0 }
 0x1c2   :  { %2607 = vst [vmem:[%s4527_s3 + $0x8] sm:$0xff] %v2591_v28  ;;  %v2439_v19 = vadd.f32 %v3291_v29, %v4419_v14  ;;  %v3294_v38 = vadd.f32 %v3293_v34, %v3292_v50  ;;  %v3357_v58 = vpop.f32.mrb[103].mxu1 }
 0x1c3   :  { %v3358_v42 = vadd.f32 %v3357_v58, %v3356_v33 }
 0x1c4   :  { %v2536_v0 = vadd.f32 %v3355_v59, %v2439_v19  ;;  %v2442_v43 = vadd.f32 %v3294_v38, %v4422_v35 }
 0x1c6   :  { %v2592_v44 = vmax.f32 %v2536_v0, 0.0  ;;  %v2539_v1 = vadd.f32 %v3358_v42, %v2442_v43  ;;  %v3295_v12 = vpop.f32.mrb[104].mxu0 }
 0x1c7   :  { %v3359_v47 = vpop.f32.mrb[104].mxu1  ;;  %v3296_v48 = vpop.f32.mrb[105].mxu0 }
 0x1c8   :  { %2608 = vst [vmem:[%s4527_s3 + $0x10] sm:$0xff] %v2592_v44  ;;  %v2593_v56 = vmax.f32 %v2539_v1, 0.0  ;;  %v3297_v6 = vadd.f32 %v3296_v48, %v3295_v12  ;;  %v3360_v53 = vpop.f32.mrb[105].mxu1  ;;  %v3298_v54 = vpop.f32.mrb[106].mxu0 }
 0x1c9   :  { %v3361_v14 = vadd.f32 %v3360_v53, %v3359_v47  ;;  %v3362_v57 = vpop.f32.mrb[106].mxu1  ;;  %v3299_v13 = vpop.f32.mrb[107].mxu0 }
 0x1ca   :  { %2609 = vst [vmem:[%s4527_s3 + $0x18] sm:$0xff] %v2593_v56  ;;  %v2447_v35 = vadd.f32 %v3297_v6, %v4425_v32  ;;  %v3300_v60 = vadd.f32 %v3299_v13, %v3298_v54  ;;  %v3363_v20 = vpop.f32.mrb[107].mxu1 }
 0x1cb   :  { %v3364_v61 = vadd.f32 %v3363_v20, %v3362_v57 }
 0x1cc   :  { %v2544_v62 = vadd.f32 %v3361_v14, %v2447_v35  ;;  %v2450_v21 = vadd.f32 %v3300_v60, %v4428_v55 }
 0x1ce   :  { %v2594_v37 = vmax.f32 %v2544_v62, 0.0  ;;  %v2547_v3 = vadd.f32 %v3364_v61, %v2450_v21  ;;  %v3301_v4 = vpop.f32.mrb[108].mxu0 }
 0x1cf   :  { %v3365_v16 = vpop.f32.mrb[108].mxu1  ;;  %v3302_v26 = vpop.f32.mrb[109].mxu0 }
 0x1d0   :  { %2610 = vst [vmem:[%s4527_s3 + $0x20] sm:$0xff] %v2594_v37  ;;  %v2595_v8 = vmax.f32 %v2547_v3, 0.0  ;;  %v3303_v9 = vadd.f32 %v3302_v26, %v3301_v4  ;;  %v3366_v11 = vpop.f32.mrb[109].mxu1  ;;  %v3304_v31 = vpop.f32.mrb[110].mxu0 }
 0x1d1   :  { %v3367_v32 = vadd.f32 %v3366_v11, %v3365_v16  ;;  %v3368_v15 = vpop.f32.mrb[110].mxu1  ;;  %v3305_v40 = vpop.f32.mrb[111].mxu0 }
 0x1d2   :  { %2611 = vst [vmem:[%s4527_s3 + $0x28] sm:$0xff] %v2595_v8  ;;  %v2455_v55 = vadd.f32 %v3303_v9, %v4431_v51  ;;  %v3306_v17 = vadd.f32 %v3305_v40, %v3304_v31  ;;  %v3369_v18 = vpop.f32.mrb[111].mxu1 }
 0x1d3   :  { %v3370_v39 = vadd.f32 %v3369_v18, %v3368_v15 }
 0x1d4   :  { %v2552_v22 = vadd.f32 %v3367_v32, %v2455_v55  ;;  %v2458_v45 = vadd.f32 %v3306_v17, %v4434_v10 }
 0x1d6   :  { %v2596_v63 = vmax.f32 %v2552_v22, 0.0  ;;  %v2555_v23 = vadd.f32 %v3370_v39, %v2458_v45  ;;  %v3307_v24 = vpop.f32.mrb[112].mxu0 }
 0x1d7   :  { %v3371_v41 = vpop.f32.mrb[112].mxu1  ;;  %v3308_v52 = vpop.f32.mrb[113].mxu0 }
 0x1d8   :  { %2612 = vst [vmem:[%s4527_s3 + $0x30] sm:$0xff] %v2596_v63  ;;  %v2597_v28 = vmax.f32 %v2555_v23, 0.0  ;;  %v3309_v29 = vadd.f32 %v3308_v52, %v3307_v24  ;;  %v3372_v36 = vpop.f32.mrb[113].mxu1  ;;  %v3310_v50 = vpop.f32.mrb[114].mxu0 }
 0x1d9   :  { %v3373_v51 = vadd.f32 %v3372_v36, %v3371_v41  ;;  %v3374_v59 = vpop.f32.mrb[114].mxu1  ;;  %v3311_v33 = vpop.f32.mrb[115].mxu0 }
 0x1da   :  { %2613 = vst [vmem:[%s4527_s3 + $0x38] sm:$0xff] %v2597_v28  ;;  %v2463_v10 = vadd.f32 %v3309_v29, %v4437_v7  ;;  %v3312_v34 = vadd.f32 %v3311_v33, %v3310_v50  ;;  %v3375_v19 = vpop.f32.mrb[115].mxu1 }
 0x1db   :  { %v3376_v38 = vadd.f32 %v3375_v19, %v3374_v59 }
 0x1dc   :  { %v2560_v58 = vadd.f32 %v3373_v51, %v2463_v10  ;;  %v2466_v42 = vadd.f32 %v3312_v34, %v4440_v30 }
 0x1de   :  { %v2598_v0 = vmax.f32 %v2560_v58, 0.0  ;;  %v2563_v43 = vadd.f32 %v3376_v38, %v2466_v42  ;;  %v3313_v44 = vpop.f32.mrb[116].mxu0 }
 0x1df   :  { %v3377_v1 = vpop.f32.mrb[116].mxu1  ;;  %v3314_v12 = vpop.f32.mrb[117].mxu0 }
 0x1e0   :  { %2614 = vst [vmem:[%s4527_s3 + $0x40] sm:$0xff] %v2598_v0  ;;  %v2599_v47 = vmax.f32 %v2563_v43, 0.0  ;;  %v3315_v48 = vadd.f32 %v3314_v12, %v3313_v44  ;;  %v3378_v56 = vpop.f32.mrb[117].mxu1  ;;  %v3316_v6 = vpop.f32.mrb[118].mxu0 }
 0x1e1   :  { %v3379_v7 = vadd.f32 %v3378_v56, %v3377_v1  ;;  %v3380_v53 = vpop.f32.mrb[118].mxu1  ;;  %v3317_v54 = vpop.f32.mrb[119].mxu0 }
 0x1e2   :  { %2615 = vst [vmem:[%s4527_s3 + $0x48] sm:$0xff] %v2599_v47  ;;  %v2471_v30 = vadd.f32 %v3315_v48, %v4443_v27  ;;  %v3318_v14 = vadd.f32 %v3317_v54, %v3316_v6  ;;  %v3381_v57 = vpop.f32.mrb[119].mxu1 }
 0x1e3   :  { %v3382_v13 = vadd.f32 %v3381_v57, %v3380_v53 }
 0x1e4   :  { %v2568_v35 = vadd.f32 %v3379_v7, %v2471_v30  ;;  %v2474_v60 = vadd.f32 %v3318_v14, %v4446_v49 }
 0x1e6   :  { %v2600_v20 = vmax.f32 %v2568_v35, 0.0  ;;  %v2571_v61 = vadd.f32 %v3382_v13, %v2474_v60  ;;  %v3319_v62 = vpop.f32.mrb[120].mxu0 }
 0x1e7   :  { %v3383_v21 = vpop.f32.mrb[120].mxu1  ;;  %v3320_v37 = vpop.f32.mrb[121].mxu0 }
 0x1e8   :  { %2616 = vst [vmem:[%s4527_s3 + $0x50] sm:$0xff] %v2600_v20  ;;  %v2601_v3 = vmax.f32 %v2571_v61, 0.0  ;;  %v3321_v4 = vadd.f32 %v3320_v37, %v3319_v62  ;;  %v3384_v16 = vpop.f32.mrb[121].mxu1  ;;  %v3322_v26 = vpop.f32.mrb[122].mxu0 }
 0x1e9   :  { %v3385_v27 = vadd.f32 %v3384_v16, %v3383_v21  ;;  %v3386_v8 = vpop.f32.mrb[122].mxu1  ;;  %v3323_v9 = vpop.f32.mrb[123].mxu0 }
 0x1ea   :  { %2617 = vst [vmem:[%s4527_s3 + $0x58] sm:$0xff] %v2601_v3  ;;  %v2479_v49 = vadd.f32 %v3321_v4, %v4449_v46  ;;  %v3324_v11 = vadd.f32 %v3323_v9, %v3322_v26  ;;  %v3387_v31 = vpop.f32.mrb[123].mxu1 }
 0x1eb   :  { %v3388_v32 = vadd.f32 %v3387_v31, %v3386_v8 }
 0x1ec   :  { %v2576_v15 = vadd.f32 %v3385_v27, %v2479_v49  ;;  %v2482_v40 = vadd.f32 %v3324_v11, %v4452_v5 }
 0x1ee   :  { %v2602_v55 = vmax.f32 %v2576_v15, 0.0  ;;  %v2579_v17 = vadd.f32 %v3388_v32, %v2482_v40  ;;  %v3325_v18 = vpop.f32.mrb[124].mxu0 }
 0x1ef   :  { %v3389_v39 = vpop.f32.mrb[124].mxu1  ;;  %v3326_v22 = vpop.f32.mrb[125].mxu0 }
 0x1f0   :  { %2618 = vst [vmem:[%s4527_s3 + $0x60] sm:$0xff] %v2602_v55  ;;  %v2603_v45 = vmax.f32 %v2579_v17, 0.0  ;;  %v3327_v63 = vadd.f32 %v3326_v22, %v3325_v18  ;;  %v3390_v23 = vpop.f32.mrb[125].mxu1  ;;  %v3328_v24 = vpop.f32.mrb[126].mxu0 }
 0x1f1   :  { %v3391_v46 = vadd.f32 %v3390_v23, %v3389_v39  ;;  %v3392_v41 = vpop.f32.mrb[126].mxu1  ;;  %v3329_v52 = vpop.f32.mrb[127].mxu0 }
 0x1f2   :  { %2619 = vst [vmem:[%s4527_s3 + $0x68] sm:$0xff] %v2603_v45  ;;  %v2487_v5 = vadd.f32 %v3327_v63, %v4455_v2  ;;  %v3330_v28 = vadd.f32 %v3329_v52, %v3328_v24  ;;  %v3393_v29 = vpop.f32.mrb[127].mxu1 }
 0x1f3   :  { %v3394_v36 = vadd.f32 %v3393_v29, %v3392_v41 }
 0x1f4   :  { %v2584_v50 = vadd.f32 %v3391_v46, %v2487_v5  ;;  %v2490_v51 = vadd.f32 %v3330_v28, %v4458_v25 }
 0x1f6   :  { %v2604_v59 = vmax.f32 %v2584_v50, 0.0  ;;  %v2587_v33 = vadd.f32 %v3394_v36, %v2490_v51 }
 0x1f8   :  { %2620 = vst [vmem:[%s4527_s3 + $0x70] sm:$0xff] %v2604_v59  ;;  %v2605_v10 = vmax.f32 %v2587_v33, 0.0 }
 0x1fa   :  { %2621 = vst [vmem:[%s4527_s3 + $0x78] sm:$0xff] %v2605_v10 }

// kernel: simple_conv64_forward.8
= control target key start
LH: loop header
LB: loop body
LE: loop exit
PB: predicated region body
PF: predicated region fallthrough
CT: control target
= control target key end

     0   :  { %s1683_s1 = inlined_call_operand.vmem [shape: bf16[1024,128], index: 1, kind: input, shape index: {}]   ;;  %s1684_s0 = inlined_call_operand.vmem [shape: bf16[64,1024], index: 0, kind: input, shape index: {}]   ;;  %s1685_s2 = inlined_call_operand.vmem [shape: f32[1,128], index: 2, kind: input, shape index: {}]   ;;  %s1686_s3 = inlined_call_operand.vmem [shape: f32[64,128], index: 3, kind: output, shape index: {}]  }
   0x1   :  { %v1263_v0 = vld [vmem:[%s1683_s1 + $0x40] sm:$0xff]   ;;  %v1267_v4 = vld [vmem:[%s1683_s1 + $0x48] sm:$0xff]   ;;  %v1271_v8 = vld [vmem:[%s1683_s1 + $0x50] sm:$0xff]  }
   0x2   :  { %v1264_v1 = vld [vmem:[%s1683_s1 + $0xc0] sm:$0xff]   ;;  %1103 = vmatprep.subr.bf16.mxu0 %v1263_v0  ;;  %v1268_v5 = vld [vmem:[%s1683_s1 + $0xc8] sm:$0xff]   ;;  %v1272_v9 = vld [vmem:[%s1683_s1 + $0xd0] sm:$0xff]  }
   0x3   :  { %v1265_v2 = vld [vmem:[%s1683_s1] sm:$0xff]   ;;  %1143 = vmatprep.subr.bf16.mxu1 %v1264_v1  ;;  %v1269_v6 = vld [vmem:[%s1683_s1 + $0x8] sm:$0xff]   ;;  %v1273_v10 = vld [vmem:[%s1683_s1 + $0x10] sm:$0xff]  }
   0x4   :  { %v1266_v3 = vld [vmem:[%s1683_s1 + $0x80] sm:$0xff]   ;;  %1104 = vmatpush3.bf16.msra.mxu0 %v1265_v2  ;;  %v1270_v7 = vld [vmem:[%s1683_s1 + $0x88] sm:$0xff]   ;;  %v1274_v11 = vld [vmem:[%s1683_s1 + $0x90] sm:$0xff]  }
   0x5   :  { %1144 = vmatpush3.bf16.msra.mxu1 %v1266_v3  ;;  %1105 = vmatprep.subr.bf16.mxu0 %v1267_v4  ;;  %v1275_v12 = vld [vmem:[%s1683_s1 + $0x58] sm:$0xff]   ;;  %v1279_v16 = vld [vmem:[%s1683_s1 + $0x60] sm:$0xff]   ;;  %v1283_v20 = vld [vmem:[%s1683_s1 + $0x68] sm:$0xff]  }
   0x6   :  { %1145 = vmatprep.subr.bf16.mxu1 %v1268_v5  ;;  %v1276_v13 = vld [vmem:[%s1683_s1 + $0xd8] sm:$0xff]   ;;  %v1280_v17 = vld [vmem:[%s1683_s1 + $0xe0] sm:$0xff]   ;;  %v1284_v21 = vld [vmem:[%s1683_s1 + $0xe8] sm:$0xff]  }
   0x7   :  { %v1277_v14 = vld [vmem:[%s1683_s1 + $0x18] sm:$0xff]   ;;  %v1281_v18 = vld [vmem:[%s1683_s1 + $0x20] sm:$0xff]   ;;  %v1285_v22 = vld [vmem:[%s1683_s1 + $0x28] sm:$0xff]  }
   0x8   :  { %1106 = vmatpush3.bf16.msra.mxu0 %v1269_v6  ;;  %v1278_v15 = vld [vmem:[%s1683_s1 + $0x98] sm:$0xff]   ;;  %v1282_v19 = vld [vmem:[%s1683_s1 + $0xa0] sm:$0xff]   ;;  %v1286_v23 = vld [vmem:[%s1683_s1 + $0xa8] sm:$0xff]  }
   0x9   :  { %1146 = vmatpush3.bf16.msra.mxu1 %v1270_v7  ;;  %1107 = vmatprep.subr.bf16.mxu0 %v1271_v8  ;;  %v1287_v24 = vld [vmem:[%s1683_s1 + $0x70] sm:$0xff]   ;;  %v1291_v28 = vld [vmem:[%s1683_s1 + $0x78] sm:$0xff]   ;;  %v15_v32 = vld [vmem:[%s1684_s0] sm:$0xff] }
   0xa   :  { %1147 = vmatprep.subr.bf16.mxu1 %v1272_v9  ;;  %v1288_v25 = vld [vmem:[%s1683_s1 + $0xf0] sm:$0xff]   ;;  %v1292_v29 = vld [vmem:[%s1683_s1 + $0xf8] sm:$0xff]   ;;  %v19_v33 = vld [vmem:[%s1684_s0 + $0x20] sm:$0xff] }
   0xb   :  { %v1289_v26 = vld [vmem:[%s1683_s1 + $0x30] sm:$0xff]   ;;  %v1293_v30 = vld [vmem:[%s1683_s1 + $0x38] sm:$0xff]   ;;  %v16_v34 = vld [vmem:[%s1684_s0 + $0x8] sm:$0xff]  ;;  %v1007_v35 = vcombine.low %v15_v32, %v19_v33  ;;  %v1008_v36 = vcombine.high %v15_v32, %v19_v33 }
   0xc   :  { %1108 = vmatpush3.bf16.msra.mxu0 %v1273_v10  ;;  %v1290_v27 = vld [vmem:[%s1683_s1 + $0xb0] sm:$0xff]   ;;  %v1294_v31 = vld [vmem:[%s1683_s1 + $0xb8] sm:$0xff]   ;;  %v20_v37 = vld [vmem:[%s1684_s0 + $0x28] sm:$0xff] }
   0xd   :  { %1148 = vmatpush3.bf16.msra.mxu1 %v1274_v11  ;;  %1109 = vmatprep.subr.bf16.mxu0 %v1275_v12  ;;  %v1009_v38 = vcombine.low %v16_v34, %v20_v37  ;;  %v1010_v39 = vcombine.high %v16_v34, %v20_v37  ;;  %v1295_v40 = vld [vmem:[%s1683_s1 + $0x140] sm:$0xff]   ;;  %v1299_v44 = vld [vmem:[%s1683_s1 + $0x148] sm:$0xff]   ;;  %v1303_v56 = vld [vmem:[%s1683_s1 + $0x150] sm:$0xff]  }
   0xe   :  { %1149 = vmatprep.subr.bf16.mxu1 %v1276_v13  ;;  %758 = vmatprep.mubr.bf16.mxu0 %v1008_v36  ;;  %v1296_v41 = vld [vmem:[%s1683_s1 + $0x1c0] sm:$0xff]   ;;  %v1300_v45 = vld [vmem:[%s1683_s1 + $0x1c8] sm:$0xff]   ;;  %v1304_v57 = vld [vmem:[%s1683_s1 + $0x1d0] sm:$0xff]  }
   0xf   :  { %823 = vmatprep.mubr.bf16.mxu1 %v1010_v39  ;;  %v1297_v42 = vld [vmem:[%s1683_s1 + $0x100] sm:$0xff]   ;;  %v1301_v46 = vld [vmem:[%s1683_s1 + $0x108] sm:$0xff]   ;;  %v1305_v58 = vld [vmem:[%s1683_s1 + $0x110] sm:$0xff]  }
  0x10   :  { %1110 = vmatpush3.bf16.msra.mxu0 %v1277_v14  ;;  %v1298_v43 = vld [vmem:[%s1683_s1 + $0x180] sm:$0xff]   ;;  %v1302_v47 = vld [vmem:[%s1683_s1 + $0x188] sm:$0xff]   ;;  %v1306_v59 = vld [vmem:[%s1683_s1 + $0x190] sm:$0xff]  }
  0x11   :  { %1150 = vmatpush3.bf16.msra.mxu1 %v1278_v15  ;;  %1111 = vmatprep.subr.bf16.mxu0 %v1279_v16  ;;  %v23_v48 = vld [vmem:[%s1684_s0 + $0x40] sm:$0xff]  ;;  %v24_v51 = vld [vmem:[%s1684_s0 + $0x48] sm:$0xff]  ;;  %v1307_v60 = vld [vmem:[%s1683_s1 + $0x158] sm:$0xff]  }
  0x12   :  { %1151 = vmatprep.subr.bf16.mxu1 %v1280_v17  ;;  %v27_v49 = vld [vmem:[%s1684_s0 + $0x60] sm:$0xff]  ;;  %v28_v52 = vld [vmem:[%s1684_s0 + $0x68] sm:$0xff]  ;;  %v1308_v61 = vld [vmem:[%s1683_s1 + $0x1d8] sm:$0xff]  }
  0x13   :  { %v1016_v50 = vcombine.high %v23_v48, %v27_v49  ;;  %v1015_v53 = vcombine.low %v23_v48, %v27_v49  ;;  %v1018_v54 = vcombine.high %v24_v51, %v28_v52  ;;  %v1017_v55 = vcombine.low %v24_v51, %v28_v52  ;;  %v1309_v62 = vld [vmem:[%s1683_s1 + $0x118] sm:$0xff]   ;;  %v31_v0 = vld [vmem:[%s1684_s0 + $0x80] sm:$0xff]  ;;  %v32_v2 = vld [vmem:[%s1684_s0 + $0x88] sm:$0xff] }
  0x14   :  { %1112 = vmatpush3.bf16.msra.mxu0 %v1281_v18  ;;  %v1310_v63 = vld [vmem:[%s1683_s1 + $0x198] sm:$0xff]   ;;  %v35_v1 = vld [vmem:[%s1684_s0 + $0xa0] sm:$0xff]  ;;  %v36_v3 = vld [vmem:[%s1684_s0 + $0xa8] sm:$0xff] }
  0x15   :  { %1152 = vmatpush3.bf16.msra.mxu1 %v1282_v19  ;;  %1113 = vmatprep.subr.bf16.mxu0 %v1283_v20  ;;  %v1024_v4 = vcombine.high %v31_v0, %v35_v1  ;;  %v1026_v5 = vcombine.high %v32_v2, %v36_v3  ;;  %v1023_v6 = vcombine.low %v31_v0, %v35_v1  ;;  %v1311_v8 = vld [vmem:[%s1683_s1 + $0x160] sm:$0xff]   ;;  %v1315_v12 = vld [vmem:[%s1683_s1 + $0x168] sm:$0xff]   ;;  %v17_v32 = vld [vmem:[%s1684_s0 + $0x10] sm:$0xff] }
  0x16   :  { %1153 = vmatprep.subr.bf16.mxu1 %v1284_v21  ;;  %v1025_v7 = vcombine.low %v32_v2, %v36_v3  ;;  %v1312_v9 = vld [vmem:[%s1683_s1 + $0x1e0] sm:$0xff]   ;;  %v1316_v13 = vld [vmem:[%s1683_s1 + $0x1e8] sm:$0xff]   ;;  %v21_v33 = vld [vmem:[%s1684_s0 + $0x30] sm:$0xff] }
  0x17   :  { %v1313_v10 = vld [vmem:[%s1683_s1 + $0x120] sm:$0xff]   ;;  %v1317_v14 = vld [vmem:[%s1683_s1 + $0x128] sm:$0xff]   ;;  %v1011_v34 = vcombine.low %v17_v32, %v21_v33  ;;  %v18_v36 = vld [vmem:[%s1684_s0 + $0x18] sm:$0xff] }
  0x18   :  { %1114 = vmatpush3.bf16.msra.mxu0 %v1285_v22  ;;  %v1314_v11 = vld [vmem:[%s1683_s1 + $0x1a0] sm:$0xff]   ;;  %v1318_v15 = vld [vmem:[%s1683_s1 + $0x1a8] sm:$0xff]   ;;  %v22_v37 = vld [vmem:[%s1684_s0 + $0x38] sm:$0xff] }
  0x19   :  { %1154 = vmatpush3.bf16.msra.mxu1 %v1286_v23  ;;  %1115 = vmatprep.subr.bf16.mxu0 %v1287_v24  ;;  %v39_v16 = vld [vmem:[%s1684_s0 + $0xc0] sm:$0xff]  ;;  %v40_v18 = vld [vmem:[%s1684_s0 + $0xc8] sm:$0xff]  ;;  %v1319_v24 = vld [vmem:[%s1683_s1 + $0x170] sm:$0xff]   ;;  %v1013_v39 = vcombine.low %v18_v36, %v22_v37 }
  0x1a   :  { %1155 = vmatprep.subr.bf16.mxu1 %v1288_v25  ;;  %v43_v17 = vld [vmem:[%s1684_s0 + $0xe0] sm:$0xff]  ;;  %v44_v20 = vld [vmem:[%s1684_s0 + $0xe8] sm:$0xff]  ;;  %v1320_v25 = vld [vmem:[%s1683_s1 + $0x1f0] sm:$0xff]  }
  0x1b   :  { %v1032_v19 = vcombine.high %v39_v16, %v43_v17  ;;  %v1031_v21 = vcombine.low %v39_v16, %v43_v17  ;;  %v1034_v22 = vcombine.high %v40_v18, %v44_v20  ;;  %v1033_v23 = vcombine.low %v40_v18, %v44_v20  ;;  %v34_v48 = vld [vmem:[%s1684_s0 + $0x98] sm:$0xff]  ;;  %v1006_v2 = vld [vmem:[%s1685_s2] ss:$0 sm:$0xff] }
  0x1c   :  { %1116 = vmatpush3.bf16.msra.mxu0 %v1289_v26  ;;  %v1321_v26 = vld [vmem:[%s1683_s1 + $0x130] sm:$0xff]   ;;  %v38_v49 = vld [vmem:[%s1684_s0 + $0xb8] sm:$0xff] }
  0x1d   :  { %1156 = vmatpush3.bf16.msra.mxu1 %v1290_v27  ;;  %1117 = vmatprep.subr.bf16.mxu0 %v1291_v28  ;;  %v1322_v27 = vld [vmem:[%s1683_s1 + $0x1b0] sm:$0xff]   ;;  %v1323_v28 = vld [vmem:[%s1683_s1 + $0x178] sm:$0xff]  }
  0x1e   :  { %1157 = vmatprep.subr.bf16.mxu1 %v1292_v29  ;;  %v1324_v29 = vld [vmem:[%s1683_s1 + $0x1f8] sm:$0xff]  }
  0x20   :  { %1118 = vmatpush3.bf16.msra.mxu0 %v1293_v30  ;;  %v1325_v30 = vld [vmem:[%s1683_s1 + $0x138] sm:$0xff]  }
  0x21   :  { %1158 = vmatpush3.bf16.msra.mxu1 %v1294_v31  ;;  %1183 = vmatprep.subr.bf16.mxu0 %v1295_v40  ;;  %v1326_v31 = vld [vmem:[%s1683_s1 + $0x1b8] sm:$0xff]   ;;  %v1014_v40 = vcombine.high %v18_v36, %v22_v37 }
  0x22   :  { %1223 = vmatprep.subr.bf16.mxu1 %v1296_v41  ;;  %v29_v41 = vld [vmem:[%s1684_s0 + $0x70] sm:$0xff] }
  0x23   :  { %759 = vmatmul.mubr.bf16.vlgmr.msra.gmra.mrb[0].mxu0 %v1007_v35  ;;  %v1012_v35 = vcombine.high %v17_v32, %v21_v33 }
  0x24   :  { %824 = vmatmul.mubr.bf16.vlgmr.msra.gmra.mrb[0].mxu1 %v1009_v38  ;;  %1184 = vmatpush3.bf16.msra.mxu0 %v1297_v42  ;;  %v25_v38 = vld [vmem:[%s1684_s0 + $0x50] sm:$0xff]  ;;  %v26_v42 = vld [vmem:[%s1684_s0 + $0x58] sm:$0xff] }
  0x25   :  { %1224 = vmatpush3.bf16.msra.mxu1 %v1298_v43  ;;  %1185 = vmatprep.subr.bf16.mxu0 %v1299_v44  ;;  %v30_v43 = vld [vmem:[%s1684_s0 + $0x78] sm:$0xff]  ;;  %v1020_v44 = vcombine.high %v25_v38, %v29_v41 }
  0x26   :  { %1225 = vmatprep.subr.bf16.mxu1 %v1300_v45  ;;  %766 = vmatprep.mubr.bf16.mxu0 %v1016_v50  ;;  %v1022_v45 = vcombine.high %v26_v42, %v30_v43  ;;  %v1019_v50 = vcombine.low %v25_v38, %v29_v41  ;;  %v1021_v51 = vcombine.low %v26_v42, %v30_v43 }
  0x27   :  { %831 = vmatprep.mubr.bf16.mxu1 %v1018_v54  ;;  %v41_v54 = vld [vmem:[%s1684_s0 + $0xd0] sm:$0xff] }
  0x28   :  { %1186 = vmatpush3.bf16.msra.mxu0 %v1301_v46  ;;  %v33_v46 = vld [vmem:[%s1684_s0 + $0x90] sm:$0xff] }
  0x29   :  { %1226 = vmatpush3.bf16.msra.mxu1 %v1302_v47  ;;  %1187 = vmatprep.subr.bf16.mxu0 %v1303_v56  ;;  %v37_v47 = vld [vmem:[%s1684_s0 + $0xb0] sm:$0xff]  ;;  %v42_v56 = vld [vmem:[%s1684_s0 + $0xd8] sm:$0xff] }
  0x2a   :  { %1227 = vmatprep.subr.bf16.mxu1 %v1304_v57  ;;  %v1028_v52 = vcombine.high %v33_v46, %v37_v47  ;;  %v46_v57 = vld [vmem:[%s1684_s0 + $0xf8] sm:$0xff] }
  0x2b   :  { %767 = vmatmul.mubr.bf16.gmra.mrb[4].mxu0 %v1015_v53  ;;  %v1030_v53 = vcombine.high %v34_v48, %v38_v49 }
  0x2c   :  { %832 = vmatmul.mubr.bf16.gmra.mrb[4].mxu1 %v1017_v55  ;;  %1188 = vmatpush3.bf16.msra.mxu0 %v1305_v58  ;;  %v45_v55 = vld [vmem:[%s1684_s0 + $0xf0] sm:$0xff]  ;;  %v1027_v58 = vcombine.low %v33_v46, %v37_v47 }
  0x2d   :  { %1228 = vmatpush3.bf16.msra.mxu1 %v1306_v59  ;;  %1189 = vmatprep.subr.bf16.mxu0 %v1307_v60  ;;  %v1029_v59 = vcombine.low %v34_v48, %v38_v49  ;;  %v1036_v60 = vcombine.high %v41_v54, %v45_v55 }
  0x2e   :  { %1229 = vmatprep.subr.bf16.mxu1 %v1308_v61  ;;  %774 = vmatprep.mubr.bf16.mxu0 %v1024_v4  ;;  %v1038_v61 = vcombine.high %v42_v56, %v46_v57 }
  0x2f   :  { %839 = vmatprep.mubr.bf16.mxu1 %v1026_v5 }
  0x30   :  { %1190 = vmatpush3.bf16.msra.mxu0 %v1309_v62  ;;  %v1035_v62 = vcombine.low %v41_v54, %v45_v55 }
  0x31   :  { %1230 = vmatpush3.bf16.msra.mxu1 %v1310_v63  ;;  %1191 = vmatprep.subr.bf16.mxu0 %v1311_v8  ;;  %v1037_v63 = vcombine.low %v42_v56, %v46_v57 }
  0x32   :  { %1231 = vmatprep.subr.bf16.mxu1 %v1312_v9 }
  0x33   :  { %775 = vmatmul.mubr.bf16.gmra.mrb[8].mxu0 %v1023_v6 }
  0x34   :  { %840 = vmatmul.mubr.bf16.gmra.mrb[8].mxu1 %v1025_v7  ;;  %1192 = vmatpush3.bf16.msra.mxu0 %v1313_v10 }
  0x35   :  { %1232 = vmatpush3.bf16.msra.mxu1 %v1314_v11  ;;  %1193 = vmatprep.subr.bf16.mxu0 %v1315_v12 }
  0x36   :  { %1233 = vmatprep.subr.bf16.mxu1 %v1316_v13  ;;  %782 = vmatprep.mubr.bf16.mxu0 %v1032_v19 }
  0x37   :  { %847 = vmatprep.mubr.bf16.mxu1 %v1034_v22 }
  0x38   :  { %1194 = vmatpush3.bf16.msra.mxu0 %v1317_v14 }
  0x39   :  { %1234 = vmatpush3.bf16.msra.mxu1 %v1318_v15  ;;  %1195 = vmatprep.subr.bf16.mxu0 %v1319_v24 }
  0x3a   :  { %1235 = vmatprep.subr.bf16.mxu1 %v1320_v25 }
  0x3b   :  { %783 = vmatmul.mubr.bf16.gmra.mrb[12].mxu0 %v1031_v21 }
  0x3c   :  { %848 = vmatmul.mubr.bf16.gmra.mrb[12].mxu1 %v1033_v23  ;;  %1196 = vmatpush3.bf16.msra.mxu0 %v1321_v26 }
  0x3d   :  { %1236 = vmatpush3.bf16.msra.mxu1 %v1322_v27  ;;  %1197 = vmatprep.subr.bf16.mxu0 %v1323_v28 }
  0x3e   :  { %1237 = vmatprep.subr.bf16.mxu1 %v1324_v29  ;;  %888 = vmatprep.mubr.bf16.mxu0 %v1012_v35 }
  0x3f   :  { %953 = vmatprep.mubr.bf16.mxu1 %v1014_v40 }
  0x40   :  { %1198 = vmatpush3.bf16.msra.mxu0 %v1325_v30 }
  0x41   :  { %1238 = vmatpush3.bf16.msra.mxu1 %v1326_v31 }
  0x43   :  { %889 = vmatmul.mubr.bf16.vlgmr.msra.gmra.mrb[16].mxu0 %v1011_v34 }
  0x44   :  { %954 = vmatmul.mubr.bf16.vlgmr.msra.gmra.mrb[16].mxu1 %v1013_v39  ;;  %896 = vmatprep.mubr.bf16.mxu0 %v1020_v44 }
  0x45   :  { %961 = vmatprep.mubr.bf16.mxu1 %v1022_v45 }
  0x4b   :  { %897 = vmatmul.mubr.bf16.gmra.mrb[20].mxu0 %v1019_v50 }
  0x4c   :  { %962 = vmatmul.mubr.bf16.gmra.mrb[20].mxu1 %v1021_v51  ;;  %904 = vmatprep.mubr.bf16.mxu0 %v1028_v52 }
  0x4d   :  { %969 = vmatprep.mubr.bf16.mxu1 %v1030_v53 }
  0x53   :  { %905 = vmatmul.mubr.bf16.gmra.mrb[24].mxu0 %v1027_v58 }
  0x54   :  { %970 = vmatmul.mubr.bf16.gmra.mrb[24].mxu1 %v1029_v59  ;;  %912 = vmatprep.mubr.bf16.mxu0 %v1036_v60 }
  0x55   :  { %977 = vmatprep.mubr.bf16.mxu1 %v1038_v61 }
  0x5b   :  { %913 = vmatmul.mubr.bf16.gmra.mrb[28].mxu0 %v1035_v62 }
  0x5c   :  { %978 = vmatmul.mubr.bf16.gmra.mrb[28].mxu1 %v1037_v63 }
  0xf6   :  { %v1119_v0 = vpop.f32.mrb[0].mxu0 }
  0xf7   :  { %v1159_v1 = vpop.f32.mrb[0].mxu1  ;;  %v1120_v3 = vpop.f32.mrb[1].mxu0 }
  0xf8   :  { %v1121_v4 = vadd.f32 %v1120_v3, %v1119_v0  ;;  %v1160_v5 = vpop.f32.mrb[1].mxu1  ;;  %v1122_v6 = vpop.f32.mrb[2].mxu0 }
  0xf9   :  { %v1161_v7 = vadd.f32 %v1160_v5, %v1159_v1  ;;  %v1162_v8 = vpop.f32.mrb[2].mxu1  ;;  %v1123_v9 = vpop.f32.mrb[3].mxu0 }
  0xfa   :  { %v761_v10 = vadd.f32 %v1121_v4, %v1006_v2  ;;  %v1124_v11 = vadd.f32 %v1123_v9, %v1122_v6  ;;  %v1163_v12 = vpop.f32.mrb[3].mxu1 }
  0xfb   :  { %v1164_v13 = vadd.f32 %v1163_v12, %v1162_v8 }
  0xfc   :  { %v826_v14 = vadd.f32 %v1161_v7, %v761_v10  ;;  %v764_v15 = vadd.f32 %v1124_v11, %v1006_v2 }
  0xfe   :  { %v1638_v16 = vadd.f32 %v1164_v13, %v764_v15  ;;  %v1125_v17 = vpop.f32.mrb[4].mxu0 }
  0xff   :  { %v1165_v18 = vpop.f32.mrb[4].mxu1  ;;  %v1126_v19 = vpop.f32.mrb[5].mxu0 }
 0x100   :  { %v1127_v20 = vadd.f32 %v1126_v19, %v1125_v17  ;;  %v1166_v21 = vpop.f32.mrb[5].mxu1  ;;  %v1128_v22 = vpop.f32.mrb[6].mxu0 }
 0x101   :  { %v1167_v23 = vadd.f32 %v1166_v21, %v1165_v18  ;;  %v1168_v24 = vpop.f32.mrb[6].mxu1  ;;  %v1129_v25 = vpop.f32.mrb[7].mxu0 }
 0x102   :  { %v769_v26 = vadd.f32 %v1127_v20, %v1006_v2  ;;  %v1130_v27 = vadd.f32 %v1129_v25, %v1128_v22  ;;  %v1169_v28 = vpop.f32.mrb[7].mxu1 }
 0x103   :  { %v1170_v29 = vadd.f32 %v1169_v28, %v1168_v24 }
 0x104   :  { %v1640_v30 = vadd.f32 %v1167_v23, %v769_v26  ;;  %v772_v31 = vadd.f32 %v1130_v27, %v1006_v2 }
 0x106   :  { %v1642_v32 = vadd.f32 %v1170_v29, %v772_v31  ;;  %v1131_v33 = vpop.f32.mrb[8].mxu0 }
 0x107   :  { %v1171_v34 = vpop.f32.mrb[8].mxu1  ;;  %v1132_v35 = vpop.f32.mrb[9].mxu0 }
 0x108   :  { %v1172_v36 = vpop.f32.mrb[9].mxu1  ;;  %v1133_v37 = vadd.f32 %v1132_v35, %v1131_v33  ;;  %v1134_v39 = vpop.f32.mrb[10].mxu0 }
 0x109   :  { %v1173_v38 = vadd.f32 %v1172_v36, %v1171_v34  ;;  %v1174_v40 = vpop.f32.mrb[10].mxu1  ;;  %v1135_v41 = vpop.f32.mrb[11].mxu0 }
 0x10a   :  { %v1175_v42 = vpop.f32.mrb[11].mxu1  ;;  %v777_v43 = vadd.f32 %v1133_v37, %v1006_v2  ;;  %v1136_v44 = vadd.f32 %v1135_v41, %v1134_v39 }
 0x10b   :  { %v1176_v45 = vadd.f32 %v1175_v42, %v1174_v40 }
 0x10c   :  { %v1644_v46 = vadd.f32 %v1173_v38, %v777_v43  ;;  %v780_v47 = vadd.f32 %v1136_v44, %v1006_v2 }
 0x10e   :  { %v1646_v48 = vadd.f32 %v1176_v45, %v780_v47  ;;  %v1137_v49 = vpop.f32.mrb[12].mxu0 }
 0x10f   :  { %v1177_v50 = vpop.f32.mrb[12].mxu1  ;;  %v1138_v51 = vpop.f32.mrb[13].mxu0 }
 0x110   :  { %v1139_v52 = vadd.f32 %v1138_v51, %v1137_v49  ;;  %v1178_v53 = vpop.f32.mrb[13].mxu1  ;;  %v1140_v54 = vpop.f32.mrb[14].mxu0 }
 0x111   :  { %v1179_v55 = vadd.f32 %v1178_v53, %v1177_v50  ;;  %v1180_v56 = vpop.f32.mrb[14].mxu1  ;;  %v1141_v57 = vpop.f32.mrb[15].mxu0 }
 0x112   :  { %v785_v58 = vadd.f32 %v1139_v52, %v1006_v2  ;;  %v1142_v59 = vadd.f32 %v1141_v57, %v1140_v54  ;;  %v1181_v60 = vpop.f32.mrb[15].mxu1 }
 0x113   :  { %v1182_v61 = vadd.f32 %v1181_v60, %v1180_v56 }
 0x114   :  { %v1648_v62 = vadd.f32 %v1179_v55, %v785_v58  ;;  %v788_v63 = vadd.f32 %v1142_v59, %v1006_v2 }
 0x116   :  { %v1650_v0 = vadd.f32 %v1182_v61, %v788_v63  ;;  %v1199_v1 = vpop.f32.mrb[16].mxu0 }
 0x117   :  { %v1239_v3 = vpop.f32.mrb[16].mxu1  ;;  %v1200_v4 = vpop.f32.mrb[17].mxu0 }
 0x118   :  { %v1201_v5 = vadd.f32 %v1200_v4, %v1199_v1  ;;  %v1240_v6 = vpop.f32.mrb[17].mxu1  ;;  %v1202_v7 = vpop.f32.mrb[18].mxu0 }
 0x119   :  { %v1241_v8 = vadd.f32 %v1240_v6, %v1239_v3  ;;  %v1242_v9 = vpop.f32.mrb[18].mxu1  ;;  %v1203_v10 = vpop.f32.mrb[19].mxu0 }
 0x11a   :  { %v891_v11 = vadd.f32 %v1201_v5, %v826_v14  ;;  %v1204_v12 = vadd.f32 %v1203_v10, %v1202_v7  ;;  %v1243_v13 = vpop.f32.mrb[19].mxu1 }
 0x11b   :  { %v1244_v15 = vadd.f32 %v1243_v13, %v1242_v9 }
 0x11c   :  { %v956_v17 = vadd.f32 %v1241_v8, %v891_v11  ;;  %v894_v18 = vadd.f32 %v1204_v12, %v1638_v16 }
 0x11e   :  { %v986_v19 = vmax.f32 %v956_v17, 0.0  ;;  %v959_v2 = vadd.f32 %v1244_v15, %v894_v18  ;;  %v1205_v20 = vpop.f32.mrb[20].mxu0 }
 0x11f   :  { %v1245_v21 = vpop.f32.mrb[20].mxu1  ;;  %v1206_v22 = vpop.f32.mrb[21].mxu0 }
 0x120   :  { %994 = vst [vmem:[%s1686_s3] sm:$0xff] %v986_v19  ;;  %v987_v23 = vmax.f32 %v959_v2, 0.0  ;;  %v1207_v24 = vadd.f32 %v1206_v22, %v1205_v20  ;;  %v1246_v25 = vpop.f32.mrb[21].mxu1  ;;  %v1208_v26 = vpop.f32.mrb[22].mxu0 }
 0x121   :  { %v1247_v14 = vadd.f32 %v1246_v25, %v1245_v21  ;;  %v1248_v27 = vpop.f32.mrb[22].mxu1  ;;  %v1209_v28 = vpop.f32.mrb[23].mxu0 }
 0x122   :  { %995 = vst [vmem:[%s1686_s3 + $0x8] sm:$0xff] %v987_v23  ;;  %v899_v16 = vadd.f32 %v1207_v24, %v1640_v30  ;;  %v1210_v29 = vadd.f32 %v1209_v28, %v1208_v26  ;;  %v1249_v31 = vpop.f32.mrb[23].mxu1 }
 0x123   :  { %v1250_v33 = vadd.f32 %v1249_v31, %v1248_v27 }
 0x124   :  { %v964_v34 = vadd.f32 %v1247_v14, %v899_v16  ;;  %v902_v35 = vadd.f32 %v1210_v29, %v1642_v32 }
 0x126   :  { %v988_v36 = vmax.f32 %v964_v34, 0.0  ;;  %v967_v37 = vadd.f32 %v1250_v33, %v902_v35  ;;  %v1211_v38 = vpop.f32.mrb[24].mxu0 }
 0x127   :  { %v1251_v39 = vpop.f32.mrb[24].mxu1  ;;  %v1212_v40 = vpop.f32.mrb[25].mxu0 }
 0x128   :  { %996 = vst [vmem:[%s1686_s3 + $0x10] sm:$0xff] %v988_v36  ;;  %v989_v41 = vmax.f32 %v967_v37, 0.0  ;;  %v1213_v42 = vadd.f32 %v1212_v40, %v1211_v38  ;;  %v1252_v43 = vpop.f32.mrb[25].mxu1  ;;  %v1214_v44 = vpop.f32.mrb[26].mxu0 }
 0x129   :  { %v1253_v30 = vadd.f32 %v1252_v43, %v1251_v39  ;;  %v1254_v45 = vpop.f32.mrb[26].mxu1  ;;  %v1215_v47 = vpop.f32.mrb[27].mxu0 }
 0x12a   :  { %997 = vst [vmem:[%s1686_s3 + $0x18] sm:$0xff] %v989_v41  ;;  %v907_v32 = vadd.f32 %v1213_v42, %v1644_v46  ;;  %v1216_v49 = vadd.f32 %v1215_v47, %v1214_v44  ;;  %v1255_v50 = vpop.f32.mrb[27].mxu1 }
 0x12b   :  { %v1256_v51 = vadd.f32 %v1255_v50, %v1254_v45 }
 0x12c   :  { %v972_v52 = vadd.f32 %v1253_v30, %v907_v32  ;;  %v910_v53 = vadd.f32 %v1216_v49, %v1646_v48 }
 0x12e   :  { %v990_v54 = vmax.f32 %v972_v52, 0.0  ;;  %v975_v55 = vadd.f32 %v1256_v51, %v910_v53  ;;  %v1217_v56 = vpop.f32.mrb[28].mxu0 }
 0x12f   :  { %v1257_v57 = vpop.f32.mrb[28].mxu1  ;;  %v1218_v58 = vpop.f32.mrb[29].mxu0 }
 0x130   :  { %998 = vst [vmem:[%s1686_s3 + $0x20] sm:$0xff] %v990_v54  ;;  %v991_v59 = vmax.f32 %v975_v55, 0.0  ;;  %v1219_v60 = vadd.f32 %v1218_v58, %v1217_v56  ;;  %v1258_v61 = vpop.f32.mrb[29].mxu1  ;;  %v1220_v63 = vpop.f32.mrb[30].mxu0 }
 0x131   :  { %v1259_v46 = vadd.f32 %v1258_v61, %v1257_v57  ;;  %v1260_v1 = vpop.f32.mrb[30].mxu1  ;;  %v1221_v3 = vpop.f32.mrb[31].mxu0 }
 0x132   :  { %999 = vst [vmem:[%s1686_s3 + $0x28] sm:$0xff] %v991_v59  ;;  %v915_v48 = vadd.f32 %v1219_v60, %v1648_v62  ;;  %v1222_v4 = vadd.f32 %v1221_v3, %v1220_v63  ;;  %v1261_v5 = vpop.f32.mrb[31].mxu1 }
 0x133   :  { %v1262_v6 = vadd.f32 %v1261_v5, %v1260_v1 }
 0x134   :  { %v980_v7 = vadd.f32 %v1259_v46, %v915_v48  ;;  %v918_v8 = vadd.f32 %v1222_v4, %v1650_v0 }
 0x136   :  { %v992_v9 = vmax.f32 %v980_v7, 0.0  ;;  %v983_v10 = vadd.f32 %v1262_v6, %v918_v8 }
 0x138   :  { %1000 = vst [vmem:[%s1686_s3 + $0x30] sm:$0xff] %v992_v9  ;;  %v993_v11 = vmax.f32 %v983_v10, 0.0 }
 0x13a   :  { %1001 = vst [vmem:[%s1686_s3 + $0x38] sm:$0xff] %v993_v11 }

// kernel: simple_conv64_forward.9
= control target key start
LH: loop header
LB: loop body
LE: loop exit
PB: predicated region body
PF: predicated region fallthrough
CT: control target
= control target key end

     0   :  { %s1370_s1 = inlined_call_operand.vmem [shape: bf16[1024,128], index: 1, kind: input, shape index: {}]   ;;  %s1371_s0 = inlined_call_operand.vmem [shape: bf16[32,1024], index: 0, kind: input, shape index: {}]   ;;  %s1372_s2 = inlined_call_operand.vmem [shape: f32[1,128], index: 2, kind: input, shape index: {}]   ;;  %s1373_s3 = inlined_call_operand.vmem [shape: f32[32,128], index: 3, kind: output, shape index: {}]  }
   0x1   :  { %v1031_v0 = vld [vmem:[%s1370_s1 + $0x40] sm:$0xff]   ;;  %v1035_v4 = vld [vmem:[%s1370_s1 + $0x48] sm:$0xff]   ;;  %v1039_v8 = vld [vmem:[%s1370_s1 + $0x50] sm:$0xff]  }
   0x2   :  { %v1032_v1 = vld [vmem:[%s1370_s1 + $0xc0] sm:$0xff]   ;;  %919 = vmatprep.subr.bf16.mxu0 %v1031_v0  ;;  %v1036_v5 = vld [vmem:[%s1370_s1 + $0xc8] sm:$0xff]   ;;  %v1040_v9 = vld [vmem:[%s1370_s1 + $0xd0] sm:$0xff]  }
   0x3   :  { %v1033_v2 = vld [vmem:[%s1370_s1] sm:$0xff]   ;;  %947 = vmatprep.subr.bf16.mxu1 %v1032_v1  ;;  %v1037_v6 = vld [vmem:[%s1370_s1 + $0x8] sm:$0xff]   ;;  %v1041_v10 = vld [vmem:[%s1370_s1 + $0x10] sm:$0xff]  }
   0x4   :  { %v1034_v3 = vld [vmem:[%s1370_s1 + $0x80] sm:$0xff]   ;;  %920 = vmatpush3.bf16.msra.mxu0 %v1033_v2  ;;  %v1038_v7 = vld [vmem:[%s1370_s1 + $0x88] sm:$0xff]   ;;  %v1042_v11 = vld [vmem:[%s1370_s1 + $0x90] sm:$0xff]  }
   0x5   :  { %948 = vmatpush3.bf16.msra.mxu1 %v1034_v3  ;;  %921 = vmatprep.subr.bf16.mxu0 %v1035_v4  ;;  %v1043_v12 = vld [vmem:[%s1370_s1 + $0x58] sm:$0xff]   ;;  %v1047_v16 = vld [vmem:[%s1370_s1 + $0x60] sm:$0xff]   ;;  %v1051_v20 = vld [vmem:[%s1370_s1 + $0x68] sm:$0xff]  }
   0x6   :  { %949 = vmatprep.subr.bf16.mxu1 %v1036_v5  ;;  %v1044_v13 = vld [vmem:[%s1370_s1 + $0xd8] sm:$0xff]   ;;  %v1048_v17 = vld [vmem:[%s1370_s1 + $0xe0] sm:$0xff]   ;;  %v1052_v21 = vld [vmem:[%s1370_s1 + $0xe8] sm:$0xff]  }
   0x7   :  { %v1045_v14 = vld [vmem:[%s1370_s1 + $0x18] sm:$0xff]   ;;  %v1049_v18 = vld [vmem:[%s1370_s1 + $0x20] sm:$0xff]   ;;  %v1053_v22 = vld [vmem:[%s1370_s1 + $0x28] sm:$0xff]  }
   0x8   :  { %922 = vmatpush3.bf16.msra.mxu0 %v1037_v6  ;;  %v1046_v15 = vld [vmem:[%s1370_s1 + $0x98] sm:$0xff]   ;;  %v1050_v19 = vld [vmem:[%s1370_s1 + $0xa0] sm:$0xff]   ;;  %v1054_v23 = vld [vmem:[%s1370_s1 + $0xa8] sm:$0xff]  }
   0x9   :  { %950 = vmatpush3.bf16.msra.mxu1 %v1038_v7  ;;  %923 = vmatprep.subr.bf16.mxu0 %v1039_v8  ;;  %v1055_v24 = vld [vmem:[%s1370_s1 + $0x70] sm:$0xff]   ;;  %v1059_v28 = vld [vmem:[%s1370_s1 + $0x78] sm:$0xff]   ;;  %v15_v32 = vld [vmem:[%s1371_s0] sm:$0xff] }
   0xa   :  { %951 = vmatprep.subr.bf16.mxu1 %v1040_v9  ;;  %v1056_v25 = vld [vmem:[%s1370_s1 + $0xf0] sm:$0xff]   ;;  %v1060_v29 = vld [vmem:[%s1370_s1 + $0xf8] sm:$0xff]   ;;  %v19_v33 = vld [vmem:[%s1371_s0 + $0x20] sm:$0xff] }
   0xb   :  { %v1057_v26 = vld [vmem:[%s1370_s1 + $0x30] sm:$0xff]   ;;  %v1061_v30 = vld [vmem:[%s1370_s1 + $0x38] sm:$0xff]   ;;  %v16_v34 = vld [vmem:[%s1371_s0 + $0x8] sm:$0xff]  ;;  %v839_v35 = vcombine.low %v15_v32, %v19_v33  ;;  %v840_v36 = vcombine.high %v15_v32, %v19_v33 }
   0xc   :  { %924 = vmatpush3.bf16.msra.mxu0 %v1041_v10  ;;  %v1058_v27 = vld [vmem:[%s1370_s1 + $0xb0] sm:$0xff]   ;;  %v1062_v31 = vld [vmem:[%s1370_s1 + $0xb8] sm:$0xff]   ;;  %v20_v37 = vld [vmem:[%s1371_s0 + $0x28] sm:$0xff] }
   0xd   :  { %952 = vmatpush3.bf16.msra.mxu1 %v1042_v11  ;;  %925 = vmatprep.subr.bf16.mxu0 %v1043_v12  ;;  %v841_v38 = vcombine.low %v16_v34, %v20_v37  ;;  %v842_v39 = vcombine.high %v16_v34, %v20_v37  ;;  %v1063_v40 = vld [vmem:[%s1370_s1 + $0x140] sm:$0xff]   ;;  %v1067_v44 = vld [vmem:[%s1370_s1 + $0x148] sm:$0xff]   ;;  %v1071_v48 = vld [vmem:[%s1370_s1 + $0x150] sm:$0xff]  }
   0xe   :  { %953 = vmatprep.subr.bf16.mxu1 %v1044_v13  ;;  %662 = vmatprep.mubr.bf16.mxu0 %v840_v36  ;;  %v1064_v41 = vld [vmem:[%s1370_s1 + $0x1c0] sm:$0xff]   ;;  %v1068_v45 = vld [vmem:[%s1370_s1 + $0x1c8] sm:$0xff]   ;;  %v1072_v49 = vld [vmem:[%s1370_s1 + $0x1d0] sm:$0xff]  }
   0xf   :  { %711 = vmatprep.mubr.bf16.mxu1 %v842_v39  ;;  %v1065_v42 = vld [vmem:[%s1370_s1 + $0x100] sm:$0xff]   ;;  %v1069_v46 = vld [vmem:[%s1370_s1 + $0x108] sm:$0xff]   ;;  %v1073_v50 = vld [vmem:[%s1370_s1 + $0x110] sm:$0xff]  }
  0x10   :  { %926 = vmatpush3.bf16.msra.mxu0 %v1045_v14  ;;  %v1066_v43 = vld [vmem:[%s1370_s1 + $0x180] sm:$0xff]   ;;  %v1070_v47 = vld [vmem:[%s1370_s1 + $0x188] sm:$0xff]   ;;  %v1074_v51 = vld [vmem:[%s1370_s1 + $0x190] sm:$0xff]  }
  0x11   :  { %954 = vmatpush3.bf16.msra.mxu1 %v1046_v15  ;;  %927 = vmatprep.subr.bf16.mxu0 %v1047_v16  ;;  %v1075_v52 = vld [vmem:[%s1370_s1 + $0x158] sm:$0xff]   ;;  %v1079_v56 = vld [vmem:[%s1370_s1 + $0x160] sm:$0xff]   ;;  %v1083_v63 = vld [vmem:[%s1370_s1 + $0x168] sm:$0xff]  }
  0x12   :  { %955 = vmatprep.subr.bf16.mxu1 %v1048_v17  ;;  %v1076_v53 = vld [vmem:[%s1370_s1 + $0x1d8] sm:$0xff]   ;;  %v1080_v57 = vld [vmem:[%s1370_s1 + $0x1e0] sm:$0xff]   ;;  %v1084_v1 = vld [vmem:[%s1370_s1 + $0x1e8] sm:$0xff]  }
  0x13   :  { %v1077_v54 = vld [vmem:[%s1370_s1 + $0x118] sm:$0xff]   ;;  %v1081_v58 = vld [vmem:[%s1370_s1 + $0x120] sm:$0xff]   ;;  %v1085_v2 = vld [vmem:[%s1370_s1 + $0x128] sm:$0xff]  }
  0x14   :  { %928 = vmatpush3.bf16.msra.mxu0 %v1049_v18  ;;  %v1078_v55 = vld [vmem:[%s1370_s1 + $0x198] sm:$0xff]   ;;  %v1082_v59 = vld [vmem:[%s1370_s1 + $0x1a0] sm:$0xff]   ;;  %v1086_v3 = vld [vmem:[%s1370_s1 + $0x1a8] sm:$0xff]  }
  0x15   :  { %956 = vmatpush3.bf16.msra.mxu1 %v1050_v19  ;;  %929 = vmatprep.subr.bf16.mxu0 %v1051_v20  ;;  %v23_v60 = vld [vmem:[%s1371_s0 + $0x40] sm:$0xff]  ;;  %v24_v4 = vld [vmem:[%s1371_s0 + $0x48] sm:$0xff]  ;;  %v1087_v8 = vld [vmem:[%s1370_s1 + $0x170] sm:$0xff]  }
  0x16   :  { %957 = vmatprep.subr.bf16.mxu1 %v1052_v21  ;;  %v27_v61 = vld [vmem:[%s1371_s0 + $0x60] sm:$0xff]  ;;  %v28_v5 = vld [vmem:[%s1371_s0 + $0x68] sm:$0xff]  ;;  %v1088_v9 = vld [vmem:[%s1370_s1 + $0x1f0] sm:$0xff]  }
  0x17   :  { %v848_v62 = vcombine.high %v23_v60, %v27_v61  ;;  %v847_v0 = vcombine.low %v23_v60, %v27_v61  ;;  %v850_v6 = vcombine.high %v24_v4, %v28_v5  ;;  %v849_v7 = vcombine.low %v24_v4, %v28_v5  ;;  %v1089_v10 = vld [vmem:[%s1370_s1 + $0x130] sm:$0xff]   ;;  %v1091_v12 = vld [vmem:[%s1370_s1 + $0x178] sm:$0xff]   ;;  %v838_v34 = vld [vmem:[%s1372_s2] ss:$0 sm:$0xff] }
  0x18   :  { %930 = vmatpush3.bf16.msra.mxu0 %v1053_v22  ;;  %v1090_v11 = vld [vmem:[%s1370_s1 + $0x1b0] sm:$0xff]   ;;  %v1092_v13 = vld [vmem:[%s1370_s1 + $0x1f8] sm:$0xff]  }
  0x19   :  { %958 = vmatpush3.bf16.msra.mxu1 %v1054_v23  ;;  %931 = vmatprep.subr.bf16.mxu0 %v1055_v24  ;;  %v1093_v14 = vld [vmem:[%s1370_s1 + $0x138] sm:$0xff]   ;;  %v17_v16 = vld [vmem:[%s1371_s0 + $0x10] sm:$0xff] }
  0x1a   :  { %959 = vmatprep.subr.bf16.mxu1 %v1056_v25  ;;  %v1094_v15 = vld [vmem:[%s1370_s1 + $0x1b8] sm:$0xff]   ;;  %v21_v17 = vld [vmem:[%s1371_s0 + $0x30] sm:$0xff] }
  0x1b   :  { %v18_v18 = vld [vmem:[%s1371_s0 + $0x18] sm:$0xff]  ;;  %v843_v20 = vcombine.low %v17_v16, %v21_v17  ;;  %v844_v21 = vcombine.high %v17_v16, %v21_v17  ;;  %v25_v24 = vld [vmem:[%s1371_s0 + $0x50] sm:$0xff] }
  0x1c   :  { %932 = vmatpush3.bf16.msra.mxu0 %v1057_v26  ;;  %v22_v19 = vld [vmem:[%s1371_s0 + $0x38] sm:$0xff]  ;;  %v29_v25 = vld [vmem:[%s1371_s0 + $0x70] sm:$0xff] }
  0x1d   :  { %960 = vmatpush3.bf16.msra.mxu1 %v1058_v27  ;;  %933 = vmatprep.subr.bf16.mxu0 %v1059_v28  ;;  %v845_v22 = vcombine.low %v18_v18, %v22_v19  ;;  %v846_v23 = vcombine.high %v18_v18, %v22_v19  ;;  %v26_v26 = vld [vmem:[%s1371_s0 + $0x58] sm:$0xff]  ;;  %v852_v27 = vcombine.high %v25_v24, %v29_v25 }
  0x1e   :  { %961 = vmatprep.subr.bf16.mxu1 %v1060_v29  ;;  %v30_v28 = vld [vmem:[%s1371_s0 + $0x78] sm:$0xff] }
  0x1f   :  { %v854_v29 = vcombine.high %v26_v26, %v30_v28 }
  0x20   :  { %934 = vmatpush3.bf16.msra.mxu0 %v1061_v30  ;;  %v851_v30 = vcombine.low %v25_v24, %v29_v25 }
  0x21   :  { %962 = vmatpush3.bf16.msra.mxu1 %v1062_v31  ;;  %975 = vmatprep.subr.bf16.mxu0 %v1063_v40  ;;  %v853_v31 = vcombine.low %v26_v26, %v30_v28 }
  0x22   :  { %1003 = vmatprep.subr.bf16.mxu1 %v1064_v41 }
  0x23   :  { %663 = vmatmul.mubr.bf16.vlgmr.msra.gmra.mrb[0].mxu0 %v839_v35 }
  0x24   :  { %712 = vmatmul.mubr.bf16.vlgmr.msra.gmra.mrb[0].mxu1 %v841_v38  ;;  %976 = vmatpush3.bf16.msra.mxu0 %v1065_v42 }
  0x25   :  { %1004 = vmatpush3.bf16.msra.mxu1 %v1066_v43  ;;  %977 = vmatprep.subr.bf16.mxu0 %v1067_v44 }
  0x26   :  { %1005 = vmatprep.subr.bf16.mxu1 %v1068_v45  ;;  %670 = vmatprep.mubr.bf16.mxu0 %v848_v62 }
  0x27   :  { %719 = vmatprep.mubr.bf16.mxu1 %v850_v6 }
  0x28   :  { %978 = vmatpush3.bf16.msra.mxu0 %v1069_v46 }
  0x29   :  { %1006 = vmatpush3.bf16.msra.mxu1 %v1070_v47  ;;  %979 = vmatprep.subr.bf16.mxu0 %v1071_v48 }
  0x2a   :  { %1007 = vmatprep.subr.bf16.mxu1 %v1072_v49 }
  0x2b   :  { %671 = vmatmul.mubr.bf16.gmra.mrb[4].mxu0 %v847_v0 }
  0x2c   :  { %980 = vmatpush3.bf16.msra.mxu0 %v1073_v50  ;;  %720 = vmatmul.mubr.bf16.gmra.mrb[4].mxu1 %v849_v7 }
  0x2d   :  { %1008 = vmatpush3.bf16.msra.mxu1 %v1074_v51  ;;  %981 = vmatprep.subr.bf16.mxu0 %v1075_v52 }
  0x2e   :  { %1009 = vmatprep.subr.bf16.mxu1 %v1076_v53  ;;  %760 = vmatprep.mubr.bf16.mxu0 %v844_v21 }
  0x2f   :  { %809 = vmatprep.mubr.bf16.mxu1 %v846_v23 }
  0x30   :  { %982 = vmatpush3.bf16.msra.mxu0 %v1077_v54 }
  0x31   :  { %1010 = vmatpush3.bf16.msra.mxu1 %v1078_v55  ;;  %983 = vmatprep.subr.bf16.mxu0 %v1079_v56 }
  0x32   :  { %1011 = vmatprep.subr.bf16.mxu1 %v1080_v57 }
  0x34   :  { %984 = vmatpush3.bf16.msra.mxu0 %v1081_v58 }
  0x35   :  { %1012 = vmatpush3.bf16.msra.mxu1 %v1082_v59  ;;  %985 = vmatprep.subr.bf16.mxu0 %v1083_v63 }
  0x36   :  { %1013 = vmatprep.subr.bf16.mxu1 %v1084_v1 }
  0x38   :  { %986 = vmatpush3.bf16.msra.mxu0 %v1085_v2 }
  0x39   :  { %1014 = vmatpush3.bf16.msra.mxu1 %v1086_v3  ;;  %987 = vmatprep.subr.bf16.mxu0 %v1087_v8 }
  0x3a   :  { %1015 = vmatprep.subr.bf16.mxu1 %v1088_v9 }
  0x3c   :  { %988 = vmatpush3.bf16.msra.mxu0 %v1089_v10 }
  0x3d   :  { %1016 = vmatpush3.bf16.msra.mxu1 %v1090_v11  ;;  %989 = vmatprep.subr.bf16.mxu0 %v1091_v12 }
  0x3e   :  { %1017 = vmatprep.subr.bf16.mxu1 %v1092_v13 }
  0x40   :  { %990 = vmatpush3.bf16.msra.mxu0 %v1093_v14 }
  0x41   :  { %1018 = vmatpush3.bf16.msra.mxu1 %v1094_v15 }
  0x43   :  { %761 = vmatmul.mubr.bf16.vlgmr.msra.gmra.mrb[8].mxu0 %v843_v20 }
  0x44   :  { %810 = vmatmul.mubr.bf16.vlgmr.msra.gmra.mrb[8].mxu1 %v845_v22  ;;  %768 = vmatprep.mubr.bf16.mxu0 %v852_v27 }
  0x45   :  { %817 = vmatprep.mubr.bf16.mxu1 %v854_v29 }
  0x4b   :  { %769 = vmatmul.mubr.bf16.gmra.mrb[12].mxu0 %v851_v30 }
  0x4c   :  { %818 = vmatmul.mubr.bf16.gmra.mrb[12].mxu1 %v853_v31 }
  0xf6   :  { %v935_v32 = vpop.f32.mrb[0].mxu0 }
  0xf7   :  { %v963_v33 = vpop.f32.mrb[0].mxu1  ;;  %v936_v35 = vpop.f32.mrb[1].mxu0 }
  0xf8   :  { %v937_v36 = vadd.f32 %v936_v35, %v935_v32  ;;  %v964_v37 = vpop.f32.mrb[1].mxu1  ;;  %v938_v38 = vpop.f32.mrb[2].mxu0 }
  0xf9   :  { %v965_v39 = vadd.f32 %v964_v37, %v963_v33  ;;  %v966_v40 = vpop.f32.mrb[2].mxu1  ;;  %v939_v41 = vpop.f32.mrb[3].mxu0 }
  0xfa   :  { %v665_v42 = vadd.f32 %v937_v36, %v838_v34  ;;  %v940_v43 = vadd.f32 %v939_v41, %v938_v38  ;;  %v967_v44 = vpop.f32.mrb[3].mxu1 }
  0xfb   :  { %v968_v45 = vadd.f32 %v967_v44, %v966_v40 }
  0xfc   :  { %v714_v46 = vadd.f32 %v965_v39, %v665_v42  ;;  %v668_v47 = vadd.f32 %v940_v43, %v838_v34 }
  0xfe   :  { %v717_v48 = vadd.f32 %v968_v45, %v668_v47  ;;  %v941_v49 = vpop.f32.mrb[4].mxu0 }
  0xff   :  { %v942_v50 = vpop.f32.mrb[5].mxu0  ;;  %v969_v56 = vpop.f32.mrb[4].mxu1 }
 0x100   :  { %v943_v51 = vadd.f32 %v942_v50, %v941_v49  ;;  %v944_v52 = vpop.f32.mrb[6].mxu0  ;;  %v970_v57 = vpop.f32.mrb[5].mxu1 }
 0x101   :  { %v945_v53 = vpop.f32.mrb[7].mxu0  ;;  %v971_v59 = vadd.f32 %v970_v57, %v969_v56  ;;  %v972_v60 = vpop.f32.mrb[6].mxu1 }
 0x102   :  { %v946_v54 = vadd.f32 %v945_v53, %v944_v52  ;;  %v673_v55 = vadd.f32 %v943_v51, %v838_v34  ;;  %v973_v61 = vpop.f32.mrb[7].mxu1 }
 0x103   :  { %v974_v63 = vadd.f32 %v973_v61, %v972_v60 }
 0x104   :  { %v676_v58 = vadd.f32 %v946_v54, %v838_v34  ;;  %v722_v62 = vadd.f32 %v971_v59, %v673_v55 }
 0x106   :  { %v725_v0 = vadd.f32 %v974_v63, %v676_v58 }
 0x116   :  { %v991_v1 = vpop.f32.mrb[8].mxu0 }
 0x117   :  { %v1019_v2 = vpop.f32.mrb[8].mxu1  ;;  %v992_v3 = vpop.f32.mrb[9].mxu0 }
 0x118   :  { %v1020_v4 = vpop.f32.mrb[9].mxu1  ;;  %v993_v5 = vadd.f32 %v992_v3, %v991_v1  ;;  %v994_v7 = vpop.f32.mrb[10].mxu0 }
 0x119   :  { %v1021_v6 = vadd.f32 %v1020_v4, %v1019_v2  ;;  %v1022_v8 = vpop.f32.mrb[10].mxu1  ;;  %v995_v9 = vpop.f32.mrb[11].mxu0 }
 0x11a   :  { %v1023_v10 = vpop.f32.mrb[11].mxu1  ;;  %v763_v11 = vadd.f32 %v993_v5, %v714_v46  ;;  %v996_v12 = vadd.f32 %v995_v9, %v994_v7 }
 0x11b   :  { %v1024_v13 = vadd.f32 %v1023_v10, %v1022_v8 }
 0x11c   :  { %v812_v14 = vadd.f32 %v1021_v6, %v763_v11  ;;  %v766_v15 = vadd.f32 %v996_v12, %v717_v48 }
 0x11e   :  { %v826_v16 = vmax.f32 %v812_v14, 0.0  ;;  %v815_v17 = vadd.f32 %v1024_v13, %v766_v15  ;;  %v997_v18 = vpop.f32.mrb[12].mxu0 }
 0x11f   :  { %v1025_v19 = vpop.f32.mrb[12].mxu1  ;;  %v998_v20 = vpop.f32.mrb[13].mxu0 }
 0x120   :  { %v1026_v21 = vpop.f32.mrb[13].mxu1  ;;  %830 = vst [vmem:[%s1373_s3] sm:$0xff] %v826_v16  ;;  %v827_v22 = vmax.f32 %v815_v17, 0.0  ;;  %v999_v23 = vadd.f32 %v998_v20, %v997_v18  ;;  %v1000_v25 = vpop.f32.mrb[14].mxu0 }
 0x121   :  { %v1027_v24 = vadd.f32 %v1026_v21, %v1025_v19  ;;  %v1028_v26 = vpop.f32.mrb[14].mxu1  ;;  %v1001_v27 = vpop.f32.mrb[15].mxu0 }
 0x122   :  { %v1029_v28 = vpop.f32.mrb[15].mxu1  ;;  %831 = vst [vmem:[%s1373_s3 + $0x8] sm:$0xff] %v827_v22  ;;  %v771_v29 = vadd.f32 %v999_v23, %v722_v62  ;;  %v1002_v30 = vadd.f32 %v1001_v27, %v1000_v25 }
 0x123   :  { %v1030_v31 = vadd.f32 %v1029_v28, %v1028_v26 }
 0x124   :  { %v820_v32 = vadd.f32 %v1027_v24, %v771_v29  ;;  %v774_v33 = vadd.f32 %v1002_v30, %v725_v0 }
 0x126   :  { %v828_v34 = vmax.f32 %v820_v32, 0.0  ;;  %v823_v35 = vadd.f32 %v1030_v31, %v774_v33 }
 0x128   :  { %832 = vst [vmem:[%s1373_s3 + $0x10] sm:$0xff] %v828_v34  ;;  %v829_v36 = vmax.f32 %v823_v35, 0.0 }
 0x12a   :  { %833 = vst [vmem:[%s1373_s3 + $0x18] sm:$0xff] %v829_v36 }

// kernel: simple_conv64_forward.10
= control target key start
LH: loop header
LB: loop body
LE: loop exit
PB: predicated region body
PF: predicated region fallthrough
CT: control target
= control target key end

     0   :  { %s3519_s1 = inlined_call_operand.vmem [shape: bf16[2048,256], index: 1, kind: input, shape index: {}]   ;;  %s3520_s0 = inlined_call_operand.vmem [shape: bf16[8,2048], index: 0, kind: input, shape index: {}]   ;;  %s3521_s2 = inlined_call_operand.vmem [shape: f32[1,256], index: 2, kind: input, shape index: {}]   ;;  %s3522_s3 = inlined_call_operand.vmem [shape: f32[8,256], index: 3, kind: output, shape index: {}]  }
   0x1   :  { %v2262_v0 = vld [vmem:[%s3519_s1 + $0x4] ss:$8 sps:$4 sm:$0xff]   ;;  %v2266_v2 = vld [vmem:[%s3519_s1] ss:$8 sps:$4 sm:$0xff]   ;;  %v2268_v4 = vld [vmem:[%s3519_s1 + $0x14] ss:$8 sps:$4 sm:$0xff]  }
   0x2   :  { %v2264_v1 = vld [vmem:[%s3519_s1 + $0x404] ss:$8 sps:$4 sm:$0xff]   ;;  %1626 = vmatprep.subr.bf16.mxu1 %v2262_v0  ;;  %v2267_v3 = vld [vmem:[%s3519_s1 + $0x400] ss:$8 sps:$4 sm:$0xff]   ;;  %v2270_v5 = vld [vmem:[%s3519_s1 + $0x414] ss:$8 sps:$4 sm:$0xff]  }
   0x3   :  { %1790 = vmatprep.subr.bf16.mxu0 %v2264_v1  ;;  %1627 = vmatpush1.bf16.msra.mxu1 %v2266_v2  ;;  %v2272_v6 = vld [vmem:[%s3519_s1 + $0x10] ss:$8 sps:$4 sm:$0xff]   ;;  %v2274_v8 = vld [vmem:[%s3519_s1 + $0x24] ss:$8 sps:$4 sm:$0xff]   ;;  %v2278_v10 = vld [vmem:[%s3519_s1 + $0x20] ss:$8 sps:$4 sm:$0xff]  }
   0x4   :  { %1791 = vmatpush1.bf16.msra.mxu0 %v2267_v3  ;;  %1628 = vmatprep.subr.bf16.mxu1 %v2268_v4  ;;  %v2273_v7 = vld [vmem:[%s3519_s1 + $0x410] ss:$8 sps:$4 sm:$0xff]   ;;  %v2276_v9 = vld [vmem:[%s3519_s1 + $0x424] ss:$8 sps:$4 sm:$0xff]   ;;  %v2279_v11 = vld [vmem:[%s3519_s1 + $0x420] ss:$8 sps:$4 sm:$0xff]  }
   0x5   :  { %1792 = vmatprep.subr.bf16.mxu0 %v2270_v5  ;;  %v2280_v12 = vld [vmem:[%s3519_s1 + $0x34] ss:$8 sps:$4 sm:$0xff]   ;;  %v2284_v14 = vld [vmem:[%s3519_s1 + $0x30] ss:$8 sps:$4 sm:$0xff]   ;;  %v2286_v16 = vld [vmem:[%s3519_s1 + $0x44] ss:$8 sps:$4 sm:$0xff]  }
   0x6   :  { %v2282_v13 = vld [vmem:[%s3519_s1 + $0x434] ss:$8 sps:$4 sm:$0xff]   ;;  %v2285_v15 = vld [vmem:[%s3519_s1 + $0x430] ss:$8 sps:$4 sm:$0xff]   ;;  %v2288_v17 = vld [vmem:[%s3519_s1 + $0x444] ss:$8 sps:$4 sm:$0xff]  }
   0x7   :  { %1629 = vmatpush1.bf16.msra.mxu1 %v2272_v6  ;;  %v2290_v18 = vld [vmem:[%s3519_s1 + $0x40] ss:$8 sps:$4 sm:$0xff]   ;;  %v2292_v20 = vld [vmem:[%s3519_s1 + $0x54] ss:$8 sps:$4 sm:$0xff]   ;;  %v2296_v22 = vld [vmem:[%s3519_s1 + $0x50] ss:$8 sps:$4 sm:$0xff]  }
   0x8   :  { %1793 = vmatpush1.bf16.msra.mxu0 %v2273_v7  ;;  %1630 = vmatprep.subr.bf16.mxu1 %v2274_v8  ;;  %v2291_v19 = vld [vmem:[%s3519_s1 + $0x440] ss:$8 sps:$4 sm:$0xff]   ;;  %v2294_v21 = vld [vmem:[%s3519_s1 + $0x454] ss:$8 sps:$4 sm:$0xff]   ;;  %v2297_v23 = vld [vmem:[%s3519_s1 + $0x450] ss:$8 sps:$4 sm:$0xff]  }
   0x9   :  { %1794 = vmatprep.subr.bf16.mxu0 %v2276_v9  ;;  %v2298_v24 = vld [vmem:[%s3519_s1 + $0x64] ss:$8 sps:$4 sm:$0xff]   ;;  %v2302_v26 = vld [vmem:[%s3519_s1 + $0x60] ss:$8 sps:$4 sm:$0xff]   ;;  %v2304_v28 = vld [vmem:[%s3519_s1 + $0x74] ss:$8 sps:$4 sm:$0xff]  }
   0xa   :  { %v2300_v25 = vld [vmem:[%s3519_s1 + $0x464] ss:$8 sps:$4 sm:$0xff]   ;;  %v2303_v27 = vld [vmem:[%s3519_s1 + $0x460] ss:$8 sps:$4 sm:$0xff]   ;;  %v2306_v29 = vld [vmem:[%s3519_s1 + $0x474] ss:$8 sps:$4 sm:$0xff]  }
   0xb   :  { %1631 = vmatpush1.bf16.msra.mxu1 %v2278_v10  ;;  %v2308_v30 = vld [vmem:[%s3519_s1 + $0x70] ss:$8 sps:$4 sm:$0xff]   ;;  %v2310_v32 = vld [vmem:[%s3519_s1 + $0x84] ss:$8 sps:$4 sm:$0xff]   ;;  %v2314_v34 = vld [vmem:[%s3519_s1 + $0x80] ss:$8 sps:$4 sm:$0xff]  }
   0xc   :  { %1795 = vmatpush1.bf16.msra.mxu0 %v2279_v11  ;;  %1632 = vmatprep.subr.bf16.mxu1 %v2280_v12  ;;  %v2309_v31 = vld [vmem:[%s3519_s1 + $0x470] ss:$8 sps:$4 sm:$0xff]   ;;  %v2312_v33 = vld [vmem:[%s3519_s1 + $0x484] ss:$8 sps:$4 sm:$0xff]   ;;  %v2315_v35 = vld [vmem:[%s3519_s1 + $0x480] ss:$8 sps:$4 sm:$0xff]  }
   0xd   :  { %1796 = vmatprep.subr.bf16.mxu0 %v2282_v13  ;;  %v2316_v36 = vld [vmem:[%s3519_s1 + $0x94] ss:$8 sps:$4 sm:$0xff]   ;;  %v2320_v38 = vld [vmem:[%s3519_s1 + $0x90] ss:$8 sps:$4 sm:$0xff]   ;;  %v2322_v40 = vld [vmem:[%s3519_s1 + $0xa4] ss:$8 sps:$4 sm:$0xff]  }
   0xe   :  { %v2318_v37 = vld [vmem:[%s3519_s1 + $0x494] ss:$8 sps:$4 sm:$0xff]   ;;  %v2321_v39 = vld [vmem:[%s3519_s1 + $0x490] ss:$8 sps:$4 sm:$0xff]   ;;  %v2324_v41 = vld [vmem:[%s3519_s1 + $0x4a4] ss:$8 sps:$4 sm:$0xff]  }
   0xf   :  { %1633 = vmatpush1.bf16.msra.mxu1 %v2284_v14  ;;  %v2326_v42 = vld [vmem:[%s3519_s1 + $0xa0] ss:$8 sps:$4 sm:$0xff]   ;;  %v2328_v44 = vld [vmem:[%s3519_s1 + $0xb4] ss:$8 sps:$4 sm:$0xff]   ;;  %v2332_v47 = vld [vmem:[%s3519_s1 + $0xb0] ss:$8 sps:$4 sm:$0xff]  }
  0x10   :  { %1797 = vmatpush1.bf16.msra.mxu0 %v2285_v15  ;;  %1634 = vmatprep.subr.bf16.mxu1 %v2286_v16  ;;  %v2327_v43 = vld [vmem:[%s3519_s1 + $0x4a0] ss:$8 sps:$4 sm:$0xff]   ;;  %v2330_v45 = vld [vmem:[%s3519_s1 + $0x4b4] ss:$8 sps:$4 sm:$0xff]   ;;  %v2333_v49 = vld [vmem:[%s3519_s1 + $0x4b0] ss:$8 sps:$4 sm:$0xff]  }
  0x11   :  { %1798 = vmatprep.subr.bf16.mxu0 %v2288_v17  ;;  %v14_v46 = vld [vmem:[%s3520_s0] sm:$0xff]  ;;  %v2340_v56 = vld [vmem:[%s3519_s1 + $0xd4] ss:$8 sps:$4 sm:$0xff]   ;;  %v2344_v58 = vld [vmem:[%s3519_s1 + $0xd0] ss:$8 sps:$4 sm:$0xff]  }
  0x12   :  { %v1963_v48 = vcombine.high %v14_v46, %v14_v46  ;;  %v18_v50 = vld [vmem:[%s3520_s0 + $0x20] sm:$0xff]  ;;  %v2342_v57 = vld [vmem:[%s3519_s1 + $0x4d4] ss:$8 sps:$4 sm:$0xff]   ;;  %v2345_v59 = vld [vmem:[%s3519_s1 + $0x4d0] ss:$8 sps:$4 sm:$0xff]   ;;  %v1962_v6 = vcombine.low %v14_v46, %v14_v46 }
  0x13   :  { %1635 = vmatpush1.bf16.msra.mxu1 %v2290_v18  ;;  %v2334_v51 = vld [vmem:[%s3519_s1 + $0xc4] ss:$8 sps:$4 sm:$0xff]   ;;  %v1971_v53 = vcombine.high %v18_v50, %v18_v50  ;;  %v2338_v54 = vld [vmem:[%s3519_s1 + $0xc0] ss:$8 sps:$4 sm:$0xff]   ;;  %v2352_v0 = vld [vmem:[%s3519_s1 + $0xf4] ss:$8 sps:$4 sm:$0xff]   ;;  %v1970_v7 = vcombine.low %v18_v50, %v18_v50 }
  0x14   :  { %1799 = vmatpush1.bf16.msra.mxu0 %v2291_v19  ;;  %1636 = vmatprep.subr.bf16.mxu1 %v2292_v20  ;;  %v2336_v52 = vld [vmem:[%s3519_s1 + $0x4c4] ss:$8 sps:$4 sm:$0xff]   ;;  %v2339_v55 = vld [vmem:[%s3519_s1 + $0x4c0] ss:$8 sps:$4 sm:$0xff]   ;;  %v2354_v1 = vld [vmem:[%s3519_s1 + $0x4f4] ss:$8 sps:$4 sm:$0xff]  }
  0x15   :  { %1800 = vmatprep.subr.bf16.mxu0 %v2294_v21  ;;  %1658 = vmatprep.mubr.bf16.mxu1 %v1963_v48  ;;  %v2346_v60 = vld [vmem:[%s3519_s1 + $0xe4] ss:$8 sps:$4 sm:$0xff]   ;;  %v2350_v62 = vld [vmem:[%s3519_s1 + $0xe0] ss:$8 sps:$4 sm:$0xff]   ;;  %v2356_v2 = vld [vmem:[%s3519_s1 + $0xf0] ss:$8 sps:$4 sm:$0xff]  }
  0x16   :  { %1822 = vmatprep.mubr.bf16.mxu0 %v1971_v53  ;;  %v2348_v61 = vld [vmem:[%s3519_s1 + $0x4e4] ss:$8 sps:$4 sm:$0xff]   ;;  %v2351_v63 = vld [vmem:[%s3519_s1 + $0x4e0] ss:$8 sps:$4 sm:$0xff]   ;;  %v2357_v3 = vld [vmem:[%s3519_s1 + $0x4f0] ss:$8 sps:$4 sm:$0xff]  }
  0x17   :  { %1637 = vmatpush1.bf16.msra.mxu1 %v2296_v22  ;;  %v2362_v4 = vld [vmem:[%s3519_s1 + $0x104] ss:$8 sps:$4 sm:$0xff]   ;;  %v2360_v8 = vld [vmem:[%s3519_s1 + $0x100] ss:$8 sps:$4 sm:$0xff]   ;;  %v2370_v10 = vld [vmem:[%s3519_s1 + $0x114] ss:$8 sps:$4 sm:$0xff]  }
  0x18   :  { %1801 = vmatpush1.bf16.msra.mxu0 %v2297_v23  ;;  %1638 = vmatprep.subr.bf16.mxu1 %v2298_v24  ;;  %v2367_v5 = vld [vmem:[%s3519_s1 + $0x504] ss:$8 sps:$4 sm:$0xff]   ;;  %v2365_v9 = vld [vmem:[%s3519_s1 + $0x500] ss:$8 sps:$4 sm:$0xff]   ;;  %v2373_v11 = vld [vmem:[%s3519_s1 + $0x514] ss:$8 sps:$4 sm:$0xff]  }
  0x19   :  { %1802 = vmatprep.subr.bf16.mxu0 %v2300_v25  ;;  %v2368_v12 = vld [vmem:[%s3519_s1 + $0x110] ss:$8 sps:$4 sm:$0xff]   ;;  %v2376_v14 = vld [vmem:[%s3519_s1 + $0x124] ss:$8 sps:$4 sm:$0xff]   ;;  %v2374_v16 = vld [vmem:[%s3519_s1 + $0x120] ss:$8 sps:$4 sm:$0xff]  }
  0x1a   :  { %v2371_v13 = vld [vmem:[%s3519_s1 + $0x510] ss:$8 sps:$4 sm:$0xff]   ;;  %v2379_v15 = vld [vmem:[%s3519_s1 + $0x524] ss:$8 sps:$4 sm:$0xff]   ;;  %v2377_v17 = vld [vmem:[%s3519_s1 + $0x520] ss:$8 sps:$4 sm:$0xff]  }
  0x1b   :  { %1639 = vmatpush1.bf16.msra.mxu1 %v2302_v26  ;;  %v2382_v18 = vld [vmem:[%s3519_s1 + $0x134] ss:$8 sps:$4 sm:$0xff]   ;;  %v2380_v20 = vld [vmem:[%s3519_s1 + $0x130] ss:$8 sps:$4 sm:$0xff]   ;;  %v2388_v22 = vld [vmem:[%s3519_s1 + $0x144] ss:$8 sps:$4 sm:$0xff]  }
  0x1c   :  { %1803 = vmatpush1.bf16.msra.mxu0 %v2303_v27  ;;  %1640 = vmatprep.subr.bf16.mxu1 %v2304_v28  ;;  %v2385_v19 = vld [vmem:[%s3519_s1 + $0x534] ss:$8 sps:$4 sm:$0xff]   ;;  %v2383_v21 = vld [vmem:[%s3519_s1 + $0x530] ss:$8 sps:$4 sm:$0xff]   ;;  %v2391_v23 = vld [vmem:[%s3519_s1 + $0x544] ss:$8 sps:$4 sm:$0xff]  }
  0x1d   :  { %1804 = vmatprep.subr.bf16.mxu0 %v2306_v29  ;;  %v2386_v24 = vld [vmem:[%s3519_s1 + $0x140] ss:$8 sps:$4 sm:$0xff]   ;;  %v2394_v26 = vld [vmem:[%s3519_s1 + $0x154] ss:$8 sps:$4 sm:$0xff]   ;;  %v2392_v28 = vld [vmem:[%s3519_s1 + $0x150] ss:$8 sps:$4 sm:$0xff]  }
  0x1e   :  { %v2389_v25 = vld [vmem:[%s3519_s1 + $0x540] ss:$8 sps:$4 sm:$0xff]   ;;  %v2397_v27 = vld [vmem:[%s3519_s1 + $0x554] ss:$8 sps:$4 sm:$0xff]   ;;  %v2395_v29 = vld [vmem:[%s3519_s1 + $0x550] ss:$8 sps:$4 sm:$0xff]  }
  0x1f   :  { %1641 = vmatpush1.bf16.msra.mxu1 %v2308_v30  ;;  %v2400_v30 = vld [vmem:[%s3519_s1 + $0x164] ss:$8 sps:$4 sm:$0xff]   ;;  %v2418_v46 = vld [vmem:[%s3519_s1 + $0x194] ss:$8 sps:$4 sm:$0xff]   ;;  %v2416_v48 = vld [vmem:[%s3519_s1 + $0x190] ss:$8 sps:$4 sm:$0xff]  }
  0x20   :  { %1805 = vmatpush1.bf16.msra.mxu0 %v2309_v31  ;;  %1642 = vmatprep.subr.bf16.mxu1 %v2310_v32  ;;  %v2403_v31 = vld [vmem:[%s3519_s1 + $0x564] ss:$8 sps:$4 sm:$0xff]   ;;  %v2425_v53 = vld [vmem:[%s3519_s1 + $0x5a0] ss:$8 sps:$4 sm:$0xff]  }
  0x21   :  { %1806 = vmatprep.subr.bf16.mxu0 %v2312_v33  ;;  %v2961_v32 = vld [vmem:[%s3520_s0 + $0x8] sm:$0xff] }
  0x22   :  { %v2398_v33 = vld [vmem:[%s3519_s1 + $0x160] ss:$8 sps:$4 sm:$0xff]   ;;  %v2424_v50 = vld [vmem:[%s3519_s1 + $0x1a4] ss:$8 sps:$4 sm:$0xff]  }
  0x23   :  { %1643 = vmatpush1.bf16.msra.mxu1 %v2314_v34  ;;  %v2401_v34 = vld [vmem:[%s3519_s1 + $0x560] ss:$8 sps:$4 sm:$0xff]  }
  0x24   :  { %1807 = vmatpush1.bf16.msra.mxu0 %v2315_v35  ;;  %1644 = vmatprep.subr.bf16.mxu1 %v2316_v36  ;;  %v1965_v35 = vcombine.high %v2961_v32, %v2961_v32  ;;  %v2974_v36 = vld [vmem:[%s3520_s0 + $0x28] sm:$0xff] }
  0x25   :  { %1808 = vmatprep.subr.bf16.mxu0 %v2318_v37  ;;  %v2406_v37 = vld [vmem:[%s3519_s1 + $0x174] ss:$8 sps:$4 sm:$0xff]  }
  0x27   :  { %1645 = vmatpush1.bf16.msra.mxu1 %v2320_v38  ;;  %v1973_v38 = vcombine.high %v2974_v36, %v2974_v36 }
  0x28   :  { %1809 = vmatpush1.bf16.msra.mxu0 %v2321_v39  ;;  %1646 = vmatprep.subr.bf16.mxu1 %v2322_v40  ;;  %v2409_v39 = vld [vmem:[%s3519_s1 + $0x574] ss:$8 sps:$4 sm:$0xff]   ;;  %v2404_v40 = vld [vmem:[%s3519_s1 + $0x170] ss:$8 sps:$4 sm:$0xff]  }
  0x29   :  { %1810 = vmatprep.subr.bf16.mxu0 %v2324_v41  ;;  %v2407_v41 = vld [vmem:[%s3519_s1 + $0x570] ss:$8 sps:$4 sm:$0xff]  }
  0x2b   :  { %1647 = vmatpush1.bf16.msra.mxu1 %v2326_v42  ;;  %v2412_v42 = vld [vmem:[%s3519_s1 + $0x184] ss:$8 sps:$4 sm:$0xff]  }
  0x2c   :  { %1811 = vmatpush1.bf16.msra.mxu0 %v2327_v43  ;;  %1648 = vmatprep.subr.bf16.mxu1 %v2328_v44  ;;  %v2415_v43 = vld [vmem:[%s3519_s1 + $0x584] ss:$8 sps:$4 sm:$0xff]   ;;  %v2410_v44 = vld [vmem:[%s3519_s1 + $0x180] ss:$8 sps:$4 sm:$0xff]  }
  0x2d   :  { %1812 = vmatprep.subr.bf16.mxu0 %v2330_v45  ;;  %v2413_v45 = vld [vmem:[%s3519_s1 + $0x580] ss:$8 sps:$4 sm:$0xff]  }
  0x2f   :  { %1649 = vmatpush1.bf16.msra.mxu1 %v2332_v47  ;;  %v2421_v47 = vld [vmem:[%s3519_s1 + $0x594] ss:$8 sps:$4 sm:$0xff]  }
  0x30   :  { %1813 = vmatpush1.bf16.msra.mxu0 %v2333_v49  ;;  %1650 = vmatprep.subr.bf16.mxu1 %v2334_v51  ;;  %v2419_v49 = vld [vmem:[%s3519_s1 + $0x590] ss:$8 sps:$4 sm:$0xff]   ;;  %v2427_v51 = vld [vmem:[%s3519_s1 + $0x5a4] ss:$8 sps:$4 sm:$0xff]  }
  0x31   :  { %1814 = vmatprep.subr.bf16.mxu0 %v2336_v52  ;;  %v2422_v52 = vld [vmem:[%s3519_s1 + $0x1a0] ss:$8 sps:$4 sm:$0xff]  }
  0x33   :  { %1651 = vmatpush1.bf16.msra.mxu1 %v2338_v54  ;;  %v2430_v54 = vld [vmem:[%s3519_s1 + $0x1b4] ss:$8 sps:$4 sm:$0xff]  }
  0x34   :  { %1815 = vmatpush1.bf16.msra.mxu0 %v2339_v55  ;;  %1652 = vmatprep.subr.bf16.mxu1 %v2340_v56  ;;  %v2433_v55 = vld [vmem:[%s3519_s1 + $0x5b4] ss:$8 sps:$4 sm:$0xff]   ;;  %v2428_v56 = vld [vmem:[%s3519_s1 + $0x1b0] ss:$8 sps:$4 sm:$0xff]  }
  0x35   :  { %1816 = vmatprep.subr.bf16.mxu0 %v2342_v57  ;;  %v2431_v57 = vld [vmem:[%s3519_s1 + $0x5b0] ss:$8 sps:$4 sm:$0xff]  }
  0x37   :  { %1653 = vmatpush1.bf16.msra.mxu1 %v2344_v58  ;;  %v2436_v58 = vld [vmem:[%s3519_s1 + $0x1c4] ss:$8 sps:$4 sm:$0xff]  }
  0x38   :  { %1817 = vmatpush1.bf16.msra.mxu0 %v2345_v59  ;;  %1654 = vmatprep.subr.bf16.mxu1 %v2346_v60  ;;  %v2439_v59 = vld [vmem:[%s3519_s1 + $0x5c4] ss:$8 sps:$4 sm:$0xff]   ;;  %v2434_v60 = vld [vmem:[%s3519_s1 + $0x1c0] ss:$8 sps:$4 sm:$0xff]  }
  0x39   :  { %1818 = vmatprep.subr.bf16.mxu0 %v2348_v61  ;;  %v2437_v61 = vld [vmem:[%s3519_s1 + $0x5c0] ss:$8 sps:$4 sm:$0xff]  }
  0x3b   :  { %1655 = vmatpush1.bf16.msra.mxu1 %v2350_v62  ;;  %v2442_v62 = vld [vmem:[%s3519_s1 + $0x1d4] ss:$8 sps:$4 sm:$0xff]  }
  0x3c   :  { %1819 = vmatpush1.bf16.msra.mxu0 %v2351_v63  ;;  %1656 = vmatprep.subr.bf16.mxu1 %v2352_v0  ;;  %v2445_v63 = vld [vmem:[%s3519_s1 + $0x5d4] ss:$8 sps:$4 sm:$0xff]   ;;  %v2440_v0 = vld [vmem:[%s3519_s1 + $0x1d0] ss:$8 sps:$4 sm:$0xff]  }
  0x3d   :  { %1820 = vmatprep.subr.bf16.mxu0 %v2354_v1  ;;  %v2443_v1 = vld [vmem:[%s3519_s1 + $0x5d0] ss:$8 sps:$4 sm:$0xff]  }
  0x3f   :  { %1657 = vmatpush1.bf16.msra.mxu1 %v2356_v2  ;;  %v2448_v2 = vld [vmem:[%s3519_s1 + $0x1e4] ss:$8 sps:$4 sm:$0xff]  }
  0x40   :  { %1821 = vmatpush1.bf16.msra.mxu0 %v2357_v3  ;;  %1667 = vmatprep.subr.bf16.mxu1 %v2362_v4  ;;  %v2451_v3 = vld [vmem:[%s3519_s1 + $0x5e4] ss:$8 sps:$4 sm:$0xff]   ;;  %v2446_v4 = vld [vmem:[%s3519_s1 + $0x1e0] ss:$8 sps:$4 sm:$0xff]  }
  0x41   :  { %1831 = vmatprep.subr.bf16.mxu0 %v2367_v5  ;;  %v2449_v5 = vld [vmem:[%s3519_s1 + $0x5e0] ss:$8 sps:$4 sm:$0xff]  }
  0x42   :  { %1659 = vmatmul.mubr.bf16.vlgmr.msra.gmra.mrb[0].mxu1 %v1962_v6  ;;  %v2454_v6 = vld [vmem:[%s3519_s1 + $0x1f4] ss:$8 sps:$4 sm:$0xff]  }
  0x43   :  { %1823 = vmatmul.mubr.bf16.vlgmr.msra.gmra.mrb[0].mxu0 %v1970_v7  ;;  %1668 = vmatpush1.bf16.msra.mxu1 %v2360_v8  ;;  %v2457_v7 = vld [vmem:[%s3519_s1 + $0x5f4] ss:$8 sps:$4 sm:$0xff]   ;;  %v2452_v8 = vld [vmem:[%s3519_s1 + $0x1f0] ss:$8 sps:$4 sm:$0xff]  }
  0x44   :  { %1832 = vmatpush1.bf16.msra.mxu0 %v2365_v9  ;;  %1669 = vmatprep.subr.bf16.mxu1 %v2370_v10  ;;  %v2455_v9 = vld [vmem:[%s3519_s1 + $0x5f0] ss:$8 sps:$4 sm:$0xff]   ;;  %v2462_v10 = vld [vmem:[%s3519_s1 + $0x204] ss:$8 sps:$4 sm:$0xff]  }
  0x45   :  { %1833 = vmatprep.subr.bf16.mxu0 %v2373_v11  ;;  %1699 = vmatprep.mubr.bf16.mxu1 %v1965_v35  ;;  %v2467_v11 = vld [vmem:[%s3519_s1 + $0x604] ss:$8 sps:$4 sm:$0xff]   ;;  %v2489_v35 = vld [vmem:[%s3519_s1 + $0x640] ss:$8 sps:$4 sm:$0xff]  }
  0x46   :  { %1863 = vmatprep.mubr.bf16.mxu0 %v1973_v38  ;;  %v2492_v38 = vld [vmem:[%s3519_s1 + $0x250] ss:$8 sps:$4 sm:$0xff]  }
  0x47   :  { %1670 = vmatpush1.bf16.msra.mxu1 %v2368_v12  ;;  %v1964_v12 = vcombine.low %v2961_v32, %v2961_v32  ;;  %v2488_v32 = vld [vmem:[%s3519_s1 + $0x244] ss:$8 sps:$4 sm:$0xff]  }
  0x48   :  { %1834 = vmatpush1.bf16.msra.mxu0 %v2371_v13  ;;  %1671 = vmatprep.subr.bf16.mxu1 %v2376_v14  ;;  %v2460_v13 = vld [vmem:[%s3519_s1 + $0x200] ss:$8 sps:$4 sm:$0xff]   ;;  %v1972_v14 = vcombine.low %v2974_v36, %v2974_v36  ;;  %v2494_v36 = vld [vmem:[%s3519_s1 + $0x254] ss:$8 sps:$4 sm:$0xff]  }
  0x49   :  { %1835 = vmatprep.subr.bf16.mxu0 %v2379_v15  ;;  %v2465_v15 = vld [vmem:[%s3519_s1 + $0x600] ss:$8 sps:$4 sm:$0xff]  }
  0x4b   :  { %1672 = vmatpush1.bf16.msra.mxu1 %v2374_v16  ;;  %v2470_v16 = vld [vmem:[%s3519_s1 + $0x214] ss:$8 sps:$4 sm:$0xff]  }
  0x4c   :  { %1836 = vmatpush1.bf16.msra.mxu0 %v2377_v17  ;;  %1673 = vmatprep.subr.bf16.mxu1 %v2382_v18  ;;  %v2473_v17 = vld [vmem:[%s3519_s1 + $0x614] ss:$8 sps:$4 sm:$0xff]  }
  0x4d   :  { %1837 = vmatprep.subr.bf16.mxu0 %v2385_v19  ;;  %v3111_v18 = vld [vmem:[%s3520_s0 + $0x10] sm:$0xff] }
  0x4e   :  { %v1967_v19 = vcombine.high %v3111_v18, %v3111_v18 }
  0x4f   :  { %1674 = vmatpush1.bf16.msra.mxu1 %v2380_v20  ;;  %v3118_v20 = vld [vmem:[%s3520_s0 + $0x30] sm:$0xff] }
  0x50   :  { %1838 = vmatpush1.bf16.msra.mxu0 %v2383_v21  ;;  %1675 = vmatprep.subr.bf16.mxu1 %v2388_v22  ;;  %v2468_v21 = vld [vmem:[%s3519_s1 + $0x210] ss:$8 sps:$4 sm:$0xff]  }
  0x51   :  { %1839 = vmatprep.subr.bf16.mxu0 %v2391_v23  ;;  %v2471_v22 = vld [vmem:[%s3519_s1 + $0x610] ss:$8 sps:$4 sm:$0xff]   ;;  %v1975_v23 = vcombine.high %v3118_v20, %v3118_v20 }
  0x53   :  { %1676 = vmatpush1.bf16.msra.mxu1 %v2386_v24  ;;  %v2476_v24 = vld [vmem:[%s3519_s1 + $0x224] ss:$8 sps:$4 sm:$0xff]  }
  0x54   :  { %1840 = vmatpush1.bf16.msra.mxu0 %v2389_v25  ;;  %1677 = vmatprep.subr.bf16.mxu1 %v2394_v26  ;;  %v2479_v25 = vld [vmem:[%s3519_s1 + $0x624] ss:$8 sps:$4 sm:$0xff]   ;;  %v2474_v26 = vld [vmem:[%s3519_s1 + $0x220] ss:$8 sps:$4 sm:$0xff]  }
  0x55   :  { %1841 = vmatprep.subr.bf16.mxu0 %v2397_v27  ;;  %v2477_v27 = vld [vmem:[%s3519_s1 + $0x620] ss:$8 sps:$4 sm:$0xff]  }
  0x57   :  { %1678 = vmatpush1.bf16.msra.mxu1 %v2392_v28  ;;  %v2482_v28 = vld [vmem:[%s3519_s1 + $0x234] ss:$8 sps:$4 sm:$0xff]  }
  0x58   :  { %1842 = vmatpush1.bf16.msra.mxu0 %v2395_v29  ;;  %1679 = vmatprep.subr.bf16.mxu1 %v2400_v30  ;;  %v2485_v29 = vld [vmem:[%s3519_s1 + $0x634] ss:$8 sps:$4 sm:$0xff]   ;;  %v2480_v30 = vld [vmem:[%s3519_s1 + $0x230] ss:$8 sps:$4 sm:$0xff]  }
  0x59   :  { %1843 = vmatprep.subr.bf16.mxu0 %v2403_v31  ;;  %v2483_v31 = vld [vmem:[%s3519_s1 + $0x630] ss:$8 sps:$4 sm:$0xff]  }
  0x5b   :  { %1680 = vmatpush1.bf16.msra.mxu1 %v2398_v33  ;;  %v2491_v33 = vld [vmem:[%s3519_s1 + $0x644] ss:$8 sps:$4 sm:$0xff]  }
  0x5c   :  { %1844 = vmatpush1.bf16.msra.mxu0 %v2401_v34  ;;  %1681 = vmatprep.subr.bf16.mxu1 %v2406_v37  ;;  %v2486_v34 = vld [vmem:[%s3519_s1 + $0x240] ss:$8 sps:$4 sm:$0xff]   ;;  %v2497_v37 = vld [vmem:[%s3519_s1 + $0x654] ss:$8 sps:$4 sm:$0xff]  }
  0x5d   :  { %1845 = vmatprep.subr.bf16.mxu0 %v2409_v39  ;;  %v2495_v39 = vld [vmem:[%s3519_s1 + $0x650] ss:$8 sps:$4 sm:$0xff]  }
  0x5f   :  { %1682 = vmatpush1.bf16.msra.mxu1 %v2404_v40  ;;  %v2500_v40 = vld [vmem:[%s3519_s1 + $0x264] ss:$8 sps:$4 sm:$0xff]  }
  0x60   :  { %1846 = vmatpush1.bf16.msra.mxu0 %v2407_v41  ;;  %1683 = vmatprep.subr.bf16.mxu1 %v2412_v42  ;;  %v2503_v41 = vld [vmem:[%s3519_s1 + $0x664] ss:$8 sps:$4 sm:$0xff]   ;;  %v2498_v42 = vld [vmem:[%s3519_s1 + $0x260] ss:$8 sps:$4 sm:$0xff]  }
  0x61   :  { %1847 = vmatprep.subr.bf16.mxu0 %v2415_v43  ;;  %v2501_v43 = vld [vmem:[%s3519_s1 + $0x660] ss:$8 sps:$4 sm:$0xff]  }
  0x63   :  { %1684 = vmatpush1.bf16.msra.mxu1 %v2410_v44  ;;  %v2506_v44 = vld [vmem:[%s3519_s1 + $0x274] ss:$8 sps:$4 sm:$0xff]  }
  0x64   :  { %1848 = vmatpush1.bf16.msra.mxu0 %v2413_v45  ;;  %1685 = vmatprep.subr.bf16.mxu1 %v2418_v46  ;;  %v2509_v45 = vld [vmem:[%s3519_s1 + $0x674] ss:$8 sps:$4 sm:$0xff]   ;;  %v2504_v46 = vld [vmem:[%s3519_s1 + $0x270] ss:$8 sps:$4 sm:$0xff]  }
  0x65   :  { %1849 = vmatprep.subr.bf16.mxu0 %v2421_v47  ;;  %v2507_v47 = vld [vmem:[%s3519_s1 + $0x670] ss:$8 sps:$4 sm:$0xff]  }
  0x67   :  { %1686 = vmatpush1.bf16.msra.mxu1 %v2416_v48  ;;  %v2512_v48 = vld [vmem:[%s3519_s1 + $0x284] ss:$8 sps:$4 sm:$0xff]  }
  0x68   :  { %1850 = vmatpush1.bf16.msra.mxu0 %v2419_v49  ;;  %1687 = vmatprep.subr.bf16.mxu1 %v2424_v50  ;;  %v2515_v49 = vld [vmem:[%s3519_s1 + $0x684] ss:$8 sps:$4 sm:$0xff]   ;;  %v2510_v50 = vld [vmem:[%s3519_s1 + $0x280] ss:$8 sps:$4 sm:$0xff]  }
  0x69   :  { %1851 = vmatprep.subr.bf16.mxu0 %v2427_v51  ;;  %v2513_v51 = vld [vmem:[%s3519_s1 + $0x680] ss:$8 sps:$4 sm:$0xff]  }
  0x6b   :  { %1688 = vmatpush1.bf16.msra.mxu1 %v2422_v52  ;;  %v2518_v52 = vld [vmem:[%s3519_s1 + $0x294] ss:$8 sps:$4 sm:$0xff]  }
  0x6c   :  { %1852 = vmatpush1.bf16.msra.mxu0 %v2425_v53  ;;  %1689 = vmatprep.subr.bf16.mxu1 %v2430_v54  ;;  %v2521_v53 = vld [vmem:[%s3519_s1 + $0x694] ss:$8 sps:$4 sm:$0xff]   ;;  %v2516_v54 = vld [vmem:[%s3519_s1 + $0x290] ss:$8 sps:$4 sm:$0xff]  }
  0x6d   :  { %1853 = vmatprep.subr.bf16.mxu0 %v2433_v55  ;;  %v2519_v55 = vld [vmem:[%s3519_s1 + $0x690] ss:$8 sps:$4 sm:$0xff]  }
  0x6f   :  { %1690 = vmatpush1.bf16.msra.mxu1 %v2428_v56  ;;  %v2524_v56 = vld [vmem:[%s3519_s1 + $0x2a4] ss:$8 sps:$4 sm:$0xff]  }
  0x70   :  { %1854 = vmatpush1.bf16.msra.mxu0 %v2431_v57  ;;  %1691 = vmatprep.subr.bf16.mxu1 %v2436_v58  ;;  %v2527_v57 = vld [vmem:[%s3519_s1 + $0x6a4] ss:$8 sps:$4 sm:$0xff]   ;;  %v2522_v58 = vld [vmem:[%s3519_s1 + $0x2a0] ss:$8 sps:$4 sm:$0xff]  }
  0x71   :  { %1855 = vmatprep.subr.bf16.mxu0 %v2439_v59  ;;  %v2525_v59 = vld [vmem:[%s3519_s1 + $0x6a0] ss:$8 sps:$4 sm:$0xff]  }
  0x73   :  { %1692 = vmatpush1.bf16.msra.mxu1 %v2434_v60  ;;  %v2530_v60 = vld [vmem:[%s3519_s1 + $0x2b4] ss:$8 sps:$4 sm:$0xff]  }
  0x74   :  { %1856 = vmatpush1.bf16.msra.mxu0 %v2437_v61  ;;  %1693 = vmatprep.subr.bf16.mxu1 %v2442_v62  ;;  %v2533_v61 = vld [vmem:[%s3519_s1 + $0x6b4] ss:$8 sps:$4 sm:$0xff]   ;;  %v2528_v62 = vld [vmem:[%s3519_s1 + $0x2b0] ss:$8 sps:$4 sm:$0xff]  }
  0x75   :  { %1857 = vmatprep.subr.bf16.mxu0 %v2445_v63  ;;  %v2531_v63 = vld [vmem:[%s3519_s1 + $0x6b0] ss:$8 sps:$4 sm:$0xff]  }
  0x77   :  { %1694 = vmatpush1.bf16.msra.mxu1 %v2440_v0  ;;  %v2536_v0 = vld [vmem:[%s3519_s1 + $0x2c4] ss:$8 sps:$4 sm:$0xff]  }
  0x78   :  { %1858 = vmatpush1.bf16.msra.mxu0 %v2443_v1  ;;  %1695 = vmatprep.subr.bf16.mxu1 %v2448_v2  ;;  %v2539_v1 = vld [vmem:[%s3519_s1 + $0x6c4] ss:$8 sps:$4 sm:$0xff]   ;;  %v2534_v2 = vld [vmem:[%s3519_s1 + $0x2c0] ss:$8 sps:$4 sm:$0xff]  }
  0x79   :  { %1859 = vmatprep.subr.bf16.mxu0 %v2451_v3  ;;  %v2537_v3 = vld [vmem:[%s3519_s1 + $0x6c0] ss:$8 sps:$4 sm:$0xff]  }
  0x7b   :  { %1696 = vmatpush1.bf16.msra.mxu1 %v2446_v4  ;;  %v2542_v4 = vld [vmem:[%s3519_s1 + $0x2d4] ss:$8 sps:$4 sm:$0xff]  }
  0x7c   :  { %1860 = vmatpush1.bf16.msra.mxu0 %v2449_v5  ;;  %1697 = vmatprep.subr.bf16.mxu1 %v2454_v6  ;;  %v2545_v5 = vld [vmem:[%s3519_s1 + $0x6d4] ss:$8 sps:$4 sm:$0xff]   ;;  %v2540_v6 = vld [vmem:[%s3519_s1 + $0x2d0] ss:$8 sps:$4 sm:$0xff]  }
  0x7d   :  { %1861 = vmatprep.subr.bf16.mxu0 %v2457_v7  ;;  %v2543_v7 = vld [vmem:[%s3519_s1 + $0x6d0] ss:$8 sps:$4 sm:$0xff]  }
  0x7f   :  { %1698 = vmatpush1.bf16.msra.mxu1 %v2452_v8  ;;  %v2548_v8 = vld [vmem:[%s3519_s1 + $0x2e4] ss:$8 sps:$4 sm:$0xff]  }
  0x80   :  { %1862 = vmatpush1.bf16.msra.mxu0 %v2455_v9  ;;  %1708 = vmatprep.subr.bf16.mxu1 %v2462_v10  ;;  %v2551_v9 = vld [vmem:[%s3519_s1 + $0x6e4] ss:$8 sps:$4 sm:$0xff]   ;;  %v2546_v10 = vld [vmem:[%s3519_s1 + $0x2e0] ss:$8 sps:$4 sm:$0xff]  }
  0x81   :  { %1872 = vmatprep.subr.bf16.mxu0 %v2467_v11  ;;  %v2549_v11 = vld [vmem:[%s3519_s1 + $0x6e0] ss:$8 sps:$4 sm:$0xff]  }
  0x82   :  { %1700 = vmatmul.mubr.bf16.vlgmr.msra.gmra.mrb[0].mxu1 %v1964_v12  ;;  %v2554_v12 = vld [vmem:[%s3519_s1 + $0x2f4] ss:$8 sps:$4 sm:$0xff]  }
  0x83   :  { %1864 = vmatmul.mubr.bf16.vlgmr.msra.gmra.mrb[0].mxu0 %v1972_v14  ;;  %1709 = vmatpush1.bf16.msra.mxu1 %v2460_v13  ;;  %v2557_v13 = vld [vmem:[%s3519_s1 + $0x6f4] ss:$8 sps:$4 sm:$0xff]   ;;  %v2552_v14 = vld [vmem:[%s3519_s1 + $0x2f0] ss:$8 sps:$4 sm:$0xff]  }
  0x84   :  { %1873 = vmatpush1.bf16.msra.mxu0 %v2465_v15  ;;  %1710 = vmatprep.subr.bf16.mxu1 %v2470_v16  ;;  %v2555_v15 = vld [vmem:[%s3519_s1 + $0x6f0] ss:$8 sps:$4 sm:$0xff]   ;;  %v2562_v16 = vld [vmem:[%s3519_s1 + $0x304] ss:$8 sps:$4 sm:$0xff]  }
  0x85   :  { %1874 = vmatprep.subr.bf16.mxu0 %v2473_v17  ;;  %1740 = vmatprep.mubr.bf16.mxu1 %v1967_v19  ;;  %v2567_v17 = vld [vmem:[%s3519_s1 + $0x704] ss:$8 sps:$4 sm:$0xff]   ;;  %v1966_v19 = vcombine.low %v3111_v18, %v3111_v18  ;;  %v2565_v18 = vld [vmem:[%s3519_s1 + $0x700] ss:$8 sps:$4 sm:$0xff]  }
  0x86   :  { %1904 = vmatprep.mubr.bf16.mxu0 %v1975_v23  ;;  %v3314_v23 = vld [vmem:[%s3520_s0 + $0x38] sm:$0xff] }
  0x87   :  { %1711 = vmatpush1.bf16.msra.mxu1 %v2468_v21  ;;  %v1974_v21 = vcombine.low %v3118_v20, %v3118_v20  ;;  %v2570_v20 = vld [vmem:[%s3519_s1 + $0x314] ss:$8 sps:$4 sm:$0xff]  }
  0x88   :  { %1875 = vmatpush1.bf16.msra.mxu0 %v2471_v22  ;;  %1712 = vmatprep.subr.bf16.mxu1 %v2476_v24  ;;  %v3309_v22 = vld [vmem:[%s3520_s0 + $0x18] sm:$0xff]  ;;  %v2560_v24 = vld [vmem:[%s3519_s1 + $0x300] ss:$8 sps:$4 sm:$0xff]  }
  0x89   :  { %1876 = vmatprep.subr.bf16.mxu0 %v2479_v25  ;;  %v2573_v25 = vld [vmem:[%s3519_s1 + $0x714] ss:$8 sps:$4 sm:$0xff]  }
  0x8b   :  { %1713 = vmatpush1.bf16.msra.mxu1 %v2474_v26  ;;  %v1969_v26 = vcombine.high %v3309_v22, %v3309_v22 }
  0x8c   :  { %1877 = vmatpush1.bf16.msra.mxu0 %v2477_v27  ;;  %1714 = vmatprep.subr.bf16.mxu1 %v2482_v28  ;;  %v1977_v27 = vcombine.high %v3314_v23, %v3314_v23  ;;  %v2568_v28 = vld [vmem:[%s3519_s1 + $0x310] ss:$8 sps:$4 sm:$0xff]  }
  0x8d   :  { %1878 = vmatprep.subr.bf16.mxu0 %v2485_v29  ;;  %v2571_v29 = vld [vmem:[%s3519_s1 + $0x710] ss:$8 sps:$4 sm:$0xff]  }
  0x8f   :  { %1715 = vmatpush1.bf16.msra.mxu1 %v2480_v30  ;;  %v2576_v30 = vld [vmem:[%s3519_s1 + $0x324] ss:$8 sps:$4 sm:$0xff]  }
  0x90   :  { %1879 = vmatpush1.bf16.msra.mxu0 %v2483_v31  ;;  %1716 = vmatprep.subr.bf16.mxu1 %v2488_v32  ;;  %v2579_v31 = vld [vmem:[%s3519_s1 + $0x724] ss:$8 sps:$4 sm:$0xff]   ;;  %v2574_v32 = vld [vmem:[%s3519_s1 + $0x320] ss:$8 sps:$4 sm:$0xff]  }
  0x91   :  { %1880 = vmatprep.subr.bf16.mxu0 %v2491_v33  ;;  %v2577_v33 = vld [vmem:[%s3519_s1 + $0x720] ss:$8 sps:$4 sm:$0xff]  }
  0x93   :  { %1717 = vmatpush1.bf16.msra.mxu1 %v2486_v34  ;;  %v2582_v34 = vld [vmem:[%s3519_s1 + $0x334] ss:$8 sps:$4 sm:$0xff]  }
  0x94   :  { %1881 = vmatpush1.bf16.msra.mxu0 %v2489_v35  ;;  %1718 = vmatprep.subr.bf16.mxu1 %v2494_v36  ;;  %v2585_v35 = vld [vmem:[%s3519_s1 + $0x734] ss:$8 sps:$4 sm:$0xff]   ;;  %v2580_v36 = vld [vmem:[%s3519_s1 + $0x330] ss:$8 sps:$4 sm:$0xff]  }
  0x95   :  { %1882 = vmatprep.subr.bf16.mxu0 %v2497_v37  ;;  %v2583_v37 = vld [vmem:[%s3519_s1 + $0x730] ss:$8 sps:$4 sm:$0xff]  }
  0x97   :  { %1719 = vmatpush1.bf16.msra.mxu1 %v2492_v38  ;;  %v2588_v38 = vld [vmem:[%s3519_s1 + $0x344] ss:$8 sps:$4 sm:$0xff]  }
  0x98   :  { %1883 = vmatpush1.bf16.msra.mxu0 %v2495_v39  ;;  %1720 = vmatprep.subr.bf16.mxu1 %v2500_v40  ;;  %v2591_v39 = vld [vmem:[%s3519_s1 + $0x744] ss:$8 sps:$4 sm:$0xff]   ;;  %v2586_v40 = vld [vmem:[%s3519_s1 + $0x340] ss:$8 sps:$4 sm:$0xff]  }
  0x99   :  { %1884 = vmatprep.subr.bf16.mxu0 %v2503_v41  ;;  %v2589_v41 = vld [vmem:[%s3519_s1 + $0x740] ss:$8 sps:$4 sm:$0xff]  }
  0x9b   :  { %1721 = vmatpush1.bf16.msra.mxu1 %v2498_v42  ;;  %v2594_v42 = vld [vmem:[%s3519_s1 + $0x354] ss:$8 sps:$4 sm:$0xff]  }
  0x9c   :  { %1885 = vmatpush1.bf16.msra.mxu0 %v2501_v43  ;;  %1722 = vmatprep.subr.bf16.mxu1 %v2506_v44  ;;  %v2597_v43 = vld [vmem:[%s3519_s1 + $0x754] ss:$8 sps:$4 sm:$0xff]   ;;  %v2592_v44 = vld [vmem:[%s3519_s1 + $0x350] ss:$8 sps:$4 sm:$0xff]  }
  0x9d   :  { %1886 = vmatprep.subr.bf16.mxu0 %v2509_v45  ;;  %v2595_v45 = vld [vmem:[%s3519_s1 + $0x750] ss:$8 sps:$4 sm:$0xff]  }
  0x9f   :  { %1723 = vmatpush1.bf16.msra.mxu1 %v2504_v46  ;;  %v2600_v46 = vld [vmem:[%s3519_s1 + $0x364] ss:$8 sps:$4 sm:$0xff]  }
  0xa0   :  { %1887 = vmatpush1.bf16.msra.mxu0 %v2507_v47  ;;  %1724 = vmatprep.subr.bf16.mxu1 %v2512_v48  ;;  %v2603_v47 = vld [vmem:[%s3519_s1 + $0x764] ss:$8 sps:$4 sm:$0xff]   ;;  %v2598_v48 = vld [vmem:[%s3519_s1 + $0x360] ss:$8 sps:$4 sm:$0xff]  }
  0xa1   :  { %1888 = vmatprep.subr.bf16.mxu0 %v2515_v49  ;;  %v2601_v49 = vld [vmem:[%s3519_s1 + $0x760] ss:$8 sps:$4 sm:$0xff]  }
  0xa3   :  { %1725 = vmatpush1.bf16.msra.mxu1 %v2510_v50  ;;  %v2606_v50 = vld [vmem:[%s3519_s1 + $0x374] ss:$8 sps:$4 sm:$0xff]  }
  0xa4   :  { %1889 = vmatpush1.bf16.msra.mxu0 %v2513_v51  ;;  %1726 = vmatprep.subr.bf16.mxu1 %v2518_v52  ;;  %v2609_v51 = vld [vmem:[%s3519_s1 + $0x774] ss:$8 sps:$4 sm:$0xff]   ;;  %v2604_v52 = vld [vmem:[%s3519_s1 + $0x370] ss:$8 sps:$4 sm:$0xff]  }
  0xa5   :  { %1890 = vmatprep.subr.bf16.mxu0 %v2521_v53  ;;  %v2607_v53 = vld [vmem:[%s3519_s1 + $0x770] ss:$8 sps:$4 sm:$0xff]  }
  0xa7   :  { %1727 = vmatpush1.bf16.msra.mxu1 %v2516_v54  ;;  %v2612_v54 = vld [vmem:[%s3519_s1 + $0x384] ss:$8 sps:$4 sm:$0xff]  }
  0xa8   :  { %1891 = vmatpush1.bf16.msra.mxu0 %v2519_v55  ;;  %1728 = vmatprep.subr.bf16.mxu1 %v2524_v56  ;;  %v2615_v55 = vld [vmem:[%s3519_s1 + $0x784] ss:$8 sps:$4 sm:$0xff]   ;;  %v2610_v56 = vld [vmem:[%s3519_s1 + $0x380] ss:$8 sps:$4 sm:$0xff]  }
  0xa9   :  { %1892 = vmatprep.subr.bf16.mxu0 %v2527_v57  ;;  %v2613_v57 = vld [vmem:[%s3519_s1 + $0x780] ss:$8 sps:$4 sm:$0xff]  }
  0xab   :  { %1729 = vmatpush1.bf16.msra.mxu1 %v2522_v58  ;;  %v2618_v58 = vld [vmem:[%s3519_s1 + $0x394] ss:$8 sps:$4 sm:$0xff]  }
  0xac   :  { %1893 = vmatpush1.bf16.msra.mxu0 %v2525_v59  ;;  %1730 = vmatprep.subr.bf16.mxu1 %v2530_v60  ;;  %v2621_v59 = vld [vmem:[%s3519_s1 + $0x794] ss:$8 sps:$4 sm:$0xff]   ;;  %v2616_v60 = vld [vmem:[%s3519_s1 + $0x390] ss:$8 sps:$4 sm:$0xff]  }
  0xad   :  { %1894 = vmatprep.subr.bf16.mxu0 %v2533_v61  ;;  %v2619_v61 = vld [vmem:[%s3519_s1 + $0x790] ss:$8 sps:$4 sm:$0xff]  }
  0xaf   :  { %1731 = vmatpush1.bf16.msra.mxu1 %v2528_v62  ;;  %v2624_v62 = vld [vmem:[%s3519_s1 + $0x3a4] ss:$8 sps:$4 sm:$0xff]  }
  0xb0   :  { %1895 = vmatpush1.bf16.msra.mxu0 %v2531_v63  ;;  %1732 = vmatprep.subr.bf16.mxu1 %v2536_v0  ;;  %v2627_v63 = vld [vmem:[%s3519_s1 + $0x7a4] ss:$8 sps:$4 sm:$0xff]   ;;  %v2622_v0 = vld [vmem:[%s3519_s1 + $0x3a0] ss:$8 sps:$4 sm:$0xff]  }
  0xb1   :  { %1896 = vmatprep.subr.bf16.mxu0 %v2539_v1  ;;  %v2625_v1 = vld [vmem:[%s3519_s1 + $0x7a0] ss:$8 sps:$4 sm:$0xff]  }
  0xb3   :  { %1733 = vmatpush1.bf16.msra.mxu1 %v2534_v2  ;;  %v2630_v2 = vld [vmem:[%s3519_s1 + $0x3b4] ss:$8 sps:$4 sm:$0xff]  }
  0xb4   :  { %1897 = vmatpush1.bf16.msra.mxu0 %v2537_v3  ;;  %1734 = vmatprep.subr.bf16.mxu1 %v2542_v4  ;;  %v2633_v3 = vld [vmem:[%s3519_s1 + $0x7b4] ss:$8 sps:$4 sm:$0xff]   ;;  %v2628_v4 = vld [vmem:[%s3519_s1 + $0x3b0] ss:$8 sps:$4 sm:$0xff]  }
  0xb5   :  { %1898 = vmatprep.subr.bf16.mxu0 %v2545_v5  ;;  %v2631_v5 = vld [vmem:[%s3519_s1 + $0x7b0] ss:$8 sps:$4 sm:$0xff]  }
  0xb7   :  { %1735 = vmatpush1.bf16.msra.mxu1 %v2540_v6  ;;  %v2636_v6 = vld [vmem:[%s3519_s1 + $0x3c4] ss:$8 sps:$4 sm:$0xff]  }
  0xb8   :  { %1899 = vmatpush1.bf16.msra.mxu0 %v2543_v7  ;;  %1736 = vmatprep.subr.bf16.mxu1 %v2548_v8  ;;  %v2639_v7 = vld [vmem:[%s3519_s1 + $0x7c4] ss:$8 sps:$4 sm:$0xff]   ;;  %v2634_v8 = vld [vmem:[%s3519_s1 + $0x3c0] ss:$8 sps:$4 sm:$0xff]  }
  0xb9   :  { %1900 = vmatprep.subr.bf16.mxu0 %v2551_v9  ;;  %v2637_v9 = vld [vmem:[%s3519_s1 + $0x7c0] ss:$8 sps:$4 sm:$0xff]  }
  0xbb   :  { %1737 = vmatpush1.bf16.msra.mxu1 %v2546_v10  ;;  %v2642_v10 = vld [vmem:[%s3519_s1 + $0x3d4] ss:$8 sps:$4 sm:$0xff]  }
  0xbc   :  { %1901 = vmatpush1.bf16.msra.mxu0 %v2549_v11  ;;  %1738 = vmatprep.subr.bf16.mxu1 %v2554_v12  ;;  %v2645_v11 = vld [vmem:[%s3519_s1 + $0x7d4] ss:$8 sps:$4 sm:$0xff]   ;;  %v2640_v12 = vld [vmem:[%s3519_s1 + $0x3d0] ss:$8 sps:$4 sm:$0xff]  }
  0xbd   :  { %1902 = vmatprep.subr.bf16.mxu0 %v2557_v13  ;;  %v2643_v13 = vld [vmem:[%s3519_s1 + $0x7d0] ss:$8 sps:$4 sm:$0xff]  }
  0xbf   :  { %1739 = vmatpush1.bf16.msra.mxu1 %v2552_v14  ;;  %v2648_v14 = vld [vmem:[%s3519_s1 + $0x3e4] ss:$8 sps:$4 sm:$0xff]  }
  0xc0   :  { %1903 = vmatpush1.bf16.msra.mxu0 %v2555_v15  ;;  %1749 = vmatprep.subr.bf16.mxu1 %v2562_v16  ;;  %v2651_v15 = vld [vmem:[%s3519_s1 + $0x7e4] ss:$8 sps:$4 sm:$0xff]   ;;  %v2646_v16 = vld [vmem:[%s3519_s1 + $0x3e0] ss:$8 sps:$4 sm:$0xff]  }
  0xc1   :  { %1913 = vmatprep.subr.bf16.mxu0 %v2567_v17  ;;  %v2649_v17 = vld [vmem:[%s3519_s1 + $0x7e0] ss:$8 sps:$4 sm:$0xff]  }
  0xc2   :  { %1741 = vmatmul.mubr.bf16.vlgmr.msra.gmra.mrb[0].mxu1 %v1966_v19  ;;  %v2654_v19 = vld [vmem:[%s3519_s1 + $0x3f4] ss:$8 sps:$4 sm:$0xff]  }
  0xc3   :  { %1905 = vmatmul.mubr.bf16.vlgmr.msra.gmra.mrb[0].mxu0 %v1974_v21  ;;  %1750 = vmatpush1.bf16.msra.mxu1 %v2560_v24  ;;  %v2657_v21 = vld [vmem:[%s3519_s1 + $0x7f4] ss:$8 sps:$4 sm:$0xff]   ;;  %v2652_v24 = vld [vmem:[%s3519_s1 + $0x3f0] ss:$8 sps:$4 sm:$0xff]  }
  0xc4   :  { %1914 = vmatpush1.bf16.msra.mxu0 %v2565_v18  ;;  %1751 = vmatprep.subr.bf16.mxu1 %v2570_v20  ;;  %v2655_v18 = vld [vmem:[%s3519_s1 + $0x7f0] ss:$8 sps:$4 sm:$0xff]   ;;  %v1968_v20 = vcombine.low %v3309_v22, %v3309_v22 }
  0xc5   :  { %1915 = vmatprep.subr.bf16.mxu0 %v2573_v25  ;;  %1781 = vmatprep.mubr.bf16.mxu1 %v1969_v26  ;;  %v1976_v25 = vcombine.low %v3314_v23, %v3314_v23  ;;  %v280_v26 = vlaneseq }
  0xc6   :  { %1945 = vmatprep.mubr.bf16.mxu0 %v1977_v27 }
  0xc7   :  { %1752 = vmatpush1.bf16.msra.mxu1 %v2568_v28  ;;  %v281_v27 = vshrl.u32 %v280_v26, 7 }
  0xc8   :  { %1916 = vmatpush1.bf16.msra.mxu0 %v2571_v29  ;;  %1753 = vmatprep.subr.bf16.mxu1 %v2576_v30  ;;  %v278_v29 = vld [vmem:[%s3521_s2] sm:$0x3] }
  0xc9   :  { %1917 = vmatprep.subr.bf16.mxu0 %v2579_v31  ;;  %v282_v28 = vsub.s32 0, %v281_v27  ;;  %v286_v30 = vsub.s32 1, %v281_v27 }
  0xcb   :  { %1754 = vmatpush1.bf16.msra.mxu1 %v2574_v32  ;;  %v283_v31 = vrot.slane %v278_v29, %v282_v28  ;;  %v287_v32 = vrot.slane %v278_v29, %v286_v30 }
  0xcc   :  { %1918 = vmatpush1.bf16.msra.mxu0 %v2577_v33  ;;  %1755 = vmatprep.subr.bf16.mxu1 %v2582_v34 }
  0xcd   :  { %1919 = vmatprep.subr.bf16.mxu0 %v2585_v35 }
  0xcf   :  { %1756 = vmatpush1.bf16.msra.mxu1 %v2580_v36 }
  0xd0   :  { %1920 = vmatpush1.bf16.msra.mxu0 %v2583_v37  ;;  %1757 = vmatprep.subr.bf16.mxu1 %v2588_v38 }
  0xd1   :  { %1921 = vmatprep.subr.bf16.mxu0 %v2591_v39 }
  0xd3   :  { %1758 = vmatpush1.bf16.msra.mxu1 %v2586_v40 }
  0xd4   :  { %1922 = vmatpush1.bf16.msra.mxu0 %v2589_v41  ;;  %1759 = vmatprep.subr.bf16.mxu1 %v2594_v42 }
  0xd5   :  { %1923 = vmatprep.subr.bf16.mxu0 %v2597_v43 }
  0xd7   :  { %1760 = vmatpush1.bf16.msra.mxu1 %v2592_v44 }
  0xd8   :  { %1924 = vmatpush1.bf16.msra.mxu0 %v2595_v45  ;;  %1761 = vmatprep.subr.bf16.mxu1 %v2600_v46 }
  0xd9   :  { %1925 = vmatprep.subr.bf16.mxu0 %v2603_v47 }
  0xdb   :  { %1762 = vmatpush1.bf16.msra.mxu1 %v2598_v48 }
  0xdc   :  { %1926 = vmatpush1.bf16.msra.mxu0 %v2601_v49  ;;  %1763 = vmatprep.subr.bf16.mxu1 %v2606_v50 }
  0xdd   :  { %1927 = vmatprep.subr.bf16.mxu0 %v2609_v51 }
  0xdf   :  { %1764 = vmatpush1.bf16.msra.mxu1 %v2604_v52 }
  0xe0   :  { %1928 = vmatpush1.bf16.msra.mxu0 %v2607_v53  ;;  %1765 = vmatprep.subr.bf16.mxu1 %v2612_v54 }
  0xe1   :  { %1929 = vmatprep.subr.bf16.mxu0 %v2615_v55 }
  0xe3   :  { %1766 = vmatpush1.bf16.msra.mxu1 %v2610_v56 }
  0xe4   :  { %1930 = vmatpush1.bf16.msra.mxu0 %v2613_v57  ;;  %1767 = vmatprep.subr.bf16.mxu1 %v2618_v58 }
  0xe5   :  { %1931 = vmatprep.subr.bf16.mxu0 %v2621_v59 }
  0xe7   :  { %1768 = vmatpush1.bf16.msra.mxu1 %v2616_v60 }
  0xe8   :  { %1932 = vmatpush1.bf16.msra.mxu0 %v2619_v61  ;;  %1769 = vmatprep.subr.bf16.mxu1 %v2624_v62 }
  0xe9   :  { %1933 = vmatprep.subr.bf16.mxu0 %v2627_v63 }
  0xeb   :  { %1770 = vmatpush1.bf16.msra.mxu1 %v2622_v0 }
  0xec   :  { %1934 = vmatpush1.bf16.msra.mxu0 %v2625_v1  ;;  %1771 = vmatprep.subr.bf16.mxu1 %v2630_v2 }
  0xed   :  { %1935 = vmatprep.subr.bf16.mxu0 %v2633_v3 }
  0xef   :  { %1772 = vmatpush1.bf16.msra.mxu1 %v2628_v4 }
  0xf0   :  { %1936 = vmatpush1.bf16.msra.mxu0 %v2631_v5  ;;  %1773 = vmatprep.subr.bf16.mxu1 %v2636_v6 }
  0xf1   :  { %1937 = vmatprep.subr.bf16.mxu0 %v2639_v7 }
  0xf3   :  { %1774 = vmatpush1.bf16.msra.mxu1 %v2634_v8 }
  0xf4   :  { %1938 = vmatpush1.bf16.msra.mxu0 %v2637_v9  ;;  %1775 = vmatprep.subr.bf16.mxu1 %v2642_v10 }
  0xf5   :  { %1939 = vmatprep.subr.bf16.mxu0 %v2645_v11 }
  0xf7   :  { %1776 = vmatpush1.bf16.msra.mxu1 %v2640_v12 }
  0xf8   :  { %1940 = vmatpush1.bf16.msra.mxu0 %v2643_v13  ;;  %1777 = vmatprep.subr.bf16.mxu1 %v2648_v14 }
  0xf9   :  { %1941 = vmatprep.subr.bf16.mxu0 %v2651_v15 }
  0xfb   :  { %1778 = vmatpush1.bf16.msra.mxu1 %v2646_v16 }
  0xfc   :  { %1942 = vmatpush1.bf16.msra.mxu0 %v2649_v17  ;;  %1779 = vmatprep.subr.bf16.mxu1 %v2654_v19 }
  0xfd   :  { %1943 = vmatprep.subr.bf16.mxu0 %v2657_v21 }
  0xff   :  { %1780 = vmatpush1.bf16.msra.mxu1 %v2652_v24 }
 0x100   :  { %1944 = vmatpush1.bf16.msra.mxu0 %v2655_v18 }
 0x102   :  { %1782 = vmatmul.mubr.bf16.vlgmr.msra.gmra.mrb[0].mxu1 %v1968_v20 }
 0x103   :  { %1946 = vmatmul.mubr.bf16.vlgmr.msra.gmra.mrb[0].mxu0 %v1976_v25 }
 0x1d5   :  { %v1783_v33 = vpop.f32.mrb[0].mxu1 }
 0x1d6   :  { %v1947_v34 = vpop.f32.mrb[0].mxu0  ;;  %v2234_v22 = vadd.f32 %v1783_v33, %v283_v31  ;;  %v1785_v35 = vpop.f32.mrb[1].mxu1 }
 0x1d7   :  { %v1949_v36 = vpop.f32.mrb[1].mxu0  ;;  %v2236_v23 = vadd.f32 %v1785_v35, %v287_v32  ;;  %v1787_v37 = vpop.f32.mrb[2].mxu1 }
 0x1d8   :  { %v1951_v38 = vpop.f32.mrb[2].mxu0  ;;  %v2235_v39 = vadd.f32 %v2234_v22, %v1947_v34  ;;  %v1788_v40 = vpop.f32.mrb[3].mxu1 }
 0x1d9   :  { %v1952_v41 = vpop.f32.mrb[3].mxu0  ;;  %v2237_v42 = vadd.f32 %v2236_v23, %v1949_v36 }
 0x1da   :  { %v1954_v43 = vmax.f32 %v2235_v39, 0.0 }
 0x1db   :  { %v1955_v44 = vmax.f32 %v2237_v42, 0.0 }
 0x1dc   :  { %1956 = vst [vmem:[%s3522_s3] sm:$0xff] %v1954_v43 }
 0x1dd   :  { %1957 = vst [vmem:[%s3522_s3 + $0x8] sm:$0xff] %v1955_v44 }

// kernel: simple_conv64_forward.11
= control target key start
LH: loop header
LB: loop body
LE: loop exit
PB: predicated region body
PF: predicated region fallthrough
CT: control target
= control target key end

     0   :  { %v540_v36 = vlaneseq  ;;  %v5618_v37 = vmov 1966171168   ;;  %s7415_s0 = inlined_call_operand.vmem [shape: bf16[2,4096], index: 0, kind: input, shape index: {}]   ;;  %s7416_s1 = inlined_call_operand.vmem [shape: bf16[4096,256], index: 1, kind: input, shape index: {}]   ;;  %s7417_s2 = inlined_call_operand.vmem [shape: f32[1,256], index: 2, kind: input, shape index: {}]   ;;  %s7418_s3 = inlined_call_operand.vmem [shape: bf16[256,10], index: 3, kind: input, shape index: {}]   ;;  %s7419_s4 = inlined_call_operand.vmem [shape: f32[1,10], index: 4, kind: input, shape index: {}]   ;;  %s7420_s5 = inlined_call_operand.hbm [shape: f32[2,10], index: 5, kind: output, shape index: {}]  }
   0x1   :  { %v4806_v0 = vld [vmem:[%s7416_s1 + $0x4] ss:$8 sps:$4 sm:$0xff]   ;;  %v4810_v2 = vld [vmem:[%s7416_s1] ss:$8 sps:$4 sm:$0xff]   ;;  %v4812_v4 = vld [vmem:[%s7416_s1 + $0x14] ss:$8 sps:$4 sm:$0xff]   ;;  %v556_v38 = vunpack.c.l.s4 %v5618_v37 }
   0x2   :  { %v4808_v1 = vld [vmem:[%s7416_s1 + $0x804] ss:$8 sps:$4 sm:$0xff]   ;;  %3342 = vmatprep.subr.bf16.mxu1 %v4806_v0  ;;  %v4811_v3 = vld [vmem:[%s7416_s1 + $0x800] ss:$8 sps:$4 sm:$0xff]   ;;  %v4814_v5 = vld [vmem:[%s7416_s1 + $0x814] ss:$8 sps:$4 sm:$0xff]  }
   0x3   :  { %3670 = vmatprep.subr.bf16.mxu0 %v4808_v1  ;;  %3343 = vmatpush1.bf16.msra.mxu1 %v4810_v2  ;;  %v4816_v6 = vld [vmem:[%s7416_s1 + $0x10] ss:$8 sps:$4 sm:$0xff]   ;;  %v4818_v8 = vld [vmem:[%s7416_s1 + $0x24] ss:$8 sps:$4 sm:$0xff]   ;;  %v4822_v10 = vld [vmem:[%s7416_s1 + $0x20] ss:$8 sps:$4 sm:$0xff]   ;;  %v557_v43 = vunpack.c.0.s8 %v556_v38 }
   0x4   :  { %3671 = vmatpush1.bf16.msra.mxu0 %v4811_v3  ;;  %3344 = vmatprep.subr.bf16.mxu1 %v4812_v4  ;;  %v4817_v7 = vld [vmem:[%s7416_s1 + $0x810] ss:$8 sps:$4 sm:$0xff]   ;;  %v4820_v9 = vld [vmem:[%s7416_s1 + $0x824] ss:$8 sps:$4 sm:$0xff]   ;;  %v4823_v11 = vld [vmem:[%s7416_s1 + $0x820] ss:$8 sps:$4 sm:$0xff]  }
   0x5   :  { %3672 = vmatprep.subr.bf16.mxu0 %v4814_v5  ;;  %v4824_v12 = vld [vmem:[%s7416_s1 + $0x34] ss:$8 sps:$4 sm:$0xff]   ;;  %v4828_v14 = vld [vmem:[%s7416_s1 + $0x30] ss:$8 sps:$4 sm:$0xff]   ;;  %v4830_v16 = vld [vmem:[%s7416_s1 + $0x44] ss:$8 sps:$4 sm:$0xff]  }
   0x6   :  { %v4826_v13 = vld [vmem:[%s7416_s1 + $0x834] ss:$8 sps:$4 sm:$0xff]   ;;  %v4829_v15 = vld [vmem:[%s7416_s1 + $0x830] ss:$8 sps:$4 sm:$0xff]   ;;  %v4832_v17 = vld [vmem:[%s7416_s1 + $0x844] ss:$8 sps:$4 sm:$0xff]  }
   0x7   :  { %3345 = vmatpush1.bf16.msra.mxu1 %v4816_v6  ;;  %v4834_v18 = vld [vmem:[%s7416_s1 + $0x40] ss:$8 sps:$4 sm:$0xff]   ;;  %v4836_v20 = vld [vmem:[%s7416_s1 + $0x54] ss:$8 sps:$4 sm:$0xff]   ;;  %v4840_v22 = vld [vmem:[%s7416_s1 + $0x50] ss:$8 sps:$4 sm:$0xff]  }
   0x8   :  { %3673 = vmatpush1.bf16.msra.mxu0 %v4817_v7  ;;  %3346 = vmatprep.subr.bf16.mxu1 %v4818_v8  ;;  %v4835_v19 = vld [vmem:[%s7416_s1 + $0x840] ss:$8 sps:$4 sm:$0xff]   ;;  %v4838_v21 = vld [vmem:[%s7416_s1 + $0x854] ss:$8 sps:$4 sm:$0xff]   ;;  %v4841_v23 = vld [vmem:[%s7416_s1 + $0x850] ss:$8 sps:$4 sm:$0xff]  }
   0x9   :  { %3674 = vmatprep.subr.bf16.mxu0 %v4820_v9  ;;  %v4842_v24 = vld [vmem:[%s7416_s1 + $0x64] ss:$8 sps:$4 sm:$0xff]   ;;  %v4846_v26 = vld [vmem:[%s7416_s1 + $0x60] ss:$8 sps:$4 sm:$0xff]   ;;  %v4848_v28 = vld [vmem:[%s7416_s1 + $0x74] ss:$8 sps:$4 sm:$0xff]  }
   0xa   :  { %v4844_v25 = vld [vmem:[%s7416_s1 + $0x864] ss:$8 sps:$4 sm:$0xff]   ;;  %v4847_v27 = vld [vmem:[%s7416_s1 + $0x860] ss:$8 sps:$4 sm:$0xff]   ;;  %v4850_v29 = vld [vmem:[%s7416_s1 + $0x874] ss:$8 sps:$4 sm:$0xff]  }
   0xb   :  { %3347 = vmatpush1.bf16.msra.mxu1 %v4822_v10  ;;  %v4852_v30 = vld [vmem:[%s7416_s1 + $0x70] ss:$8 sps:$4 sm:$0xff]   ;;  %v4854_v32 = vld [vmem:[%s7416_s1 + $0x84] ss:$8 sps:$4 sm:$0xff]   ;;  %v4858_v34 = vld [vmem:[%s7416_s1 + $0x80] ss:$8 sps:$4 sm:$0xff]  }
   0xc   :  { %3675 = vmatpush1.bf16.msra.mxu0 %v4823_v11  ;;  %3348 = vmatprep.subr.bf16.mxu1 %v4824_v12  ;;  %v4853_v31 = vld [vmem:[%s7416_s1 + $0x870] ss:$8 sps:$4 sm:$0xff]   ;;  %v4856_v33 = vld [vmem:[%s7416_s1 + $0x884] ss:$8 sps:$4 sm:$0xff]   ;;  %v4859_v35 = vld [vmem:[%s7416_s1 + $0x880] ss:$8 sps:$4 sm:$0xff]  }
   0xd   :  { %3676 = vmatprep.subr.bf16.mxu0 %v4826_v13  ;;  %v4860_v39 = vld [vmem:[%s7416_s1 + $0x94] ss:$8 sps:$4 sm:$0xff]   ;;  %v4864_v41 = vld [vmem:[%s7416_s1 + $0x90] ss:$8 sps:$4 sm:$0xff]   ;;  %v5767_v42 = vshrl.u32 %v540_v36, 7  ;;  %v5796_v52 = vld [vmem:[%s7415_s0] sm:$0xff] }
   0xe   :  { %v4862_v40 = vld [vmem:[%s7416_s1 + $0x894] ss:$8 sps:$4 sm:$0xff]   ;;  %v4865_v44 = vld [vmem:[%s7416_s1 + $0x890] ss:$8 sps:$4 sm:$0xff]   ;;  %v4866_v45 = vld [vmem:[%s7416_s1 + $0xa4] ss:$8 sps:$4 sm:$0xff]  }
   0xf   :  { %3349 = vmatpush1.bf16.msra.mxu1 %v4828_v14  ;;  %v4868_v46 = vld [vmem:[%s7416_s1 + $0x8a4] ss:$8 sps:$4 sm:$0xff]   ;;  %v4870_v47 = vld [vmem:[%s7416_s1 + $0xa0] ss:$8 sps:$4 sm:$0xff]   ;;  %v5785_v49 = vsub.s32 %v557_v43, %v5767_v42  ;;  %v4872_v50 = vld [vmem:[%s7416_s1 + $0xb4] ss:$8 sps:$4 sm:$0xff]  }
  0x10   :  { %3677 = vmatpush1.bf16.msra.mxu0 %v4829_v15  ;;  %3350 = vmatprep.subr.bf16.mxu1 %v4830_v16  ;;  %v4871_v48 = vld [vmem:[%s7416_s1 + $0x8a0] ss:$8 sps:$4 sm:$0xff]   ;;  %v4874_v51 = vld [vmem:[%s7416_s1 + $0x8b4] ss:$8 sps:$4 sm:$0xff]   ;;  %v4876_v53 = vld [vmem:[%s7416_s1 + $0xb0] ss:$8 sps:$4 sm:$0xff]  }
  0x11   :  { %3678 = vmatprep.subr.bf16.mxu0 %v4832_v17  ;;  %v561_v54 = vrot.slane %v5796_v52, %v5785_v49  ;;  %v4877_v55 = vld [vmem:[%s7416_s1 + $0x8b0] ss:$8 sps:$4 sm:$0xff]   ;;  %v4878_v57 = vld [vmem:[%s7416_s1 + $0xc4] ss:$8 sps:$4 sm:$0xff]   ;;  %v4882_v63 = vld [vmem:[%s7416_s1 + $0xc0] ss:$8 sps:$4 sm:$0xff]  }
  0x12   :  { %v5809_v56 = vld [vmem:[%s7415_s0 + $0x10] sm:$0xff]  ;;  %v4880_v58 = vld [vmem:[%s7416_s1 + $0x8c4] ss:$8 sps:$4 sm:$0xff]   ;;  %v4883_v0 = vld [vmem:[%s7416_s1 + $0x8c0] ss:$8 sps:$4 sm:$0xff]  }
  0x13   :  { %3351 = vmatpush1.bf16.msra.mxu1 %v4834_v18  ;;  %v569_v59 = vcombine.high %v561_v54, %v561_v54  ;;  %v659_v60 = vrot.slane %v5809_v56, %v5785_v49  ;;  %v4884_v1 = vld [vmem:[%s7416_s1 + $0xd4] ss:$8 sps:$4 sm:$0xff]   ;;  %v4888_v4 = vld [vmem:[%s7416_s1 + $0xd0] ss:$8 sps:$4 sm:$0xff]   ;;  %v4890_v6 = vld [vmem:[%s7416_s1 + $0xe4] ss:$8 sps:$4 sm:$0xff]   ;;  %v5870_v16 = vrot.slane %v561_v54, %v5785_v49 }
  0x14   :  { %3679 = vmatpush1.bf16.msra.mxu0 %v4835_v19  ;;  %3352 = vmatprep.subr.bf16.mxu1 %v4836_v20  ;;  %v4886_v2 = vld [vmem:[%s7416_s1 + $0x8d4] ss:$8 sps:$4 sm:$0xff]   ;;  %v4889_v5 = vld [vmem:[%s7416_s1 + $0x8d0] ss:$8 sps:$4 sm:$0xff]   ;;  %v4892_v7 = vld [vmem:[%s7416_s1 + $0x8e4] ss:$8 sps:$4 sm:$0xff]  }
  0x15   :  { %3680 = vmatprep.subr.bf16.mxu0 %v4838_v21  ;;  %v591_v61 = vrot.slane %v569_v59, %v5785_v49  ;;  %v667_v62 = vcombine.high %v659_v60, %v659_v60  ;;  %v4894_v8 = vld [vmem:[%s7416_s1 + $0xe0] ss:$8 sps:$4 sm:$0xff]   ;;  %v4896_v10 = vld [vmem:[%s7416_s1 + $0xf4] ss:$8 sps:$4 sm:$0xff]   ;;  %v4900_v12 = vld [vmem:[%s7416_s1 + $0xf0] ss:$8 sps:$4 sm:$0xff]   ;;  %v5873_v17 = vrot.slane %v659_v60, %v5785_v49 }
  0x16   :  { %v4895_v9 = vld [vmem:[%s7416_s1 + $0x8e0] ss:$8 sps:$4 sm:$0xff]   ;;  %v4898_v11 = vld [vmem:[%s7416_s1 + $0x8f4] ss:$8 sps:$4 sm:$0xff]   ;;  %v4901_v13 = vld [vmem:[%s7416_s1 + $0x8f0] ss:$8 sps:$4 sm:$0xff]  }
  0x17   :  { %3353 = vmatpush1.bf16.msra.mxu1 %v4840_v22  ;;  %v689_v3 = vrot.slane %v667_v62, %v5785_v49  ;;  %3374 = vmatprep.mubr.bf16.mxu1 %v591_v61  ;;  %v4905_v14 = vld [vmem:[%s7416_s1 + $0x104] ss:$8 sps:$4 sm:$0xff]   ;;  %v4903_v18 = vld [vmem:[%s7416_s1 + $0x100] ss:$8 sps:$4 sm:$0xff]   ;;  %v4912_v20 = vld [vmem:[%s7416_s1 + $0x114] ss:$8 sps:$4 sm:$0xff]   ;;  %v601_v22 = vcombine.high %v591_v61, %v591_v61 }
  0x18   :  { %3681 = vmatpush1.bf16.msra.mxu0 %v4841_v23  ;;  %3354 = vmatprep.subr.bf16.mxu1 %v4842_v24  ;;  %v4909_v15 = vld [vmem:[%s7416_s1 + $0x904] ss:$8 sps:$4 sm:$0xff]   ;;  %v4907_v19 = vld [vmem:[%s7416_s1 + $0x900] ss:$8 sps:$4 sm:$0xff]   ;;  %v4915_v21 = vld [vmem:[%s7416_s1 + $0x914] ss:$8 sps:$4 sm:$0xff]  }
  0x19   :  { %3682 = vmatprep.subr.bf16.mxu0 %v4844_v25  ;;  %3702 = vmatprep.mubr.bf16.mxu0 %v689_v3  ;;  %v699_v23 = vcombine.high %v689_v3, %v689_v3  ;;  %v4910_v24 = vld [vmem:[%s7416_s1 + $0x110] ss:$8 sps:$4 sm:$0xff]   ;;  %v4928_v36 = vld [vmem:[%s7416_s1 + $0x140] ss:$8 sps:$4 sm:$0xff]   ;;  %v4936_v38 = vld [vmem:[%s7416_s1 + $0x154] ss:$8 sps:$4 sm:$0xff]  }
  0x1a   :  { %v4913_v25 = vld [vmem:[%s7416_s1 + $0x910] ss:$8 sps:$4 sm:$0xff]   ;;  %v4931_v37 = vld [vmem:[%s7416_s1 + $0x940] ss:$8 sps:$4 sm:$0xff]   ;;  %v4942_v43 = vld [vmem:[%s7416_s1 + $0x164] ss:$8 sps:$4 sm:$0xff]  }
  0x1b   :  { %3355 = vmatpush1.bf16.msra.mxu1 %v4846_v26  ;;  %v4918_v26 = vld [vmem:[%s7416_s1 + $0x124] ss:$8 sps:$4 sm:$0xff]   ;;  %v4963_v59 = vld [vmem:[%s7416_s1 + $0x994] ss:$8 sps:$4 sm:$0xff]   ;;  %v4958_v60 = vld [vmem:[%s7416_s1 + $0x190] ss:$8 sps:$4 sm:$0xff]  }
  0x1c   :  { %3683 = vmatpush1.bf16.msra.mxu0 %v4847_v27  ;;  %3356 = vmatprep.subr.bf16.mxu1 %v4848_v28  ;;  %v4921_v27 = vld [vmem:[%s7416_s1 + $0x924] ss:$8 sps:$4 sm:$0xff]   ;;  %v4916_v28 = vld [vmem:[%s7416_s1 + $0x120] ss:$8 sps:$4 sm:$0xff]   ;;  %v4961_v61 = vld [vmem:[%s7416_s1 + $0x990] ss:$8 sps:$4 sm:$0xff]  }
  0x1d   :  { %3684 = vmatprep.subr.bf16.mxu0 %v4850_v29  ;;  %v4919_v29 = vld [vmem:[%s7416_s1 + $0x920] ss:$8 sps:$4 sm:$0xff]   ;;  %v4957_v54 = vld [vmem:[%s7416_s1 + $0x984] ss:$8 sps:$4 sm:$0xff]   ;;  %v4975_v3 = vld [vmem:[%s7416_s1 + $0x9b4] ss:$8 sps:$4 sm:$0xff]  }
  0x1e   :  { %v4966_v62 = vld [vmem:[%s7416_s1 + $0x1a4] ss:$8 sps:$4 sm:$0xff]  }
  0x1f   :  { %3357 = vmatpush1.bf16.msra.mxu1 %v4852_v30  ;;  %v4924_v30 = vld [vmem:[%s7416_s1 + $0x134] ss:$8 sps:$4 sm:$0xff]  }
  0x20   :  { %3685 = vmatpush1.bf16.msra.mxu0 %v4853_v31  ;;  %3358 = vmatprep.subr.bf16.mxu1 %v4854_v32  ;;  %v4927_v31 = vld [vmem:[%s7416_s1 + $0x934] ss:$8 sps:$4 sm:$0xff]   ;;  %v4922_v32 = vld [vmem:[%s7416_s1 + $0x130] ss:$8 sps:$4 sm:$0xff]  }
  0x21   :  { %3686 = vmatprep.subr.bf16.mxu0 %v4856_v33  ;;  %v4925_v33 = vld [vmem:[%s7416_s1 + $0x930] ss:$8 sps:$4 sm:$0xff]  }
  0x23   :  { %3359 = vmatpush1.bf16.msra.mxu1 %v4858_v34  ;;  %v4930_v34 = vld [vmem:[%s7416_s1 + $0x144] ss:$8 sps:$4 sm:$0xff]  }
  0x24   :  { %3687 = vmatpush1.bf16.msra.mxu0 %v4859_v35  ;;  %3360 = vmatprep.subr.bf16.mxu1 %v4860_v39  ;;  %v4933_v35 = vld [vmem:[%s7416_s1 + $0x944] ss:$8 sps:$4 sm:$0xff]   ;;  %v4939_v39 = vld [vmem:[%s7416_s1 + $0x954] ss:$8 sps:$4 sm:$0xff]  }
  0x25   :  { %3688 = vmatprep.subr.bf16.mxu0 %v4862_v40  ;;  %v4934_v40 = vld [vmem:[%s7416_s1 + $0x150] ss:$8 sps:$4 sm:$0xff]  }
  0x27   :  { %3361 = vmatpush1.bf16.msra.mxu1 %v4864_v41  ;;  %v4937_v41 = vld [vmem:[%s7416_s1 + $0x950] ss:$8 sps:$4 sm:$0xff]  }
  0x28   :  { %3689 = vmatpush1.bf16.msra.mxu0 %v4865_v44  ;;  %3362 = vmatprep.subr.bf16.mxu1 %v4866_v45  ;;  %v4945_v44 = vld [vmem:[%s7416_s1 + $0x964] ss:$8 sps:$4 sm:$0xff]   ;;  %v4940_v45 = vld [vmem:[%s7416_s1 + $0x160] ss:$8 sps:$4 sm:$0xff]  }
  0x29   :  { %3690 = vmatprep.subr.bf16.mxu0 %v4868_v46  ;;  %v4943_v46 = vld [vmem:[%s7416_s1 + $0x960] ss:$8 sps:$4 sm:$0xff]  }
  0x2b   :  { %3363 = vmatpush1.bf16.msra.mxu1 %v4870_v47  ;;  %v4948_v47 = vld [vmem:[%s7416_s1 + $0x174] ss:$8 sps:$4 sm:$0xff]  }
  0x2c   :  { %3691 = vmatpush1.bf16.msra.mxu0 %v4871_v48  ;;  %3364 = vmatprep.subr.bf16.mxu1 %v4872_v50  ;;  %v4951_v48 = vld [vmem:[%s7416_s1 + $0x974] ss:$8 sps:$4 sm:$0xff]   ;;  %v4946_v50 = vld [vmem:[%s7416_s1 + $0x170] ss:$8 sps:$4 sm:$0xff]  }
  0x2d   :  { %3692 = vmatprep.subr.bf16.mxu0 %v4874_v51  ;;  %v4949_v51 = vld [vmem:[%s7416_s1 + $0x970] ss:$8 sps:$4 sm:$0xff]  }
  0x2f   :  { %3365 = vmatpush1.bf16.msra.mxu1 %v4876_v53  ;;  %v4954_v53 = vld [vmem:[%s7416_s1 + $0x184] ss:$8 sps:$4 sm:$0xff]  }
  0x30   :  { %3693 = vmatpush1.bf16.msra.mxu0 %v4877_v55  ;;  %3366 = vmatprep.subr.bf16.mxu1 %v4878_v57  ;;  %v4952_v55 = vld [vmem:[%s7416_s1 + $0x180] ss:$8 sps:$4 sm:$0xff]  }
  0x31   :  { %3694 = vmatprep.subr.bf16.mxu0 %v4880_v58  ;;  %v4955_v57 = vld [vmem:[%s7416_s1 + $0x980] ss:$8 sps:$4 sm:$0xff]   ;;  %v4960_v58 = vld [vmem:[%s7416_s1 + $0x194] ss:$8 sps:$4 sm:$0xff]  }
  0x33   :  { %3367 = vmatpush1.bf16.msra.mxu1 %v4882_v63  ;;  %v4969_v63 = vld [vmem:[%s7416_s1 + $0x9a4] ss:$8 sps:$4 sm:$0xff]  }
  0x34   :  { %3695 = vmatpush1.bf16.msra.mxu0 %v4883_v0  ;;  %3368 = vmatprep.subr.bf16.mxu1 %v4884_v1  ;;  %v4964_v0 = vld [vmem:[%s7416_s1 + $0x1a0] ss:$8 sps:$4 sm:$0xff]  }
  0x35   :  { %3696 = vmatprep.subr.bf16.mxu0 %v4886_v2  ;;  %v4967_v1 = vld [vmem:[%s7416_s1 + $0x9a0] ss:$8 sps:$4 sm:$0xff]   ;;  %v4972_v2 = vld [vmem:[%s7416_s1 + $0x1b4] ss:$8 sps:$4 sm:$0xff]  }
  0x37   :  { %3369 = vmatpush1.bf16.msra.mxu1 %v4888_v4  ;;  %v4970_v4 = vld [vmem:[%s7416_s1 + $0x1b0] ss:$8 sps:$4 sm:$0xff]  }
  0x38   :  { %3697 = vmatpush1.bf16.msra.mxu0 %v4889_v5  ;;  %3370 = vmatprep.subr.bf16.mxu1 %v4890_v6  ;;  %v4973_v5 = vld [vmem:[%s7416_s1 + $0x9b0] ss:$8 sps:$4 sm:$0xff]   ;;  %v4978_v6 = vld [vmem:[%s7416_s1 + $0x1c4] ss:$8 sps:$4 sm:$0xff]  }
  0x39   :  { %3698 = vmatprep.subr.bf16.mxu0 %v4892_v7  ;;  %v4981_v7 = vld [vmem:[%s7416_s1 + $0x9c4] ss:$8 sps:$4 sm:$0xff]  }
  0x3b   :  { %3371 = vmatpush1.bf16.msra.mxu1 %v4894_v8  ;;  %v4976_v8 = vld [vmem:[%s7416_s1 + $0x1c0] ss:$8 sps:$4 sm:$0xff]  }
  0x3c   :  { %3699 = vmatpush1.bf16.msra.mxu0 %v4895_v9  ;;  %3372 = vmatprep.subr.bf16.mxu1 %v4896_v10  ;;  %v4979_v9 = vld [vmem:[%s7416_s1 + $0x9c0] ss:$8 sps:$4 sm:$0xff]   ;;  %v4984_v10 = vld [vmem:[%s7416_s1 + $0x1d4] ss:$8 sps:$4 sm:$0xff]  }
  0x3d   :  { %3700 = vmatprep.subr.bf16.mxu0 %v4898_v11  ;;  %v4987_v11 = vld [vmem:[%s7416_s1 + $0x9d4] ss:$8 sps:$4 sm:$0xff]  }
  0x3f   :  { %3373 = vmatpush1.bf16.msra.mxu1 %v4900_v12  ;;  %v4982_v12 = vld [vmem:[%s7416_s1 + $0x1d0] ss:$8 sps:$4 sm:$0xff]  }
  0x40   :  { %3701 = vmatpush1.bf16.msra.mxu0 %v4901_v13  ;;  %3383 = vmatprep.subr.bf16.mxu1 %v4905_v14  ;;  %v4985_v13 = vld [vmem:[%s7416_s1 + $0x9d0] ss:$8 sps:$4 sm:$0xff]   ;;  %v4990_v14 = vld [vmem:[%s7416_s1 + $0x1e4] ss:$8 sps:$4 sm:$0xff]  }
  0x41   :  { %3711 = vmatprep.subr.bf16.mxu0 %v4909_v15  ;;  %v4993_v15 = vld [vmem:[%s7416_s1 + $0x9e4] ss:$8 sps:$4 sm:$0xff]  }
  0x42   :  { %3375 = vmatmul.mubr.bf16.vlgmr.msra.gmra.mrb[0].mxu1 %v5870_v16 }
  0x43   :  { %3703 = vmatmul.mubr.bf16.vlgmr.msra.gmra.mrb[0].mxu0 %v5873_v17  ;;  %3384 = vmatpush1.bf16.msra.mxu1 %v4903_v18  ;;  %v554_v18 = vcombine.high %v5796_v52, %v5796_v52  ;;  %v4999_v52 = vld [vmem:[%s7416_s1 + $0x9f4] ss:$8 sps:$4 sm:$0xff]  }
  0x44   :  { %3712 = vmatpush1.bf16.msra.mxu0 %v4907_v19  ;;  %3385 = vmatprep.subr.bf16.mxu1 %v4912_v20  ;;  %v652_v19 = vcombine.high %v5809_v56, %v5809_v56  ;;  %v4988_v20 = vld [vmem:[%s7416_s1 + $0x1e0] ss:$8 sps:$4 sm:$0xff]  }
  0x45   :  { %3713 = vmatprep.subr.bf16.mxu0 %v4915_v21  ;;  %3415 = vmatprep.mubr.bf16.mxu1 %v601_v22  ;;  %v4991_v21 = vld [vmem:[%s7416_s1 + $0x9e0] ss:$8 sps:$4 sm:$0xff]   ;;  %v4996_v22 = vld [vmem:[%s7416_s1 + $0x1f4] ss:$8 sps:$4 sm:$0xff]   ;;  %v6062_v56 = vrot.slane %v554_v18, %v5785_v49  ;;  %v5066_v18 = vld [vmem:[%s7416_s1 + $0x2b0] ss:$8 sps:$4 sm:$0xff]  }
  0x46   :  { %3743 = vmatprep.mubr.bf16.mxu0 %v699_v23  ;;  %v6065_v23 = vrot.slane %v652_v19, %v5785_v49  ;;  %v5069_v19 = vld [vmem:[%s7416_s1 + $0xab0] ss:$8 sps:$4 sm:$0xff]  }
  0x47   :  { %3386 = vmatpush1.bf16.msra.mxu1 %v4910_v24  ;;  %v4994_v24 = vld [vmem:[%s7416_s1 + $0x1f0] ss:$8 sps:$4 sm:$0xff]  }
  0x48   :  { %3714 = vmatpush1.bf16.msra.mxu0 %v4913_v25  ;;  %3387 = vmatprep.subr.bf16.mxu1 %v4918_v26  ;;  %v4997_v25 = vld [vmem:[%s7416_s1 + $0x9f0] ss:$8 sps:$4 sm:$0xff]   ;;  %v5002_v26 = vld [vmem:[%s7416_s1 + $0x204] ss:$8 sps:$4 sm:$0xff]  }
  0x49   :  { %3715 = vmatprep.subr.bf16.mxu0 %v4921_v27  ;;  %v5005_v27 = vld [vmem:[%s7416_s1 + $0xa04] ss:$8 sps:$4 sm:$0xff]  }
  0x4b   :  { %3388 = vmatpush1.bf16.msra.mxu1 %v4916_v28  ;;  %v570_v28 = vcombine.high %v6062_v56, %v6062_v56 }
  0x4c   :  { %3716 = vmatpush1.bf16.msra.mxu0 %v4919_v29  ;;  %3389 = vmatprep.subr.bf16.mxu1 %v4924_v30  ;;  %v668_v29 = vcombine.high %v6065_v23, %v6065_v23  ;;  %v599_v30 = vcombine.high %v5870_v16, %v5870_v16  ;;  %v5011_v16 = vld [vmem:[%s7416_s1 + $0xa14] ss:$8 sps:$4 sm:$0xff]  }
  0x4d   :  { %3717 = vmatprep.subr.bf16.mxu0 %v4927_v31  ;;  %v697_v31 = vcombine.high %v5873_v17, %v5873_v17  ;;  %v6100_v17 = vrot.slane %v570_v28, %v5785_v49  ;;  %v5086_v28 = vld [vmem:[%s7416_s1 + $0x2e4] ss:$8 sps:$4 sm:$0xff]  }
  0x4f   :  { %3390 = vmatpush1.bf16.msra.mxu1 %v4922_v32  ;;  %v5000_v32 = vld [vmem:[%s7416_s1 + $0x200] ss:$8 sps:$4 sm:$0xff]  }
  0x50   :  { %3718 = vmatpush1.bf16.msra.mxu0 %v4925_v33  ;;  %3391 = vmatprep.subr.bf16.mxu1 %v4930_v34  ;;  %v5003_v33 = vld [vmem:[%s7416_s1 + $0xa00] ss:$8 sps:$4 sm:$0xff]   ;;  %v5008_v34 = vld [vmem:[%s7416_s1 + $0x214] ss:$8 sps:$4 sm:$0xff]  }
  0x51   :  { %3719 = vmatprep.subr.bf16.mxu0 %v4933_v35  ;;  %v6103_v35 = vrot.slane %v668_v29, %v5785_v49  ;;  %v5089_v29 = vld [vmem:[%s7416_s1 + $0xae4] ss:$8 sps:$4 sm:$0xff]  }
  0x53   :  { %3392 = vmatpush1.bf16.msra.mxu1 %v4928_v36  ;;  %v5006_v36 = vld [vmem:[%s7416_s1 + $0x210] ss:$8 sps:$4 sm:$0xff]  }
  0x54   :  { %3720 = vmatpush1.bf16.msra.mxu0 %v4931_v37  ;;  %3393 = vmatprep.subr.bf16.mxu1 %v4936_v38  ;;  %v5009_v37 = vld [vmem:[%s7416_s1 + $0xa10] ss:$8 sps:$4 sm:$0xff]   ;;  %v5014_v38 = vld [vmem:[%s7416_s1 + $0x224] ss:$8 sps:$4 sm:$0xff]  }
  0x55   :  { %3721 = vmatprep.subr.bf16.mxu0 %v4939_v39  ;;  %v5017_v39 = vld [vmem:[%s7416_s1 + $0xa24] ss:$8 sps:$4 sm:$0xff]  }
  0x57   :  { %3394 = vmatpush1.bf16.msra.mxu1 %v4934_v40  ;;  %v5012_v40 = vld [vmem:[%s7416_s1 + $0x220] ss:$8 sps:$4 sm:$0xff]  }
  0x58   :  { %3722 = vmatpush1.bf16.msra.mxu0 %v4937_v41  ;;  %3395 = vmatprep.subr.bf16.mxu1 %v4942_v43  ;;  %v5015_v41 = vld [vmem:[%s7416_s1 + $0xa20] ss:$8 sps:$4 sm:$0xff]   ;;  %v5020_v43 = vld [vmem:[%s7416_s1 + $0x234] ss:$8 sps:$4 sm:$0xff]  }
  0x59   :  { %3723 = vmatprep.subr.bf16.mxu0 %v4945_v44  ;;  %v5023_v44 = vld [vmem:[%s7416_s1 + $0xa34] ss:$8 sps:$4 sm:$0xff]  }
  0x5b   :  { %3396 = vmatpush1.bf16.msra.mxu1 %v4940_v45  ;;  %v5018_v45 = vld [vmem:[%s7416_s1 + $0x230] ss:$8 sps:$4 sm:$0xff]  }
  0x5c   :  { %3724 = vmatpush1.bf16.msra.mxu0 %v4943_v46  ;;  %3397 = vmatprep.subr.bf16.mxu1 %v4948_v47  ;;  %v5021_v46 = vld [vmem:[%s7416_s1 + $0xa30] ss:$8 sps:$4 sm:$0xff]   ;;  %v5026_v47 = vld [vmem:[%s7416_s1 + $0x244] ss:$8 sps:$4 sm:$0xff]  }
  0x5d   :  { %3725 = vmatprep.subr.bf16.mxu0 %v4951_v48  ;;  %v5029_v48 = vld [vmem:[%s7416_s1 + $0xa44] ss:$8 sps:$4 sm:$0xff]  }
  0x5f   :  { %3398 = vmatpush1.bf16.msra.mxu1 %v4946_v50  ;;  %v5024_v50 = vld [vmem:[%s7416_s1 + $0x240] ss:$8 sps:$4 sm:$0xff]  }
  0x60   :  { %3726 = vmatpush1.bf16.msra.mxu0 %v4949_v51  ;;  %3399 = vmatprep.subr.bf16.mxu1 %v4954_v53  ;;  %v5027_v51 = vld [vmem:[%s7416_s1 + $0xa40] ss:$8 sps:$4 sm:$0xff]   ;;  %v5032_v53 = vld [vmem:[%s7416_s1 + $0x254] ss:$8 sps:$4 sm:$0xff]  }
  0x61   :  { %3727 = vmatprep.subr.bf16.mxu0 %v4957_v54  ;;  %v5035_v54 = vld [vmem:[%s7416_s1 + $0xa54] ss:$8 sps:$4 sm:$0xff]  }
  0x63   :  { %3400 = vmatpush1.bf16.msra.mxu1 %v4952_v55  ;;  %v5030_v55 = vld [vmem:[%s7416_s1 + $0x250] ss:$8 sps:$4 sm:$0xff]  }
  0x64   :  { %3728 = vmatpush1.bf16.msra.mxu0 %v4955_v57  ;;  %3401 = vmatprep.subr.bf16.mxu1 %v4960_v58  ;;  %v5033_v57 = vld [vmem:[%s7416_s1 + $0xa50] ss:$8 sps:$4 sm:$0xff]   ;;  %v5038_v58 = vld [vmem:[%s7416_s1 + $0x264] ss:$8 sps:$4 sm:$0xff]  }
  0x65   :  { %3729 = vmatprep.subr.bf16.mxu0 %v4963_v59  ;;  %v5041_v59 = vld [vmem:[%s7416_s1 + $0xa64] ss:$8 sps:$4 sm:$0xff]  }
  0x67   :  { %3402 = vmatpush1.bf16.msra.mxu1 %v4958_v60  ;;  %v5036_v60 = vld [vmem:[%s7416_s1 + $0x260] ss:$8 sps:$4 sm:$0xff]  }
  0x68   :  { %3730 = vmatpush1.bf16.msra.mxu0 %v4961_v61  ;;  %3403 = vmatprep.subr.bf16.mxu1 %v4966_v62  ;;  %v5039_v61 = vld [vmem:[%s7416_s1 + $0xa60] ss:$8 sps:$4 sm:$0xff]   ;;  %v5044_v62 = vld [vmem:[%s7416_s1 + $0x274] ss:$8 sps:$4 sm:$0xff]  }
  0x69   :  { %3731 = vmatprep.subr.bf16.mxu0 %v4969_v63  ;;  %v5047_v63 = vld [vmem:[%s7416_s1 + $0xa74] ss:$8 sps:$4 sm:$0xff]  }
  0x6b   :  { %3404 = vmatpush1.bf16.msra.mxu1 %v4964_v0  ;;  %v5042_v0 = vld [vmem:[%s7416_s1 + $0x270] ss:$8 sps:$4 sm:$0xff]  }
  0x6c   :  { %3732 = vmatpush1.bf16.msra.mxu0 %v4967_v1  ;;  %3405 = vmatprep.subr.bf16.mxu1 %v4972_v2  ;;  %v5045_v1 = vld [vmem:[%s7416_s1 + $0xa70] ss:$8 sps:$4 sm:$0xff]   ;;  %v5050_v2 = vld [vmem:[%s7416_s1 + $0x284] ss:$8 sps:$4 sm:$0xff]  }
  0x6d   :  { %3733 = vmatprep.subr.bf16.mxu0 %v4975_v3  ;;  %v5053_v3 = vld [vmem:[%s7416_s1 + $0xa84] ss:$8 sps:$4 sm:$0xff]  }
  0x6f   :  { %3406 = vmatpush1.bf16.msra.mxu1 %v4970_v4  ;;  %v5048_v4 = vld [vmem:[%s7416_s1 + $0x280] ss:$8 sps:$4 sm:$0xff]  }
  0x70   :  { %3734 = vmatpush1.bf16.msra.mxu0 %v4973_v5  ;;  %3407 = vmatprep.subr.bf16.mxu1 %v4978_v6  ;;  %v5051_v5 = vld [vmem:[%s7416_s1 + $0xa80] ss:$8 sps:$4 sm:$0xff]   ;;  %v5056_v6 = vld [vmem:[%s7416_s1 + $0x294] ss:$8 sps:$4 sm:$0xff]  }
  0x71   :  { %3735 = vmatprep.subr.bf16.mxu0 %v4981_v7  ;;  %v5059_v7 = vld [vmem:[%s7416_s1 + $0xa94] ss:$8 sps:$4 sm:$0xff]  }
  0x73   :  { %3408 = vmatpush1.bf16.msra.mxu1 %v4976_v8  ;;  %v5054_v8 = vld [vmem:[%s7416_s1 + $0x290] ss:$8 sps:$4 sm:$0xff]  }
  0x74   :  { %3736 = vmatpush1.bf16.msra.mxu0 %v4979_v9  ;;  %3409 = vmatprep.subr.bf16.mxu1 %v4984_v10  ;;  %v5057_v9 = vld [vmem:[%s7416_s1 + $0xa90] ss:$8 sps:$4 sm:$0xff]   ;;  %v5062_v10 = vld [vmem:[%s7416_s1 + $0x2a4] ss:$8 sps:$4 sm:$0xff]  }
  0x75   :  { %3737 = vmatprep.subr.bf16.mxu0 %v4987_v11  ;;  %v5065_v11 = vld [vmem:[%s7416_s1 + $0xaa4] ss:$8 sps:$4 sm:$0xff]  }
  0x77   :  { %3410 = vmatpush1.bf16.msra.mxu1 %v4982_v12  ;;  %v5060_v12 = vld [vmem:[%s7416_s1 + $0x2a0] ss:$8 sps:$4 sm:$0xff]  }
  0x78   :  { %3738 = vmatpush1.bf16.msra.mxu0 %v4985_v13  ;;  %3411 = vmatprep.subr.bf16.mxu1 %v4990_v14  ;;  %v5063_v13 = vld [vmem:[%s7416_s1 + $0xaa0] ss:$8 sps:$4 sm:$0xff]   ;;  %v5068_v14 = vld [vmem:[%s7416_s1 + $0x2b4] ss:$8 sps:$4 sm:$0xff]  }
  0x79   :  { %3739 = vmatprep.subr.bf16.mxu0 %v4993_v15  ;;  %v5071_v15 = vld [vmem:[%s7416_s1 + $0xab4] ss:$8 sps:$4 sm:$0xff]  }
  0x7b   :  { %3412 = vmatpush1.bf16.msra.mxu1 %v4988_v20  ;;  %v5074_v20 = vld [vmem:[%s7416_s1 + $0x2c4] ss:$8 sps:$4 sm:$0xff]  }
  0x7c   :  { %3740 = vmatpush1.bf16.msra.mxu0 %v4991_v21  ;;  %3413 = vmatprep.subr.bf16.mxu1 %v4996_v22  ;;  %v5077_v21 = vld [vmem:[%s7416_s1 + $0xac4] ss:$8 sps:$4 sm:$0xff]   ;;  %v5072_v22 = vld [vmem:[%s7416_s1 + $0x2c0] ss:$8 sps:$4 sm:$0xff]  }
  0x7d   :  { %3741 = vmatprep.subr.bf16.mxu0 %v4999_v52  ;;  %v5075_v52 = vld [vmem:[%s7416_s1 + $0xac0] ss:$8 sps:$4 sm:$0xff]  }
  0x7f   :  { %3414 = vmatpush1.bf16.msra.mxu1 %v4994_v24  ;;  %v5080_v24 = vld [vmem:[%s7416_s1 + $0x2d4] ss:$8 sps:$4 sm:$0xff]  }
  0x80   :  { %3742 = vmatpush1.bf16.msra.mxu0 %v4997_v25  ;;  %3424 = vmatprep.subr.bf16.mxu1 %v5002_v26  ;;  %v5083_v25 = vld [vmem:[%s7416_s1 + $0xad4] ss:$8 sps:$4 sm:$0xff]   ;;  %v5078_v26 = vld [vmem:[%s7416_s1 + $0x2d0] ss:$8 sps:$4 sm:$0xff]  }
  0x81   :  { %3752 = vmatprep.subr.bf16.mxu0 %v5005_v27  ;;  %v5081_v27 = vld [vmem:[%s7416_s1 + $0xad0] ss:$8 sps:$4 sm:$0xff]  }
  0x82   :  { %3416 = vmatmul.mubr.bf16.vlgmr.msra.gmra.mrb[0].mxu1 %v599_v30  ;;  %v5084_v30 = vld [vmem:[%s7416_s1 + $0x2e0] ss:$8 sps:$4 sm:$0xff]  }
  0x83   :  { %3744 = vmatmul.mubr.bf16.vlgmr.msra.gmra.mrb[0].mxu0 %v697_v31  ;;  %3425 = vmatpush1.bf16.msra.mxu1 %v5000_v32  ;;  %v5087_v31 = vld [vmem:[%s7416_s1 + $0xae0] ss:$8 sps:$4 sm:$0xff]   ;;  %v5092_v32 = vld [vmem:[%s7416_s1 + $0x2f4] ss:$8 sps:$4 sm:$0xff]  }
  0x84   :  { %3753 = vmatpush1.bf16.msra.mxu0 %v5003_v33  ;;  %3426 = vmatprep.subr.bf16.mxu1 %v5008_v34  ;;  %v5095_v33 = vld [vmem:[%s7416_s1 + $0xaf4] ss:$8 sps:$4 sm:$0xff]   ;;  %v5090_v34 = vld [vmem:[%s7416_s1 + $0x2f0] ss:$8 sps:$4 sm:$0xff]  }
  0x85   :  { %3754 = vmatprep.subr.bf16.mxu0 %v5011_v16  ;;  %3456 = vmatprep.mubr.bf16.mxu1 %v6100_v17  ;;  %v5093_v16 = vld [vmem:[%s7416_s1 + $0xaf0] ss:$8 sps:$4 sm:$0xff]  }
  0x86   :  { %3784 = vmatprep.mubr.bf16.mxu0 %v6103_v35 }
  0x87   :  { %3427 = vmatpush1.bf16.msra.mxu1 %v5006_v36  ;;  %v5098_v36 = vld [vmem:[%s7416_s1 + $0x304] ss:$8 sps:$4 sm:$0xff]  }
  0x88   :  { %3755 = vmatpush1.bf16.msra.mxu0 %v5009_v37  ;;  %3428 = vmatprep.subr.bf16.mxu1 %v5014_v38  ;;  %v5101_v37 = vld [vmem:[%s7416_s1 + $0xb04] ss:$8 sps:$4 sm:$0xff]   ;;  %v6289_v38 = vrot.slane %v6062_v56, %v5785_v49  ;;  %v5104_v56 = vld [vmem:[%s7416_s1 + $0x314] ss:$8 sps:$4 sm:$0xff]  }
  0x89   :  { %3756 = vmatprep.subr.bf16.mxu0 %v5017_v39  ;;  %v6293_v39 = vrot.slane %v6065_v23, %v5785_v49  ;;  %v5107_v23 = vld [vmem:[%s7416_s1 + $0xb14] ss:$8 sps:$4 sm:$0xff]  }
  0x8b   :  { %3429 = vmatpush1.bf16.msra.mxu1 %v5012_v40  ;;  %v5096_v40 = vld [vmem:[%s7416_s1 + $0x300] ss:$8 sps:$4 sm:$0xff]  }
  0x8c   :  { %3757 = vmatpush1.bf16.msra.mxu0 %v5015_v41  ;;  %3430 = vmatprep.subr.bf16.mxu1 %v5020_v43  ;;  %v5099_v41 = vld [vmem:[%s7416_s1 + $0xb00] ss:$8 sps:$4 sm:$0xff]   ;;  %v602_v43 = vcombine.high %v6100_v17, %v6100_v17  ;;  %v5110_v17 = vld [vmem:[%s7416_s1 + $0x324] ss:$8 sps:$4 sm:$0xff]  }
  0x8d   :  { %3758 = vmatprep.subr.bf16.mxu0 %v5023_v44  ;;  %v700_v44 = vcombine.high %v6103_v35, %v6103_v35  ;;  %v5113_v35 = vld [vmem:[%s7416_s1 + $0xb24] ss:$8 sps:$4 sm:$0xff]  }
  0x8f   :  { %3431 = vmatpush1.bf16.msra.mxu1 %v5018_v45  ;;  %v5102_v45 = vld [vmem:[%s7416_s1 + $0x310] ss:$8 sps:$4 sm:$0xff]  }
  0x90   :  { %3759 = vmatpush1.bf16.msra.mxu0 %v5021_v46  ;;  %3432 = vmatprep.subr.bf16.mxu1 %v5026_v47  ;;  %v5105_v46 = vld [vmem:[%s7416_s1 + $0xb10] ss:$8 sps:$4 sm:$0xff]   ;;  %v5108_v47 = vld [vmem:[%s7416_s1 + $0x320] ss:$8 sps:$4 sm:$0xff]  }
  0x91   :  { %3760 = vmatprep.subr.bf16.mxu0 %v5029_v48  ;;  %v5111_v48 = vld [vmem:[%s7416_s1 + $0xb20] ss:$8 sps:$4 sm:$0xff]  }
  0x93   :  { %3433 = vmatpush1.bf16.msra.mxu1 %v5024_v50  ;;  %v5116_v50 = vld [vmem:[%s7416_s1 + $0x334] ss:$8 sps:$4 sm:$0xff]  }
  0x94   :  { %3761 = vmatpush1.bf16.msra.mxu0 %v5027_v51  ;;  %3434 = vmatprep.subr.bf16.mxu1 %v5032_v53  ;;  %v5119_v51 = vld [vmem:[%s7416_s1 + $0xb34] ss:$8 sps:$4 sm:$0xff]   ;;  %v5114_v53 = vld [vmem:[%s7416_s1 + $0x330] ss:$8 sps:$4 sm:$0xff]  }
  0x95   :  { %3762 = vmatprep.subr.bf16.mxu0 %v5035_v54  ;;  %v5117_v54 = vld [vmem:[%s7416_s1 + $0xb30] ss:$8 sps:$4 sm:$0xff]  }
  0x97   :  { %3435 = vmatpush1.bf16.msra.mxu1 %v5030_v55  ;;  %v5122_v55 = vld [vmem:[%s7416_s1 + $0x344] ss:$8 sps:$4 sm:$0xff]  }
  0x98   :  { %3763 = vmatpush1.bf16.msra.mxu0 %v5033_v57  ;;  %3436 = vmatprep.subr.bf16.mxu1 %v5038_v58  ;;  %v5125_v57 = vld [vmem:[%s7416_s1 + $0xb44] ss:$8 sps:$4 sm:$0xff]   ;;  %v5120_v58 = vld [vmem:[%s7416_s1 + $0x340] ss:$8 sps:$4 sm:$0xff]  }
  0x99   :  { %3764 = vmatprep.subr.bf16.mxu0 %v5041_v59  ;;  %v5123_v59 = vld [vmem:[%s7416_s1 + $0xb40] ss:$8 sps:$4 sm:$0xff]  }
  0x9b   :  { %3437 = vmatpush1.bf16.msra.mxu1 %v5036_v60  ;;  %v5128_v60 = vld [vmem:[%s7416_s1 + $0x354] ss:$8 sps:$4 sm:$0xff]  }
  0x9c   :  { %3765 = vmatpush1.bf16.msra.mxu0 %v5039_v61  ;;  %3438 = vmatprep.subr.bf16.mxu1 %v5044_v62  ;;  %v5131_v61 = vld [vmem:[%s7416_s1 + $0xb54] ss:$8 sps:$4 sm:$0xff]   ;;  %v5126_v62 = vld [vmem:[%s7416_s1 + $0x350] ss:$8 sps:$4 sm:$0xff]  }
  0x9d   :  { %3766 = vmatprep.subr.bf16.mxu0 %v5047_v63  ;;  %v5129_v63 = vld [vmem:[%s7416_s1 + $0xb50] ss:$8 sps:$4 sm:$0xff]  }
  0x9f   :  { %3439 = vmatpush1.bf16.msra.mxu1 %v5042_v0  ;;  %v5134_v0 = vld [vmem:[%s7416_s1 + $0x364] ss:$8 sps:$4 sm:$0xff]  }
  0xa0   :  { %3767 = vmatpush1.bf16.msra.mxu0 %v5045_v1  ;;  %3440 = vmatprep.subr.bf16.mxu1 %v5050_v2  ;;  %v5137_v1 = vld [vmem:[%s7416_s1 + $0xb64] ss:$8 sps:$4 sm:$0xff]   ;;  %v5132_v2 = vld [vmem:[%s7416_s1 + $0x360] ss:$8 sps:$4 sm:$0xff]  }
  0xa1   :  { %3768 = vmatprep.subr.bf16.mxu0 %v5053_v3  ;;  %v5135_v3 = vld [vmem:[%s7416_s1 + $0xb60] ss:$8 sps:$4 sm:$0xff]  }
  0xa3   :  { %3441 = vmatpush1.bf16.msra.mxu1 %v5048_v4  ;;  %v5140_v4 = vld [vmem:[%s7416_s1 + $0x374] ss:$8 sps:$4 sm:$0xff]  }
  0xa4   :  { %3769 = vmatpush1.bf16.msra.mxu0 %v5051_v5  ;;  %3442 = vmatprep.subr.bf16.mxu1 %v5056_v6  ;;  %v5143_v5 = vld [vmem:[%s7416_s1 + $0xb74] ss:$8 sps:$4 sm:$0xff]   ;;  %v5138_v6 = vld [vmem:[%s7416_s1 + $0x370] ss:$8 sps:$4 sm:$0xff]  }
  0xa5   :  { %3770 = vmatprep.subr.bf16.mxu0 %v5059_v7  ;;  %v5141_v7 = vld [vmem:[%s7416_s1 + $0xb70] ss:$8 sps:$4 sm:$0xff]  }
  0xa7   :  { %3443 = vmatpush1.bf16.msra.mxu1 %v5054_v8  ;;  %v5146_v8 = vld [vmem:[%s7416_s1 + $0x384] ss:$8 sps:$4 sm:$0xff]  }
  0xa8   :  { %3771 = vmatpush1.bf16.msra.mxu0 %v5057_v9  ;;  %3444 = vmatprep.subr.bf16.mxu1 %v5062_v10  ;;  %v5149_v9 = vld [vmem:[%s7416_s1 + $0xb84] ss:$8 sps:$4 sm:$0xff]   ;;  %v5144_v10 = vld [vmem:[%s7416_s1 + $0x380] ss:$8 sps:$4 sm:$0xff]  }
  0xa9   :  { %3772 = vmatprep.subr.bf16.mxu0 %v5065_v11  ;;  %v5147_v11 = vld [vmem:[%s7416_s1 + $0xb80] ss:$8 sps:$4 sm:$0xff]  }
  0xab   :  { %3445 = vmatpush1.bf16.msra.mxu1 %v5060_v12  ;;  %v5152_v12 = vld [vmem:[%s7416_s1 + $0x394] ss:$8 sps:$4 sm:$0xff]  }
  0xac   :  { %3773 = vmatpush1.bf16.msra.mxu0 %v5063_v13  ;;  %3446 = vmatprep.subr.bf16.mxu1 %v5068_v14  ;;  %v5155_v13 = vld [vmem:[%s7416_s1 + $0xb94] ss:$8 sps:$4 sm:$0xff]   ;;  %v5150_v14 = vld [vmem:[%s7416_s1 + $0x390] ss:$8 sps:$4 sm:$0xff]  }
  0xad   :  { %3774 = vmatprep.subr.bf16.mxu0 %v5071_v15  ;;  %v5153_v15 = vld [vmem:[%s7416_s1 + $0xb90] ss:$8 sps:$4 sm:$0xff]  }
  0xaf   :  { %3447 = vmatpush1.bf16.msra.mxu1 %v5066_v18  ;;  %v5158_v18 = vld [vmem:[%s7416_s1 + $0x3a4] ss:$8 sps:$4 sm:$0xff]  }
  0xb0   :  { %3775 = vmatpush1.bf16.msra.mxu0 %v5069_v19  ;;  %3448 = vmatprep.subr.bf16.mxu1 %v5074_v20  ;;  %v5161_v19 = vld [vmem:[%s7416_s1 + $0xba4] ss:$8 sps:$4 sm:$0xff]   ;;  %v5156_v20 = vld [vmem:[%s7416_s1 + $0x3a0] ss:$8 sps:$4 sm:$0xff]  }
  0xb1   :  { %3776 = vmatprep.subr.bf16.mxu0 %v5077_v21  ;;  %v5159_v21 = vld [vmem:[%s7416_s1 + $0xba0] ss:$8 sps:$4 sm:$0xff]  }
  0xb3   :  { %3449 = vmatpush1.bf16.msra.mxu1 %v5072_v22  ;;  %v5164_v22 = vld [vmem:[%s7416_s1 + $0x3b4] ss:$8 sps:$4 sm:$0xff]  }
  0xb4   :  { %3777 = vmatpush1.bf16.msra.mxu0 %v5075_v52  ;;  %3450 = vmatprep.subr.bf16.mxu1 %v5080_v24  ;;  %v5167_v52 = vld [vmem:[%s7416_s1 + $0xbb4] ss:$8 sps:$4 sm:$0xff]   ;;  %v5162_v24 = vld [vmem:[%s7416_s1 + $0x3b0] ss:$8 sps:$4 sm:$0xff]  }
  0xb5   :  { %3778 = vmatprep.subr.bf16.mxu0 %v5083_v25  ;;  %v5165_v25 = vld [vmem:[%s7416_s1 + $0xbb0] ss:$8 sps:$4 sm:$0xff]  }
  0xb7   :  { %3451 = vmatpush1.bf16.msra.mxu1 %v5078_v26  ;;  %v5170_v26 = vld [vmem:[%s7416_s1 + $0x3c4] ss:$8 sps:$4 sm:$0xff]  }
  0xb8   :  { %3779 = vmatpush1.bf16.msra.mxu0 %v5081_v27  ;;  %3452 = vmatprep.subr.bf16.mxu1 %v5086_v28  ;;  %v5173_v27 = vld [vmem:[%s7416_s1 + $0xbc4] ss:$8 sps:$4 sm:$0xff]   ;;  %v5168_v28 = vld [vmem:[%s7416_s1 + $0x3c0] ss:$8 sps:$4 sm:$0xff]  }
  0xb9   :  { %3780 = vmatprep.subr.bf16.mxu0 %v5089_v29  ;;  %v5171_v29 = vld [vmem:[%s7416_s1 + $0xbc0] ss:$8 sps:$4 sm:$0xff]  }
  0xbb   :  { %3453 = vmatpush1.bf16.msra.mxu1 %v5084_v30  ;;  %v5176_v30 = vld [vmem:[%s7416_s1 + $0x3d4] ss:$8 sps:$4 sm:$0xff]  }
  0xbc   :  { %3781 = vmatpush1.bf16.msra.mxu0 %v5087_v31  ;;  %3454 = vmatprep.subr.bf16.mxu1 %v5092_v32  ;;  %v5179_v31 = vld [vmem:[%s7416_s1 + $0xbd4] ss:$8 sps:$4 sm:$0xff]   ;;  %v5174_v32 = vld [vmem:[%s7416_s1 + $0x3d0] ss:$8 sps:$4 sm:$0xff]  }
  0xbd   :  { %3782 = vmatprep.subr.bf16.mxu0 %v5095_v33  ;;  %v5177_v33 = vld [vmem:[%s7416_s1 + $0xbd0] ss:$8 sps:$4 sm:$0xff]  }
  0xbf   :  { %3455 = vmatpush1.bf16.msra.mxu1 %v5090_v34  ;;  %v5182_v34 = vld [vmem:[%s7416_s1 + $0x3e4] ss:$8 sps:$4 sm:$0xff]  }
  0xc0   :  { %3783 = vmatpush1.bf16.msra.mxu0 %v5093_v16  ;;  %3465 = vmatprep.subr.bf16.mxu1 %v5098_v36  ;;  %v5185_v16 = vld [vmem:[%s7416_s1 + $0xbe4] ss:$8 sps:$4 sm:$0xff]   ;;  %v5180_v36 = vld [vmem:[%s7416_s1 + $0x3e0] ss:$8 sps:$4 sm:$0xff]  }
  0xc1   :  { %3793 = vmatprep.subr.bf16.mxu0 %v5101_v37  ;;  %v5183_v37 = vld [vmem:[%s7416_s1 + $0xbe0] ss:$8 sps:$4 sm:$0xff]  }
  0xc2   :  { %3457 = vmatmul.mubr.bf16.vlgmr.msra.gmra.mrb[0].mxu1 %v6289_v38 }
  0xc3   :  { %3785 = vmatmul.mubr.bf16.vlgmr.msra.gmra.mrb[0].mxu0 %v6293_v39  ;;  %3466 = vmatpush1.bf16.msra.mxu1 %v5096_v40  ;;  %v6478_v40 = vld [vmem:[%s7415_s0 + $0x8] sm:$0xff] }
  0xc4   :  { %3794 = vmatpush1.bf16.msra.mxu0 %v5099_v41  ;;  %3467 = vmatprep.subr.bf16.mxu1 %v5104_v56  ;;  %v6483_v41 = vld [vmem:[%s7415_s0 + $0x18] sm:$0xff] }
  0xc5   :  { %3795 = vmatprep.subr.bf16.mxu0 %v5107_v23  ;;  %3497 = vmatprep.mubr.bf16.mxu1 %v602_v43  ;;  %v5188_v56 = vld [vmem:[%s7416_s1 + $0x3f4] ss:$8 sps:$4 sm:$0xff]   ;;  %v6493_v43 = vrot.slane %v6478_v40, %v5785_v49 }
  0xc6   :  { %3825 = vmatprep.mubr.bf16.mxu0 %v700_v44  ;;  %v5191_v23 = vld [vmem:[%s7416_s1 + $0xbf4] ss:$8 sps:$4 sm:$0xff]   ;;  %v6497_v44 = vrot.slane %v6483_v41, %v5785_v49 }
  0xc7   :  { %3468 = vmatpush1.bf16.msra.mxu1 %v5102_v45  ;;  %v5186_v45 = vld [vmem:[%s7416_s1 + $0x3f0] ss:$8 sps:$4 sm:$0xff]  }
  0xc8   :  { %3796 = vmatpush1.bf16.msra.mxu0 %v5105_v46  ;;  %3469 = vmatprep.subr.bf16.mxu1 %v5110_v17  ;;  %v5189_v46 = vld [vmem:[%s7416_s1 + $0xbf0] ss:$8 sps:$4 sm:$0xff]   ;;  %v5194_v17 = vld [vmem:[%s7416_s1 + $0x404] ss:$8 sps:$4 sm:$0xff]  }
  0xc9   :  { %3797 = vmatprep.subr.bf16.mxu0 %v5113_v35  ;;  %v5197_v35 = vld [vmem:[%s7416_s1 + $0xc04] ss:$8 sps:$4 sm:$0xff]  }
  0xcb   :  { %3470 = vmatpush1.bf16.msra.mxu1 %v5108_v47  ;;  %v618_v47 = vcombine.high %v6493_v43, %v6493_v43 }
  0xcc   :  { %3798 = vmatpush1.bf16.msra.mxu0 %v5111_v48  ;;  %3471 = vmatprep.subr.bf16.mxu1 %v5116_v50  ;;  %v716_v48 = vcombine.high %v6497_v44, %v6497_v44  ;;  %v5192_v50 = vld [vmem:[%s7416_s1 + $0x400] ss:$8 sps:$4 sm:$0xff]  }
  0xcd   :  { %3799 = vmatprep.subr.bf16.mxu0 %v5119_v51  ;;  %v5195_v51 = vld [vmem:[%s7416_s1 + $0xc00] ss:$8 sps:$4 sm:$0xff]  }
  0xcf   :  { %3472 = vmatpush1.bf16.msra.mxu1 %v5114_v53  ;;  %v600_v53 = vcombine.high %v6289_v38, %v6289_v38  ;;  %v6535_v38 = vrot.slane %v716_v48, %v5785_v49  ;;  %v5273_v48 = vld [vmem:[%s7416_s1 + $0xcd0] ss:$8 sps:$4 sm:$0xff]  }
  0xd0   :  { %3800 = vmatpush1.bf16.msra.mxu0 %v5117_v54  ;;  %3473 = vmatprep.subr.bf16.mxu1 %v5122_v55  ;;  %v698_v54 = vcombine.high %v6293_v39, %v6293_v39  ;;  %v5200_v55 = vld [vmem:[%s7416_s1 + $0x414] ss:$8 sps:$4 sm:$0xff]   ;;  %v5198_v39 = vld [vmem:[%s7416_s1 + $0x410] ss:$8 sps:$4 sm:$0xff]  }
  0xd1   :  { %3801 = vmatprep.subr.bf16.mxu0 %v5125_v57  ;;  %v5203_v57 = vld [vmem:[%s7416_s1 + $0xc14] ss:$8 sps:$4 sm:$0xff]  }
  0xd3   :  { %3474 = vmatpush1.bf16.msra.mxu1 %v5120_v58  ;;  %v6532_v58 = vrot.slane %v618_v47, %v5785_v49  ;;  %v5270_v47 = vld [vmem:[%s7416_s1 + $0x4d0] ss:$8 sps:$4 sm:$0xff]  }
  0xd4   :  { %3802 = vmatpush1.bf16.msra.mxu0 %v5123_v59  ;;  %3475 = vmatprep.subr.bf16.mxu1 %v5128_v60  ;;  %v5201_v59 = vld [vmem:[%s7416_s1 + $0xc10] ss:$8 sps:$4 sm:$0xff]   ;;  %v5206_v60 = vld [vmem:[%s7416_s1 + $0x424] ss:$8 sps:$4 sm:$0xff]  }
  0xd5   :  { %3803 = vmatprep.subr.bf16.mxu0 %v5131_v61  ;;  %v5209_v61 = vld [vmem:[%s7416_s1 + $0xc24] ss:$8 sps:$4 sm:$0xff]  }
  0xd7   :  { %3476 = vmatpush1.bf16.msra.mxu1 %v5126_v62  ;;  %v5204_v62 = vld [vmem:[%s7416_s1 + $0x420] ss:$8 sps:$4 sm:$0xff]  }
  0xd8   :  { %3804 = vmatpush1.bf16.msra.mxu0 %v5129_v63  ;;  %3477 = vmatprep.subr.bf16.mxu1 %v5134_v0  ;;  %v5207_v63 = vld [vmem:[%s7416_s1 + $0xc20] ss:$8 sps:$4 sm:$0xff]   ;;  %v5212_v0 = vld [vmem:[%s7416_s1 + $0x434] ss:$8 sps:$4 sm:$0xff]  }
  0xd9   :  { %3805 = vmatprep.subr.bf16.mxu0 %v5137_v1  ;;  %v5215_v1 = vld [vmem:[%s7416_s1 + $0xc34] ss:$8 sps:$4 sm:$0xff]  }
  0xdb   :  { %3478 = vmatpush1.bf16.msra.mxu1 %v5132_v2  ;;  %v5210_v2 = vld [vmem:[%s7416_s1 + $0x430] ss:$8 sps:$4 sm:$0xff]  }
  0xdc   :  { %3806 = vmatpush1.bf16.msra.mxu0 %v5135_v3  ;;  %3479 = vmatprep.subr.bf16.mxu1 %v5140_v4  ;;  %v5213_v3 = vld [vmem:[%s7416_s1 + $0xc30] ss:$8 sps:$4 sm:$0xff]   ;;  %v5218_v4 = vld [vmem:[%s7416_s1 + $0x444] ss:$8 sps:$4 sm:$0xff]  }
  0xdd   :  { %3807 = vmatprep.subr.bf16.mxu0 %v5143_v5  ;;  %v5221_v5 = vld [vmem:[%s7416_s1 + $0xc44] ss:$8 sps:$4 sm:$0xff]  }
  0xdf   :  { %3480 = vmatpush1.bf16.msra.mxu1 %v5138_v6  ;;  %v5216_v6 = vld [vmem:[%s7416_s1 + $0x440] ss:$8 sps:$4 sm:$0xff]  }
  0xe0   :  { %3808 = vmatpush1.bf16.msra.mxu0 %v5141_v7  ;;  %3481 = vmatprep.subr.bf16.mxu1 %v5146_v8  ;;  %v5219_v7 = vld [vmem:[%s7416_s1 + $0xc40] ss:$8 sps:$4 sm:$0xff]   ;;  %v5224_v8 = vld [vmem:[%s7416_s1 + $0x454] ss:$8 sps:$4 sm:$0xff]  }
  0xe1   :  { %3809 = vmatprep.subr.bf16.mxu0 %v5149_v9  ;;  %v5227_v9 = vld [vmem:[%s7416_s1 + $0xc54] ss:$8 sps:$4 sm:$0xff]  }
  0xe3   :  { %3482 = vmatpush1.bf16.msra.mxu1 %v5144_v10  ;;  %v5222_v10 = vld [vmem:[%s7416_s1 + $0x450] ss:$8 sps:$4 sm:$0xff]  }
  0xe4   :  { %3810 = vmatpush1.bf16.msra.mxu0 %v5147_v11  ;;  %3483 = vmatprep.subr.bf16.mxu1 %v5152_v12  ;;  %v5225_v11 = vld [vmem:[%s7416_s1 + $0xc50] ss:$8 sps:$4 sm:$0xff]   ;;  %v5230_v12 = vld [vmem:[%s7416_s1 + $0x464] ss:$8 sps:$4 sm:$0xff]  }
  0xe5   :  { %3811 = vmatprep.subr.bf16.mxu0 %v5155_v13  ;;  %v5233_v13 = vld [vmem:[%s7416_s1 + $0xc64] ss:$8 sps:$4 sm:$0xff]  }
  0xe7   :  { %3484 = vmatpush1.bf16.msra.mxu1 %v5150_v14  ;;  %v5228_v14 = vld [vmem:[%s7416_s1 + $0x460] ss:$8 sps:$4 sm:$0xff]  }
  0xe8   :  { %3812 = vmatpush1.bf16.msra.mxu0 %v5153_v15  ;;  %3485 = vmatprep.subr.bf16.mxu1 %v5158_v18  ;;  %v5231_v15 = vld [vmem:[%s7416_s1 + $0xc60] ss:$8 sps:$4 sm:$0xff]   ;;  %v5236_v18 = vld [vmem:[%s7416_s1 + $0x474] ss:$8 sps:$4 sm:$0xff]  }
  0xe9   :  { %3813 = vmatprep.subr.bf16.mxu0 %v5161_v19  ;;  %v5239_v19 = vld [vmem:[%s7416_s1 + $0xc74] ss:$8 sps:$4 sm:$0xff]  }
  0xeb   :  { %3486 = vmatpush1.bf16.msra.mxu1 %v5156_v20  ;;  %v5234_v20 = vld [vmem:[%s7416_s1 + $0x470] ss:$8 sps:$4 sm:$0xff]  }
  0xec   :  { %3814 = vmatpush1.bf16.msra.mxu0 %v5159_v21  ;;  %3487 = vmatprep.subr.bf16.mxu1 %v5164_v22  ;;  %v5237_v21 = vld [vmem:[%s7416_s1 + $0xc70] ss:$8 sps:$4 sm:$0xff]   ;;  %v5242_v22 = vld [vmem:[%s7416_s1 + $0x484] ss:$8 sps:$4 sm:$0xff]  }
  0xed   :  { %3815 = vmatprep.subr.bf16.mxu0 %v5167_v52  ;;  %v5245_v52 = vld [vmem:[%s7416_s1 + $0xc84] ss:$8 sps:$4 sm:$0xff]  }
  0xef   :  { %3488 = vmatpush1.bf16.msra.mxu1 %v5162_v24  ;;  %v5240_v24 = vld [vmem:[%s7416_s1 + $0x480] ss:$8 sps:$4 sm:$0xff]  }
  0xf0   :  { %3816 = vmatpush1.bf16.msra.mxu0 %v5165_v25  ;;  %3489 = vmatprep.subr.bf16.mxu1 %v5170_v26  ;;  %v5243_v25 = vld [vmem:[%s7416_s1 + $0xc80] ss:$8 sps:$4 sm:$0xff]   ;;  %v5248_v26 = vld [vmem:[%s7416_s1 + $0x494] ss:$8 sps:$4 sm:$0xff]  }
  0xf1   :  { %3817 = vmatprep.subr.bf16.mxu0 %v5173_v27  ;;  %v5251_v27 = vld [vmem:[%s7416_s1 + $0xc94] ss:$8 sps:$4 sm:$0xff]  }
  0xf3   :  { %3490 = vmatpush1.bf16.msra.mxu1 %v5168_v28  ;;  %v5246_v28 = vld [vmem:[%s7416_s1 + $0x490] ss:$8 sps:$4 sm:$0xff]  }
  0xf4   :  { %3818 = vmatpush1.bf16.msra.mxu0 %v5171_v29  ;;  %3491 = vmatprep.subr.bf16.mxu1 %v5176_v30  ;;  %v5249_v29 = vld [vmem:[%s7416_s1 + $0xc90] ss:$8 sps:$4 sm:$0xff]   ;;  %v5254_v30 = vld [vmem:[%s7416_s1 + $0x4a4] ss:$8 sps:$4 sm:$0xff]  }
  0xf5   :  { %3819 = vmatprep.subr.bf16.mxu0 %v5179_v31  ;;  %v5257_v31 = vld [vmem:[%s7416_s1 + $0xca4] ss:$8 sps:$4 sm:$0xff]  }
  0xf7   :  { %3492 = vmatpush1.bf16.msra.mxu1 %v5174_v32  ;;  %v5252_v32 = vld [vmem:[%s7416_s1 + $0x4a0] ss:$8 sps:$4 sm:$0xff]  }
  0xf8   :  { %3820 = vmatpush1.bf16.msra.mxu0 %v5177_v33  ;;  %3493 = vmatprep.subr.bf16.mxu1 %v5182_v34  ;;  %v5255_v33 = vld [vmem:[%s7416_s1 + $0xca0] ss:$8 sps:$4 sm:$0xff]   ;;  %v5260_v34 = vld [vmem:[%s7416_s1 + $0x4b4] ss:$8 sps:$4 sm:$0xff]  }
  0xf9   :  { %3821 = vmatprep.subr.bf16.mxu0 %v5185_v16  ;;  %v5263_v16 = vld [vmem:[%s7416_s1 + $0xcb4] ss:$8 sps:$4 sm:$0xff]  }
  0xfb   :  { %3494 = vmatpush1.bf16.msra.mxu1 %v5180_v36  ;;  %v5258_v36 = vld [vmem:[%s7416_s1 + $0x4b0] ss:$8 sps:$4 sm:$0xff]  }
  0xfc   :  { %3822 = vmatpush1.bf16.msra.mxu0 %v5183_v37  ;;  %3495 = vmatprep.subr.bf16.mxu1 %v5188_v56  ;;  %v5261_v37 = vld [vmem:[%s7416_s1 + $0xcb0] ss:$8 sps:$4 sm:$0xff]   ;;  %v5266_v56 = vld [vmem:[%s7416_s1 + $0x4c4] ss:$8 sps:$4 sm:$0xff]  }
  0xfd   :  { %3823 = vmatprep.subr.bf16.mxu0 %v5191_v23  ;;  %v5269_v23 = vld [vmem:[%s7416_s1 + $0xcc4] ss:$8 sps:$4 sm:$0xff]  }
  0xff   :  { %3496 = vmatpush1.bf16.msra.mxu1 %v5186_v45  ;;  %v5264_v45 = vld [vmem:[%s7416_s1 + $0x4c0] ss:$8 sps:$4 sm:$0xff]  }
 0x100   :  { %3824 = vmatpush1.bf16.msra.mxu0 %v5189_v46  ;;  %3506 = vmatprep.subr.bf16.mxu1 %v5194_v17  ;;  %v5267_v46 = vld [vmem:[%s7416_s1 + $0xcc0] ss:$8 sps:$4 sm:$0xff]   ;;  %v5272_v17 = vld [vmem:[%s7416_s1 + $0x4d4] ss:$8 sps:$4 sm:$0xff]  }
 0x101   :  { %3834 = vmatprep.subr.bf16.mxu0 %v5197_v35  ;;  %v5275_v35 = vld [vmem:[%s7416_s1 + $0xcd4] ss:$8 sps:$4 sm:$0xff]  }
 0x102   :  { %3498 = vmatmul.mubr.bf16.vlgmr.msra.gmra.mrb[0].mxu1 %v600_v53  ;;  %v5276_v53 = vld [vmem:[%s7416_s1 + $0x4e0] ss:$8 sps:$4 sm:$0xff]  }
 0x103   :  { %3826 = vmatmul.mubr.bf16.vlgmr.msra.gmra.mrb[0].mxu0 %v698_v54  ;;  %3507 = vmatpush1.bf16.msra.mxu1 %v5192_v50  ;;  %v5278_v50 = vld [vmem:[%s7416_s1 + $0x4e4] ss:$8 sps:$4 sm:$0xff]   ;;  %v5279_v54 = vld [vmem:[%s7416_s1 + $0xce0] ss:$8 sps:$4 sm:$0xff]  }
 0x104   :  { %3835 = vmatpush1.bf16.msra.mxu0 %v5195_v51  ;;  %3508 = vmatprep.subr.bf16.mxu1 %v5200_v55  ;;  %v5281_v51 = vld [vmem:[%s7416_s1 + $0xce4] ss:$8 sps:$4 sm:$0xff]   ;;  %v5284_v55 = vld [vmem:[%s7416_s1 + $0x4f4] ss:$8 sps:$4 sm:$0xff]  }
 0x105   :  { %3836 = vmatprep.subr.bf16.mxu0 %v5203_v57  ;;  %3538 = vmatprep.mubr.bf16.mxu1 %v6532_v58  ;;  %v5287_v57 = vld [vmem:[%s7416_s1 + $0xcf4] ss:$8 sps:$4 sm:$0xff]  }
 0x106   :  { %3866 = vmatprep.mubr.bf16.mxu0 %v6535_v38 }
 0x107   :  { %3509 = vmatpush1.bf16.msra.mxu1 %v5198_v39  ;;  %v5282_v39 = vld [vmem:[%s7416_s1 + $0x4f0] ss:$8 sps:$4 sm:$0xff]  }
 0x108   :  { %3837 = vmatpush1.bf16.msra.mxu0 %v5201_v59  ;;  %3510 = vmatprep.subr.bf16.mxu1 %v5206_v60  ;;  %v5285_v59 = vld [vmem:[%s7416_s1 + $0xcf0] ss:$8 sps:$4 sm:$0xff]   ;;  %v5290_v60 = vld [vmem:[%s7416_s1 + $0x504] ss:$8 sps:$4 sm:$0xff]  }
 0x109   :  { %3838 = vmatprep.subr.bf16.mxu0 %v5209_v61  ;;  %v5293_v61 = vld [vmem:[%s7416_s1 + $0xd04] ss:$8 sps:$4 sm:$0xff]  }
 0x10b   :  { %3511 = vmatpush1.bf16.msra.mxu1 %v5204_v62  ;;  %v6721_v62 = vrot.slane %v6493_v43, %v5785_v49  ;;  %v5296_v43 = vld [vmem:[%s7416_s1 + $0x514] ss:$8 sps:$4 sm:$0xff]  }
 0x10c   :  { %3839 = vmatpush1.bf16.msra.mxu0 %v5207_v63  ;;  %3512 = vmatprep.subr.bf16.mxu1 %v5212_v0  ;;  %v6725_v63 = vrot.slane %v6497_v44, %v5785_v49  ;;  %v5288_v0 = vld [vmem:[%s7416_s1 + $0x500] ss:$8 sps:$4 sm:$0xff]   ;;  %v5299_v44 = vld [vmem:[%s7416_s1 + $0xd14] ss:$8 sps:$4 sm:$0xff]  }
 0x10d   :  { %3840 = vmatprep.subr.bf16.mxu0 %v5215_v1  ;;  %v5291_v1 = vld [vmem:[%s7416_s1 + $0xd00] ss:$8 sps:$4 sm:$0xff]  }
 0x10f   :  { %3513 = vmatpush1.bf16.msra.mxu1 %v5210_v2  ;;  %v650_v2 = vcombine.high %v6532_v58, %v6532_v58  ;;  %v5302_v58 = vld [vmem:[%s7416_s1 + $0x524] ss:$8 sps:$4 sm:$0xff]  }
 0x110   :  { %3841 = vmatpush1.bf16.msra.mxu0 %v5213_v3  ;;  %3514 = vmatprep.subr.bf16.mxu1 %v5218_v4  ;;  %v748_v3 = vcombine.high %v6535_v38, %v6535_v38  ;;  %v5294_v4 = vld [vmem:[%s7416_s1 + $0x510] ss:$8 sps:$4 sm:$0xff]   ;;  %v5305_v38 = vld [vmem:[%s7416_s1 + $0xd24] ss:$8 sps:$4 sm:$0xff]  }
 0x111   :  { %3842 = vmatprep.subr.bf16.mxu0 %v5221_v5  ;;  %v5297_v5 = vld [vmem:[%s7416_s1 + $0xd10] ss:$8 sps:$4 sm:$0xff]  }
 0x113   :  { %3515 = vmatpush1.bf16.msra.mxu1 %v5216_v6  ;;  %v5300_v6 = vld [vmem:[%s7416_s1 + $0x520] ss:$8 sps:$4 sm:$0xff]  }
 0x114   :  { %3843 = vmatpush1.bf16.msra.mxu0 %v5219_v7  ;;  %3516 = vmatprep.subr.bf16.mxu1 %v5224_v8  ;;  %v5303_v7 = vld [vmem:[%s7416_s1 + $0xd20] ss:$8 sps:$4 sm:$0xff]   ;;  %v5308_v8 = vld [vmem:[%s7416_s1 + $0x534] ss:$8 sps:$4 sm:$0xff]  }
 0x115   :  { %3844 = vmatprep.subr.bf16.mxu0 %v5227_v9  ;;  %v5311_v9 = vld [vmem:[%s7416_s1 + $0xd34] ss:$8 sps:$4 sm:$0xff]  }
 0x117   :  { %3517 = vmatpush1.bf16.msra.mxu1 %v5222_v10  ;;  %v5306_v10 = vld [vmem:[%s7416_s1 + $0x530] ss:$8 sps:$4 sm:$0xff]  }
 0x118   :  { %3845 = vmatpush1.bf16.msra.mxu0 %v5225_v11  ;;  %3518 = vmatprep.subr.bf16.mxu1 %v5230_v12  ;;  %v5309_v11 = vld [vmem:[%s7416_s1 + $0xd30] ss:$8 sps:$4 sm:$0xff]   ;;  %v5314_v12 = vld [vmem:[%s7416_s1 + $0x544] ss:$8 sps:$4 sm:$0xff]  }
 0x119   :  { %3846 = vmatprep.subr.bf16.mxu0 %v5233_v13  ;;  %v5317_v13 = vld [vmem:[%s7416_s1 + $0xd44] ss:$8 sps:$4 sm:$0xff]  }
 0x11b   :  { %3519 = vmatpush1.bf16.msra.mxu1 %v5228_v14  ;;  %v5312_v14 = vld [vmem:[%s7416_s1 + $0x540] ss:$8 sps:$4 sm:$0xff]  }
 0x11c   :  { %3847 = vmatpush1.bf16.msra.mxu0 %v5231_v15  ;;  %3520 = vmatprep.subr.bf16.mxu1 %v5236_v18  ;;  %v5315_v15 = vld [vmem:[%s7416_s1 + $0xd40] ss:$8 sps:$4 sm:$0xff]   ;;  %v5320_v18 = vld [vmem:[%s7416_s1 + $0x554] ss:$8 sps:$4 sm:$0xff]  }
 0x11d   :  { %3848 = vmatprep.subr.bf16.mxu0 %v5239_v19  ;;  %v5323_v19 = vld [vmem:[%s7416_s1 + $0xd54] ss:$8 sps:$4 sm:$0xff]  }
 0x11f   :  { %3521 = vmatpush1.bf16.msra.mxu1 %v5234_v20 }
 0x120   :  { %3849 = vmatpush1.bf16.msra.mxu0 %v5237_v21  ;;  %3522 = vmatprep.subr.bf16.mxu1 %v5242_v22 }
 0x121   :  { %3850 = vmatprep.subr.bf16.mxu0 %v5245_v52 }
 0x123   :  { %3523 = vmatpush1.bf16.msra.mxu1 %v5240_v24 }
 0x124   :  { %3851 = vmatpush1.bf16.msra.mxu0 %v5243_v25  ;;  %3524 = vmatprep.subr.bf16.mxu1 %v5248_v26 }
 0x125   :  { %3852 = vmatprep.subr.bf16.mxu0 %v5251_v27 }
 0x127   :  { %3525 = vmatpush1.bf16.msra.mxu1 %v5246_v28 }
 0x128   :  { %3853 = vmatpush1.bf16.msra.mxu0 %v5249_v29  ;;  %3526 = vmatprep.subr.bf16.mxu1 %v5254_v30 }
 0x129   :  { %3854 = vmatprep.subr.bf16.mxu0 %v5257_v31 }
 0x12b   :  { %3527 = vmatpush1.bf16.msra.mxu1 %v5252_v32 }
 0x12c   :  { %3855 = vmatpush1.bf16.msra.mxu0 %v5255_v33  ;;  %3528 = vmatprep.subr.bf16.mxu1 %v5260_v34 }
 0x12d   :  { %3856 = vmatprep.subr.bf16.mxu0 %v5263_v16 }
 0x12f   :  { %3529 = vmatpush1.bf16.msra.mxu1 %v5258_v36 }
 0x130   :  { %3857 = vmatpush1.bf16.msra.mxu0 %v5261_v37  ;;  %3530 = vmatprep.subr.bf16.mxu1 %v5266_v56 }
 0x131   :  { %3858 = vmatprep.subr.bf16.mxu0 %v5269_v23 }
 0x133   :  { %3531 = vmatpush1.bf16.msra.mxu1 %v5264_v45 }
 0x134   :  { %3859 = vmatpush1.bf16.msra.mxu0 %v5267_v46  ;;  %3532 = vmatprep.subr.bf16.mxu1 %v5272_v17 }
 0x135   :  { %3860 = vmatprep.subr.bf16.mxu0 %v5275_v35 }
 0x137   :  { %3533 = vmatpush1.bf16.msra.mxu1 %v5270_v47 }
 0x138   :  { %3861 = vmatpush1.bf16.msra.mxu0 %v5273_v48  ;;  %3534 = vmatprep.subr.bf16.mxu1 %v5278_v50 }
 0x139   :  { %3862 = vmatprep.subr.bf16.mxu0 %v5281_v51 }
 0x13b   :  { %3535 = vmatpush1.bf16.msra.mxu1 %v5276_v53 }
 0x13c   :  { %3863 = vmatpush1.bf16.msra.mxu0 %v5279_v54  ;;  %3536 = vmatprep.subr.bf16.mxu1 %v5284_v55 }
 0x13d   :  { %3864 = vmatprep.subr.bf16.mxu0 %v5287_v57 }
 0x13f   :  { %3537 = vmatpush1.bf16.msra.mxu1 %v5282_v39 }
 0x140   :  { %3865 = vmatpush1.bf16.msra.mxu0 %v5285_v59  ;;  %3547 = vmatprep.subr.bf16.mxu1 %v5290_v60 }
 0x141   :  { %3875 = vmatprep.subr.bf16.mxu0 %v5293_v61 }
 0x142   :  { %3539 = vmatmul.mubr.bf16.vlgmr.msra.gmra.mrb[0].mxu1 %v6721_v62 }
 0x143   :  { %3867 = vmatmul.mubr.bf16.vlgmr.msra.gmra.mrb[0].mxu0 %v6725_v63  ;;  %3548 = vmatpush1.bf16.msra.mxu1 %v5288_v0 }
 0x144   :  { %3876 = vmatpush1.bf16.msra.mxu0 %v5291_v1  ;;  %3549 = vmatprep.subr.bf16.mxu1 %v5296_v43 }
 0x145   :  { %3877 = vmatprep.subr.bf16.mxu0 %v5299_v44  ;;  %3579 = vmatprep.mubr.bf16.mxu1 %v650_v2 }
 0x146   :  { %3907 = vmatprep.mubr.bf16.mxu0 %v748_v3 }
 0x147   :  { %3550 = vmatpush1.bf16.msra.mxu1 %v5294_v4 }
 0x148   :  { %3878 = vmatpush1.bf16.msra.mxu0 %v5297_v5  ;;  %3551 = vmatprep.subr.bf16.mxu1 %v5302_v58 }
 0x149   :  { %3879 = vmatprep.subr.bf16.mxu0 %v5305_v38 }
 0x14b   :  { %3552 = vmatpush1.bf16.msra.mxu1 %v5300_v6 }
 0x14c   :  { %3880 = vmatpush1.bf16.msra.mxu0 %v5303_v7  ;;  %3553 = vmatprep.subr.bf16.mxu1 %v5308_v8 }
 0x14d   :  { %3881 = vmatprep.subr.bf16.mxu0 %v5311_v9 }
 0x14f   :  { %3554 = vmatpush1.bf16.msra.mxu1 %v5306_v10 }
 0x150   :  { %3882 = vmatpush1.bf16.msra.mxu0 %v5309_v11  ;;  %3555 = vmatprep.subr.bf16.mxu1 %v5314_v12 }
 0x151   :  { %3883 = vmatprep.subr.bf16.mxu0 %v5317_v13 }
 0x152   :  { %10 = vsyncpa [#allocation3], 0  ;;  %v5318_v20 = vld [vmem:[%s7416_s1 + $0x550] ss:$8 sps:$4 sm:$0xff]   ;;  %v5326_v22 = vld [vmem:[%s7416_s1 + $0x564] ss:$8 sps:$4 sm:$0xff]   ;;  %v603_v0 = vcombine.high %v6478_v40, %v6478_v40  ;;  %v701_v1 = vcombine.high %v6483_v41, %v6483_v41  ;;  %v648_v8 = vcombine.high %v6721_v62, %v6721_v62  ;;  %v746_v9 = vcombine.high %v6725_v63, %v6725_v63 }
 0x153   :  { %3556 = vmatpush1.bf16.msra.mxu1 %v5312_v14  ;;  %v5321_v21 = vld [vmem:[%s7416_s1 + $0xd50] ss:$8 sps:$4 sm:$0xff]   ;;  %v5329_v52 = vld [vmem:[%s7416_s1 + $0xd64] ss:$8 sps:$4 sm:$0xff]   ;;  %v5324_v24 = vld [vmem:[%s7416_s1 + $0x560] ss:$8 sps:$4 sm:$0xff]  }
 0x154   :  { %3884 = vmatpush1.bf16.msra.mxu0 %v5315_v15  ;;  %3557 = vmatprep.subr.bf16.mxu1 %v5320_v18  ;;  %v5327_v25 = vld [vmem:[%s7416_s1 + $0xd60] ss:$8 sps:$4 sm:$0xff]   ;;  %v5332_v26 = vld [vmem:[%s7416_s1 + $0x574] ss:$8 sps:$4 sm:$0xff]   ;;  %v5330_v28 = vld [vmem:[%s7416_s1 + $0x570] ss:$8 sps:$4 sm:$0xff]   ;;  %v6918_v41 = vrot.slane %v603_v0, %v5785_v49  ;;  %v6921_v3 = vrot.slane %v701_v1, %v5785_v49 }
 0x155   :  { %3885 = vmatprep.subr.bf16.mxu0 %v5323_v19  ;;  %v5335_v27 = vld [vmem:[%s7416_s1 + $0xd74] ss:$8 sps:$4 sm:$0xff]   ;;  %v5333_v29 = vld [vmem:[%s7416_s1 + $0xd70] ss:$8 sps:$4 sm:$0xff]   ;;  %v5338_v30 = vld [vmem:[%s7416_s1 + $0x584] ss:$8 sps:$4 sm:$0xff]  }
 0x156   :  { %v5341_v31 = vld [vmem:[%s7416_s1 + $0xd84] ss:$8 sps:$4 sm:$0xff]   ;;  %v5336_v32 = vld [vmem:[%s7416_s1 + $0x580] ss:$8 sps:$4 sm:$0xff]   ;;  %v5344_v34 = vld [vmem:[%s7416_s1 + $0x594] ss:$8 sps:$4 sm:$0xff]   ;;  %v619_v6 = vcombine.high %v6918_v41, %v6918_v41  ;;  %v717_v7 = vcombine.high %v6921_v3, %v6921_v3 }
 0x157   :  { %3558 = vmatpush1.bf16.msra.mxu1 %v5318_v20  ;;  %v5339_v33 = vld [vmem:[%s7416_s1 + $0xd80] ss:$8 sps:$4 sm:$0xff]   ;;  %v5347_v16 = vld [vmem:[%s7416_s1 + $0xd94] ss:$8 sps:$4 sm:$0xff]   ;;  %v5342_v36 = vld [vmem:[%s7416_s1 + $0x590] ss:$8 sps:$4 sm:$0xff]  }
 0x158   :  { %3886 = vmatpush1.bf16.msra.mxu0 %v5321_v21  ;;  %3559 = vmatprep.subr.bf16.mxu1 %v5326_v22  ;;  %v5345_v37 = vld [vmem:[%s7416_s1 + $0xd90] ss:$8 sps:$4 sm:$0xff]   ;;  %v5350_v56 = vld [vmem:[%s7416_s1 + $0x5a4] ss:$8 sps:$4 sm:$0xff]   ;;  %v5348_v45 = vld [vmem:[%s7416_s1 + $0x5a0] ss:$8 sps:$4 sm:$0xff]   ;;  %v6956_v63 = vrot.slane %v619_v6, %v5785_v49  ;;  %v6959_v13 = vrot.slane %v717_v7, %v5785_v49 }
 0x159   :  { %3887 = vmatprep.subr.bf16.mxu0 %v5329_v52  ;;  %v5353_v23 = vld [vmem:[%s7416_s1 + $0xda4] ss:$8 sps:$4 sm:$0xff]   ;;  %v5351_v46 = vld [vmem:[%s7416_s1 + $0xda0] ss:$8 sps:$4 sm:$0xff]   ;;  %v5356_v17 = vld [vmem:[%s7416_s1 + $0x5b4] ss:$8 sps:$4 sm:$0xff]  }
 0x15a   :  { %v5359_v35 = vld [vmem:[%s7416_s1 + $0xdb4] ss:$8 sps:$4 sm:$0xff]   ;;  %v5354_v47 = vld [vmem:[%s7416_s1 + $0x5b0] ss:$8 sps:$4 sm:$0xff]   ;;  %v5362_v50 = vld [vmem:[%s7416_s1 + $0x5c4] ss:$8 sps:$4 sm:$0xff]  }
 0x15b   :  { %3560 = vmatpush1.bf16.msra.mxu1 %v5324_v24  ;;  %v5357_v48 = vld [vmem:[%s7416_s1 + $0xdb0] ss:$8 sps:$4 sm:$0xff]   ;;  %v5365_v51 = vld [vmem:[%s7416_s1 + $0xdc4] ss:$8 sps:$4 sm:$0xff]   ;;  %v5360_v53 = vld [vmem:[%s7416_s1 + $0x5c0] ss:$8 sps:$4 sm:$0xff]  }
 0x15c   :  { %3888 = vmatpush1.bf16.msra.mxu0 %v5327_v25  ;;  %3561 = vmatprep.subr.bf16.mxu1 %v5332_v26  ;;  %v5363_v54 = vld [vmem:[%s7416_s1 + $0xdc0] ss:$8 sps:$4 sm:$0xff]   ;;  %v5368_v55 = vld [vmem:[%s7416_s1 + $0x5d4] ss:$8 sps:$4 sm:$0xff]   ;;  %v5366_v39 = vld [vmem:[%s7416_s1 + $0x5d0] ss:$8 sps:$4 sm:$0xff]  }
 0x15d   :  { %3889 = vmatprep.subr.bf16.mxu0 %v5335_v27  ;;  %v5371_v57 = vld [vmem:[%s7416_s1 + $0xdd4] ss:$8 sps:$4 sm:$0xff]   ;;  %v5369_v59 = vld [vmem:[%s7416_s1 + $0xdd0] ss:$8 sps:$4 sm:$0xff]   ;;  %v5374_v60 = vld [vmem:[%s7416_s1 + $0x5e4] ss:$8 sps:$4 sm:$0xff]  }
 0x15e   :  { %v5377_v61 = vld [vmem:[%s7416_s1 + $0xde4] ss:$8 sps:$4 sm:$0xff]   ;;  %v5372_v43 = vld [vmem:[%s7416_s1 + $0x5e0] ss:$8 sps:$4 sm:$0xff]   ;;  %v5380_v2 = vld [vmem:[%s7416_s1 + $0x5f4] ss:$8 sps:$4 sm:$0xff]  }
 0x15f   :  { %3562 = vmatpush1.bf16.msra.mxu1 %v5330_v28  ;;  %v5375_v44 = vld [vmem:[%s7416_s1 + $0xde0] ss:$8 sps:$4 sm:$0xff]   ;;  %v5383_v40 = vld [vmem:[%s7416_s1 + $0xdf4] ss:$8 sps:$4 sm:$0xff]   ;;  %v5378_v4 = vld [vmem:[%s7416_s1 + $0x5f0] ss:$8 sps:$4 sm:$0xff]  }
 0x160   :  { %3890 = vmatpush1.bf16.msra.mxu0 %v5333_v29  ;;  %3563 = vmatprep.subr.bf16.mxu1 %v5338_v30  ;;  %v5381_v5 = vld [vmem:[%s7416_s1 + $0xdf0] ss:$8 sps:$4 sm:$0xff]   ;;  %v5386_v58 = vld [vmem:[%s7416_s1 + $0x604] ss:$8 sps:$4 sm:$0xff]   ;;  %v5384_v10 = vld [vmem:[%s7416_s1 + $0x600] ss:$8 sps:$4 sm:$0xff]  }
 0x161   :  { %3891 = vmatprep.subr.bf16.mxu0 %v5341_v31  ;;  %v5389_v38 = vld [vmem:[%s7416_s1 + $0xe04] ss:$8 sps:$4 sm:$0xff]   ;;  %v5387_v11 = vld [vmem:[%s7416_s1 + $0xe00] ss:$8 sps:$4 sm:$0xff]   ;;  %v5392_v12 = vld [vmem:[%s7416_s1 + $0x614] ss:$8 sps:$4 sm:$0xff]  }
 0x162   :  { %v5395_v62 = vld [vmem:[%s7416_s1 + $0xe14] ss:$8 sps:$4 sm:$0xff]   ;;  %v5390_v14 = vld [vmem:[%s7416_s1 + $0x610] ss:$8 sps:$4 sm:$0xff]   ;;  %v5398_v18 = vld [vmem:[%s7416_s1 + $0x624] ss:$8 sps:$4 sm:$0xff]  }
 0x163   :  { %3564 = vmatpush1.bf16.msra.mxu1 %v5336_v32  ;;  %v5393_v15 = vld [vmem:[%s7416_s1 + $0xe10] ss:$8 sps:$4 sm:$0xff]   ;;  %v5401_v19 = vld [vmem:[%s7416_s1 + $0xe24] ss:$8 sps:$4 sm:$0xff]   ;;  %v5396_v20 = vld [vmem:[%s7416_s1 + $0x620] ss:$8 sps:$4 sm:$0xff]  }
 0x164   :  { %3892 = vmatpush1.bf16.msra.mxu0 %v5339_v33  ;;  %3565 = vmatprep.subr.bf16.mxu1 %v5344_v34  ;;  %v5399_v21 = vld [vmem:[%s7416_s1 + $0xe20] ss:$8 sps:$4 sm:$0xff]   ;;  %v5404_v22 = vld [vmem:[%s7416_s1 + $0x634] ss:$8 sps:$4 sm:$0xff]   ;;  %v5402_v24 = vld [vmem:[%s7416_s1 + $0x630] ss:$8 sps:$4 sm:$0xff]  }
 0x165   :  { %3893 = vmatprep.subr.bf16.mxu0 %v5347_v16  ;;  %v5407_v52 = vld [vmem:[%s7416_s1 + $0xe34] ss:$8 sps:$4 sm:$0xff]   ;;  %v5405_v25 = vld [vmem:[%s7416_s1 + $0xe30] ss:$8 sps:$4 sm:$0xff]   ;;  %v5410_v26 = vld [vmem:[%s7416_s1 + $0x644] ss:$8 sps:$4 sm:$0xff]  }
 0x166   :  { %v5413_v27 = vld [vmem:[%s7416_s1 + $0xe44] ss:$8 sps:$4 sm:$0xff]   ;;  %v5408_v28 = vld [vmem:[%s7416_s1 + $0x640] ss:$8 sps:$4 sm:$0xff]   ;;  %v5416_v30 = vld [vmem:[%s7416_s1 + $0x654] ss:$8 sps:$4 sm:$0xff]  }
 0x167   :  { %3566 = vmatpush1.bf16.msra.mxu1 %v5342_v36  ;;  %v5411_v29 = vld [vmem:[%s7416_s1 + $0xe40] ss:$8 sps:$4 sm:$0xff]   ;;  %v5419_v31 = vld [vmem:[%s7416_s1 + $0xe54] ss:$8 sps:$4 sm:$0xff]   ;;  %v5414_v32 = vld [vmem:[%s7416_s1 + $0x650] ss:$8 sps:$4 sm:$0xff]  }
 0x168   :  { %3894 = vmatpush1.bf16.msra.mxu0 %v5345_v37  ;;  %3567 = vmatprep.subr.bf16.mxu1 %v5350_v56  ;;  %v5417_v33 = vld [vmem:[%s7416_s1 + $0xe50] ss:$8 sps:$4 sm:$0xff]   ;;  %v5422_v34 = vld [vmem:[%s7416_s1 + $0x664] ss:$8 sps:$4 sm:$0xff]   ;;  %v5420_v36 = vld [vmem:[%s7416_s1 + $0x660] ss:$8 sps:$4 sm:$0xff]  }
 0x169   :  { %3895 = vmatprep.subr.bf16.mxu0 %v5353_v23  ;;  %v5425_v16 = vld [vmem:[%s7416_s1 + $0xe64] ss:$8 sps:$4 sm:$0xff]   ;;  %v5423_v37 = vld [vmem:[%s7416_s1 + $0xe60] ss:$8 sps:$4 sm:$0xff]   ;;  %v5428_v56 = vld [vmem:[%s7416_s1 + $0x674] ss:$8 sps:$4 sm:$0xff]  }
 0x16a   :  { %v5431_v23 = vld [vmem:[%s7416_s1 + $0xe74] ss:$8 sps:$4 sm:$0xff]   ;;  %v5450_v0 = vld [vmem:[%s7416_s1 + $0x6b0] ss:$8 sps:$4 sm:$0xff]   ;;  %v5470_v6 = vld [vmem:[%s7416_s1 + $0x6e4] ss:$8 sps:$4 sm:$0xff]  }
 0x16b   :  { %3568 = vmatpush1.bf16.msra.mxu1 %v5348_v45  ;;  %v5426_v45 = vld [vmem:[%s7416_s1 + $0x670] ss:$8 sps:$4 sm:$0xff]   ;;  %v5473_v7 = vld [vmem:[%s7416_s1 + $0xee4] ss:$8 sps:$4 sm:$0xff]   ;;  %s5619_s10 = smov [#allocation2]   ;;  %vm4177_vm0 = vcmask 74752  }
 0x16c   :  { %3896 = vmatpush1.bf16.msra.mxu0 %v5351_v46  ;;  %3569 = vmatprep.subr.bf16.mxu1 %v5356_v17  ;;  %v5429_v46 = vld [vmem:[%s7416_s1 + $0xe70] ss:$8 sps:$4 sm:$0xff]   ;;  %v5434_v17 = vld [vmem:[%s7416_s1 + $0x684] ss:$8 sps:$4 sm:$0xff]   ;;  %s4185_s11 = sshll.u32 %s5619_s10, 4  ;;  %s4186_s11 = int_to_ptr.vmem [resolvable:$true] %s4185_s11 }
 0x16d   :  { %3897 = vmatprep.subr.bf16.mxu0 %v5359_v35  ;;  %v5437_v35 = vld [vmem:[%s7416_s1 + $0xe84] ss:$8 sps:$4 sm:$0xff]   ;;  %v5453_v1 = vld [vmem:[%s7416_s1 + $0xeb0] ss:$8 sps:$4 sm:$0xff]   ;;  %s5594_s12 = scalar_lea.vmem %s4186_s11, 32  ;;  %p5599_p1 = scmp.lt.s32.totalorder %s4186_s11, %s4186_s11 }
 0x16e   :  { %p5595_p0 = scmp.ne.s32.totalorder %s4186_s11, %s5594_s12  ;;  %p5600_p2 = scmp.lt.s32.totalorder %s5594_s12, %s5594_s12 }
 0x16f   :  { %3570 = vmatpush1.bf16.msra.mxu1 %v5354_v47  ;;  %v5432_v47 = vld [vmem:[%s7416_s1 + $0x680] ss:$8 sps:$4 sm:$0xff]  }
 0x170   :  { %3898 = vmatpush1.bf16.msra.mxu0 %v5357_v48  ;;  %3571 = vmatprep.subr.bf16.mxu1 %v5362_v50  ;;  %v5435_v48 = vld [vmem:[%s7416_s1 + $0xe80] ss:$8 sps:$4 sm:$0xff]   ;;  %v5440_v50 = vld [vmem:[%s7416_s1 + $0x694] ss:$8 sps:$4 sm:$0xff]   ;;  %p5601_p3 = por %p5600_p2, %p5599_p1 }
 0x171   :  { %3899 = vmatprep.subr.bf16.mxu0 %v5365_v51  ;;  %v5443_v51 = vld [vmem:[%s7416_s1 + $0xe94] ss:$8 sps:$4 sm:$0xff]  }
 0x172   :  { %p5602_p4 = pnand %p5601_p3, %p5595_p0 }
 0x173   :  { %3572 = vmatpush1.bf16.msra.mxu1 %v5360_v53  ;;  %v5438_v53 = vld [vmem:[%s7416_s1 + $0x690] ss:$8 sps:$4 sm:$0xff]  }
 0x174   :  { %3900 = vmatpush1.bf16.msra.mxu0 %v5363_v54  ;;  %3573 = vmatprep.subr.bf16.mxu1 %v5368_v55  ;;  %v5441_v54 = vld [vmem:[%s7416_s1 + $0xe90] ss:$8 sps:$4 sm:$0xff]   ;;  %v5446_v55 = vld [vmem:[%s7416_s1 + $0x6a4] ss:$8 sps:$4 sm:$0xff]  }
 0x175   :  { %3901 = vmatprep.subr.bf16.mxu0 %v5371_v57  ;;  %v5449_v57 = vld [vmem:[%s7416_s1 + $0xea4] ss:$8 sps:$4 sm:$0xff]  }
 0x177   :  { %3574 = vmatpush1.bf16.msra.mxu1 %v5366_v39  ;;  %v5444_v39 = vld [vmem:[%s7416_s1 + $0x6a0] ss:$8 sps:$4 sm:$0xff]  }
 0x178   :  { %3902 = vmatpush1.bf16.msra.mxu0 %v5369_v59  ;;  %3575 = vmatprep.subr.bf16.mxu1 %v5374_v60  ;;  %v5447_v59 = vld [vmem:[%s7416_s1 + $0xea0] ss:$8 sps:$4 sm:$0xff]   ;;  %v5452_v60 = vld [vmem:[%s7416_s1 + $0x6b4] ss:$8 sps:$4 sm:$0xff]  }
 0x179   :  { %3903 = vmatprep.subr.bf16.mxu0 %v5377_v61  ;;  %v5455_v61 = vld [vmem:[%s7416_s1 + $0xeb4] ss:$8 sps:$4 sm:$0xff]  }
 0x17b   :  { %3576 = vmatpush1.bf16.msra.mxu1 %v5372_v43  ;;  %v5458_v43 = vld [vmem:[%s7416_s1 + $0x6c4] ss:$8 sps:$4 sm:$0xff]  }
 0x17c   :  { %3904 = vmatpush1.bf16.msra.mxu0 %v5375_v44  ;;  %3577 = vmatprep.subr.bf16.mxu1 %v5380_v2  ;;  %v5461_v44 = vld [vmem:[%s7416_s1 + $0xec4] ss:$8 sps:$4 sm:$0xff]   ;;  %v5456_v2 = vld [vmem:[%s7416_s1 + $0x6c0] ss:$8 sps:$4 sm:$0xff]  }
 0x17d   :  { %3905 = vmatprep.subr.bf16.mxu0 %v5383_v40  ;;  %v5459_v40 = vld [vmem:[%s7416_s1 + $0xec0] ss:$8 sps:$4 sm:$0xff]  }
 0x17f   :  { %3578 = vmatpush1.bf16.msra.mxu1 %v5378_v4  ;;  %v5464_v4 = vld [vmem:[%s7416_s1 + $0x6d4] ss:$8 sps:$4 sm:$0xff]  }
 0x180   :  { %3906 = vmatpush1.bf16.msra.mxu0 %v5381_v5  ;;  %3588 = vmatprep.subr.bf16.mxu1 %v5386_v58  ;;  %v5467_v5 = vld [vmem:[%s7416_s1 + $0xed4] ss:$8 sps:$4 sm:$0xff]   ;;  %v5462_v58 = vld [vmem:[%s7416_s1 + $0x6d0] ss:$8 sps:$4 sm:$0xff]  }
 0x181   :  { %3916 = vmatprep.subr.bf16.mxu0 %v5389_v38  ;;  %v5465_v38 = vld [vmem:[%s7416_s1 + $0xed0] ss:$8 sps:$4 sm:$0xff]  }
 0x182   :  { %3580 = vmatmul.mubr.bf16.vlgmr.msra.gmra.mrb[0].mxu1 %v648_v8  ;;  %v5468_v8 = vld [vmem:[%s7416_s1 + $0x6e0] ss:$8 sps:$4 sm:$0xff]  }
 0x183   :  { %3908 = vmatmul.mubr.bf16.vlgmr.msra.gmra.mrb[0].mxu0 %v746_v9  ;;  %3589 = vmatpush1.bf16.msra.mxu1 %v5384_v10  ;;  %v5471_v9 = vld [vmem:[%s7416_s1 + $0xee0] ss:$8 sps:$4 sm:$0xff]   ;;  %v5476_v10 = vld [vmem:[%s7416_s1 + $0x6f4] ss:$8 sps:$4 sm:$0xff]  }
 0x184   :  { %3917 = vmatpush1.bf16.msra.mxu0 %v5387_v11  ;;  %3590 = vmatprep.subr.bf16.mxu1 %v5392_v12  ;;  %v5479_v11 = vld [vmem:[%s7416_s1 + $0xef4] ss:$8 sps:$4 sm:$0xff]   ;;  %v5474_v12 = vld [vmem:[%s7416_s1 + $0x6f0] ss:$8 sps:$4 sm:$0xff]  }
 0x185   :  { %3918 = vmatprep.subr.bf16.mxu0 %v5395_v62  ;;  %3620 = vmatprep.mubr.bf16.mxu1 %v6956_v63  ;;  %v5477_v62 = vld [vmem:[%s7416_s1 + $0xef0] ss:$8 sps:$4 sm:$0xff]  }
 0x186   :  { %3948 = vmatprep.mubr.bf16.mxu0 %v6959_v13 }
 0x187   :  { %3591 = vmatpush1.bf16.msra.mxu1 %v5390_v14  ;;  %v5483_v14 = vld [vmem:[%s7416_s1 + $0x704] ss:$8 sps:$4 sm:$0xff]  }
 0x188   :  { %3919 = vmatpush1.bf16.msra.mxu0 %v5393_v15  ;;  %3592 = vmatprep.subr.bf16.mxu1 %v5398_v18  ;;  %v5487_v15 = vld [vmem:[%s7416_s1 + $0xf04] ss:$8 sps:$4 sm:$0xff]   ;;  %v7145_v18 = vrot.slane %v6918_v41, %v5785_v49  ;;  %v5490_v41 = vld [vmem:[%s7416_s1 + $0x714] ss:$8 sps:$4 sm:$0xff]  }
 0x189   :  { %3920 = vmatprep.subr.bf16.mxu0 %v5401_v19  ;;  %v7149_v19 = vrot.slane %v6921_v3, %v5785_v49  ;;  %v5493_v49 = vld [vmem:[%s7416_s1 + $0xf14] ss:$8 sps:$4 sm:$0xff]   ;;  %v651_v3 = vcombine.high %v6956_v63, %v6956_v63  ;;  %v5496_v63 = vld [vmem:[%s7416_s1 + $0x724] ss:$8 sps:$4 sm:$0xff]  }
 0x18b   :  { %3593 = vmatpush1.bf16.msra.mxu1 %v5396_v20  ;;  %v5481_v20 = vld [vmem:[%s7416_s1 + $0x700] ss:$8 sps:$4 sm:$0xff]  }
 0x18c   :  { %3921 = vmatpush1.bf16.msra.mxu0 %v5399_v21  ;;  %3594 = vmatprep.subr.bf16.mxu1 %v5404_v22  ;;  %v5485_v21 = vld [vmem:[%s7416_s1 + $0xf00] ss:$8 sps:$4 sm:$0xff]   ;;  %v749_v22 = vcombine.high %v6959_v13, %v6959_v13  ;;  %v5499_v13 = vld [vmem:[%s7416_s1 + $0xf24] ss:$8 sps:$4 sm:$0xff]  }
 0x18d   :  { %3922 = vmatprep.subr.bf16.mxu0 %v5407_v52  ;;  %v5488_v52 = vld [vmem:[%s7416_s1 + $0x710] ss:$8 sps:$4 sm:$0xff]  }
 0x18f   :  { %3595 = vmatpush1.bf16.msra.mxu1 %v5402_v24  ;;  %v5491_v24 = vld [vmem:[%s7416_s1 + $0xf10] ss:$8 sps:$4 sm:$0xff]  }
 0x190   :  { %3923 = vmatpush1.bf16.msra.mxu0 %v5405_v25  ;;  %3596 = vmatprep.subr.bf16.mxu1 %v5410_v26  ;;  %v5494_v25 = vld [vmem:[%s7416_s1 + $0x720] ss:$8 sps:$4 sm:$0xff]  }
 0x191   :  { %3924 = vmatprep.subr.bf16.mxu0 %v5413_v27  ;;  %v5497_v26 = vld [vmem:[%s7416_s1 + $0xf20] ss:$8 sps:$4 sm:$0xff]   ;;  %v5502_v27 = vld [vmem:[%s7416_s1 + $0x734] ss:$8 sps:$4 sm:$0xff]  }
 0x193   :  { %3597 = vmatpush1.bf16.msra.mxu1 %v5408_v28  ;;  %v5505_v28 = vld [vmem:[%s7416_s1 + $0xf34] ss:$8 sps:$4 sm:$0xff]  }
 0x194   :  { %3925 = vmatpush1.bf16.msra.mxu0 %v5411_v29  ;;  %3598 = vmatprep.subr.bf16.mxu1 %v5416_v30  ;;  %v5500_v29 = vld [vmem:[%s7416_s1 + $0x730] ss:$8 sps:$4 sm:$0xff]  }
 0x195   :  { %3926 = vmatprep.subr.bf16.mxu0 %v5419_v31  ;;  %v5503_v30 = vld [vmem:[%s7416_s1 + $0xf30] ss:$8 sps:$4 sm:$0xff]   ;;  %v5508_v31 = vld [vmem:[%s7416_s1 + $0x744] ss:$8 sps:$4 sm:$0xff]  }
 0x197   :  { %3599 = vmatpush1.bf16.msra.mxu1 %v5414_v32  ;;  %v5511_v32 = vld [vmem:[%s7416_s1 + $0xf44] ss:$8 sps:$4 sm:$0xff]  }
 0x198   :  { %3927 = vmatpush1.bf16.msra.mxu0 %v5417_v33  ;;  %3600 = vmatprep.subr.bf16.mxu1 %v5422_v34  ;;  %v5506_v33 = vld [vmem:[%s7416_s1 + $0x740] ss:$8 sps:$4 sm:$0xff]  }
 0x199   :  { %3928 = vmatprep.subr.bf16.mxu0 %v5425_v16  ;;  %v5509_v34 = vld [vmem:[%s7416_s1 + $0xf40] ss:$8 sps:$4 sm:$0xff]   ;;  %v5514_v16 = vld [vmem:[%s7416_s1 + $0x754] ss:$8 sps:$4 sm:$0xff]  }
 0x19b   :  { %3601 = vmatpush1.bf16.msra.mxu1 %v5420_v36  ;;  %v5517_v36 = vld [vmem:[%s7416_s1 + $0xf54] ss:$8 sps:$4 sm:$0xff]  }
 0x19c   :  { %3929 = vmatpush1.bf16.msra.mxu0 %v5423_v37  ;;  %3602 = vmatprep.subr.bf16.mxu1 %v5428_v56  ;;  %v5512_v37 = vld [vmem:[%s7416_s1 + $0x750] ss:$8 sps:$4 sm:$0xff]  }
 0x19d   :  { %3930 = vmatprep.subr.bf16.mxu0 %v5431_v23  ;;  %v5515_v56 = vld [vmem:[%s7416_s1 + $0xf50] ss:$8 sps:$4 sm:$0xff]   ;;  %v5520_v23 = vld [vmem:[%s7416_s1 + $0x764] ss:$8 sps:$4 sm:$0xff]  }
 0x19f   :  { %3603 = vmatpush1.bf16.msra.mxu1 %v5426_v45  ;;  %v5523_v45 = vld [vmem:[%s7416_s1 + $0xf64] ss:$8 sps:$4 sm:$0xff]  }
 0x1a0   :  { %3931 = vmatpush1.bf16.msra.mxu0 %v5429_v46  ;;  %3604 = vmatprep.subr.bf16.mxu1 %v5434_v17  ;;  %v5518_v46 = vld [vmem:[%s7416_s1 + $0x760] ss:$8 sps:$4 sm:$0xff]  }
 0x1a1   :  { %3932 = vmatprep.subr.bf16.mxu0 %v5437_v35  ;;  %v5521_v17 = vld [vmem:[%s7416_s1 + $0xf60] ss:$8 sps:$4 sm:$0xff]   ;;  %v5526_v35 = vld [vmem:[%s7416_s1 + $0x774] ss:$8 sps:$4 sm:$0xff]  }
 0x1a3   :  { %3605 = vmatpush1.bf16.msra.mxu1 %v5432_v47  ;;  %v5529_v47 = vld [vmem:[%s7416_s1 + $0xf74] ss:$8 sps:$4 sm:$0xff]  }
 0x1a4   :  { %3933 = vmatpush1.bf16.msra.mxu0 %v5435_v48  ;;  %3606 = vmatprep.subr.bf16.mxu1 %v5440_v50  ;;  %v5524_v48 = vld [vmem:[%s7416_s1 + $0x770] ss:$8 sps:$4 sm:$0xff]  }
 0x1a5   :  { %3934 = vmatprep.subr.bf16.mxu0 %v5443_v51  ;;  %v5527_v50 = vld [vmem:[%s7416_s1 + $0xf70] ss:$8 sps:$4 sm:$0xff]   ;;  %v5532_v51 = vld [vmem:[%s7416_s1 + $0x784] ss:$8 sps:$4 sm:$0xff]  }
 0x1a7   :  { %3607 = vmatpush1.bf16.msra.mxu1 %v5438_v53  ;;  %v5535_v53 = vld [vmem:[%s7416_s1 + $0xf84] ss:$8 sps:$4 sm:$0xff]  }
 0x1a8   :  { %3935 = vmatpush1.bf16.msra.mxu0 %v5441_v54  ;;  %3608 = vmatprep.subr.bf16.mxu1 %v5446_v55  ;;  %v5530_v54 = vld [vmem:[%s7416_s1 + $0x780] ss:$8 sps:$4 sm:$0xff]  }
 0x1a9   :  { %3936 = vmatprep.subr.bf16.mxu0 %v5449_v57  ;;  %v5533_v55 = vld [vmem:[%s7416_s1 + $0xf80] ss:$8 sps:$4 sm:$0xff]   ;;  %v5538_v57 = vld [vmem:[%s7416_s1 + $0x794] ss:$8 sps:$4 sm:$0xff]  }
 0x1ab   :  { %3609 = vmatpush1.bf16.msra.mxu1 %v5444_v39  ;;  %v5541_v39 = vld [vmem:[%s7416_s1 + $0xf94] ss:$8 sps:$4 sm:$0xff]  }
 0x1ac   :  { %3937 = vmatpush1.bf16.msra.mxu0 %v5447_v59  ;;  %3610 = vmatprep.subr.bf16.mxu1 %v5452_v60  ;;  %v5536_v59 = vld [vmem:[%s7416_s1 + $0x790] ss:$8 sps:$4 sm:$0xff]  }
 0x1ad   :  { %3938 = vmatprep.subr.bf16.mxu0 %v5455_v61  ;;  %v5539_v60 = vld [vmem:[%s7416_s1 + $0xf90] ss:$8 sps:$4 sm:$0xff]   ;;  %v5544_v61 = vld [vmem:[%s7416_s1 + $0x7a4] ss:$8 sps:$4 sm:$0xff]  }
 0x1af   :  { %3611 = vmatpush1.bf16.msra.mxu1 %v5450_v0  ;;  %v5547_v0 = vld [vmem:[%s7416_s1 + $0xfa4] ss:$8 sps:$4 sm:$0xff]  }
 0x1b0   :  { %3939 = vmatpush1.bf16.msra.mxu0 %v5453_v1  ;;  %3612 = vmatprep.subr.bf16.mxu1 %v5458_v43  ;;  %v5542_v1 = vld [vmem:[%s7416_s1 + $0x7a0] ss:$8 sps:$4 sm:$0xff]  }
 0x1b1   :  { %3940 = vmatprep.subr.bf16.mxu0 %v5461_v44  ;;  %v5545_v43 = vld [vmem:[%s7416_s1 + $0xfa0] ss:$8 sps:$4 sm:$0xff]   ;;  %v5550_v44 = vld [vmem:[%s7416_s1 + $0x7b4] ss:$8 sps:$4 sm:$0xff]  }
 0x1b3   :  { %3613 = vmatpush1.bf16.msra.mxu1 %v5456_v2  ;;  %v5553_v2 = vld [vmem:[%s7416_s1 + $0xfb4] ss:$8 sps:$4 sm:$0xff]  }
 0x1b4   :  { %3941 = vmatpush1.bf16.msra.mxu0 %v5459_v40  ;;  %3614 = vmatprep.subr.bf16.mxu1 %v5464_v4  ;;  %v5548_v40 = vld [vmem:[%s7416_s1 + $0x7b0] ss:$8 sps:$4 sm:$0xff]  }
 0x1b5   :  { %3942 = vmatprep.subr.bf16.mxu0 %v5467_v5  ;;  %v5551_v4 = vld [vmem:[%s7416_s1 + $0xfb0] ss:$8 sps:$4 sm:$0xff]   ;;  %v5556_v5 = vld [vmem:[%s7416_s1 + $0x7c4] ss:$8 sps:$4 sm:$0xff]  }
 0x1b7   :  { %3615 = vmatpush1.bf16.msra.mxu1 %v5462_v58  ;;  %v5559_v58 = vld [vmem:[%s7416_s1 + $0xfc4] ss:$8 sps:$4 sm:$0xff]  }
 0x1b8   :  { %3943 = vmatpush1.bf16.msra.mxu0 %v5465_v38  ;;  %3616 = vmatprep.subr.bf16.mxu1 %v5470_v6  ;;  %v5554_v38 = vld [vmem:[%s7416_s1 + $0x7c0] ss:$8 sps:$4 sm:$0xff]  }
 0x1b9   :  { %3944 = vmatprep.subr.bf16.mxu0 %v5473_v7  ;;  %v5557_v6 = vld [vmem:[%s7416_s1 + $0xfc0] ss:$8 sps:$4 sm:$0xff]   ;;  %v5562_v7 = vld [vmem:[%s7416_s1 + $0x7d4] ss:$8 sps:$4 sm:$0xff]  }
 0x1bb   :  { %3617 = vmatpush1.bf16.msra.mxu1 %v5468_v8  ;;  %v5565_v8 = vld [vmem:[%s7416_s1 + $0xfd4] ss:$8 sps:$4 sm:$0xff]  }
 0x1bc   :  { %3945 = vmatpush1.bf16.msra.mxu0 %v5471_v9  ;;  %3618 = vmatprep.subr.bf16.mxu1 %v5476_v10  ;;  %v5560_v9 = vld [vmem:[%s7416_s1 + $0x7d0] ss:$8 sps:$4 sm:$0xff]  }
 0x1bd   :  { %3946 = vmatprep.subr.bf16.mxu0 %v5479_v11  ;;  %v5563_v10 = vld [vmem:[%s7416_s1 + $0xfd0] ss:$8 sps:$4 sm:$0xff]   ;;  %v5568_v11 = vld [vmem:[%s7416_s1 + $0x7e4] ss:$8 sps:$4 sm:$0xff]  }
 0x1bf   :  { %3619 = vmatpush1.bf16.msra.mxu1 %v5474_v12  ;;  %v5571_v12 = vld [vmem:[%s7416_s1 + $0xfe4] ss:$8 sps:$4 sm:$0xff]  }
 0x1c0   :  { %3947 = vmatpush1.bf16.msra.mxu0 %v5477_v62  ;;  %3629 = vmatprep.subr.bf16.mxu1 %v5483_v14  ;;  %v5566_v62 = vld [vmem:[%s7416_s1 + $0x7e0] ss:$8 sps:$4 sm:$0xff]  }
 0x1c1   :  { %3957 = vmatprep.subr.bf16.mxu0 %v5487_v15  ;;  %v5569_v14 = vld [vmem:[%s7416_s1 + $0xfe0] ss:$8 sps:$4 sm:$0xff]   ;;  %v5574_v15 = vld [vmem:[%s7416_s1 + $0x7f4] ss:$8 sps:$4 sm:$0xff]  }
 0x1c2   :  { %3621 = vmatmul.mubr.bf16.vlgmr.msra.gmra.mrb[0].mxu1 %v7145_v18 }
 0x1c3   :  { %3949 = vmatmul.mubr.bf16.vlgmr.msra.gmra.mrb[0].mxu0 %v7149_v19  ;;  %3630 = vmatpush1.bf16.msra.mxu1 %v5481_v20  ;;  %v5577_v20 = vld [vmem:[%s7416_s1 + $0xff4] ss:$8 sps:$4 sm:$0xff]  }
 0x1c4   :  { %3958 = vmatpush1.bf16.msra.mxu0 %v5485_v21  ;;  %3631 = vmatprep.subr.bf16.mxu1 %v5490_v41  ;;  %v5572_v21 = vld [vmem:[%s7416_s1 + $0x7f0] ss:$8 sps:$4 sm:$0xff]  }
 0x1c5   :  { %3959 = vmatprep.subr.bf16.mxu0 %v5493_v49  ;;  %3661 = vmatprep.mubr.bf16.mxu1 %v651_v3  ;;  %v5575_v41 = vld [vmem:[%s7416_s1 + $0xff0] ss:$8 sps:$4 sm:$0xff]   ;;  %v5578_v49 = vld [vmem:[%s7418_s3 + $0x40] sm:$0xff]   ;;  %v649_v3 = vcombine.high %v7145_v18, %v7145_v18  ;;  %v5581_v18 = vld [vmem:[%s7418_s3 + $0x8] sm:$0xff]  }
 0x1c6   :  { %3989 = vmatprep.mubr.bf16.mxu0 %v749_v22  ;;  %v747_v22 = vcombine.high %v7149_v19, %v7149_v19  ;;  %v5582_v19 = vld [vmem:[%s7418_s3 + $0x50] sm:$0xff]  }
 0x1c7   :  { %3632 = vmatpush1.bf16.msra.mxu1 %v5488_v52  ;;  %v5579_v52 = vld [vmem:[%s7418_s3] sm:$0xff]  }
 0x1c8   :  { %3960 = vmatpush1.bf16.msra.mxu0 %v5491_v24  ;;  %3633 = vmatprep.subr.bf16.mxu1 %v5496_v63  ;;  %v5580_v24 = vld [vmem:[%s7418_s3 + $0x48] sm:$0xff]   ;;  %v5583_v63 = vld [vmem:[%s7418_s3 + $0x10] sm:$0xff]  }
 0x1c9   :  { %3961 = vmatprep.subr.bf16.mxu0 %v5499_v13  ;;  %v5584_v13 = vld [vmem:[%s7418_s3 + $0x58] sm:$0xff]  }
 0x1cb   :  { %3634 = vmatpush1.bf16.msra.mxu1 %v5494_v25  ;;  %v5585_v25 = vld [vmem:[%s7418_s3 + $0x18] sm:$0xff]  }
 0x1cc   :  { %3962 = vmatpush1.bf16.msra.mxu0 %v5497_v26  ;;  %3635 = vmatprep.subr.bf16.mxu1 %v5502_v27  ;;  %v5586_v26 = vld [vmem:[%s7418_s3 + $0x60] sm:$0xff]  }
 0x1cd   :  { %3963 = vmatprep.subr.bf16.mxu0 %v5505_v28  ;;  %v5587_v27 = vld [vmem:[%s7418_s3 + $0x20] sm:$0xff]   ;;  %v5588_v28 = vld [vmem:[%s7418_s3 + $0x68] sm:$0xff]  }
 0x1cf   :  { %3636 = vmatpush1.bf16.msra.mxu1 %v5500_v29  ;;  %v5589_v29 = vld [vmem:[%s7418_s3 + $0x28] sm:$0xff]  }
 0x1d0   :  { %3964 = vmatpush1.bf16.msra.mxu0 %v5503_v30  ;;  %3637 = vmatprep.subr.bf16.mxu1 %v5508_v31  ;;  %v5590_v30 = vld [vmem:[%s7418_s3 + $0x70] sm:$0xff]  }
 0x1d1   :  { %3965 = vmatprep.subr.bf16.mxu0 %v5511_v32  ;;  %v5591_v31 = vld [vmem:[%s7418_s3 + $0x30] sm:$0xff]   ;;  %v5592_v32 = vld [vmem:[%s7418_s3 + $0x78] sm:$0xff]  }
 0x1d3   :  { %3638 = vmatpush1.bf16.msra.mxu1 %v5506_v33  ;;  %v5593_v33 = vld [vmem:[%s7418_s3 + $0x38] sm:$0xff]  }
 0x1d4   :  { %3966 = vmatpush1.bf16.msra.mxu0 %v5509_v34  ;;  %3639 = vmatprep.subr.bf16.mxu1 %v5514_v16  ;;  %v542_v34 = vsub.s32 0, %v5767_v42  ;;  %v538_v16 = vld [vmem:[%s7417_s2] sm:$0x3] }
 0x1d5   :  { %3967 = vmatprep.subr.bf16.mxu0 %v5517_v36  ;;  %v546_v36 = vsub.s32 1, %v5767_v42 }
 0x1d7   :  { %3640 = vmatpush1.bf16.msra.mxu1 %v5512_v37  ;;  %v543_v37 = vrot.slane %v538_v16, %v542_v34 }
 0x1d8   :  { %3968 = vmatpush1.bf16.msra.mxu0 %v5515_v56  ;;  %3641 = vmatprep.subr.bf16.mxu1 %v5520_v23  ;;  %v547_v56 = vrot.slane %v538_v16, %v546_v36 }
 0x1d9   :  { %3969 = vmatprep.subr.bf16.mxu0 %v5523_v45 }
 0x1db   :  { %3642 = vmatpush1.bf16.msra.mxu1 %v5518_v46 }
 0x1dc   :  { %3970 = vmatpush1.bf16.msra.mxu0 %v5521_v17  ;;  %3643 = vmatprep.subr.bf16.mxu1 %v5526_v35 }
 0x1dd   :  { %3971 = vmatprep.subr.bf16.mxu0 %v5529_v47 }
 0x1df   :  { %3644 = vmatpush1.bf16.msra.mxu1 %v5524_v48 }
 0x1e0   :  { %3972 = vmatpush1.bf16.msra.mxu0 %v5527_v50  ;;  %3645 = vmatprep.subr.bf16.mxu1 %v5532_v51 }
 0x1e1   :  { %3973 = vmatprep.subr.bf16.mxu0 %v5535_v53 }
 0x1e3   :  { %3646 = vmatpush1.bf16.msra.mxu1 %v5530_v54 }
 0x1e4   :  { %3974 = vmatpush1.bf16.msra.mxu0 %v5533_v55  ;;  %3647 = vmatprep.subr.bf16.mxu1 %v5538_v57 }
 0x1e5   :  { %3975 = vmatprep.subr.bf16.mxu0 %v5541_v39 }
 0x1e7   :  { %3648 = vmatpush1.bf16.msra.mxu1 %v5536_v59 }
 0x1e8   :  { %3976 = vmatpush1.bf16.msra.mxu0 %v5539_v60  ;;  %3649 = vmatprep.subr.bf16.mxu1 %v5544_v61  ;;  %v4705_v61 = vld [vmem:[%s7419_s4] ss:$0 sm:$0xff] }
 0x1e9   :  { %3977 = vmatprep.subr.bf16.mxu0 %v5547_v0 }
 0x1eb   :  { %3650 = vmatpush1.bf16.msra.mxu1 %v5542_v1 }
 0x1ec   :  { %3978 = vmatpush1.bf16.msra.mxu0 %v5545_v43  ;;  %3651 = vmatprep.subr.bf16.mxu1 %v5550_v44 }
 0x1ed   :  { %3979 = vmatprep.subr.bf16.mxu0 %v5553_v2 }
 0x1ef   :  { %3652 = vmatpush1.bf16.msra.mxu1 %v5548_v40 }
 0x1f0   :  { %3980 = vmatpush1.bf16.msra.mxu0 %v5551_v4  ;;  %3653 = vmatprep.subr.bf16.mxu1 %v5556_v5 }
 0x1f1   :  { %3981 = vmatprep.subr.bf16.mxu0 %v5559_v58 }
 0x1f3   :  { %3654 = vmatpush1.bf16.msra.mxu1 %v5554_v38 }
 0x1f4   :  { %3982 = vmatpush1.bf16.msra.mxu0 %v5557_v6  ;;  %3655 = vmatprep.subr.bf16.mxu1 %v5562_v7 }
 0x1f5   :  { %3983 = vmatprep.subr.bf16.mxu0 %v5565_v8 }
 0x1f7   :  { %3656 = vmatpush1.bf16.msra.mxu1 %v5560_v9 }
 0x1f8   :  { %3984 = vmatpush1.bf16.msra.mxu0 %v5563_v10  ;;  %3657 = vmatprep.subr.bf16.mxu1 %v5568_v11 }
 0x1f9   :  { %3985 = vmatprep.subr.bf16.mxu0 %v5571_v12 }
 0x1fb   :  { %3658 = vmatpush1.bf16.msra.mxu1 %v5566_v62 }
 0x1fc   :  { %3986 = vmatpush1.bf16.msra.mxu0 %v5569_v14  ;;  %3659 = vmatprep.subr.bf16.mxu1 %v5574_v15 }
 0x1fd   :  { %3987 = vmatprep.subr.bf16.mxu0 %v5577_v20 }
 0x1ff   :  { %3660 = vmatpush1.bf16.msra.mxu1 %v5572_v21 }
 0x200   :  { %3988 = vmatpush1.bf16.msra.mxu0 %v5575_v41  ;;  %4722 = vmatprep.subr.bf16.mxu1 %v5578_v49 }
 0x202   :  { %3662 = vmatmul.mubr.bf16.vlgmr.msra.gmra.mrb[0].mxu1 %v649_v3 }
 0x203   :  { %3990 = vmatmul.mubr.bf16.vlgmr.msra.gmra.mrb[0].mxu0 %v747_v22  ;;  %4723 = vmatpush3.bf16.msra.mxu1 %v5579_v52 }
 0x204   :  { %4724 = vmatprep.subr.bf16.mxu1 %v5580_v24 }
 0x207   :  { %4725 = vmatpush3.bf16.msra.mxu1 %v5581_v18 }
 0x208   :  { %4726 = vmatprep.subr.bf16.mxu1 %v5582_v19 }
 0x20b   :  { %4727 = vmatpush3.bf16.msra.mxu1 %v5583_v63 }
 0x20c   :  { %4728 = vmatprep.subr.bf16.mxu1 %v5584_v13 }
 0x20f   :  { %4729 = vmatpush3.bf16.msra.mxu1 %v5585_v25 }
 0x210   :  { %4730 = vmatprep.subr.bf16.mxu1 %v5586_v26 }
 0x213   :  { %4731 = vmatpush3.bf16.msra.mxu1 %v5587_v27 }
 0x214   :  { %4732 = vmatprep.subr.bf16.mxu1 %v5588_v28 }
 0x217   :  { %4733 = vmatpush3.bf16.msra.mxu1 %v5589_v29 }
 0x218   :  { %4734 = vmatprep.subr.bf16.mxu1 %v5590_v30 }
 0x21b   :  { %4735 = vmatpush3.bf16.msra.mxu1 %v5591_v31 }
 0x21c   :  { %4736 = vmatprep.subr.bf16.mxu1 %v5592_v32 }
 0x21f   :  { %4737 = vmatpush3.bf16.msra.mxu1 %v5593_v33 }
 0x2d5   :  { %v3663_v23 = vpop.f32.mrb[0].mxu1 }
 0x2d6   :  { %v3991_v45 = vpop.f32.mrb[0].mxu0  ;;  %v4744_v46 = vadd.f32 %v3663_v23, %v543_v37  ;;  %v3665_v17 = vpop.f32.mrb[1].mxu1 }
 0x2d7   :  { %v3993_v35 = vpop.f32.mrb[1].mxu0  ;;  %v4746_v47 = vadd.f32 %v3665_v17, %v547_v56  ;;  %v3667_v48 = vpop.f32.mrb[2].mxu1 }
 0x2d8   :  { %v3995_v50 = vpop.f32.mrb[2].mxu0  ;;  %v4745_v51 = vadd.f32 %v4744_v46, %v3991_v45  ;;  %v3668_v53 = vpop.f32.mrb[3].mxu1 }
 0x2d9   :  { %v3996_v54 = vpop.f32.mrb[3].mxu0  ;;  %v4747_v55 = vadd.f32 %v4746_v47, %v3993_v35 }
 0x2da   :  { %v3998_v57 = vmax.f32 %v4745_v51, 0.0 }
 0x2db   :  { %v3999_v39 = vmax.f32 %v4747_v55, 0.0 }
 0x2dc   :  { %v4000_v60 = vpack.c.bf16 %v3998_v57, %v3998_v57 }
 0x2dd   :  { %v4001_v59 = vpack.c.bf16 %v3999_v39, %v3999_v39 }
 0x2df   :  { %4169 = vmatprep.mubr.bf16.mxu1 %v4001_v59 }
 0x2e0   :  { %4170 = vmatmul.mubr.bf16.vlgmr.msra.gmra.mrb[4].mxu1 %v4000_v60 }
 0x3b3   :  { %v4738_v42 = vpop.f32.mrb[4].mxu1 }
 0x3b4   :  { %v4739_v0 = vpop.f32.mrb[5].mxu1 }
 0x3b5   :  { %v4740_v1 = vadd.f32 %v4739_v0, %v4738_v42  ;;  %v4741_v43 = vpop.f32.mrb[6].mxu1 }
 0x3b6   :  { %v4742_v44 = vpop.f32.mrb[7].mxu1 }
 0x3b7   :  { %v4172_v2 = vadd.f32 %v4740_v1, %v4705_v61 }
 0x3b9   :  { %4178 = vst.msk [vmem:[#allocation2] sm:$0x3] %vm4177_vm0, %v4172_v2 }
 0x3ba   :  { %5605 = shalt.err (!%p5602_p4)
}
 0x3bb   :  { %s5606_s4 = scalar_lea.hbm %s7420_s5, 32 }
 0x3bc   :  { %p5607_p5 = scmp.ne.s32.totalorder %s7420_s5, %s5606_s4  ;;  %p5610_p6 = scmp.lt.u32.totalorder %s5606_s4, %s7420_s5 }
 0x3be   :  { %p5612_p7 = pnand %p5610_p6, %p5607_p5 }
 0x3c0   :  { %5615 = shalt.err (!%p5612_p7)
}
 0x3c1   :  { %4188 = dma.vmem_to_hbm [thread:$0]  %s4186_s11, 32, %s7420_s5, [#allocation3]  }
 0x3c2   :  { %5616 = dma.done.wait [#allocation3], 32  }
 0x3c3   :  { %5617 = vsyncadd [#allocation3], 4294967264 }
 0x3c4   :  { %4192 = vsyncpa [#allocation3], 1 }

</bundles_post_ra>
